<compile_context>
chip_gen: v6e
topology: v6e:2x2x1
jax: 0.10.0
libtpu: 0.0.40
codegen_flags: <defaults>
</compile_context>

<pallas_src>
import math

import jax
import jax.numpy as jnp
from jax.experimental import pallas as pl
from jax.experimental.pallas import tpu as pltpu

EMB_DIM = 200
K_H = 5
K_W = 5
KK_PAD = 32               # 25 zero-padded to a sublane-friendly 32
IMG_H = 2 * 10            # 20
IMG_W = 20                # 20
OUT_H = IMG_H - K_H + 1   # 16
OUT_W = IMG_W - K_W + 1   # 16
C_OUT = 200
SIZE_FLAT = OUT_H * OUT_W * C_OUT   # 51200
BN_EPS = 1e-5


def _round_up(x, m):
    return (x + m - 1) // m * m


# ------------- Kernel 1: conv-as-matmul (BN0/BN1 folded) + bias + ReLU --------------
def _conv_bn_relu_kernel(p_ref, w_ref, b_ref, o_ref):
    # p_ref: [KK, TM] f32 (K on sublanes, M on lanes), w_ref: [KK, C] f32
    y = jax.lax.dot_general(
        p_ref[...], w_ref[...],
        dimension_numbers=(((0,), (0,)), ((), ())),
        preferred_element_type=jnp.float32)            # [TM, C]
    o_ref[...] = jnp.maximum(y + b_ref[...], 0.0).astype(o_ref.dtype)


def conv_bn_relu_pallas(patches, w_eff, b_eff):
    KK, M = patches.shape
    C = w_eff.shape[1]
    tm = 512 if M % 512 == 0 else 256
    return pl.pallas_call(
        _conv_bn_relu_kernel,
        out_shape=jax.ShapeDtypeStruct((M, C), jnp.bfloat16),
        grid_spec=pltpu.PrefetchScalarGridSpec(
            num_scalar_prefetch=0,
            grid=(M // tm,),
            in_specs=[
                pl.BlockSpec((KK, tm), lambda m: (0, m)),
                pl.BlockSpec((KK, C), lambda m: (0, 0)),
                pl.BlockSpec((1, C), lambda m: (0, 0)),
            ],
            out_specs=pl.BlockSpec((tm, C), lambda m: (m, 0)),
        ),
        compiler_params=pltpu.CompilerParams(
            dimension_semantics=("parallel",)),
    )(patches, w_eff, b_eff)


# ------------- Kernel 2: FC (K-tiled bf16 matmul) + bias/BN2 + ReLU -----------------
def _fc_bn_relu_kernel(x_ref, w_ref, bn_ref, o_ref):
    k = pl.program_id(0)

    @pl.when(k == 0)
    def _():
        o_ref[...] = jnp.zeros_like(o_ref)

    # x: [B, tk] bf16, w: [N, tk] bf16 (lane-dense), contract on tk -> [B, N] f32
    o_ref[...] += jax.lax.dot_general(
        x_ref[...].astype(jnp.bfloat16), w_ref[...],
        dimension_numbers=(((1,), (1,)), ((), ())),
        preferred_element_type=jnp.float32)

    @pl.when(k == pl.num_programs(0) - 1)
    def _():
        y = o_ref[...] * bn_ref[0:1, :] + bn_ref[1:2, :]
        o_ref[...] = jnp.maximum(y, 0.0)


def fc_bn_relu_pallas(x_flat, w, bn2fc, *, tk=12800):
    B, K = x_flat.shape
    N, Kw = w.shape
    assert Kw == K and K % tk == 0
    return pl.pallas_call(
        _fc_bn_relu_kernel,
        out_shape=jax.ShapeDtypeStruct((B, N), jnp.float32),
        grid_spec=pltpu.PrefetchScalarGridSpec(
            num_scalar_prefetch=0,
            grid=(K // tk,),
            in_specs=[
                pl.BlockSpec((B, tk), lambda k: (0, k)),
                pl.BlockSpec((N, tk), lambda k: (0, k)),
                pl.BlockSpec((2, N), lambda k: (0, 0)),
            ],
            out_specs=pl.BlockSpec((B, N), lambda k: (0, 0)),
        ),
        compiler_params=pltpu.CompilerParams(
            dimension_semantics=("arbitrary",),
            vmem_limit_bytes=32 * 1024 * 1024),
    )(x_flat, w, bn2fc)


# ------------- Kernel 3: fused tanh(entities) + score matmul + bias + sigmoid -------
def _score_kernel(x_ref, emb_ref, b_ref, o_ref):
    e = jnp.tanh(emb_ref[...])                          # [TN, D]
    s = jax.lax.dot_general(
        x_ref[...], e,
        dimension_numbers=(((1,), (1,)), ((), ())),
        preferred_element_type=jnp.float32)             # [B, TN]
    o_ref[...] = jax.nn.sigmoid(s + b_ref[...])


def score_pallas(x, embedding, bias_row):
    B, D = x.shape
    num = embedding.shape[0]
    tn = min(1024, _round_up(num, 128))
    num_pad = _round_up(num, tn)
    if num_pad != num:
        embedding = jnp.pad(embedding, ((0, num_pad - num), (0, 0)))
        bias_row = jnp.pad(bias_row, ((0, 0), (0, num_pad - num)))
    out = pl.pallas_call(
        _score_kernel,
        out_shape=jax.ShapeDtypeStruct((B, num_pad), jnp.float32),
        grid_spec=pltpu.PrefetchScalarGridSpec(
            num_scalar_prefetch=0,
            grid=(num_pad // tn,),
            in_specs=[
                pl.BlockSpec((B, D), lambda i: (0, 0)),
                pl.BlockSpec((tn, D), lambda i: (i, 0)),
                pl.BlockSpec((1, tn), lambda i: (0, i)),
            ],
            out_specs=pl.BlockSpec((B, tn), lambda i: (0, i)),
        ),
        compiler_params=pltpu.CompilerParams(
            dimension_semantics=("parallel",)),
    )(x, embedding, bias_row)
    return out[:, :num] if num_pad != num else out


# ------------------------------ parameters & prep -----------------------------------
def bn_scale_shift(p):
    scale = p["gamma"] / jnp.sqrt(p["var"] + BN_EPS)
    shift = p["beta"] - p["mean"] * scale
    return scale, shift


def init_params(key, num):
    k_conv, k_fcw, k_fcb = jax.random.split(key, 3)
    conv_bound = 1.0 / math.sqrt(1 * K_H * K_W)
    conv_w = jax.random.uniform(k_conv, (C_OUT, 1, K_H, K_W), jnp.float32,
                                -conv_bound, conv_bound)
    fc_bound = 1.0 / math.sqrt(SIZE_FLAT)
    fc_w = jax.random.uniform(k_fcw, (EMB_DIM, SIZE_FLAT), jnp.float32,
                              -fc_bound, fc_bound)
    fc_b = jax.random.uniform(k_fcb, (EMB_DIM,), jnp.float32,
                              -fc_bound, fc_bound)

    def bn(n):
        return dict(gamma=jnp.ones((n,), jnp.float32),
                    beta=jnp.zeros((n,), jnp.float32),
                    mean=jnp.zeros((n,), jnp.float32),
                    var=jnp.ones((n,), jnp.float32))

    return dict(conv_w=conv_w, fc_w=fc_w, fc_b=fc_b,
                bn0=bn(1), bn1=bn(C_OUT), bn2=bn(EMB_DIM),
                bias=jnp.zeros((num,), jnp.float32))


def prepare_pallas_params(params):
    """One-time host-side folding / layout prep (not on the per-call hot path)."""
    conv_w = params["conv_w"].reshape(C_OUT, K_H * K_W)            # [200, 25]
    bn0_s, bn0_h = bn_scale_shift(params["bn0"])                   # (1,), (1,)
    bn1_s, bn1_h = bn_scale_shift(params["bn1"])                   # (200,), (200,)

    # Fold BN0 (input affine) + BN1 (output affine) into conv weight & bias.
    w_eff = conv_w.T * (bn0_s[0] * bn1_s)[None, :]                 # [25, 200]
    w_eff = jnp.pad(w_eff, ((0, KK_PAD - K_H * K_W), (0, 0)))      # [32, 200]
    b_eff = (bn0_h[0] * bn1_s * conv_w.sum(axis=1) + bn1_h)[None, :]  # [1, 200]

    # Fold fc bias + BN2 into one (scale, shift) pair for the FC epilogue.
    bn2_s, bn2_h = bn_scale_shift(params["bn2"])
    bn2fc = jnp.stack([bn2_s, params["fc_b"] * bn2_s + bn2_h], axis=0)  # [2, 200]

    # Permute FC weight K axis NCHW -> HWC (matches conv_out flatten), cast bf16.
    fc_w_hwc = (params["fc_w"]
                .reshape(EMB_DIM, C_OUT, OUT_H, OUT_W)
                .transpose(0, 2, 3, 1)
                .reshape(EMB_DIM, SIZE_FLAT)
                .astype(jnp.bfloat16))                              # [200, 51200]

    return dict(conv_w_eff=w_eff.astype(jnp.float32),
                conv_b_eff=b_eff.astype(jnp.float32),
                fc_w=fc_w_hwc,
                bn2fc=bn2fc.astype(jnp.float32),
                bias=params["bias"])


# ------------------------------------ forward ----------------------------------------
def conve_forward(prep, embedding, emb_rel, emb_time, triplets):
    del emb_time  # unused in the PyTorch forward
    B = triplets.shape[0]
    num = embedding.shape[0]

    # gather + ConvE "concat" reshape (glue; tanh of only the B gathered rows)
    e1 = jnp.tanh(embedding[triplets[:, 0]])                         # [B, 200]
    rel = emb_rel[triplets[:, 1]]                                    # [B, 200]
    stacked = jnp.transpose(jnp.stack([e1, rel], axis=1), (0, 2, 1))  # [B, 200, 2]
    img = stacked.reshape(B, IMG_H, IMG_W)                           # [B, 20, 20]

    # im2col, K-major so M lands on the lane axis (glue)
    M = B * OUT_H * OUT_W
    cols = [img[:, i:i + OUT_H, j:j + OUT_W]
            for i in range(K_H) for j in range(K_W)]
    patches = jnp.stack(cols, axis=0).reshape(K_H * K_W, M)          # [25, M]
    patches = jnp.pad(patches, ((0, KK_PAD - K_H * K_W), (0, 0)))    # [32, M]

    conv_out = conv_bn_relu_pallas(patches, prep["conv_w_eff"],
                                   prep["conv_b_eff"])               # [M, 200] bf16

    # HWC flatten — matches the HWC-permuted FC weight; no transpose needed.
    x_flat = conv_out.reshape(B, SIZE_FLAT)                          # [B, 51200] bf16

    x = fc_bn_relu_pallas(x_flat, prep["fc_w"], prep["bn2fc"])       # [B, 200] f32

    bias_row = prep["bias"].reshape(1, num)
    pred = score_pallas(x, embedding, bias_row)                      # [B, num]
    return pred


def conve_forward_ref(params, embedding, emb_rel, emb_time, triplets):
    """Plain-JAX f32 reference matching the PyTorch forward (eval mode)."""
    del emb_time
    B = triplets.shape[0]
    e_all = jnp.tanh(embedding)
    e1 = e_all[triplets[:, 0]]
    rel = emb_rel[triplets[:, 1]]
    stacked = jnp.transpose(jnp.stack([e1, rel], axis=1), (0, 2, 1))
    x = stacked.reshape(B, 1, IMG_H, IMG_W)
    bn0_s, bn0_h = bn_scale_shift(params["bn0"])
    x = x * bn0_s[0] + bn0_h[0]
    y = jax.lax.conv_general_dilated(
        x, params["conv_w"], (1, 1), "VALID",
        dimension_numbers=("NCHW", "OIHW", "NCHW"))
    bn1_s, bn1_h = bn_scale_shift(params["bn1"])
    y = y * bn1_s[None, :, None, None] + bn1_h[None, :, None, None]
    y = jnp.maximum(y, 0.0).reshape(B, SIZE_FLAT)
    z = y @ params["fc_w"].T + params["fc_b"]
    bn2_s, bn2_h = bn_scale_shift(params["bn2"])
    z = jnp.maximum(z * bn2_s + bn2_h, 0.0)
    s = z @ e_all.T + params["bias"][None, :]
    return jax.nn.sigmoid(s)


if __name__ == "__main__":
    key = jax.random.PRNGKey(0)
    k_emb, k_rel, k_time, k_par, k_tr = jax.random.split(key, 5)

    num = 256       # number of entities ("num" in ConvE.__init__)
    n_rel = 16
    B = 8           # number of triplets

    embedding = jax.random.normal(k_emb, (num, EMB_DIM), jnp.float32)
    emb_rel = jax.random.normal(k_rel, (n_rel, EMB_DIM), jnp.float32)
    emb_time = jax.random.normal(k_time, (4, EMB_DIM), jnp.float32)  # unused
    heads = jax.random.randint(k_tr, (B,), 0, num)
    rels = jax.random.randint(jax.random.fold_in(k_tr, 1), (B,), 0, n_rel)
    tails = jax.random.randint(jax.random.fold_in(k_tr, 2), (B,), 0, num)
    triplets = jnp.stack([heads, rels, tails], axis=1).astype(jnp.int32)

    params = init_params(k_par, num)
    prep = prepare_pallas_params(params)     # one-time weight fold / permute / bf16

    forward = jax.jit(conve_forward)
    pred = forward(prep, embedding, emb_rel, emb_time, triplets)
    pred = jax.block_until_ready(pred)
    assert pred.shape == (B, num)

    ref = conve_forward_ref(params, embedding, emb_rel, emb_time, triplets)
    err = float(jnp.max(jnp.abs(pred - ref)))
    assert err < 2e-2, f"max abs err vs reference: {err}"

    print("KERNEL_OK")
</pallas_src>

<mosaic_0001>
module attributes {stable_mosaic.version = 11 : i64} {
  func.func @_fc_bn_relu_kernel(%arg0: i32, %arg1: memref<8x12800xbf16, #tpu.memory_space<vmem>>, %arg2: memref<200x12800xbf16, #tpu.memory_space<vmem>>, %arg3: memref<2x200xf32, #tpu.memory_space<vmem>>, %arg4: memref<8x200xf32, #tpu.memory_space<vmem>>) attributes {dimension_semantics = [#tpu.dimension_semantics<arbitrary>], iteration_bounds = array<i64: 4>, scalar_prefetch = 0 : i64, scratch_operands = 0 : i64, tpu.core_type = #tpu.core_type<tc>, window_params = [{transform_indices = @transform_0, window_bounds = array<i64: 8, 12800>}, {transform_indices = @transform_1, window_bounds = array<i64: 200, 12800>}, {pipeline_mode = #tpu.pipeline_mode<synchronous>, transform_indices = @transform_2, window_bounds = array<i64: 2, 200>}, {pipeline_mode = #tpu.pipeline_mode<synchronous>, transform_indices = @transform_3, window_bounds = array<i64: 8, 200>}]} {
    %c0_i32 = arith.constant 0 : i32
    %0 = arith.cmpi eq, %arg0, %c0_i32 : i32
    %1 = arith.extui %0 : i1 to i32
    %c0_i32_0 = arith.constant 0 : i32
    %2 = arith.cmpi ne, %1, %c0_i32_0 : i32
    scf.if %2 {
      %cst_9 = arith.constant 0.000000e+00 : f32
      %12 = vector.broadcast %cst_9 : f32 to vector<8x200xf32>
      %c0_10 = arith.constant 0 : index
      %c0_11 = arith.constant 0 : index
      %13 = vector.load %arg4[%c0_10, %c0_11] : memref<8x200xf32, #tpu.memory_space<vmem>>, vector<8x200xf32>
      tpu.vector_store %arg4[%c0_10, %c0_11], %12 {strides = array<i32>} : memref<8x200xf32, #tpu.memory_space<vmem>>, vector<8x200xf32>,
    } else {
    }
    %c0 = arith.constant 0 : index
    %c0_1 = arith.constant 0 : index
    %3 = vector.load %arg4[%c0, %c0_1] : memref<8x200xf32, #tpu.memory_space<vmem>>, vector<8x200xf32>
    %c0_2 = arith.constant 0 : index
    %c0_3 = arith.constant 0 : index
    %4 = vector.load %arg1[%c0_2, %c0_3] : memref<8x12800xbf16, #tpu.memory_space<vmem>>, vector<8x12800xbf16>
    %c0_4 = arith.constant 0 : index
    %c0_5 = arith.constant 0 : index
    %5 = vector.load %arg2[%c0_4, %c0_5] : memref<200x12800xbf16, #tpu.memory_space<vmem>>, vector<200x12800xbf16>
    %cst = arith.constant dense<0.000000e+00> : vector<8x200xf32>
    %6 = tpu.matmul %4, %5, %cst {dimension_numbers = #tpu.dot_dimension_numbers<[1], [1], [0], [0], [0, 0, 1, 0], [], []>} : vector<8x12800xbf16>, vector<200x12800xbf16>, vector<8x200xf32> -> vector<8x200xf32>
    %7 = arith.addf %3, %6 : vector<8x200xf32>
    %c0_6 = arith.constant 0 : index
    %c0_7 = arith.constant 0 : index
    %8 = vector.load %arg4[%c0_6, %c0_7] : memref<8x200xf32, #tpu.memory_space<vmem>>, vector<8x200xf32>
    tpu.vector_store %arg4[%c0_6, %c0_7], %7 {strides = array<i32>} : memref<8x200xf32, #tpu.memory_space<vmem>>, vector<8x200xf32>,
    %c3_i32 = arith.constant 3 : i32
    %9 = arith.cmpi eq, %arg0, %c3_i32 : i32
    %10 = arith.extui %9 : i1 to i32
    %c0_i32_8 = arith.constant 0 : i32
    %11 = arith.cmpi ne, %10, %c0_i32_8 : i32
    scf.if %11 {
      %c0_9 = arith.constant 0 : index
      %c0_10 = arith.constant 0 : index
      %12 = vector.load %arg4[%c0_9, %c0_10] : memref<8x200xf32, #tpu.memory_space<vmem>>, vector<8x200xf32>
      %c0_11 = arith.constant 0 : index
      %c0_12 = arith.constant 0 : index
      %13 = vector.load %arg3[%c0_11, %c0_12] : memref<2x200xf32, #tpu.memory_space<vmem>>, vector<1x200xf32>
      %14 = vector.broadcast %13 : vector<1x200xf32> to vector<8x200xf32>
      %15 = arith.mulf %12, %14 : vector<8x200xf32>
      %c1 = arith.constant 1 : index
      %c0_13 = arith.constant 0 : index
      %16 = vector.load %arg3[%c1, %c0_13] : memref<2x200xf32, #tpu.memory_space<vmem>>, vector<1x200xf32>
      %17 = vector.broadcast %16 : vector<1x200xf32> to vector<8x200xf32>
      %18 = arith.addf %15, %17 : vector<8x200xf32>
      %cst_14 = arith.constant 0.000000e+00 : f32
      %19 = vector.broadcast %cst_14 : f32 to vector<8x200xf32>
      %20 = arith.maximumf %18, %19 : vector<8x200xf32>
      %c0_15 = arith.constant 0 : index
      %c0_16 = arith.constant 0 : index
      %21 = vector.load %arg4[%c0_15, %c0_16] : memref<8x200xf32, #tpu.memory_space<vmem>>, vector<8x200xf32>
      tpu.vector_store %arg4[%c0_15, %c0_16], %20 {strides = array<i32>} : memref<8x200xf32, #tpu.memory_space<vmem>>, vector<8x200xf32>,
    } else {
    }
    return
  }
  func.func @transform_0(%arg0: i32) -> (i32, i32) {
    %c0_i32 = arith.constant 0 : i32
    %c0_i32_0 = arith.constant 0 : i32
    return %c0_i32, %arg0 : i32, i32
  }
  func.func @transform_1(%arg0: i32) -> (i32, i32) {
    %c0_i32 = arith.constant 0 : i32
    %c0_i32_0 = arith.constant 0 : i32
    return %c0_i32, %arg0 : i32, i32
  }
  func.func @transform_2(%arg0: i32) -> (i32, i32) {
    %c0_i32 = arith.constant 0 : i32
    %c0_i32_0 = arith.constant 0 : i32
    %c0_i32_1 = arith.constant 0 : i32
    return %c0_i32, %c0_i32_0 : i32, i32
  }
  func.func @transform_3(%arg0: i32) -> (i32, i32) {
    %c0_i32 = arith.constant 0 : i32
    %c0_i32_0 = arith.constant 0 : i32
    %c0_i32_1 = arith.constant 0 : i32
    return %c0_i32, %c0_i32_0 : i32, i32
  }
}

module attributes {stable_mosaic.version = 11 : i64} {
  func.func @_conv_bn_relu_kernel(%arg0: i32, %arg1: memref<32x512xf32, #tpu.memory_space<vmem>>, %arg2: memref<32x200xf32, #tpu.memory_space<vmem>>, %arg3: memref<1x200xf32, #tpu.memory_space<vmem>>, %arg4: memref<512x200xbf16, #tpu.memory_space<vmem>>) attributes {dimension_semantics = [#tpu.dimension_semantics<parallel>], iteration_bounds = array<i64: 4>, scalar_prefetch = 0 : i64, scratch_operands = 0 : i64, tpu.core_type = #tpu.core_type<tc>, window_params = [{transform_indices = @transform_0, window_bounds = array<i64: 32, 512>}, {pipeline_mode = #tpu.pipeline_mode<synchronous>, transform_indices = @transform_1, window_bounds = array<i64: 32, 200>}, {pipeline_mode = #tpu.pipeline_mode<synchronous>, transform_indices = @transform_2, window_bounds = array<i64: 1, 200>}, {transform_indices = @transform_3, window_bounds = array<i64: 512, 200>}]} {
    %c0 = arith.constant 0 : index
    %c0_0 = arith.constant 0 : index
    %0 = vector.load %arg1[%c0, %c0_0] : memref<32x512xf32, #tpu.memory_space<vmem>>, vector<32x512xf32>
    %c0_1 = arith.constant 0 : index
    %c0_2 = arith.constant 0 : index
    %1 = vector.load %arg2[%c0_1, %c0_2] : memref<32x200xf32, #tpu.memory_space<vmem>>, vector<32x200xf32>
    %cst = arith.constant dense<0.000000e+00> : vector<512x200xf32>
    %2 = tpu.matmul %0, %1, %cst {dimension_numbers = #tpu.dot_dimension_numbers<[0], [0], [1], [1], [0, 1, 1, 1], [], []>} : vector<32x512xf32>, vector<32x200xf32>, vector<512x200xf32> -> vector<512x200xf32>
    %c0_3 = arith.constant 0 : index
    %c0_4 = arith.constant 0 : index
    %3 = vector.load %arg3[%c0_3, %c0_4] : memref<1x200xf32, #tpu.memory_space<vmem>>, vector<1x200xf32>
    %4 = vector.broadcast %3 : vector<1x200xf32> to vector<512x200xf32>
    %5 = arith.addf %2, %4 : vector<512x200xf32>
    %cst_5 = arith.constant 0.000000e+00 : f32
    %6 = vector.broadcast %cst_5 : f32 to vector<512x200xf32>
    %7 = arith.maximumf %5, %6 : vector<512x200xf32>
    %8 = arith.truncf %7 : vector<512x200xf32> to vector<512x200xbf16>
    %c0_6 = arith.constant 0 : index
    %c0_7 = arith.constant 0 : index
    %9 = vector.load %arg4[%c0_6, %c0_7] : memref<512x200xbf16, #tpu.memory_space<vmem>>, vector<512x200xbf16>
    tpu.vector_store %arg4[%c0_6, %c0_7], %8 {strides = array<i32>} : memref<512x200xbf16, #tpu.memory_space<vmem>>, vector<512x200xbf16>,
    return
  }
  func.func @transform_0(%arg0: i32) -> (i32, i32) {
    %c0_i32 = arith.constant 0 : i32
    %c0_i32_0 = arith.constant 0 : i32
    return %c0_i32, %arg0 : i32, i32
  }
  func.func @transform_1(%arg0: i32) -> (i32, i32) {
    %c0_i32 = arith.constant 0 : i32
    %c0_i32_0 = arith.constant 0 : i32
    %c0_i32_1 = arith.constant 0 : i32
    return %c0_i32, %c0_i32_0 : i32, i32
  }
  func.func @transform_2(%arg0: i32) -> (i32, i32) {
    %c0_i32 = arith.constant 0 : i32
    %c0_i32_0 = arith.constant 0 : i32
    %c0_i32_1 = arith.constant 0 : i32
    return %c0_i32, %c0_i32_0 : i32, i32
  }
  func.func @transform_3(%arg0: i32) -> (i32, i32) {
    %c0_i32 = arith.constant 0 : i32
    %c0_i32_0 = arith.constant 0 : i32
    return %arg0, %c0_i32 : i32, i32
  }
}

module attributes {stable_mosaic.version = 11 : i64} {
  func.func @_score_kernel(%arg0: i32, %arg1: memref<8x200xf32, #tpu.memory_space<vmem>>, %arg2: memref<256x200xf32, #tpu.memory_space<vmem>>, %arg3: memref<1x256xf32, #tpu.memory_space<vmem>>, %arg4: memref<8x256xf32, #tpu.memory_space<vmem>>) attributes {dimension_semantics = [#tpu.dimension_semantics<parallel>], iteration_bounds = array<i64: 1>, scalar_prefetch = 0 : i64, scratch_operands = 0 : i64, tpu.core_type = #tpu.core_type<tc>, window_params = [{pipeline_mode = #tpu.pipeline_mode<synchronous>, transform_indices = @transform_0, window_bounds = array<i64: 8, 200>}, {transform_indices = @transform_1, window_bounds = array<i64: 256, 200>}, {transform_indices = @transform_2, window_bounds = array<i64: 1, 256>}, {transform_indices = @transform_3, window_bounds = array<i64: 8, 256>}]} {
    %c0 = arith.constant 0 : index
    %c0_0 = arith.constant 0 : index
    %0 = vector.load %arg2[%c0, %c0_0] : memref<256x200xf32, #tpu.memory_space<vmem>>, vector<256x200xf32>
    %1 = math.tanh %0 : vector<256x200xf32>
    %c0_1 = arith.constant 0 : index
    %c0_2 = arith.constant 0 : index
    %2 = vector.load %arg1[%c0_1, %c0_2] : memref<8x200xf32, #tpu.memory_space<vmem>>, vector<8x200xf32>
    %cst = arith.constant dense<0.000000e+00> : vector<8x256xf32>
    %3 = tpu.matmul %2, %1, %cst {dimension_numbers = #tpu.dot_dimension_numbers<[1], [1], [0], [0], [0, 0, 1, 0], [], []>} : vector<8x200xf32>, vector<256x200xf32>, vector<8x256xf32> -> vector<8x256xf32>
    %c0_3 = arith.constant 0 : index
    %c0_4 = arith.constant 0 : index
    %4 = vector.load %arg3[%c0_3, %c0_4] : memref<1x256xf32, #tpu.memory_space<vmem>>, vector<1x256xf32>
    %5 = vector.broadcast %4 : vector<1x256xf32> to vector<8x256xf32>
    %6 = arith.addf %3, %5 : vector<8x256xf32>
    %7 = arith.negf %6 : vector<8x256xf32>
    %8 = math.exp %7 : vector<8x256xf32>
    %cst_5 = arith.constant 1.000000e+00 : f32
    %9 = vector.broadcast %cst_5 : f32 to vector<8x256xf32>
    %10 = arith.addf %9, %8 : vector<8x256xf32>
    %11 = arith.divf %9, %10 : vector<8x256xf32>
    %c0_6 = arith.constant 0 : index
    %c0_7 = arith.constant 0 : index
    %12 = vector.load %arg4[%c0_6, %c0_7] : memref<8x256xf32, #tpu.memory_space<vmem>>, vector<8x256xf32>
    tpu.vector_store %arg4[%c0_6, %c0_7], %11 {strides = array<i32>} : memref<8x256xf32, #tpu.memory_space<vmem>>, vector<8x256xf32>,
    return
  }
  func.func @transform_0(%arg0: i32) -> (i32, i32) {
    %c0_i32 = arith.constant 0 : i32
    %c0_i32_0 = arith.constant 0 : i32
    %c0_i32_1 = arith.constant 0 : i32
    return %c0_i32, %c0_i32_0 : i32, i32
  }
  func.func @transform_1(%arg0: i32) -> (i32, i32) {
    %c0_i32 = arith.constant 0 : i32
    %c0_i32_0 = arith.constant 0 : i32
    return %arg0, %c0_i32 : i32, i32
  }
  func.func @transform_2(%arg0: i32) -> (i32, i32) {
    %c0_i32 = arith.constant 0 : i32
    %c0_i32_0 = arith.constant 0 : i32
    return %c0_i32, %arg0 : i32, i32
  }
  func.func @transform_3(%arg0: i32) -> (i32, i32) {
    %c0_i32 = arith.constant 0 : i32
    %c0_i32_0 = arith.constant 0 : i32
    return %c0_i32, %arg0 : i32, i32
  }
}

</mosaic_0001>

<bundles_post_ra>
// kernel: conve_forward.5
= control target key start
LH: loop header
LB: loop body
LE: loop exit
PB: predicated region body
PF: predicated region fallthrough
CT: control target
= control target key end

     0   :  { %vm157_vm0 = vcmask 588800   ;;  %s808_s0 = inlined_call_operand.vmem [shape: f32[8,200], index: 0, kind: input, shape index: {}]   ;;  %s809_s1 = inlined_call_operand.vmem [shape: f32[256,200], index: 1, kind: input, shape index: {}]   ;;  %s810_s2 = inlined_call_operand.vmem [shape: f32[1,256], index: 2, kind: input, shape index: {}]   ;;  %s811_s3 = inlined_call_operand.hbm [shape: f32[8,256], index: 3, kind: output, shape index: {}]  }
   0x1   :  { %v46_v0 = vld [vmem:[%s809_s1 + $0xf8] sm:$0xff]  ;;  %v45_v1 = vld [vmem:[%s809_s1 + $0xf0] sm:$0xff]  ;;  %v44_v2 = vld [vmem:[%s809_s1 + $0xe8] sm:$0xff] }
   0x2   :  { %392 = vtanh.f32 %v46_v0  ;;  %v43_v3 = vld [vmem:[%s809_s1 + $0xe0] sm:$0xff]  ;;  %v42_v4 = vld [vmem:[%s809_s1 + $0xd8] sm:$0xff]  ;;  %v41_v5 = vld [vmem:[%s809_s1 + $0xd0] sm:$0xff] }
   0x3   :  { %394 = vtanh.f32 %v45_v1  ;;  %v40_v6 = vld [vmem:[%s809_s1 + $0xc8] sm:$0xff]  ;;  %v39_v7 = vld [vmem:[%s809_s1 + $0xc0] sm:$0xff]  ;;  %v38_v8 = vld [vmem:[%s809_s1 + $0xb8] sm:$0xff] }
   0x4   :  { %396 = vtanh.f32 %v44_v2  ;;  %v37_v9 = vld [vmem:[%s809_s1 + $0xb0] sm:$0xff]  ;;  %v36_v11 = vld [vmem:[%s809_s1 + $0xa8] sm:$0xff]  ;;  %v35_v15 = vld [vmem:[%s809_s1 + $0xa0] sm:$0xff] }
   0x5   :  { %398 = vtanh.f32 %v43_v3  ;;  %v34_v17 = vld [vmem:[%s809_s1 + $0x98] sm:$0xff]  ;;  %v33_v19 = vld [vmem:[%s809_s1 + $0x90] sm:$0xff]  ;;  %v144_v20 = vld [vmem:[%s808_s0 + $0x8] sm:$0xff] }
   0x6   :  { %400 = vtanh.f32 %v42_v4  ;;  %v32_v22 = vld [vmem:[%s809_s1 + $0x88] sm:$0xff]  ;;  %388 = vmatprep.mubr.msk.f32.mxu0 %vm157_vm0, %v144_v20 }
   0x7   :  { %402 = vtanh.f32 %v41_v5 }
   0x8   :  { %404 = vtanh.f32 %v40_v6 }
   0x9   :  { %406 = vtanh.f32 %v39_v7 }
   0xa   :  { %408 = vtanh.f32 %v38_v8 }
   0xb   :  { %410 = vtanh.f32 %v37_v9 }
   0xc   :  { %412 = vtanh.f32 %v36_v11 }
   0xd   :  { %414 = vtanh.f32 %v35_v15 }
   0xe   :  { %416 = vtanh.f32 %v34_v17 }
   0xf   :  { %v393_v10 = vpop.eup %392 }
  0x10   :  { %v395_v12 = vpop.eup %394  ;;  %356 = vmatprep.subr.msk.mxu0 %vm157_vm0, %v393_v10 }
  0x11   :  { %v397_v13 = vpop.eup %396  ;;  %258 = vmatpush1.xpose.msra.mxu0 %v395_v12 }
  0x12   :  { %v399_v14 = vpop.eup %398  ;;  %357 = vmatprep.subr.msk.mxu0 %vm157_vm0, %v397_v13 }
  0x13   :  { %v401_v16 = vpop.eup %400 }
  0x14   :  { %v403_v18 = vpop.eup %402 }
  0x15   :  { %260 = vmatpush1.xpose.msra.mxu0 %v399_v14  ;;  %v405_v21 = vpop.eup %404 }
  0x16   :  { %358 = vmatprep.subr.msk.mxu0 %vm157_vm0, %v401_v16 }
  0x17   :  { %8 = vsyncpa [#allocation3], 0  ;;  %418 = vtanh.f32 %v33_v19  ;;  %v407_v23 = vpop.eup %406  ;;  %v31_v24 = vld [vmem:[%s809_s1 + $0x80] sm:$0xff]  ;;  %v30_v26 = vld [vmem:[%s809_s1 + $0x78] sm:$0xff] }
  0x18   :  { %420 = vtanh.f32 %v32_v22  ;;  %v409_v25 = vpop.eup %408  ;;  %v29_v28 = vld [vmem:[%s809_s1 + $0x70] sm:$0xff]  ;;  %v28_v30 = vld [vmem:[%s809_s1 + $0x68] sm:$0xff]  ;;  %v27_v32 = vld [vmem:[%s809_s1 + $0x60] sm:$0xff] }
  0x19   :  { %262 = vmatpush1.xpose.msra.mxu0 %v403_v18  ;;  %422 = vtanh.f32 %v31_v24  ;;  %v411_v27 = vpop.eup %410  ;;  %v26_v34 = vld [vmem:[%s809_s1 + $0x58] sm:$0xff]  ;;  %v25_v36 = vld [vmem:[%s809_s1 + $0x50] sm:$0xff]  ;;  %v24_v38 = vld [vmem:[%s809_s1 + $0x48] sm:$0xff] }
  0x1a   :  { %359 = vmatprep.subr.msk.mxu0 %vm157_vm0, %v405_v21  ;;  %424 = vtanh.f32 %v30_v26  ;;  %v413_v29 = vpop.eup %412  ;;  %v23_v40 = vld [vmem:[%s809_s1 + $0x40] sm:$0xff]  ;;  %v22_v42 = vld [vmem:[%s809_s1 + $0x38] sm:$0xff]  ;;  %v21_v44 = vld [vmem:[%s809_s1 + $0x30] sm:$0xff] }
  0x1b   :  { %426 = vtanh.f32 %v29_v28  ;;  %v415_v31 = vpop.eup %414  ;;  %v20_v46 = vld [vmem:[%s809_s1 + $0x28] sm:$0xff]  ;;  %v19_v48 = vld [vmem:[%s809_s1 + $0x20] sm:$0xff]  ;;  %v18_v50 = vld [vmem:[%s809_s1 + $0x18] sm:$0xff] }
  0x1c   :  { %428 = vtanh.f32 %v28_v30  ;;  %v417_v33 = vpop.eup %416  ;;  %v17_v52 = vld [vmem:[%s809_s1 + $0x10] sm:$0xff]  ;;  %v16_v54 = vld [vmem:[%s809_s1 + $0x8] sm:$0xff]  ;;  %v15_v56 = vld [vmem:[%s809_s1] sm:$0xff] }
  0x1d   :  { %264 = vmatpush1.xpose.msra.mxu0 %v407_v23  ;;  %430 = vtanh.f32 %v27_v32  ;;  %v78_v58 = vld [vmem:[%s809_s1 + $0x1f8] sm:$0xff]  ;;  %v77_v60 = vld [vmem:[%s809_s1 + $0x1f0] sm:$0xff]  ;;  %v76_v62 = vld [vmem:[%s809_s1 + $0x1e8] sm:$0xff] }
  0x1e   :  { %360 = vmatprep.subr.msk.mxu0 %vm157_vm0, %v409_v25  ;;  %432 = vtanh.f32 %v26_v34  ;;  %v75_v0 = vld [vmem:[%s809_s1 + $0x1e0] sm:$0xff]  ;;  %v74_v2 = vld [vmem:[%s809_s1 + $0x1d8] sm:$0xff]  ;;  %v73_v4 = vld [vmem:[%s809_s1 + $0x1d0] sm:$0xff] }
  0x1f   :  { %434 = vtanh.f32 %v25_v36  ;;  %v72_v6 = vld [vmem:[%s809_s1 + $0x1c8] sm:$0xff]  ;;  %v71_v8 = vld [vmem:[%s809_s1 + $0x1c0] sm:$0xff]  ;;  %v70_v10 = vld [vmem:[%s809_s1 + $0x1b8] sm:$0xff] }
  0x20   :  { %436 = vtanh.f32 %v24_v38  ;;  %v69_v12 = vld [vmem:[%s809_s1 + $0x1b0] sm:$0xff]  ;;  %v68_v14 = vld [vmem:[%s809_s1 + $0x1a8] sm:$0xff]  ;;  %v67_v16 = vld [vmem:[%s809_s1 + $0x1a0] sm:$0xff] }
  0x21   :  { %266 = vmatpush1.xpose.msra.mxu0 %v411_v27  ;;  %438 = vtanh.f32 %v23_v40  ;;  %v66_v18 = vld [vmem:[%s809_s1 + $0x198] sm:$0xff]  ;;  %v65_v20 = vld [vmem:[%s809_s1 + $0x190] sm:$0xff]  ;;  %v64_v22 = vld [vmem:[%s809_s1 + $0x188] sm:$0xff] }
  0x22   :  { %361 = vmatprep.subr.msk.mxu0 %vm157_vm0, %v413_v29  ;;  %440 = vtanh.f32 %v22_v42  ;;  %v63_v24 = vld [vmem:[%s809_s1 + $0x180] sm:$0xff]  ;;  %v62_v26 = vld [vmem:[%s809_s1 + $0x178] sm:$0xff]  ;;  %v61_v28 = vld [vmem:[%s809_s1 + $0x170] sm:$0xff] }
  0x23   :  { %442 = vtanh.f32 %v21_v44  ;;  %v60_v30 = vld [vmem:[%s809_s1 + $0x168] sm:$0xff]  ;;  %v59_v32 = vld [vmem:[%s809_s1 + $0x160] sm:$0xff]  ;;  %v58_v34 = vld [vmem:[%s809_s1 + $0x158] sm:$0xff] }
  0x24   :  { %v419_v35 = vpop.eup %418  ;;  %444 = vtanh.f32 %v20_v46  ;;  %v57_v36 = vld [vmem:[%s809_s1 + $0x150] sm:$0xff]  ;;  %v56_v38 = vld [vmem:[%s809_s1 + $0x148] sm:$0xff]  ;;  %v55_v40 = vld [vmem:[%s809_s1 + $0x140] sm:$0xff] }
  0x25   :  { %268 = vmatpush1.xpose.msra.mxu0 %v415_v31  ;;  %v421_v37 = vpop.eup %420  ;;  %446 = vtanh.f32 %v19_v48  ;;  %v54_v42 = vld [vmem:[%s809_s1 + $0x138] sm:$0xff]  ;;  %v53_v44 = vld [vmem:[%s809_s1 + $0x130] sm:$0xff]  ;;  %v52_v46 = vld [vmem:[%s809_s1 + $0x128] sm:$0xff] }
  0x26   :  { %362 = vmatprep.subr.msk.mxu0 %vm157_vm0, %v417_v33  ;;  %v423_v39 = vpop.eup %422  ;;  %448 = vtanh.f32 %v18_v50  ;;  %v51_v48 = vld [vmem:[%s809_s1 + $0x120] sm:$0xff]  ;;  %v50_v50 = vld [vmem:[%s809_s1 + $0x118] sm:$0xff] }
  0x27   :  { %v425_v41 = vpop.eup %424  ;;  %450 = vtanh.f32 %v17_v52  ;;  %v49_v52 = vld [vmem:[%s809_s1 + $0x110] sm:$0xff] }
  0x28   :  { %v427_v43 = vpop.eup %426  ;;  %452 = vtanh.f32 %v16_v54  ;;  %v48_v54 = vld [vmem:[%s809_s1 + $0x108] sm:$0xff] }
  0x29   :  { %270 = vmatpush1.xpose.msra.mxu0 %v419_v35  ;;  %v429_v45 = vpop.eup %428  ;;  %454 = vtanh.f32 %v15_v56  ;;  %v47_v56 = vld [vmem:[%s809_s1 + $0x100] sm:$0xff] }
  0x2a   :  { %363 = vmatprep.subr.msk.mxu0 %vm157_vm0, %v421_v37  ;;  %v431_v47 = vpop.eup %430  ;;  %456 = vtanh.f32 %v78_v58 }
  0x2b   :  { %v433_v49 = vpop.eup %432  ;;  %458 = vtanh.f32 %v77_v60 }
  0x2c   :  { %v435_v51 = vpop.eup %434  ;;  %460 = vtanh.f32 %v76_v62 }
  0x2d   :  { %272 = vmatpush1.xpose.msra.mxu0 %v423_v39  ;;  %v437_v53 = vpop.eup %436  ;;  %462 = vtanh.f32 %v75_v0 }
  0x2e   :  { %364 = vmatprep.subr.msk.mxu0 %vm157_vm0, %v425_v41  ;;  %v439_v55 = vpop.eup %438  ;;  %464 = vtanh.f32 %v74_v2  ;;  %v147_v2 = vlaneseq }
  0x2f   :  { %v441_v57 = vpop.eup %440  ;;  %466 = vtanh.f32 %v73_v4 }
  0x30   :  { %v443_v59 = vpop.eup %442  ;;  %468 = vtanh.f32 %v72_v6 }
  0x31   :  { %274 = vmatpush1.xpose.msra.mxu0 %v427_v43  ;;  %v445_v61 = vpop.eup %444  ;;  %470 = vtanh.f32 %v71_v8 }
  0x32   :  { %365 = vmatprep.subr.msk.mxu0 %vm157_vm0, %v429_v45  ;;  %v447_v63 = vpop.eup %446  ;;  %472 = vtanh.f32 %v70_v10 }
  0x33   :  { %v449_v1 = vpop.eup %448  ;;  %474 = vtanh.f32 %v69_v12 }
  0x34   :  { %v451_v3 = vpop.eup %450  ;;  %476 = vtanh.f32 %v68_v14 }
  0x35   :  { %276 = vmatpush1.xpose.msra.mxu0 %v431_v47  ;;  %v453_v5 = vpop.eup %452  ;;  %478 = vtanh.f32 %v67_v16 }
  0x36   :  { %366 = vmatprep.subr.msk.mxu0 %vm157_vm0, %v433_v49  ;;  %v455_v7 = vpop.eup %454  ;;  %480 = vtanh.f32 %v66_v18 }
  0x37   :  { %v457_v9 = vpop.eup %456  ;;  %482 = vtanh.f32 %v65_v20 }
  0x38   :  { %v459_v11 = vpop.eup %458  ;;  %484 = vtanh.f32 %v64_v22 }
  0x39   :  { %278 = vmatpush1.xpose.msra.mxu0 %v435_v51  ;;  %v461_v13 = vpop.eup %460  ;;  %486 = vtanh.f32 %v63_v24 }
  0x3a   :  { %367 = vmatprep.subr.msk.mxu0 %vm157_vm0, %v437_v53  ;;  %v463_v15 = vpop.eup %462  ;;  %488 = vtanh.f32 %v62_v26 }
  0x3b   :  { %v465_v17 = vpop.eup %464  ;;  %490 = vtanh.f32 %v61_v28 }
  0x3c   :  { %v467_v19 = vpop.eup %466  ;;  %492 = vtanh.f32 %v60_v30 }
  0x3d   :  { %280 = vmatpush1.xpose.msra.mxu0 %v439_v55  ;;  %v469_v21 = vpop.eup %468  ;;  %494 = vtanh.f32 %v59_v32 }
  0x3e   :  { %368 = vmatprep.subr.msk.mxu0 %vm157_vm0, %v441_v57  ;;  %v471_v23 = vpop.eup %470  ;;  %496 = vtanh.f32 %v58_v34 }
  0x3f   :  { %v473_v25 = vpop.eup %472  ;;  %498 = vtanh.f32 %v57_v36 }
  0x40   :  { %v475_v27 = vpop.eup %474  ;;  %500 = vtanh.f32 %v56_v38 }
  0x41   :  { %282 = vmatpush1.xpose.msra.mxu0 %v443_v59  ;;  %v477_v29 = vpop.eup %476  ;;  %502 = vtanh.f32 %v55_v40 }
  0x42   :  { %369 = vmatprep.subr.msk.mxu0 %vm157_vm0, %v445_v61  ;;  %v479_v31 = vpop.eup %478  ;;  %504 = vtanh.f32 %v54_v42 }
  0x43   :  { %v481_v33 = vpop.eup %480  ;;  %506 = vtanh.f32 %v53_v44 }
  0x44   :  { %v483_v35 = vpop.eup %482  ;;  %508 = vtanh.f32 %v52_v46 }
  0x45   :  { %284 = vmatpush1.xpose.msra.mxu0 %v447_v63  ;;  %v485_v37 = vpop.eup %484  ;;  %510 = vtanh.f32 %v51_v48 }
  0x46   :  { %370 = vmatprep.subr.msk.mxu0 %vm157_vm0, %v449_v1  ;;  %v487_v39 = vpop.eup %486  ;;  %512 = vtanh.f32 %v50_v50  ;;  %v143_v1 = vld [vmem:[%s808_s0] sm:$0xff]  ;;  %s550_s0 = smov [#allocation2]  }
  0x47   :  { %v489_v41 = vpop.eup %488  ;;  %514 = vtanh.f32 %v49_v52  ;;  %s348_s10 = sshll.u32 %s550_s0, 4  ;;  %s349_s10 = int_to_ptr.vmem [resolvable:$true] %s348_s10 }
  0x48   :  { %v491_v43 = vpop.eup %490  ;;  %516 = vtanh.f32 %v48_v54  ;;  %p533_p1 = scmp.lt.s32.totalorder %s349_s10, %s349_s10 }
  0x49   :  { %286 = vmatpush1.xpose.msra.mxu0 %v451_v3  ;;  %v493_v45 = vpop.eup %492  ;;  %518 = vtanh.f32 %v47_v56  ;;  %v148_v3 = vshrl.u32 %v147_v2, 7 }
  0x4a   :  { %371 = vmatprep.subr.msk.mxu0 %vm157_vm0, %v453_v5  ;;  %v495_v47 = vpop.eup %494  ;;  %v145_v5 = vld [vmem:[%s810_s2] sm:$0x3]  ;;  %s528_s2 = scalar_lea.vmem %s349_s10, 256 }
  0x4b   :  { %v497_v49 = vpop.eup %496  ;;  %v149_v4 = vsub.s32 0, %v148_v3  ;;  %v153_v6 = vsub.s32 1, %v148_v3  ;;  %p529_p0 = scmp.ne.s32.totalorder %s349_s10, %s528_s2  ;;  %p534_p2 = scmp.lt.s32.totalorder %s528_s2, %s528_s2 }
  0x4c   :  { %v499_v51 = vpop.eup %498 }
  0x4d   :  { %288 = vmatpush1.xpose.msra.mxu0 %v455_v7  ;;  %v501_v53 = vpop.eup %500  ;;  %v150_v7 = vrot.slane %v145_v5, %v149_v4  ;;  %v154_v8 = vrot.slane %v145_v5, %v153_v6  ;;  %p535_p3 = por %p534_p2, %p533_p1 }
  0x4e   :  { %372 = vmatprep.subr.msk.mxu0 %vm157_vm0, %v457_v9  ;;  %v503_v55 = vpop.eup %502 }
  0x4f   :  { %v505_v57 = vpop.eup %504  ;;  %p536_p4 = pnand %p535_p3, %p529_p0 }
  0x50   :  { %v507_v58 = vpop.eup %506 }
  0x51   :  { %290 = vmatpush2.xpose.msra.mxu0 %v459_v11  ;;  %v509_v59 = vpop.eup %508 }
  0x52   :  { %373 = vmatprep.subr.msk.mxu0 %vm157_vm0, %v461_v13  ;;  %v511_v60 = vpop.eup %510 }
  0x53   :  { %v513_v61 = vpop.eup %512 }
  0x54   :  { %v515_v62 = vpop.eup %514 }
  0x55   :  { %292 = vmatpush2.xpose.msra.mxu0 %v463_v15  ;;  %v517_v63 = vpop.eup %516 }
  0x56   :  { %374 = vmatprep.subr.msk.mxu0 %vm157_vm0, %v465_v17  ;;  %v519_v0 = vpop.eup %518 }
  0x59   :  { %294 = vmatpush2.xpose.msra.mxu0 %v467_v19 }
  0x5a   :  { %375 = vmatprep.subr.msk.mxu0 %vm157_vm0, %v469_v21 }
  0x5d   :  { %296 = vmatpush2.xpose.msra.mxu0 %v471_v23 }
  0x5e   :  { %376 = vmatprep.subr.msk.mxu0 %vm157_vm0, %v473_v25 }
  0x61   :  { %298 = vmatpush2.xpose.msra.mxu0 %v475_v27 }
  0x62   :  { %377 = vmatprep.subr.msk.mxu0 %vm157_vm0, %v477_v29 }
  0x65   :  { %300 = vmatpush2.xpose.msra.mxu0 %v479_v31 }
  0x66   :  { %378 = vmatprep.subr.msk.mxu0 %vm157_vm0, %v481_v33 }
  0x69   :  { %302 = vmatpush2.xpose.msra.mxu0 %v483_v35 }
  0x6a   :  { %379 = vmatprep.subr.msk.mxu0 %vm157_vm0, %v485_v37 }
  0x6d   :  { %304 = vmatpush2.xpose.msra.mxu0 %v487_v39 }
  0x6e   :  { %380 = vmatprep.subr.msk.mxu0 %vm157_vm0, %v489_v41 }
  0x71   :  { %306 = vmatpush2.xpose.msra.mxu0 %v491_v43 }
  0x72   :  { %381 = vmatprep.subr.msk.mxu0 %vm157_vm0, %v493_v45 }
  0x75   :  { %308 = vmatpush2.xpose.msra.mxu0 %v495_v47 }
  0x76   :  { %382 = vmatprep.subr.msk.mxu0 %vm157_vm0, %v497_v49 }
  0x79   :  { %310 = vmatpush2.xpose.msra.mxu0 %v499_v51 }
  0x7a   :  { %383 = vmatprep.subr.msk.mxu0 %vm157_vm0, %v501_v53 }
  0x7d   :  { %312 = vmatpush2.xpose.msra.mxu0 %v503_v55 }
  0x7e   :  { %384 = vmatprep.subr.msk.mxu0 %vm157_vm0, %v505_v57 }
  0x81   :  { %314 = vmatpush2.xpose.msra.mxu0 %v507_v58 }
  0x82   :  { %385 = vmatprep.subr.msk.mxu0 %vm157_vm0, %v509_v59 }
  0x85   :  { %316 = vmatpush2.xpose.msra.mxu0 %v511_v60 }
  0x86   :  { %386 = vmatprep.subr.msk.mxu0 %vm157_vm0, %v513_v61 }
  0x89   :  { %318 = vmatpush2.xpose.msra.mxu0 %v515_v62 }
  0x8a   :  { %387 = vmatprep.subr.msk.mxu0 %vm157_vm0, %v517_v63 }
  0x8d   :  { %320 = vmatpush2.xpose.msra.mxu0 %v519_v0 }
  0x90   :  { %322 = vmatmul.mubr.f32.vlgmr.msra.gmra.mxu0 %v143_v1 }
 0x150   :  { %v323_v9 = vpop.f32.mrf.mxu0 }
 0x151   :  { %v324_v10 = vadd.f32 %v323_v9, %v150_v7 }
 0x152   :  { %v325_v11 = vpop.f32.mrf.mxu0 }
 0x153   :  { %v389_v12 = vmul.f32 -1.442695, %v324_v10  ;;  %v326_v13 = vadd.f32 %v325_v11, %v154_v8 }
 0x155   :  { %520 = vpow2.f32 %v389_v12  ;;  %v390_v14 = vmul.f32 -1.442695, %v326_v13 }
 0x157   :  { %522 = vpow2.f32 %v390_v14 }
 0x162   :  { %v521_v15 = vpop.eup %520 }
 0x163   :  { %v334_v16 = vadd.f32 1.0, %v521_v15 }
 0x164   :  { %v523_v17 = vpop.eup %522 }
 0x165   :  { %524 = vrcp.f32 %v334_v16  ;;  %v335_v18 = vadd.f32 1.0, %v523_v17 }
 0x167   :  { %526 = vrcp.f32 %v335_v18 }
 0x172   :  { %v525_v19 = vpop.eup %524 }
 0x173   :  { %340 = vst [vmem:[#allocation2] sm:$0xff] %v525_v19 }
 0x174   :  { %v527_v20 = vpop.eup %526 }
 0x175   :  { %341 = vst [vmem:[#allocation2 + $0x8] sm:$0xff] %v527_v20 }
 0x176   :  { %539 = shalt.err (!%p536_p4)
}
 0x177   :  { %351 = dma.vmem_to_hbm [thread:$0]  %s349_s10, 256, %s811_s3, [#allocation3]  }
 0x178   :  { %548 = dma.done.wait [#allocation3], 256  }
 0x179   :  { %549 = vsyncadd [#allocation3], 4294967040 }
 0x17a   :  { %355 = vsyncpa [#allocation3], 1 }

// kernel: conve_forward.3
= control target key start
LH: loop header
LB: loop body
LE: loop exit
PB: predicated region body
PF: predicated region fallthrough
CT: control target
= control target key end

     0   :  { %8 = vsyncpa [#allocation4], 0  ;;  %s2699_s0 = inlined_call_operand.vmem [shape: f32[32,2048], index: 0, kind: input, shape index: {}]   ;;  %s2700_s1 = inlined_call_operand.hbm [shape: f32[32,200], index: 1, kind: input, shape index: {}]   ;;  %s2701_s2 = inlined_call_operand.hbm [shape: f32[1,200], index: 2, kind: input, shape index: {}]   ;;  %s2702_s3 = inlined_call_operand.vmem [shape: bf16[2048,200], index: 3, kind: output, shape index: {}]  }
   0x1   :  { %9 = vsyncpa [#allocation6], 0  ;;  %s2101_s12 = smov 0   ;;  %s2103_s13 = smov 0  }
   0x2   :  { %s2105_s14 = smov 0  }
   0x3 LB: > { %s1724_s15 = sadd.s32 4294967295, %s2074_s14   ;;  %s2118_s16 = sadd.s32 1, %s2074_s14   ;;  %s2074_s14 = sphi %s2105_s14, %s2714_s14   ;;  %s2070_s13 = sphi %s2103_s13, %s2713_s13   ;;  %s2066_s12 = sphi %s2101_s12, %s2712_s12  }
   0x4   : > { %s19_s17 = ssub.s32 %s2074_s14, %s2118_s16  ;;  %s22_s18 = sadd.s32 1, %s2070_s13 }
   0x5   : > { %p20_p0 = scmp.eq.s32.totalorder %s19_s17, 0  ;;  %p29_p1 = scmp.ne.s32.totalorder %s2070_s13, %s2066_s12 }
   0x6   : > { %p30_p2 = scmp.eq.s32.totalorder %s2074_s14, 0  ;;  %p1726_p3 = scmp.ge.s32.totalorder %s2074_s14, 1 }
   0x7   : > { %s2128_s19 = scalar_select %p20_p0, %s2070_s13, %s22_s18  }
   0x8   : > { %p2130_p4 = por %p30_p2, %p29_p1  ;;  %p114_p5 = scmp.lt.s32.totalorder %s2074_s14, 5 }
   0x9   : > { %p2137_p6 = scmp.eq.s32.totalorder %s1724_s15, 0  ;;  %s2076_s23 = smov [#allocation3]  }
   0xa   : > { %p2141_p7 = pnand %p1726_p3, %p114_p5  ;;  %s126_s24 = sshll.u32 %s2076_s23, 4  ;;  %s127_s24 = int_to_ptr.vmem [resolvable:$true] %s126_s24 }
   0xb   : > { %s2706_s21 = scalar_select %p2137_p6, 1, 0 }
   0xc   : > { %p1952_p8 = pneg %p2141_p7  ;;  %s2077_s26 = smov [#allocation5]  }
   0xd   : > { %s140_s27 = sshll.u32 %s2077_s26, 4  ;;  %s2003_s28 = scalar_lea.vmem %s127_s24, 1024  ;;  %s141_s27 = int_to_ptr.vmem [resolvable:$true] %s140_s27 }
   0xe   : > { %p2149_p9 = pnand %p2137_p6, %p1952_p8  ;;  %p2004_p11 = scmp.ne.s32.totalorder %s127_s24, %s2003_s28 }
   0xf   : > { %p2011_p0 = scmp.lt.s32.totalorder %s127_s24, %s127_s24  ;;  %p2012_p1 = scmp.lt.s32.totalorder %s2003_s28, %s2003_s28 }
  0x10   : > { %p1994_p10 = pneg %p2149_p9 }
  0x11   : > { %p2013_p2 = por %p2012_p1, %p2011_p0 }
  0x12   : > { %p2006_p12 = pnand %p2004_p11, %p1994_p10 }
  0x14   : > { %p2007_p13 = pneg %p2006_p12 }
  0x16   : > { %p2014_p3 = pnand %p2013_p2, %p2007_p13 }
  0x18   : > { %2017 = shalt.err (!%p2014_p3)
}
  0x19   : > { %s2078_s29 = smov 256   ;;  %s2079_s30 = smov 16  }
  0x1a   : > { %1955 = dma.hbm_to_vmem [thread:$0]  (!%p2149_p9), %s2700_s1, 1024, %s127_s24, [#allocation4], %s2078_s29, %s2078_s29, %s2079_s30  }
  0x1b   : > { %s2029_s6 = scalar_lea.vmem %s141_s27, 32  ;;  %p2037_p12 = scmp.lt.s32.totalorder %s141_s27, %s141_s27 }
  0x1c   : > { %p2030_p5 = scmp.ne.s32.totalorder %s141_s27, %s2029_s6  ;;  %p2038_p6 = scmp.lt.s32.totalorder %s2029_s6, %s2029_s6 }
  0x1e   : > { %p2032_p8 = pnand %p2030_p5, %p1994_p10  ;;  %p2039_p0 = por %p2038_p6, %p2037_p12 }
  0x20   : > { %p2033_p11 = pneg %p2032_p8 }
  0x22   : > { %p2040_p13 = pnand %p2039_p0, %p2033_p11 }
  0x24   : > { %2043 = shalt.err (!%p2040_p13)
}
  0x25   : > { %1958 = dma.hbm_to_vmem [thread:$0]  (!%p2149_p9), %s2701_s2, 32, %s141_s27, [#allocation6]  }
  0x26   : > { %p1729_p1 = scmp.ge.s32.totalorder %s2074_s14, 4 }
  0x28   : > { %147 = sbr.rel (%p1729_p1) target bundleno = 57 (0x39), region = 24 }
  0x2d   : > { %150 = sbr.rel (!%p2130_p4) target bundleno = 57 (0x39), region = 28  ;;  %s152_s9 = sand.u32 (%p2130_p4), 1, %s2070_s13  }
  0x2e   : > { %s1870_s10 = sshll.u32 (%p2130_p4), %s2074_s14, 5  ;;  %s1730_s11 = sshll.u32 (%p2130_p4), %s152_s9, 7 }
  0x2f   : > { %s2179_s23 = scalar_lea.vmem (%p2130_p4), %s2699_s0, %s1870_s10  ;;  %s154_s20 = scalar_lea.vmem (%p2130_p4), [#allocation2], %s1730_s11 }
  0x30   : > { %v170_v0 = vld [vmem:[%s2179_s23] sm:$0xff] (%p2130_p4)  ;;  %v172_v1 = vld [vmem:[%s2179_s23 + $0x8] sm:$0xff] (%p2130_p4)  ;;  %v174_v2 = vld [vmem:[%s2179_s23 + $0x10] sm:$0xff] (%p2130_p4) }
  0x31   : > { %171 = vst [vmem:[%s154_s20] sm:$0xff] (%p2130_p4), %v170_v0  ;;  %173 = vst [vmem:[%s154_s20 + $0x8] sm:$0xff] (%p2130_p4), %v172_v1  ;;  %v176_v3 = vld [vmem:[%s2179_s23 + $0x18] sm:$0xff] (%p2130_p4)  ;;  %v178_v4 = vld [vmem:[%s2179_s23 + $0x80] sm:$0xff] (%p2130_p4) }
  0x32   : > { %175 = vst [vmem:[%s154_s20 + $0x10] sm:$0xff] %v174_v2  ;;  %v180_v5 = vld [vmem:[%s2179_s23 + $0x88] sm:$0xff]  ;;  %177 = vst [vmem:[%s154_s20 + $0x18] sm:$0xff] %v176_v3  ;;  %v182_v6 = vld [vmem:[%s2179_s23 + $0x90] sm:$0xff] }
  0x33   : > { %179 = vst [vmem:[%s154_s20 + $0x20] sm:$0xff] %v178_v4  ;;  %181 = vst [vmem:[%s154_s20 + $0x28] sm:$0xff] %v180_v5  ;;  %v184_v7 = vld [vmem:[%s2179_s23 + $0x98] sm:$0xff]  ;;  %v186_v8 = vld [vmem:[%s2179_s23 + $0x100] sm:$0xff] }
  0x34   : > { %183 = vst [vmem:[%s154_s20 + $0x30] sm:$0xff] %v182_v6  ;;  %185 = vst [vmem:[%s154_s20 + $0x38] sm:$0xff] %v184_v7  ;;  %v188_v9 = vld [vmem:[%s2179_s23 + $0x108] sm:$0xff]  ;;  %v190_v10 = vld [vmem:[%s2179_s23 + $0x110] sm:$0xff] }
  0x35   : > { %187 = vst [vmem:[%s154_s20 + $0x40] sm:$0xff] %v186_v8  ;;  %v192_v11 = vld [vmem:[%s2179_s23 + $0x118] sm:$0xff]  ;;  %189 = vst [vmem:[%s154_s20 + $0x48] sm:$0xff] %v188_v9  ;;  %v194_v12 = vld [vmem:[%s2179_s23 + $0x180] sm:$0xff] }
  0x36   : > { %191 = vst [vmem:[%s154_s20 + $0x50] sm:$0xff] %v190_v10  ;;  %193 = vst [vmem:[%s154_s20 + $0x58] sm:$0xff] %v192_v11  ;;  %v196_v13 = vld [vmem:[%s2179_s23 + $0x188] sm:$0xff]  ;;  %v198_v14 = vld [vmem:[%s2179_s23 + $0x190] sm:$0xff] }
  0x37   : > { %195 = vst [vmem:[%s154_s20 + $0x60] sm:$0xff] %v194_v12  ;;  %197 = vst [vmem:[%s154_s20 + $0x68] sm:$0xff] %v196_v13  ;;  %v200_v15 = vld [vmem:[%s2179_s23 + $0x198] sm:$0xff] }
  0x38   : > { %199 = vst [vmem:[%s154_s20 + $0x70] sm:$0xff] %v198_v14  ;;  %201 = vst [vmem:[%s154_s20 + $0x78] sm:$0xff] %v200_v15 }
  0x39 PF: > { %210 = sbr.rel (%p2141_p7) target bundleno = 518 (0x206), region = 51  ;;  %s213_s24 = sand.u32 (!%p2141_p7), 1, %s2066_s12  }
  0x3a   : > { %s1734_s25 = sshll.u32 (!%p2141_p7), %s213_s24, 7  ;;  %p2709_p4 = scmp.ne.s32.totalorder (!%p2141_p7), %s2706_s21, 0 }
  0x3b   : > { %s2200_s26 = scalar_lea.vmem (!%p2141_p7), [#allocation2], %s1734_s25 }
  0x3e   : > { %2057 = dma.done.wait (%p2709_p4), [#allocation4], 1024  }
  0x3f   : > { %2059 = vsyncadd (%p2709_p4), [#allocation4], 4294966272 }
  0x40   : > { %2061 = dma.done.wait (%p2709_p4), [#allocation6], 32  }
  0x41   : > { %2063 = vsyncadd (%p2709_p4), [#allocation6], 4294967264  ;;  %v2080_v16 = vmov 0.0   ;;  %v255_v17 = vld [vmem:[%s2200_s26 + $0x10] sm:$0xff]  ;;  %v253_v18 = vld [vmem:[%s2200_s26] sm:$0xff]  ;;  %vm417_vm0 = vcmask 261120  }
  0x42   : > { %674 = vmatprep.mubr.f32.mxu0 %v2080_v16  ;;  %866 = vmatprep.mubr.f32.mxu1 %v2080_v16  ;;  %v259_v19 = vld [vmem:[%s2200_s26 + $0x30] sm:$0xff]  ;;  %v257_v20 = vld [vmem:[%s2200_s26 + $0x20] sm:$0xff]  ;;  %v276_v21 = vld [vmem:[#allocation3 + $0x38] sm:$0xff]  ;;  %s1737_s12 = sshll.u32 %s1724_s15, 6  ;;  %vm1571_vm1 = vcmask 1043456   ;;  %vm1572_vm2 = vcmask 588804  }
  0x43   : > { %353 = vxpose.xlu1.b32.start [1/4] (short) %v255_v17, 128  ;;  %289 = vxpose.xlu0.b32.start [1/4] (short) %v253_v18, 128  ;;  %v275_v22 = vld [vmem:[#allocation3 + $0x30] sm:$0xff]  ;;  %v261_v24 = vld [vmem:[%s2200_s26 + $0x40] sm:$0xff]  ;;  %v274_v25 = vld [vmem:[#allocation3 + $0x28] sm:$0xff]  ;;  %p247_p6 = scmp.lt.s32.totalorder %s1737_s12, 255 }
  0x44   : > { %v263_v23 = vld [vmem:[%s2200_s26 + $0x50] sm:$0xff]  ;;  %634 = vmatprep.subr.mxu0 %v276_v21  ;;  %1936 = vmatprep.subr.mxu1 %v276_v21  ;;  %v273_v26 = vld [vmem:[#allocation3 + $0x20] sm:$0xff]  ;;  %v272_v27 = vld [vmem:[#allocation3 + $0x18] sm:$0xff] }
  0x45   : > { %635 = vmatpush1.msra.mxu0 %v275_v22  ;;  %1940 = vmatpush1.msra.mxu1 %v275_v22  ;;  %v271_v28 = vld [vmem:[#allocation3 + $0x10] sm:$0xff]  ;;  %v265_v30 = vld [vmem:[%s2200_s26 + $0x60] sm:$0xff]  ;;  %v270_v31 = vld [vmem:[#allocation3 + $0x8] sm:$0xff]  ;;  %s2716_s12 = smov (!%p247_p6, %s1737_s12), 255 }
  0x46   : > { %636 = vmatprep.subr.mxu0 %v274_v25  ;;  %1937 = vmatprep.subr.mxu1 %v274_v25  ;;  %v267_v29 = vld [vmem:[%s2200_s26 + $0x70] sm:$0xff]  ;;  %v269_v32 = vld [vmem:[#allocation3] sm:$0xff]  ;;  %v256_v33 = vld [vmem:[%s2200_s26 + $0x18] sm:$0xff]  ;;  %s1871_s21 = sshll.u32 %s2716_s12, 3 }
  0x47   : > { %354 = vxpose.xlu1.b32.cont [2/4] (short) %v259_v19, 128  ;;  %290 = vxpose.xlu0.b32.cont [2/4] (short) %v257_v20, 128  ;;  %v254_v34 = vld [vmem:[%s2200_s26 + $0x8] sm:$0xff]  ;;  %v260_v35 = vld [vmem:[%s2200_s26 + $0x38] sm:$0xff]  ;;  %s2367_s22 = scalar_lea.vmem %s2702_s3, %s1871_s21  ;;  %vm2369_vm3 = vmor %vm1572_vm2, %vm1571_vm1 }
  0x48   : > { %637 = vmatpush1.msra.mxu0 %v273_v26  ;;  %1941 = vmatpush1.msra.mxu1 %v273_v26  ;;  %v258_v36 = vld [vmem:[%s2200_s26 + $0x28] sm:$0xff]  ;;  %v264_v37 = vld [vmem:[%s2200_s26 + $0x58] sm:$0xff] }
  0x49   : > { %638 = vmatprep.subr.mxu0 %v272_v27  ;;  %1938 = vmatprep.subr.mxu1 %v272_v27  ;;  %v262_v38 = vld [vmem:[%s2200_s26 + $0x48] sm:$0xff]  ;;  %v268_v39 = vld [vmem:[%s2200_s26 + $0x78] sm:$0xff] }
  0x4a   : > { %639 = vmatpush1.msra.mxu0 %v271_v28  ;;  %1942 = vmatpush1.msra.mxu1 %v271_v28  ;;  %v266_v40 = vld [vmem:[%s2200_s26 + $0x68] sm:$0xff] }
  0x4b   : > { %355 = vxpose.xlu1.b32.cont [3/4] (short) %v263_v23, 128  ;;  %291 = vxpose.xlu0.b32.cont [3/4] (short) %v261_v24, 128 }
  0x4c   : > { %640 = vmatprep.subr.mxu0 %v270_v31  ;;  %1939 = vmatprep.subr.mxu1 %v270_v31 }
  0x4d   : > { %641 = vmatpush1.msra.mxu0 %v269_v32  ;;  %1943 = vmatpush1.msra.mxu1 %v269_v32 }
  0x4f   : > { %356 = vxpose.xlu1.b32.end [4/4] (short) %v267_v29, 128  ;;  %292 = vxpose.xlu0.b32.end [4/4] (short) %v265_v30, 128 }
  0x80   : > { %385 = vxpose.xlu1.b32.start [1/4] (short) %v256_v33, 128  ;;  %321 = vxpose.xlu0.b32.start [1/4] (short) %v254_v34, 128 }
  0x84   : > { %386 = vxpose.xlu1.b32.cont [2/4] (short) %v260_v35, 128  ;;  %322 = vxpose.xlu0.b32.cont [2/4] (short) %v258_v36, 128 }
  0x88   : > { %387 = vxpose.xlu1.b32.cont [3/4] (short) %v264_v37, 128  ;;  %323 = vxpose.xlu0.b32.cont [3/4] (short) %v262_v38, 128 }
  0x8c   : > { %388 = vxpose.xlu1.b32.end [4/4] (short) %v268_v39, 128  ;;  %324 = vxpose.xlu0.b32.end [4/4] (short) %v266_v40, 128 }
  0xbf   : > { %v369_v41 = vpop.trf.xlu1  ;;  %v305_v42 = vpop.trf.xlu0 }
  0xc0   : > { %1740 = vmatmul.mubr.msk.f32.vlgmr.msra.gmra.mxu0 %vm417_vm0, %v305_v42  ;;  %1772 = vmatmul.mubr.msk.f32.vlgmr.msra.gmra.mxu1 %vm417_vm0, %v369_v41  ;;  %v279_v42 = vlaneseq }
  0xc1   : > { %872 = vmatprep.mubr.f32.mxu1 %v2080_v16  ;;  %680 = vmatprep.mubr.f32.mxu0 %v2080_v16 }
  0xc3   : > { %v370_v43 = vpop.trf.xlu1  ;;  %v306_v44 = vpop.trf.xlu0 }
  0xc4   : > { %1741 = vmatmul.mubr.msk.f32.gmra.mxu0 %vm417_vm0, %v306_v44  ;;  %1773 = vmatmul.mubr.msk.f32.gmra.mxu1 %vm417_vm0, %v370_v43  ;;  %v280_v43 = vshrl.u32 %v279_v42, 7 }
  0xc5   : > { %878 = vmatprep.mubr.f32.mxu1 %v2080_v16  ;;  %686 = vmatprep.mubr.f32.mxu0 %v2080_v16 }
  0xc6   : > { %v281_v44 = vsub.s32 0, %v280_v43 }
  0xc7   : > { %v371_v45 = vpop.trf.xlu1  ;;  %v307_v46 = vpop.trf.xlu0 }
  0xc8   : > { %1742 = vmatmul.mubr.msk.f32.gmra.mxu0 %vm417_vm0, %v307_v46  ;;  %1774 = vmatmul.mubr.msk.f32.gmra.mxu1 %vm417_vm0, %v371_v45  ;;  %v277_v45 = vld [vmem:[#allocation5] sm:$0x3]  ;;  %v285_v46 = vsub.s32 1, %v280_v43 }
  0xc9   : > { %884 = vmatprep.mubr.f32.mxu1 %v2080_v16  ;;  %692 = vmatprep.mubr.f32.mxu0 %v2080_v16 }
  0xcb   : > { %v372_v47 = vpop.trf.xlu1  ;;  %v308_v48 = vpop.trf.xlu0 }
  0xcc   : > { %1743 = vmatmul.mubr.msk.f32.gmra.mxu0 %vm417_vm0, %v308_v48  ;;  %1775 = vmatmul.mubr.msk.f32.gmra.mxu1 %vm417_vm0, %v372_v47  ;;  %v2356_v47 = vrot.slane %v277_v45, %v281_v44  ;;  %v2358_v48 = vrot.slane %v277_v45, %v285_v46 }
  0xcd   : > { %890 = vmatprep.mubr.f32.mxu1 %v2080_v16  ;;  %698 = vmatprep.mubr.f32.mxu0 %v2080_v16 }
  0xcf   : > { %v373_v49 = vpop.trf.xlu1  ;;  %v309_v50 = vpop.trf.xlu0 }
  0xd0   : > { %1744 = vmatmul.mubr.msk.f32.gmra.mxu0 %vm417_vm0, %v309_v50  ;;  %1776 = vmatmul.mubr.msk.f32.gmra.mxu1 %vm417_vm0, %v373_v49 }
  0xd1   : > { %896 = vmatprep.mubr.f32.mxu1 %v2080_v16  ;;  %704 = vmatprep.mubr.f32.mxu0 %v2080_v16 }
  0xd3   : > { %v374_v51 = vpop.trf.xlu1  ;;  %v310_v52 = vpop.trf.xlu0 }
  0xd4   : > { %1745 = vmatmul.mubr.msk.f32.gmra.mxu0 %vm417_vm0, %v310_v52  ;;  %1777 = vmatmul.mubr.msk.f32.gmra.mxu1 %vm417_vm0, %v374_v51 }
  0xd5   : > { %902 = vmatprep.mubr.f32.mxu1 %v2080_v16  ;;  %710 = vmatprep.mubr.f32.mxu0 %v2080_v16 }
  0xd7   : > { %v375_v53 = vpop.trf.xlu1  ;;  %v311_v54 = vpop.trf.xlu0 }
  0xd8   : > { %1746 = vmatmul.mubr.msk.f32.gmra.mxu0 %vm417_vm0, %v311_v54  ;;  %1778 = vmatmul.mubr.msk.f32.gmra.mxu1 %vm417_vm0, %v375_v53 }
  0xd9   : > { %908 = vmatprep.mubr.f32.mxu1 %v2080_v16  ;;  %716 = vmatprep.mubr.f32.mxu0 %v2080_v16 }
  0xdb   : > { %v376_v55 = vpop.trf.xlu1  ;;  %v312_v56 = vpop.trf.xlu0 }
  0xdc   : > { %1747 = vmatmul.mubr.msk.f32.gmra.mxu0 %vm417_vm0, %v312_v56  ;;  %1779 = vmatmul.mubr.msk.f32.gmra.mxu1 %vm417_vm0, %v376_v55 }
  0xdd   : > { %914 = vmatprep.mubr.f32.mxu1 %v2080_v16  ;;  %722 = vmatprep.mubr.f32.mxu0 %v2080_v16 }
  0xdf   : > { %v377_v57 = vpop.trf.xlu1  ;;  %v313_v58 = vpop.trf.xlu0 }
  0xe0   : > { %1748 = vmatmul.mubr.msk.f32.gmra.mxu0 %vm417_vm0, %v313_v58  ;;  %1780 = vmatmul.mubr.msk.f32.gmra.mxu1 %vm417_vm0, %v377_v57 }
  0xe1   : > { %920 = vmatprep.mubr.f32.mxu1 %v2080_v16  ;;  %728 = vmatprep.mubr.f32.mxu0 %v2080_v16 }
  0xe3   : > { %v378_v59 = vpop.trf.xlu1  ;;  %v314_v60 = vpop.trf.xlu0 }
  0xe4   : > { %1749 = vmatmul.mubr.msk.f32.gmra.mxu0 %vm417_vm0, %v314_v60  ;;  %1781 = vmatmul.mubr.msk.f32.gmra.mxu1 %vm417_vm0, %v378_v59 }
  0xe5   : > { %926 = vmatprep.mubr.f32.mxu1 %v2080_v16  ;;  %734 = vmatprep.mubr.f32.mxu0 %v2080_v16 }
  0xe7   : > { %v379_v61 = vpop.trf.xlu1  ;;  %v315_v62 = vpop.trf.xlu0 }
  0xe8   : > { %1750 = vmatmul.mubr.msk.f32.gmra.mxu0 %vm417_vm0, %v315_v62  ;;  %1782 = vmatmul.mubr.msk.f32.gmra.mxu1 %vm417_vm0, %v379_v61 }
  0xe9   : > { %932 = vmatprep.mubr.f32.mxu1 %v2080_v16  ;;  %740 = vmatprep.mubr.f32.mxu0 %v2080_v16 }
  0xeb   : > { %v380_v63 = vpop.trf.xlu1  ;;  %v316_v0 = vpop.trf.xlu0 }
  0xec   : > { %1751 = vmatmul.mubr.msk.f32.gmra.mxu0 %vm417_vm0, %v316_v0  ;;  %1783 = vmatmul.mubr.msk.f32.gmra.mxu1 %vm417_vm0, %v380_v63 }
  0xed   : > { %938 = vmatprep.mubr.f32.mxu1 %v2080_v16  ;;  %746 = vmatprep.mubr.f32.mxu0 %v2080_v16 }
  0xef   : > { %v381_v1 = vpop.trf.xlu1  ;;  %v317_v2 = vpop.trf.xlu0 }
  0xf0   : > { %1752 = vmatmul.mubr.msk.f32.gmra.mxu0 %vm417_vm0, %v317_v2  ;;  %1784 = vmatmul.mubr.msk.f32.gmra.mxu1 %vm417_vm0, %v381_v1 }
  0xf1   : > { %944 = vmatprep.mubr.f32.mxu1 %v2080_v16  ;;  %752 = vmatprep.mubr.f32.mxu0 %v2080_v16 }
  0xf3   : > { %v382_v3 = vpop.trf.xlu1  ;;  %v318_v4 = vpop.trf.xlu0 }
  0xf4   : > { %1753 = vmatmul.mubr.msk.f32.gmra.mxu0 %vm417_vm0, %v318_v4  ;;  %1785 = vmatmul.mubr.msk.f32.gmra.mxu1 %vm417_vm0, %v382_v3 }
  0xf5   : > { %950 = vmatprep.mubr.f32.mxu1 %v2080_v16  ;;  %758 = vmatprep.mubr.f32.mxu0 %v2080_v16 }
  0xf7   : > { %v383_v5 = vpop.trf.xlu1  ;;  %v319_v6 = vpop.trf.xlu0 }
  0xf8   : > { %1754 = vmatmul.mubr.msk.f32.gmra.mxu0 %vm417_vm0, %v319_v6  ;;  %1786 = vmatmul.mubr.msk.f32.gmra.mxu1 %vm417_vm0, %v383_v5 }
  0xf9   : > { %956 = vmatprep.mubr.f32.mxu1 %v2080_v16  ;;  %764 = vmatprep.mubr.f32.mxu0 %v2080_v16 }
  0xfb   : > { %v384_v7 = vpop.trf.xlu1  ;;  %v320_v8 = vpop.trf.xlu0 }
  0xfc   : > { %1755 = vmatmul.mubr.msk.f32.gmra.mxu0 %vm417_vm0, %v320_v8  ;;  %1787 = vmatmul.mubr.msk.f32.gmra.mxu1 %vm417_vm0, %v384_v7 }
  0xfd   : > { %962 = vmatprep.mubr.f32.mxu1 %v2080_v16  ;;  %770 = vmatprep.mubr.f32.mxu0 %v2080_v16 }
  0xff   : > { %v401_v9 = vpop.trf.xlu1  ;;  %v337_v10 = vpop.trf.xlu0 }
 0x100   : > { %1756 = vmatmul.mubr.msk.f32.gmra.mxu0 %vm417_vm0, %v337_v10  ;;  %1788 = vmatmul.mubr.msk.f32.gmra.mxu1 %vm417_vm0, %v401_v9 }
 0x101   : > { %968 = vmatprep.mubr.f32.mxu1 %v2080_v16  ;;  %776 = vmatprep.mubr.f32.mxu0 %v2080_v16 }
 0x103   : > { %v402_v11 = vpop.trf.xlu1  ;;  %v338_v12 = vpop.trf.xlu0 }
 0x104   : > { %1757 = vmatmul.mubr.msk.f32.gmra.mxu0 %vm417_vm0, %v338_v12  ;;  %1789 = vmatmul.mubr.msk.f32.gmra.mxu1 %vm417_vm0, %v402_v11 }
 0x105   : > { %974 = vmatprep.mubr.f32.mxu1 %v2080_v16  ;;  %782 = vmatprep.mubr.f32.mxu0 %v2080_v16 }
 0x107   : > { %v403_v13 = vpop.trf.xlu1  ;;  %v339_v14 = vpop.trf.xlu0 }
 0x108   : > { %1758 = vmatmul.mubr.msk.f32.gmra.mxu0 %vm417_vm0, %v339_v14  ;;  %1790 = vmatmul.mubr.msk.f32.gmra.mxu1 %vm417_vm0, %v403_v13 }
 0x109   : > { %980 = vmatprep.mubr.f32.mxu1 %v2080_v16  ;;  %788 = vmatprep.mubr.f32.mxu0 %v2080_v16 }
 0x10b   : > { %v404_v15 = vpop.trf.xlu1  ;;  %v340_v17 = vpop.trf.xlu0 }
 0x10c   : > { %1759 = vmatmul.mubr.msk.f32.gmra.mxu0 %vm417_vm0, %v340_v17  ;;  %1791 = vmatmul.mubr.msk.f32.gmra.mxu1 %vm417_vm0, %v404_v15 }
 0x10d   : > { %986 = vmatprep.mubr.f32.mxu1 %v2080_v16  ;;  %794 = vmatprep.mubr.f32.mxu0 %v2080_v16 }
 0x10f   : > { %v405_v18 = vpop.trf.xlu1  ;;  %v341_v19 = vpop.trf.xlu0 }
 0x110   : > { %1760 = vmatmul.mubr.msk.f32.gmra.mxu0 %vm417_vm0, %v341_v19  ;;  %1792 = vmatmul.mubr.msk.f32.gmra.mxu1 %vm417_vm0, %v405_v18 }
 0x111   : > { %992 = vmatprep.mubr.f32.mxu1 %v2080_v16  ;;  %800 = vmatprep.mubr.f32.mxu0 %v2080_v16 }
 0x113   : > { %v406_v20 = vpop.trf.xlu1  ;;  %v342_v21 = vpop.trf.xlu0 }
 0x114   : > { %1761 = vmatmul.mubr.msk.f32.gmra.mxu0 %vm417_vm0, %v342_v21  ;;  %1793 = vmatmul.mubr.msk.f32.gmra.mxu1 %vm417_vm0, %v406_v20 }
 0x115   : > { %998 = vmatprep.mubr.f32.mxu1 %v2080_v16  ;;  %806 = vmatprep.mubr.f32.mxu0 %v2080_v16 }
 0x117   : > { %v407_v22 = vpop.trf.xlu1  ;;  %v343_v23 = vpop.trf.xlu0 }
 0x118   : > { %1762 = vmatmul.mubr.msk.f32.gmra.mxu0 %vm417_vm0, %v343_v23  ;;  %1794 = vmatmul.mubr.msk.f32.gmra.mxu1 %vm417_vm0, %v407_v22 }
 0x119   : > { %1004 = vmatprep.mubr.f32.mxu1 %v2080_v16  ;;  %812 = vmatprep.mubr.f32.mxu0 %v2080_v16 }
 0x11b   : > { %v408_v24 = vpop.trf.xlu1  ;;  %v344_v25 = vpop.trf.xlu0 }
 0x11c   : > { %1763 = vmatmul.mubr.msk.f32.gmra.mxu0 %vm417_vm0, %v344_v25  ;;  %1795 = vmatmul.mubr.msk.f32.gmra.mxu1 %vm417_vm0, %v408_v24 }
 0x11d   : > { %1010 = vmatprep.mubr.f32.mxu1 %v2080_v16  ;;  %818 = vmatprep.mubr.f32.mxu0 %v2080_v16 }
 0x11f   : > { %v409_v26 = vpop.trf.xlu1  ;;  %v345_v27 = vpop.trf.xlu0 }
 0x120   : > { %1764 = vmatmul.mubr.msk.f32.gmra.mxu0 %vm417_vm0, %v345_v27  ;;  %1796 = vmatmul.mubr.msk.f32.gmra.mxu1 %vm417_vm0, %v409_v26 }
 0x121   : > { %1016 = vmatprep.mubr.f32.mxu1 %v2080_v16  ;;  %824 = vmatprep.mubr.f32.mxu0 %v2080_v16 }
 0x123   : > { %v410_v28 = vpop.trf.xlu1  ;;  %v346_v29 = vpop.trf.xlu0 }
 0x124   : > { %1765 = vmatmul.mubr.msk.f32.gmra.mxu0 %vm417_vm0, %v346_v29  ;;  %1797 = vmatmul.mubr.msk.f32.gmra.mxu1 %vm417_vm0, %v410_v28 }
 0x125   : > { %1022 = vmatprep.mubr.f32.mxu1 %v2080_v16  ;;  %830 = vmatprep.mubr.f32.mxu0 %v2080_v16 }
 0x127   : > { %v411_v30 = vpop.trf.xlu1  ;;  %v347_v31 = vpop.trf.xlu0 }
 0x128   : > { %1766 = vmatmul.mubr.msk.f32.gmra.mxu0 %vm417_vm0, %v347_v31  ;;  %1798 = vmatmul.mubr.msk.f32.gmra.mxu1 %vm417_vm0, %v411_v30 }
 0x129   : > { %1028 = vmatprep.mubr.f32.mxu1 %v2080_v16  ;;  %836 = vmatprep.mubr.f32.mxu0 %v2080_v16 }
 0x12b   : > { %v412_v32 = vpop.trf.xlu1  ;;  %v348_v33 = vpop.trf.xlu0 }
 0x12c   : > { %1767 = vmatmul.mubr.msk.f32.gmra.mxu0 %vm417_vm0, %v348_v33  ;;  %1799 = vmatmul.mubr.msk.f32.gmra.mxu1 %vm417_vm0, %v412_v32 }
 0x12d   : > { %1034 = vmatprep.mubr.f32.mxu1 %v2080_v16  ;;  %842 = vmatprep.mubr.f32.mxu0 %v2080_v16 }
 0x12f   : > { %v413_v34 = vpop.trf.xlu1  ;;  %v349_v35 = vpop.trf.xlu0 }
 0x130   : > { %1768 = vmatmul.mubr.msk.f32.gmra.mxu0 %vm417_vm0, %v349_v35  ;;  %1800 = vmatmul.mubr.msk.f32.gmra.mxu1 %vm417_vm0, %v413_v34 }
 0x131   : > { %1040 = vmatprep.mubr.f32.mxu1 %v2080_v16  ;;  %848 = vmatprep.mubr.f32.mxu0 %v2080_v16 }
 0x133   : > { %v414_v36 = vpop.trf.xlu1  ;;  %v350_v37 = vpop.trf.xlu0 }
 0x134   : > { %1769 = vmatmul.mubr.msk.f32.gmra.mxu0 %vm417_vm0, %v350_v37  ;;  %1801 = vmatmul.mubr.msk.f32.gmra.mxu1 %vm417_vm0, %v414_v36 }
 0x135   : > { %1046 = vmatprep.mubr.f32.mxu1 %v2080_v16  ;;  %854 = vmatprep.mubr.f32.mxu0 %v2080_v16 }
 0x137   : > { %v415_v38 = vpop.trf.xlu1  ;;  %v351_v39 = vpop.trf.xlu0 }
 0x138   : > { %1770 = vmatmul.mubr.msk.f32.gmra.mxu0 %vm417_vm0, %v351_v39  ;;  %1802 = vmatmul.mubr.msk.f32.gmra.mxu1 %vm417_vm0, %v415_v38 }
 0x139   : > { %1052 = vmatprep.mubr.f32.mxu1 %v2080_v16  ;;  %860 = vmatprep.mubr.f32.mxu0 %v2080_v16 }
 0x13b   : > { %v416_v40 = vpop.trf.xlu1  ;;  %v352_v41 = vpop.trf.xlu0 }
 0x13c   : > { %1771 = vmatmul.mubr.msk.f32.gmra.mxu0 %vm417_vm0, %v352_v41  ;;  %1803 = vmatmul.mubr.msk.f32.gmra.mxu1 %vm417_vm0, %v416_v40 }
 0x180   : > { %v676_v16 = vpop.f32.mrf.mxu0  ;;  %v868_v49 = vpop.f32.mrf.mxu1 }
 0x181   : > { %v677_v50 = vadd.f32 %v676_v16, %v2356_v47  ;;  %v869_v51 = vadd.f32 %v868_v49, %v2356_v47 }
 0x182   : > { %v678_v52 = vpop.f32.mrf.mxu0  ;;  %v870_v53 = vpop.f32.mrf.mxu1 }
 0x183   : > { %v679_v54 = vadd.f32 %v678_v52, %v2358_v48  ;;  %v871_v55 = vadd.f32 %v870_v53, %v2358_v48  ;;  %v1059_v58 = vmax.f32 %v677_v50, 0.0  ;;  %v1123_v59 = vmax.f32 %v869_v51, 0.0 }
 0x184   : > { %v682_v56 = vpop.f32.mrf.mxu0  ;;  %v874_v57 = vpop.f32.mrf.mxu1 }
 0x185   : > { %v1060_v60 = vmax.f32 %v679_v54, 0.0  ;;  %v1124_v61 = vmax.f32 %v871_v55, 0.0  ;;  %v683_v63 = vadd.f32 %v682_v56, %v2356_v47  ;;  %v875_v0 = vadd.f32 %v874_v57, %v2356_v47 }
 0x186   : > { %v684_v1 = vpop.f32.mrf.mxu0  ;;  %v876_v2 = vpop.f32.mrf.mxu1 }
 0x187   : > { %v1872_v3 = vpack.c.bf16 %v1060_v60, %v1059_v58  ;;  %v1904_v4 = vpack.c.bf16 %v1124_v61, %v1123_v59  ;;  %v685_v5 = vadd.f32 %v684_v1, %v2358_v48  ;;  %v877_v6 = vadd.f32 %v876_v2, %v2358_v48 }
 0x188   : > { %v688_v7 = vpop.f32.mrf.mxu0  ;;  %v880_v8 = vpop.f32.mrf.mxu1  ;;  %v1061_v11 = vmax.f32 %v683_v63, 0.0  ;;  %v1125_v12 = vmax.f32 %v875_v0, 0.0 }
 0x189   : > { %1574 = vst.msk [vmem:[%s2367_s22] sm:$0xff] %vm2369_vm3, %v1872_v3  ;;  %1606 = vst.msk [vmem:[%s2367_s22 + $0x100] sm:$0xff] %vm2369_vm3, %v1904_v4  ;;  %v689_v9 = vadd.f32 %v688_v7, %v2356_v47  ;;  %v881_v10 = vadd.f32 %v880_v8, %v2356_v47  ;;  %v1062_v13 = vmax.f32 %v685_v5, 0.0  ;;  %v1126_v14 = vmax.f32 %v877_v6, 0.0 }
 0x18a   : > { %v690_v15 = vpop.f32.mrf.mxu0  ;;  %v882_v17 = vpop.f32.mrf.mxu1 }
 0x18b   : > { %v691_v18 = vadd.f32 %v690_v15, %v2358_v48  ;;  %v883_v19 = vadd.f32 %v882_v17, %v2358_v48  ;;  %v1873_v20 = vpack.c.bf16 %v1062_v13, %v1061_v11  ;;  %v1905_v21 = vpack.c.bf16 %v1126_v14, %v1125_v12 }
 0x18c   : > { %v694_v22 = vpop.f32.mrf.mxu0  ;;  %v886_v23 = vpop.f32.mrf.mxu1  ;;  %v1063_v24 = vmax.f32 %v689_v9, 0.0  ;;  %v1127_v25 = vmax.f32 %v881_v10, 0.0 }
 0x18d   : > { %v1064_v26 = vmax.f32 %v691_v18, 0.0  ;;  %v1128_v27 = vmax.f32 %v883_v19, 0.0  ;;  %1575 = vst.msk [vmem:[%s2367_s22 + $0x8] sm:$0xff] %vm2369_vm3, %v1873_v20  ;;  %1607 = vst.msk [vmem:[%s2367_s22 + $0x108] sm:$0xff] %vm2369_vm3, %v1905_v21  ;;  %v695_v28 = vadd.f32 %v694_v22, %v2356_v47  ;;  %v887_v29 = vadd.f32 %v886_v23, %v2356_v47 }
 0x18e   : > { %v696_v30 = vpop.f32.mrf.mxu0  ;;  %v888_v31 = vpop.f32.mrf.mxu1 }
 0x18f   : > { %v1874_v32 = vpack.c.bf16 %v1064_v26, %v1063_v24  ;;  %v1906_v33 = vpack.c.bf16 %v1128_v27, %v1127_v25  ;;  %v697_v34 = vadd.f32 %v696_v30, %v2358_v48  ;;  %v889_v35 = vadd.f32 %v888_v31, %v2358_v48 }
 0x190   : > { %v700_v36 = vpop.f32.mrf.mxu0  ;;  %v892_v37 = vpop.f32.mrf.mxu1  ;;  %v1065_v40 = vmax.f32 %v695_v28, 0.0  ;;  %v1129_v41 = vmax.f32 %v887_v29, 0.0 }
 0x191   : > { %1576 = vst.msk [vmem:[%s2367_s22 + $0x10] sm:$0xff] %vm2369_vm3, %v1874_v32  ;;  %1608 = vst.msk [vmem:[%s2367_s22 + $0x110] sm:$0xff] %vm2369_vm3, %v1906_v33  ;;  %v701_v38 = vadd.f32 %v700_v36, %v2356_v47  ;;  %v893_v39 = vadd.f32 %v892_v37, %v2356_v47  ;;  %v1066_v42 = vmax.f32 %v697_v34, 0.0  ;;  %v1130_v43 = vmax.f32 %v889_v35, 0.0 }
 0x192   : > { %v702_v44 = vpop.f32.mrf.mxu0  ;;  %v894_v45 = vpop.f32.mrf.mxu1 }
 0x193   : > { %v703_v46 = vadd.f32 %v702_v44, %v2358_v48  ;;  %v895_v16 = vadd.f32 %v894_v45, %v2358_v48  ;;  %v1875_v49 = vpack.c.bf16 %v1066_v42, %v1065_v40  ;;  %v1907_v50 = vpack.c.bf16 %v1130_v43, %v1129_v41 }
 0x194   : > { %v706_v51 = vpop.f32.mrf.mxu0  ;;  %v898_v52 = vpop.f32.mrf.mxu1  ;;  %v1067_v53 = vmax.f32 %v701_v38, 0.0  ;;  %v1131_v54 = vmax.f32 %v893_v39, 0.0 }
 0x195   : > { %v1068_v55 = vmax.f32 %v703_v46, 0.0  ;;  %v1132_v56 = vmax.f32 %v895_v16, 0.0  ;;  %1577 = vst.msk [vmem:[%s2367_s22 + $0x18] sm:$0xff] %vm2369_vm3, %v1875_v49  ;;  %1609 = vst.msk [vmem:[%s2367_s22 + $0x118] sm:$0xff] %vm2369_vm3, %v1907_v50  ;;  %v707_v57 = vadd.f32 %v706_v51, %v2356_v47  ;;  %v899_v58 = vadd.f32 %v898_v52, %v2356_v47 }
 0x196   : > { %v708_v59 = vpop.f32.mrf.mxu0  ;;  %v900_v60 = vpop.f32.mrf.mxu1 }
 0x197   : > { %v1876_v61 = vpack.c.bf16 %v1068_v55, %v1067_v53  ;;  %v1908_v63 = vpack.c.bf16 %v1132_v56, %v1131_v54  ;;  %v709_v0 = vadd.f32 %v708_v59, %v2358_v48  ;;  %v901_v1 = vadd.f32 %v900_v60, %v2358_v48 }
 0x198   : > { %v712_v2 = vpop.f32.mrf.mxu0  ;;  %v904_v3 = vpop.f32.mrf.mxu1  ;;  %v1069_v6 = vmax.f32 %v707_v57, 0.0  ;;  %v1133_v7 = vmax.f32 %v899_v58, 0.0 }
 0x199   : > { %1578 = vst.msk [vmem:[%s2367_s22 + $0x20] sm:$0xff] %vm2369_vm3, %v1876_v61  ;;  %1610 = vst.msk [vmem:[%s2367_s22 + $0x120] sm:$0xff] %vm2369_vm3, %v1908_v63  ;;  %v713_v4 = vadd.f32 %v712_v2, %v2356_v47  ;;  %v905_v5 = vadd.f32 %v904_v3, %v2356_v47  ;;  %v1070_v8 = vmax.f32 %v709_v0, 0.0  ;;  %v1134_v9 = vmax.f32 %v901_v1, 0.0 }
 0x19a   : > { %v714_v10 = vpop.f32.mrf.mxu0  ;;  %v906_v11 = vpop.f32.mrf.mxu1 }
 0x19b   : > { %v715_v12 = vadd.f32 %v714_v10, %v2358_v48  ;;  %v907_v13 = vadd.f32 %v906_v11, %v2358_v48  ;;  %v1877_v14 = vpack.c.bf16 %v1070_v8, %v1069_v6  ;;  %v1909_v15 = vpack.c.bf16 %v1134_v9, %v1133_v7 }
 0x19c   : > { %v718_v17 = vpop.f32.mrf.mxu0  ;;  %v910_v18 = vpop.f32.mrf.mxu1  ;;  %v1071_v19 = vmax.f32 %v713_v4, 0.0  ;;  %v1135_v20 = vmax.f32 %v905_v5, 0.0 }
 0x19d   : > { %v1072_v21 = vmax.f32 %v715_v12, 0.0  ;;  %v1136_v22 = vmax.f32 %v907_v13, 0.0  ;;  %1579 = vst.msk [vmem:[%s2367_s22 + $0x28] sm:$0xff] %vm2369_vm3, %v1877_v14  ;;  %1611 = vst.msk [vmem:[%s2367_s22 + $0x128] sm:$0xff] %vm2369_vm3, %v1909_v15  ;;  %v719_v23 = vadd.f32 %v718_v17, %v2356_v47  ;;  %v911_v24 = vadd.f32 %v910_v18, %v2356_v47 }
 0x19e   : > { %v720_v25 = vpop.f32.mrf.mxu0  ;;  %v912_v26 = vpop.f32.mrf.mxu1 }
 0x19f   : > { %v1878_v27 = vpack.c.bf16 %v1072_v21, %v1071_v19  ;;  %v1910_v28 = vpack.c.bf16 %v1136_v22, %v1135_v20  ;;  %v721_v29 = vadd.f32 %v720_v25, %v2358_v48  ;;  %v913_v30 = vadd.f32 %v912_v26, %v2358_v48 }
 0x1a0   : > { %v724_v31 = vpop.f32.mrf.mxu0  ;;  %v916_v32 = vpop.f32.mrf.mxu1  ;;  %v1073_v35 = vmax.f32 %v719_v23, 0.0  ;;  %v1137_v36 = vmax.f32 %v911_v24, 0.0 }
 0x1a1   : > { %1580 = vst.msk [vmem:[%s2367_s22 + $0x30] sm:$0xff] %vm2369_vm3, %v1878_v27  ;;  %1612 = vst.msk [vmem:[%s2367_s22 + $0x130] sm:$0xff] %vm2369_vm3, %v1910_v28  ;;  %v725_v33 = vadd.f32 %v724_v31, %v2356_v47  ;;  %v917_v34 = vadd.f32 %v916_v32, %v2356_v47  ;;  %v1074_v37 = vmax.f32 %v721_v29, 0.0  ;;  %v1138_v38 = vmax.f32 %v913_v30, 0.0 }
 0x1a2   : > { %v726_v39 = vpop.f32.mrf.mxu0  ;;  %v918_v40 = vpop.f32.mrf.mxu1 }
 0x1a3   : > { %v727_v41 = vadd.f32 %v726_v39, %v2358_v48  ;;  %v919_v42 = vadd.f32 %v918_v40, %v2358_v48  ;;  %v1879_v43 = vpack.c.bf16 %v1074_v37, %v1073_v35  ;;  %v1911_v44 = vpack.c.bf16 %v1138_v38, %v1137_v36 }
 0x1a4   : > { %v730_v45 = vpop.f32.mrf.mxu0  ;;  %v922_v46 = vpop.f32.mrf.mxu1  ;;  %v1075_v16 = vmax.f32 %v725_v33, 0.0  ;;  %v1139_v49 = vmax.f32 %v917_v34, 0.0 }
 0x1a5   : > { %v1076_v50 = vmax.f32 %v727_v41, 0.0  ;;  %v1140_v51 = vmax.f32 %v919_v42, 0.0  ;;  %1581 = vst.msk [vmem:[%s2367_s22 + $0x38] sm:$0xff] %vm2369_vm3, %v1879_v43  ;;  %1613 = vst.msk [vmem:[%s2367_s22 + $0x138] sm:$0xff] %vm2369_vm3, %v1911_v44  ;;  %v731_v52 = vadd.f32 %v730_v45, %v2356_v47  ;;  %v923_v53 = vadd.f32 %v922_v46, %v2356_v47 }
 0x1a6   : > { %v732_v54 = vpop.f32.mrf.mxu0  ;;  %v924_v55 = vpop.f32.mrf.mxu1 }
 0x1a7   : > { %v1880_v56 = vpack.c.bf16 %v1076_v50, %v1075_v16  ;;  %v1912_v57 = vpack.c.bf16 %v1140_v51, %v1139_v49  ;;  %v733_v58 = vadd.f32 %v732_v54, %v2358_v48  ;;  %v925_v59 = vadd.f32 %v924_v55, %v2358_v48 }
 0x1a8   : > { %v736_v60 = vpop.f32.mrf.mxu0  ;;  %v928_v61 = vpop.f32.mrf.mxu1  ;;  %v1077_v1 = vmax.f32 %v731_v52, 0.0  ;;  %v1141_v2 = vmax.f32 %v923_v53, 0.0 }
 0x1a9   : > { %1582 = vst.msk [vmem:[%s2367_s22 + $0x40] sm:$0xff] %vm2369_vm3, %v1880_v56  ;;  %1614 = vst.msk [vmem:[%s2367_s22 + $0x140] sm:$0xff] %vm2369_vm3, %v1912_v57  ;;  %v737_v63 = vadd.f32 %v736_v60, %v2356_v47  ;;  %v929_v0 = vadd.f32 %v928_v61, %v2356_v47  ;;  %v1078_v3 = vmax.f32 %v733_v58, 0.0  ;;  %v1142_v4 = vmax.f32 %v925_v59, 0.0 }
 0x1aa   : > { %v738_v5 = vpop.f32.mrf.mxu0  ;;  %v930_v6 = vpop.f32.mrf.mxu1 }
 0x1ab   : > { %v739_v7 = vadd.f32 %v738_v5, %v2358_v48  ;;  %v931_v8 = vadd.f32 %v930_v6, %v2358_v48  ;;  %v1881_v9 = vpack.c.bf16 %v1078_v3, %v1077_v1  ;;  %v1913_v10 = vpack.c.bf16 %v1142_v4, %v1141_v2 }
 0x1ac   : > { %v742_v11 = vpop.f32.mrf.mxu0  ;;  %v934_v12 = vpop.f32.mrf.mxu1  ;;  %v1079_v13 = vmax.f32 %v737_v63, 0.0  ;;  %v1143_v14 = vmax.f32 %v929_v0, 0.0 }
 0x1ad   : > { %v1080_v15 = vmax.f32 %v739_v7, 0.0  ;;  %v1144_v17 = vmax.f32 %v931_v8, 0.0  ;;  %1583 = vst.msk [vmem:[%s2367_s22 + $0x48] sm:$0xff] %vm2369_vm3, %v1881_v9  ;;  %1615 = vst.msk [vmem:[%s2367_s22 + $0x148] sm:$0xff] %vm2369_vm3, %v1913_v10  ;;  %v743_v18 = vadd.f32 %v742_v11, %v2356_v47  ;;  %v935_v19 = vadd.f32 %v934_v12, %v2356_v47 }
 0x1ae   : > { %v744_v20 = vpop.f32.mrf.mxu0  ;;  %v936_v21 = vpop.f32.mrf.mxu1 }
 0x1af   : > { %v1882_v22 = vpack.c.bf16 %v1080_v15, %v1079_v13  ;;  %v1914_v23 = vpack.c.bf16 %v1144_v17, %v1143_v14  ;;  %v745_v24 = vadd.f32 %v744_v20, %v2358_v48  ;;  %v937_v25 = vadd.f32 %v936_v21, %v2358_v48 }
 0x1b0   : > { %v748_v26 = vpop.f32.mrf.mxu0  ;;  %v940_v27 = vpop.f32.mrf.mxu1  ;;  %v1081_v30 = vmax.f32 %v743_v18, 0.0  ;;  %v1145_v31 = vmax.f32 %v935_v19, 0.0 }
 0x1b1   : > { %1584 = vst.msk [vmem:[%s2367_s22 + $0x50] sm:$0xff] %vm2369_vm3, %v1882_v22  ;;  %1616 = vst.msk [vmem:[%s2367_s22 + $0x150] sm:$0xff] %vm2369_vm3, %v1914_v23  ;;  %v749_v28 = vadd.f32 %v748_v26, %v2356_v47  ;;  %v941_v29 = vadd.f32 %v940_v27, %v2356_v47  ;;  %v1082_v32 = vmax.f32 %v745_v24, 0.0  ;;  %v1146_v33 = vmax.f32 %v937_v25, 0.0 }
 0x1b2   : > { %v750_v34 = vpop.f32.mrf.mxu0  ;;  %v942_v35 = vpop.f32.mrf.mxu1 }
 0x1b3   : > { %v751_v36 = vadd.f32 %v750_v34, %v2358_v48  ;;  %v943_v37 = vadd.f32 %v942_v35, %v2358_v48  ;;  %v1883_v38 = vpack.c.bf16 %v1082_v32, %v1081_v30  ;;  %v1915_v39 = vpack.c.bf16 %v1146_v33, %v1145_v31 }
 0x1b4   : > { %v754_v40 = vpop.f32.mrf.mxu0  ;;  %v946_v41 = vpop.f32.mrf.mxu1  ;;  %v1083_v42 = vmax.f32 %v749_v28, 0.0  ;;  %v1147_v43 = vmax.f32 %v941_v29, 0.0 }
 0x1b5   : > { %v1084_v44 = vmax.f32 %v751_v36, 0.0  ;;  %v1148_v45 = vmax.f32 %v943_v37, 0.0  ;;  %1585 = vst.msk [vmem:[%s2367_s22 + $0x58] sm:$0xff] %vm2369_vm3, %v1883_v38  ;;  %1617 = vst.msk [vmem:[%s2367_s22 + $0x158] sm:$0xff] %vm2369_vm3, %v1915_v39  ;;  %v755_v46 = vadd.f32 %v754_v40, %v2356_v47  ;;  %v947_v16 = vadd.f32 %v946_v41, %v2356_v47 }
 0x1b6   : > { %v756_v49 = vpop.f32.mrf.mxu0  ;;  %v948_v50 = vpop.f32.mrf.mxu1 }
 0x1b7   : > { %v1884_v51 = vpack.c.bf16 %v1084_v44, %v1083_v42  ;;  %v1916_v52 = vpack.c.bf16 %v1148_v45, %v1147_v43  ;;  %v757_v53 = vadd.f32 %v756_v49, %v2358_v48  ;;  %v949_v54 = vadd.f32 %v948_v50, %v2358_v48 }
 0x1b8   : > { %v760_v55 = vpop.f32.mrf.mxu0  ;;  %v952_v56 = vpop.f32.mrf.mxu1  ;;  %v1085_v59 = vmax.f32 %v755_v46, 0.0  ;;  %v1149_v60 = vmax.f32 %v947_v16, 0.0 }
 0x1b9   : > { %1586 = vst.msk [vmem:[%s2367_s22 + $0x60] sm:$0xff] %vm2369_vm3, %v1884_v51  ;;  %1618 = vst.msk [vmem:[%s2367_s22 + $0x160] sm:$0xff] %vm2369_vm3, %v1916_v52  ;;  %v761_v57 = vadd.f32 %v760_v55, %v2356_v47  ;;  %v953_v58 = vadd.f32 %v952_v56, %v2356_v47  ;;  %v1086_v61 = vmax.f32 %v757_v53, 0.0  ;;  %v1150_v63 = vmax.f32 %v949_v54, 0.0 }
 0x1ba   : > { %v762_v0 = vpop.f32.mrf.mxu0  ;;  %v954_v1 = vpop.f32.mrf.mxu1 }
 0x1bb   : > { %v763_v2 = vadd.f32 %v762_v0, %v2358_v48  ;;  %v955_v3 = vadd.f32 %v954_v1, %v2358_v48  ;;  %v1885_v4 = vpack.c.bf16 %v1086_v61, %v1085_v59  ;;  %v1917_v5 = vpack.c.bf16 %v1150_v63, %v1149_v60 }
 0x1bc   : > { %v766_v6 = vpop.f32.mrf.mxu0  ;;  %v958_v7 = vpop.f32.mrf.mxu1  ;;  %v1087_v8 = vmax.f32 %v761_v57, 0.0  ;;  %v1151_v9 = vmax.f32 %v953_v58, 0.0 }
 0x1bd   : > { %v1088_v10 = vmax.f32 %v763_v2, 0.0  ;;  %v1152_v11 = vmax.f32 %v955_v3, 0.0  ;;  %1587 = vst.msk [vmem:[%s2367_s22 + $0x68] sm:$0xff] %vm2369_vm3, %v1885_v4  ;;  %1619 = vst.msk [vmem:[%s2367_s22 + $0x168] sm:$0xff] %vm2369_vm3, %v1917_v5  ;;  %v767_v12 = vadd.f32 %v766_v6, %v2356_v47  ;;  %v959_v13 = vadd.f32 %v958_v7, %v2356_v47 }
 0x1be   : > { %v768_v14 = vpop.f32.mrf.mxu0  ;;  %v960_v15 = vpop.f32.mrf.mxu1 }
 0x1bf   : > { %v1886_v17 = vpack.c.bf16 %v1088_v10, %v1087_v8  ;;  %v1918_v18 = vpack.c.bf16 %v1152_v11, %v1151_v9  ;;  %v769_v19 = vadd.f32 %v768_v14, %v2358_v48  ;;  %v961_v20 = vadd.f32 %v960_v15, %v2358_v48 }
 0x1c0   : > { %v772_v21 = vpop.f32.mrf.mxu0  ;;  %v964_v22 = vpop.f32.mrf.mxu1  ;;  %v1089_v25 = vmax.f32 %v767_v12, 0.0  ;;  %v1153_v26 = vmax.f32 %v959_v13, 0.0 }
 0x1c1   : > { %1588 = vst.msk [vmem:[%s2367_s22 + $0x70] sm:$0xff] %vm2369_vm3, %v1886_v17  ;;  %1620 = vst.msk [vmem:[%s2367_s22 + $0x170] sm:$0xff] %vm2369_vm3, %v1918_v18  ;;  %v773_v23 = vadd.f32 %v772_v21, %v2356_v47  ;;  %v965_v24 = vadd.f32 %v964_v22, %v2356_v47  ;;  %v1090_v27 = vmax.f32 %v769_v19, 0.0  ;;  %v1154_v28 = vmax.f32 %v961_v20, 0.0 }
 0x1c2   : > { %v774_v29 = vpop.f32.mrf.mxu0  ;;  %v966_v30 = vpop.f32.mrf.mxu1 }
 0x1c3   : > { %v775_v31 = vadd.f32 %v774_v29, %v2358_v48  ;;  %v967_v32 = vadd.f32 %v966_v30, %v2358_v48  ;;  %v1887_v33 = vpack.c.bf16 %v1090_v27, %v1089_v25  ;;  %v1919_v34 = vpack.c.bf16 %v1154_v28, %v1153_v26 }
 0x1c4   : > { %v778_v35 = vpop.f32.mrf.mxu0  ;;  %v970_v36 = vpop.f32.mrf.mxu1  ;;  %v1091_v37 = vmax.f32 %v773_v23, 0.0  ;;  %v1155_v38 = vmax.f32 %v965_v24, 0.0 }
 0x1c5   : > { %v1092_v39 = vmax.f32 %v775_v31, 0.0  ;;  %v1156_v40 = vmax.f32 %v967_v32, 0.0  ;;  %1589 = vst.msk [vmem:[%s2367_s22 + $0x78] sm:$0xff] %vm2369_vm3, %v1887_v33  ;;  %1621 = vst.msk [vmem:[%s2367_s22 + $0x178] sm:$0xff] %vm2369_vm3, %v1919_v34  ;;  %v779_v41 = vadd.f32 %v778_v35, %v2356_v47  ;;  %v971_v42 = vadd.f32 %v970_v36, %v2356_v47 }
 0x1c6   : > { %v780_v43 = vpop.f32.mrf.mxu0  ;;  %v972_v44 = vpop.f32.mrf.mxu1 }
 0x1c7   : > { %v1888_v45 = vpack.c.bf16 %v1092_v39, %v1091_v37  ;;  %v1920_v46 = vpack.c.bf16 %v1156_v40, %v1155_v38  ;;  %v781_v16 = vadd.f32 %v780_v43, %v2358_v48  ;;  %v973_v49 = vadd.f32 %v972_v44, %v2358_v48 }
 0x1c8   : > { %v784_v50 = vpop.f32.mrf.mxu0  ;;  %v976_v51 = vpop.f32.mrf.mxu1  ;;  %v1093_v54 = vmax.f32 %v779_v41, 0.0  ;;  %v1157_v55 = vmax.f32 %v971_v42, 0.0 }
 0x1c9   : > { %1590 = vst.msk [vmem:[%s2367_s22 + $0x80] sm:$0xff] %vm2369_vm3, %v1888_v45  ;;  %1622 = vst.msk [vmem:[%s2367_s22 + $0x180] sm:$0xff] %vm2369_vm3, %v1920_v46  ;;  %v785_v52 = vadd.f32 %v784_v50, %v2356_v47  ;;  %v977_v53 = vadd.f32 %v976_v51, %v2356_v47  ;;  %v1094_v56 = vmax.f32 %v781_v16, 0.0  ;;  %v1158_v57 = vmax.f32 %v973_v49, 0.0 }
 0x1ca   : > { %v786_v58 = vpop.f32.mrf.mxu0  ;;  %v978_v59 = vpop.f32.mrf.mxu1 }
 0x1cb   : > { %v787_v60 = vadd.f32 %v786_v58, %v2358_v48  ;;  %v979_v61 = vadd.f32 %v978_v59, %v2358_v48  ;;  %v1889_v63 = vpack.c.bf16 %v1094_v56, %v1093_v54  ;;  %v1921_v0 = vpack.c.bf16 %v1158_v57, %v1157_v55 }
 0x1cc   : > { %v790_v1 = vpop.f32.mrf.mxu0  ;;  %v982_v2 = vpop.f32.mrf.mxu1  ;;  %v1095_v3 = vmax.f32 %v785_v52, 0.0  ;;  %v1159_v4 = vmax.f32 %v977_v53, 0.0 }
 0x1cd   : > { %v1096_v5 = vmax.f32 %v787_v60, 0.0  ;;  %v1160_v6 = vmax.f32 %v979_v61, 0.0  ;;  %1591 = vst.msk [vmem:[%s2367_s22 + $0x88] sm:$0xff] %vm2369_vm3, %v1889_v63  ;;  %1623 = vst.msk [vmem:[%s2367_s22 + $0x188] sm:$0xff] %vm2369_vm3, %v1921_v0  ;;  %v791_v7 = vadd.f32 %v790_v1, %v2356_v47  ;;  %v983_v8 = vadd.f32 %v982_v2, %v2356_v47 }
 0x1ce   : > { %v792_v9 = vpop.f32.mrf.mxu0  ;;  %v984_v10 = vpop.f32.mrf.mxu1 }
 0x1cf   : > { %v1890_v11 = vpack.c.bf16 %v1096_v5, %v1095_v3  ;;  %v1922_v12 = vpack.c.bf16 %v1160_v6, %v1159_v4  ;;  %v793_v13 = vadd.f32 %v792_v9, %v2358_v48  ;;  %v985_v14 = vadd.f32 %v984_v10, %v2358_v48 }
 0x1d0   : > { %v796_v15 = vpop.f32.mrf.mxu0  ;;  %v988_v17 = vpop.f32.mrf.mxu1  ;;  %v1097_v20 = vmax.f32 %v791_v7, 0.0  ;;  %v1161_v21 = vmax.f32 %v983_v8, 0.0 }
 0x1d1   : > { %1592 = vst.msk [vmem:[%s2367_s22 + $0x90] sm:$0xff] %vm2369_vm3, %v1890_v11  ;;  %1624 = vst.msk [vmem:[%s2367_s22 + $0x190] sm:$0xff] %vm2369_vm3, %v1922_v12  ;;  %v797_v18 = vadd.f32 %v796_v15, %v2356_v47  ;;  %v989_v19 = vadd.f32 %v988_v17, %v2356_v47  ;;  %v1098_v22 = vmax.f32 %v793_v13, 0.0  ;;  %v1162_v23 = vmax.f32 %v985_v14, 0.0 }
 0x1d2   : > { %v798_v24 = vpop.f32.mrf.mxu0  ;;  %v990_v25 = vpop.f32.mrf.mxu1 }
 0x1d3   : > { %v799_v26 = vadd.f32 %v798_v24, %v2358_v48  ;;  %v991_v27 = vadd.f32 %v990_v25, %v2358_v48  ;;  %v1891_v28 = vpack.c.bf16 %v1098_v22, %v1097_v20  ;;  %v1923_v29 = vpack.c.bf16 %v1162_v23, %v1161_v21 }
 0x1d4   : > { %v802_v30 = vpop.f32.mrf.mxu0  ;;  %v994_v31 = vpop.f32.mrf.mxu1  ;;  %v1099_v32 = vmax.f32 %v797_v18, 0.0  ;;  %v1163_v33 = vmax.f32 %v989_v19, 0.0 }
 0x1d5   : > { %v1100_v34 = vmax.f32 %v799_v26, 0.0  ;;  %v1164_v35 = vmax.f32 %v991_v27, 0.0  ;;  %1593 = vst.msk [vmem:[%s2367_s22 + $0x98] sm:$0xff] %vm2369_vm3, %v1891_v28  ;;  %1625 = vst.msk [vmem:[%s2367_s22 + $0x198] sm:$0xff] %vm2369_vm3, %v1923_v29  ;;  %v803_v36 = vadd.f32 %v802_v30, %v2356_v47  ;;  %v995_v37 = vadd.f32 %v994_v31, %v2356_v47 }
 0x1d6   : > { %v804_v38 = vpop.f32.mrf.mxu0  ;;  %v996_v39 = vpop.f32.mrf.mxu1 }
 0x1d7   : > { %v1892_v40 = vpack.c.bf16 %v1100_v34, %v1099_v32  ;;  %v1924_v41 = vpack.c.bf16 %v1164_v35, %v1163_v33  ;;  %v805_v42 = vadd.f32 %v804_v38, %v2358_v48  ;;  %v997_v43 = vadd.f32 %v996_v39, %v2358_v48 }
 0x1d8   : > { %v808_v44 = vpop.f32.mrf.mxu0  ;;  %v1000_v45 = vpop.f32.mrf.mxu1  ;;  %v1101_v49 = vmax.f32 %v803_v36, 0.0  ;;  %v1165_v50 = vmax.f32 %v995_v37, 0.0 }
 0x1d9   : > { %1594 = vst.msk [vmem:[%s2367_s22 + $0xa0] sm:$0xff] %vm2369_vm3, %v1892_v40  ;;  %1626 = vst.msk [vmem:[%s2367_s22 + $0x1a0] sm:$0xff] %vm2369_vm3, %v1924_v41  ;;  %v809_v46 = vadd.f32 %v808_v44, %v2356_v47  ;;  %v1001_v16 = vadd.f32 %v1000_v45, %v2356_v47  ;;  %v1102_v51 = vmax.f32 %v805_v42, 0.0  ;;  %v1166_v52 = vmax.f32 %v997_v43, 0.0 }
 0x1da   : > { %v810_v53 = vpop.f32.mrf.mxu0  ;;  %v1002_v54 = vpop.f32.mrf.mxu1 }
 0x1db   : > { %v811_v55 = vadd.f32 %v810_v53, %v2358_v48  ;;  %v1003_v56 = vadd.f32 %v1002_v54, %v2358_v48  ;;  %v1893_v57 = vpack.c.bf16 %v1102_v51, %v1101_v49  ;;  %v1925_v58 = vpack.c.bf16 %v1166_v52, %v1165_v50 }
 0x1dc   : > { %v814_v59 = vpop.f32.mrf.mxu0  ;;  %v1006_v60 = vpop.f32.mrf.mxu1  ;;  %v1103_v61 = vmax.f32 %v809_v46, 0.0  ;;  %v1167_v63 = vmax.f32 %v1001_v16, 0.0 }
 0x1dd   : > { %v1104_v0 = vmax.f32 %v811_v55, 0.0  ;;  %v1168_v1 = vmax.f32 %v1003_v56, 0.0  ;;  %1595 = vst.msk [vmem:[%s2367_s22 + $0xa8] sm:$0xff] %vm2369_vm3, %v1893_v57  ;;  %1627 = vst.msk [vmem:[%s2367_s22 + $0x1a8] sm:$0xff] %vm2369_vm3, %v1925_v58  ;;  %v815_v2 = vadd.f32 %v814_v59, %v2356_v47  ;;  %v1007_v3 = vadd.f32 %v1006_v60, %v2356_v47 }
 0x1de   : > { %v816_v4 = vpop.f32.mrf.mxu0  ;;  %v1008_v5 = vpop.f32.mrf.mxu1 }
 0x1df   : > { %v1894_v6 = vpack.c.bf16 %v1104_v0, %v1103_v61  ;;  %v1926_v7 = vpack.c.bf16 %v1168_v1, %v1167_v63  ;;  %v817_v8 = vadd.f32 %v816_v4, %v2358_v48  ;;  %v1009_v9 = vadd.f32 %v1008_v5, %v2358_v48 }
 0x1e0   : > { %v820_v10 = vpop.f32.mrf.mxu0  ;;  %v1012_v11 = vpop.f32.mrf.mxu1  ;;  %v1105_v14 = vmax.f32 %v815_v2, 0.0  ;;  %v1169_v15 = vmax.f32 %v1007_v3, 0.0 }
 0x1e1   : > { %1596 = vst.msk [vmem:[%s2367_s22 + $0xb0] sm:$0xff] %vm2369_vm3, %v1894_v6  ;;  %1628 = vst.msk [vmem:[%s2367_s22 + $0x1b0] sm:$0xff] %vm2369_vm3, %v1926_v7  ;;  %v821_v12 = vadd.f32 %v820_v10, %v2356_v47  ;;  %v1013_v13 = vadd.f32 %v1012_v11, %v2356_v47  ;;  %v1106_v17 = vmax.f32 %v817_v8, 0.0  ;;  %v1170_v18 = vmax.f32 %v1009_v9, 0.0 }
 0x1e2   : > { %v822_v19 = vpop.f32.mrf.mxu0  ;;  %v1014_v20 = vpop.f32.mrf.mxu1 }
 0x1e3   : > { %v823_v21 = vadd.f32 %v822_v19, %v2358_v48  ;;  %v1015_v22 = vadd.f32 %v1014_v20, %v2358_v48  ;;  %v1895_v23 = vpack.c.bf16 %v1106_v17, %v1105_v14  ;;  %v1927_v24 = vpack.c.bf16 %v1170_v18, %v1169_v15 }
 0x1e4   : > { %v826_v25 = vpop.f32.mrf.mxu0  ;;  %v1018_v26 = vpop.f32.mrf.mxu1  ;;  %v1107_v27 = vmax.f32 %v821_v12, 0.0  ;;  %v1171_v28 = vmax.f32 %v1013_v13, 0.0 }
 0x1e5   : > { %v1108_v29 = vmax.f32 %v823_v21, 0.0  ;;  %v1172_v30 = vmax.f32 %v1015_v22, 0.0  ;;  %1597 = vst.msk [vmem:[%s2367_s22 + $0xb8] sm:$0xff] %vm2369_vm3, %v1895_v23  ;;  %1629 = vst.msk [vmem:[%s2367_s22 + $0x1b8] sm:$0xff] %vm2369_vm3, %v1927_v24  ;;  %v827_v31 = vadd.f32 %v826_v25, %v2356_v47  ;;  %v1019_v32 = vadd.f32 %v1018_v26, %v2356_v47 }
 0x1e6   : > { %v828_v33 = vpop.f32.mrf.mxu0  ;;  %v1020_v34 = vpop.f32.mrf.mxu1 }
 0x1e7   : > { %v1896_v35 = vpack.c.bf16 %v1108_v29, %v1107_v27  ;;  %v1928_v36 = vpack.c.bf16 %v1172_v30, %v1171_v28  ;;  %v829_v37 = vadd.f32 %v828_v33, %v2358_v48  ;;  %v1021_v38 = vadd.f32 %v1020_v34, %v2358_v48 }
 0x1e8   : > { %v832_v39 = vpop.f32.mrf.mxu0  ;;  %v1024_v40 = vpop.f32.mrf.mxu1  ;;  %v1109_v43 = vmax.f32 %v827_v31, 0.0  ;;  %v1173_v44 = vmax.f32 %v1019_v32, 0.0 }
 0x1e9   : > { %1598 = vst.msk [vmem:[%s2367_s22 + $0xc0] sm:$0xff] %vm2369_vm3, %v1896_v35  ;;  %1630 = vst.msk [vmem:[%s2367_s22 + $0x1c0] sm:$0xff] %vm2369_vm3, %v1928_v36  ;;  %v833_v41 = vadd.f32 %v832_v39, %v2356_v47  ;;  %v1025_v42 = vadd.f32 %v1024_v40, %v2356_v47  ;;  %v1110_v45 = vmax.f32 %v829_v37, 0.0  ;;  %v1174_v46 = vmax.f32 %v1021_v38, 0.0 }
 0x1ea   : > { %v834_v16 = vpop.f32.mrf.mxu0  ;;  %v1026_v49 = vpop.f32.mrf.mxu1 }
 0x1eb   : > { %v835_v50 = vadd.f32 %v834_v16, %v2358_v48  ;;  %v1027_v51 = vadd.f32 %v1026_v49, %v2358_v48  ;;  %v1897_v52 = vpack.c.bf16 %v1110_v45, %v1109_v43  ;;  %v1929_v53 = vpack.c.bf16 %v1174_v46, %v1173_v44 }
 0x1ec   : > { %v838_v54 = vpop.f32.mrf.mxu0  ;;  %v1030_v55 = vpop.f32.mrf.mxu1  ;;  %v1111_v56 = vmax.f32 %v833_v41, 0.0  ;;  %v1175_v57 = vmax.f32 %v1025_v42, 0.0 }
 0x1ed   : > { %v1112_v58 = vmax.f32 %v835_v50, 0.0  ;;  %v1176_v59 = vmax.f32 %v1027_v51, 0.0  ;;  %1599 = vst.msk [vmem:[%s2367_s22 + $0xc8] sm:$0xff] %vm2369_vm3, %v1897_v52  ;;  %1631 = vst.msk [vmem:[%s2367_s22 + $0x1c8] sm:$0xff] %vm2369_vm3, %v1929_v53  ;;  %v839_v60 = vadd.f32 %v838_v54, %v2356_v47  ;;  %v1031_v61 = vadd.f32 %v1030_v55, %v2356_v47 }
 0x1ee   : > { %v840_v63 = vpop.f32.mrf.mxu0  ;;  %v1032_v0 = vpop.f32.mrf.mxu1 }
 0x1ef   : > { %v1898_v1 = vpack.c.bf16 %v1112_v58, %v1111_v56  ;;  %v1930_v2 = vpack.c.bf16 %v1176_v59, %v1175_v57  ;;  %v841_v3 = vadd.f32 %v840_v63, %v2358_v48  ;;  %v1033_v4 = vadd.f32 %v1032_v0, %v2358_v48 }
 0x1f0   : > { %v844_v5 = vpop.f32.mrf.mxu0  ;;  %v1036_v6 = vpop.f32.mrf.mxu1  ;;  %v1113_v9 = vmax.f32 %v839_v60, 0.0  ;;  %v1177_v10 = vmax.f32 %v1031_v61, 0.0 }
 0x1f1   : > { %1600 = vst.msk [vmem:[%s2367_s22 + $0xd0] sm:$0xff] %vm2369_vm3, %v1898_v1  ;;  %1632 = vst.msk [vmem:[%s2367_s22 + $0x1d0] sm:$0xff] %vm2369_vm3, %v1930_v2  ;;  %v845_v7 = vadd.f32 %v844_v5, %v2356_v47  ;;  %v1037_v8 = vadd.f32 %v1036_v6, %v2356_v47  ;;  %v1114_v11 = vmax.f32 %v841_v3, 0.0  ;;  %v1178_v12 = vmax.f32 %v1033_v4, 0.0 }
 0x1f2   : > { %v846_v13 = vpop.f32.mrf.mxu0  ;;  %v1038_v14 = vpop.f32.mrf.mxu1 }
 0x1f3   : > { %v847_v15 = vadd.f32 %v846_v13, %v2358_v48  ;;  %v1039_v17 = vadd.f32 %v1038_v14, %v2358_v48  ;;  %v1899_v18 = vpack.c.bf16 %v1114_v11, %v1113_v9  ;;  %v1931_v19 = vpack.c.bf16 %v1178_v12, %v1177_v10 }
 0x1f4   : > { %v850_v20 = vpop.f32.mrf.mxu0  ;;  %v1042_v21 = vpop.f32.mrf.mxu1  ;;  %v1115_v22 = vmax.f32 %v845_v7, 0.0  ;;  %v1179_v23 = vmax.f32 %v1037_v8, 0.0 }
 0x1f5   : > { %v1116_v24 = vmax.f32 %v847_v15, 0.0  ;;  %v1180_v25 = vmax.f32 %v1039_v17, 0.0  ;;  %1601 = vst.msk [vmem:[%s2367_s22 + $0xd8] sm:$0xff] %vm2369_vm3, %v1899_v18  ;;  %1633 = vst.msk [vmem:[%s2367_s22 + $0x1d8] sm:$0xff] %vm2369_vm3, %v1931_v19  ;;  %v851_v26 = vadd.f32 %v850_v20, %v2356_v47  ;;  %v1043_v27 = vadd.f32 %v1042_v21, %v2356_v47 }
 0x1f6   : > { %v852_v28 = vpop.f32.mrf.mxu0  ;;  %v1044_v29 = vpop.f32.mrf.mxu1 }
 0x1f7   : > { %v1900_v30 = vpack.c.bf16 %v1116_v24, %v1115_v22  ;;  %v1932_v31 = vpack.c.bf16 %v1180_v25, %v1179_v23  ;;  %v853_v32 = vadd.f32 %v852_v28, %v2358_v48  ;;  %v1045_v33 = vadd.f32 %v1044_v29, %v2358_v48 }
 0x1f8   : > { %v856_v34 = vpop.f32.mrf.mxu0  ;;  %v1048_v35 = vpop.f32.mrf.mxu1  ;;  %v1117_v38 = vmax.f32 %v851_v26, 0.0  ;;  %v1181_v39 = vmax.f32 %v1043_v27, 0.0 }
 0x1f9   : > { %1602 = vst.msk [vmem:[%s2367_s22 + $0xe0] sm:$0xff] %vm2369_vm3, %v1900_v30  ;;  %1634 = vst.msk [vmem:[%s2367_s22 + $0x1e0] sm:$0xff] %vm2369_vm3, %v1932_v31  ;;  %v857_v36 = vadd.f32 %v856_v34, %v2356_v47  ;;  %v1049_v37 = vadd.f32 %v1048_v35, %v2356_v47  ;;  %v1118_v40 = vmax.f32 %v853_v32, 0.0  ;;  %v1182_v41 = vmax.f32 %v1045_v33, 0.0 }
 0x1fa   : > { %v858_v42 = vpop.f32.mrf.mxu0  ;;  %v1050_v43 = vpop.f32.mrf.mxu1 }
 0x1fb   : > { %v859_v44 = vadd.f32 %v858_v42, %v2358_v48  ;;  %v1051_v45 = vadd.f32 %v1050_v43, %v2358_v48  ;;  %v1901_v46 = vpack.c.bf16 %v1118_v40, %v1117_v38  ;;  %v1933_v16 = vpack.c.bf16 %v1182_v41, %v1181_v39 }
 0x1fc   : > { %v862_v49 = vpop.f32.mrf.mxu0  ;;  %v1054_v50 = vpop.f32.mrf.mxu1  ;;  %v1119_v51 = vmax.f32 %v857_v36, 0.0  ;;  %v1183_v52 = vmax.f32 %v1049_v37, 0.0 }
 0x1fd   : > { %v1120_v53 = vmax.f32 %v859_v44, 0.0  ;;  %v1184_v54 = vmax.f32 %v1051_v45, 0.0  ;;  %1603 = vst.msk [vmem:[%s2367_s22 + $0xe8] sm:$0xff] %vm2369_vm3, %v1901_v46  ;;  %1635 = vst.msk [vmem:[%s2367_s22 + $0x1e8] sm:$0xff] %vm2369_vm3, %v1933_v16  ;;  %v863_v55 = vadd.f32 %v862_v49, %v2356_v47  ;;  %v1055_v56 = vadd.f32 %v1054_v50, %v2356_v47 }
 0x1fe   : > { %v864_v57 = vpop.f32.mrf.mxu0  ;;  %v1056_v58 = vpop.f32.mrf.mxu1 }
 0x1ff   : > { %v1902_v59 = vpack.c.bf16 %v1120_v53, %v1119_v51  ;;  %v1934_v60 = vpack.c.bf16 %v1184_v54, %v1183_v52  ;;  %v865_v61 = vadd.f32 %v864_v57, %v2358_v48  ;;  %v1057_v63 = vadd.f32 %v1056_v58, %v2358_v48 }
 0x200   : > { %v1121_v0 = vmax.f32 %v863_v55, 0.0  ;;  %v1185_v1 = vmax.f32 %v1055_v56, 0.0 }
 0x201   : > { %1604 = vst.msk [vmem:[%s2367_s22 + $0xf0] sm:$0xff] %vm2369_vm3, %v1902_v59  ;;  %1636 = vst.msk [vmem:[%s2367_s22 + $0x1f0] sm:$0xff] %vm2369_vm3, %v1934_v60  ;;  %v1122_v2 = vmax.f32 %v865_v61, 0.0  ;;  %v1186_v3 = vmax.f32 %v1057_v63, 0.0 }
 0x203   : > { %v1903_v47 = vpack.c.bf16 %v1122_v2, %v1121_v0  ;;  %v1935_v4 = vpack.c.bf16 %v1186_v3, %v1185_v1 }
 0x205   : > { %1605 = vst.msk [vmem:[%s2367_s22 + $0xf8] sm:$0xff] %vm2369_vm3, %v1903_v47  ;;  %1637 = vst.msk [vmem:[%s2367_s22 + $0x1f8] sm:$0xff] %vm2369_vm3, %v1935_v4 }
 0x206 PF: > { %p12_p7 = scmp.ge.s32.totalorder %s2118_s16, 6   ;;  %s2712_s12 = smov %s2070_s13 }
 0x207   : > { %s2713_s13 = smov %s2128_s19  ;;  %s2714_s14 = smov %s2118_s16 }
 0x208   :  { %14 = sbr.rel (!%p12_p7) target bundleno = 3 (0x3), region = 99 }
 0x20d   :  { %1662 = vsyncpa [#allocation4], 1 }
 0x20e   :  { %1664 = vsyncpa [#allocation4 + $0x1], 1 }
 0x20f   :  { %1665 = vsyncpa [#allocation6], 1 }

// kernel: conve_forward.4
= control target key start
LH: loop header
LB: loop body
LE: loop exit
PB: predicated region body
PF: predicated region fallthrough
CT: control target
= control target key end

     0   :  { %8 = vsyncpa [#allocation3], 0  ;;  %s15869_s0 = inlined_call_operand.vmem [shape: bf16[8,51200], index: 0, kind: input, shape index: {}]   ;;  %s15870_s1 = inlined_call_operand.hbm [shape: bf16[200,51200], index: 1, kind: input, shape index: {}]   ;;  %s15871_s2 = inlined_call_operand.hbm [shape: f32[2,200], index: 2, kind: input, shape index: {}]   ;;  %s15872_s3 = inlined_call_operand.vmem [shape: f32[8,200], index: 3, kind: output, shape index: {}]  }
   0x1   :  { %10 = vsyncpa [#allocation3 + $0x1], 0 }
   0x2   :  { %11 = vsyncpa [#allocation5], 0  ;;  %s13966_s12 = smov 0   ;;  %s13968_s13 = smov 0  }
   0x3   :  { %s13970_s14 = smov 0   ;;  %s13972_s15 = smov 0  }
   0x4 LB: > { %s13985_s16 = sadd.s32 4294967295, %s13938_s15   ;;  %s13988_s17 = sadd.s32 1, %s13938_s15   ;;  %s13938_s15 = sphi %s13972_s15, %s15889_s15   ;;  %s13934_s14 = sphi %s13970_s14, %s15888_s14   ;;  %s13930_s13 = sphi %s13968_s13, %s15887_s13   ;;  %s13926_s12 = sphi %s13966_s12, %s15886_s12  }
   0x5   : > { %s47_s18 = ssub.s32 %s13938_s15, %s13988_s17  ;;  %s50_s19 = sadd.s32 1, %s13934_s14 }
   0x6   : > { %p48_p0 = scmp.eq.s32.totalorder %s47_s18, 0  ;;  %p57_p1 = scmp.ne.s32.totalorder %s13934_s14, %s13930_s13 }
   0x7   : > { %p58_p2 = scmp.eq.s32.totalorder %s13938_s15, 0  ;;  %p63_p3 = scmp.ne.s32.totalorder %s13930_s13, %s13926_s12 }
   0x8   : > { %s13998_s20 = scalar_select %p48_p0, %s13934_s14, %s50_s19  }
   0x9   : > { %p14000_p4 = por %p58_p2, %p57_p1  ;;  %p15873_p5 = scmp.eq.s32.totalorder %s13985_s16, 0 }
   0xa   : > { %p10378_p6 = scmp.ge.s32.totalorder %s13938_s15, 1  ;;  %p116_p7 = scmp.lt.s32.totalorder %s13938_s15, 5 }
   0xb   : > { %p14009_p8 = por %p15873_p5, %p63_p3  ;;  %s13940_s24 = smov [#allocation4]  }
   0xc   : > { %p14014_p10 = pnand %p10378_p6, %p116_p7  ;;  %s129_s25 = sshll.u32 %s13940_s24, 4  ;;  %s130_s25 = int_to_ptr.vmem [resolvable:$true] %s129_s25 }
   0xd   : > { %s15877_s22 = scalar_select %p14009_p8, 1, 0 }
   0xe   : > { %s15878_s23 = scalar_select %p14014_p10, 1, 0 }
   0xf   : > { %p11798_p11 = pneg %p14014_p10  ;;  %p11807_p12 = scmp.lt.s32.totalorder %s13938_s15, 4 }
  0x10   : > { %s149_s26 = sand.u32 1, %s13934_s14   ;;  %s11789_s30 = smul.u32 6400, %s13938_s15 }
  0x11   : > { %p14024_p13 = pnand %p11798_p11, %p15873_p5  ;;  %p14030_p0 = pnand %p11807_p12, %p14000_p4 }
  0x12   : > { %s11790_s29 = smul.u32 10000, %s149_s26  ;;  %s13857_s4 = scalar_lea.vmem %s130_s25, 64 }
  0x13   : > { %p13848_p1 = pneg %p14024_p13  ;;  %p13858_p2 = scmp.ne.s32.totalorder %s130_s25, %s13857_s4 }
  0x14   : > { %p13865_p7 = scmp.lt.s32.totalorder %s130_s25, %s130_s25  ;;  %p13866_p9 = scmp.lt.s32.totalorder %s13857_s4, %s13857_s4 }
  0x15   : > { %p13860_p3 = pnand %p13858_p2, %p13848_p1 }
  0x16   : > { %p13867_p11 = por %p13866_p9, %p13865_p7 }
  0x17   : > { %p13861_p6 = pneg %p13860_p3 }
  0x19   : > { %p13868_p5 = pnand %p13867_p11, %p13861_p6 }
  0x1b   : > { %13871 = shalt.err (!%p13868_p5)
}
  0x1c   : > { %11801 = dma.hbm_to_vmem [thread:$0]  (!%p14024_p13), %s15871_s2, 64, %s130_s25, [#allocation5]  }
  0x1d   : > { %s14045_s9 = scalar_lea.hbm %s15870_s1, %s11789_s30  ;;  %s153_s10 = scalar_lea.vmem [#allocation2], %s11790_s29 }
  0x1e   : > { %s160_s11 = sshll.u32 %s153_s10, 4  ;;  %s14049_s12 = scalar_lea.sflag [#allocation3], %s149_s26  ;;  %s14047_s11 = int_to_ptr.vmem [resolvable:$true] %s160_s11 }
  0x1f   : > { %s13872_s15 = scalar_lea.hbm %s14045_s9, 160000  ;;  %p13874_p5 = pneg %p14030_p0 }
  0x20   : > { %p13873_p4 = scmp.ne.s32.totalorder %s14045_s9, %s13872_s15  ;;  %s13877_s21 = scalar_lea.hbm %s15870_s1, 640000 }
  0x21   : > { %p13878_p13 = scmp.lt.s32.totalorder %s14045_s9, %s15870_s1  ;;  %p13879_p1 = scmp.lt.s32.totalorder %s13877_s21, %s13872_s15 }
  0x22   : > { %p13875_p9 = pnand %p13874_p5, %p13873_p4 }
  0x23   : > { %p13880_p2 = por %p13879_p1, %p13878_p13 }
  0x24   : > { %p13876_p12 = pneg %p13875_p9 }
  0x26   : > { %p13881_p3 = pnand %p13880_p2, %p13876_p12 }
  0x28   : > { %13884 = shalt.err (!%p13881_p3)
}
  0x29   : > { %s13885_s26 = scalar_lea.vmem %s14047_s11, 160000  ;;  %s13941_s27 = smov [#allocation2]  }
  0x2a   : > { %p13886_p6 = scmp.ne.s32.totalorder %s14047_s11, %s13885_s26  ;;  %s13890_s29 = sshll.u32 %s13941_s27, 4  ;;  %s13891_s29 = int_to_ptr.vmem [resolvable:$false] %s13890_s29 }
  0x2b   : > { %s13892_s30 = scalar_lea.vmem %s13891_s29, 320000  ;;  %p13893_p4 = scmp.lt.s32.totalorder %s14047_s11, %s13891_s29 }
  0x2c   : > { %p13888_p7 = pnand %p13886_p6, %p13874_p5  ;;  %p13894_p9 = scmp.lt.s32.totalorder %s13892_s30, %s13885_s26 }
  0x2e   : > { %p13889_p11 = pneg %p13888_p7  ;;  %p13895_p8 = por %p13894_p9, %p13893_p4 }
  0x30   : > { %p13896_p10 = pnand %p13895_p8, %p13889_p11 }
  0x32   : > { %13899 = shalt.err (!%p13896_p10)
}
  0x33   : > { %s13942_s4 = smov 25600   ;;  %s13943_s5 = smov 6400  }
  0x34   : > { %s13944_s6 = smov 400   ;;  %p15881_p5 = scmp.ne.s32.totalorder %s15878_s23, 0 }
  0x35   : > { %11805 = dma.hbm_to_vmem [thread:$0]  (!%p14030_p0), %s14045_s9, 160000, %s14047_s11, %s14049_s12, %s13942_s4, %s13943_s5, %s13944_s6  }
  0x36   : > { %172 = sbr.rel (%p15881_p5) target bundleno = 2890 (0xb4a), region = 32  ;;  %s174_s7 = sand.u32 (!%p15881_p5), 1, %s13930_s13  }
  0x37   : > { %s11791_s8 = smul.u32 (!%p15881_p5), 10000, %s174_s7  ;;  %s175_s10 = scalar_lea.sflag (!%p15881_p5), [#allocation3], %s174_s7 }
  0x38   : > { %p15882_p8 = scmp.ne.s32.totalorder (!%p15881_p5), %s15877_s22, 0 }
  0x39   : > { %s14073_s15 = scalar_lea.vmem (!%p15881_p5), [#allocation2], %s11791_s8 }
  0x3b   : > { %13917 = dma.done.wait (%p15882_p8), %s175_s10, 160000  }
  0x3c   : > { %13919 = vsyncadd (%p15882_p8), %s175_s10, 4294807296  ;;  %p15883_p10 = scmp.eq.s32.totalorder %s13985_s16, 0 }
  0x3e   : > { %13921 = dma.done.wait (%p15883_p10), [#allocation5], 64   ;;  %p15884_p0 = pmov %p15883_p10 }
  0x3f   : > { %s205_s23 = smul.u32 100, %s13985_s16  ;;  %p15885_p13 = scmp.ne.s32.totalorder %s13985_s16, 0 }
  0x40   : > { %13923 = vsyncadd (%p15884_p0), [#allocation5], 4294967232 }
  0x41   : > { %p206_p12 = scmp.lt.s32.totalorder %s205_s23, 399  ;;  %216 = sbr.rel (%p15885_p13) target bundleno = 72 (0x48), region = 44 }
  0x43   : > { %s15891_s23 = smov (!%p206_p12, %s205_s23), 399 }
  0x44   : > { %s10384_s28 = sshll.u32 %s15891_s23, 2 }
  0x45   : > { %s14087_s12 = scalar_lea.vmem %s15869_s0, %s10384_s28 }
  0x46   : > { %vm218_vm0 = vcmask 588800   ;;  %v13945_v0 = vmov 0.0  }
  0x47   : > { %217 = vst [vmem:[%s15872_s3] sm:$0xff] %v13945_v0  ;;  %219 = vst.msk [vmem:[%s15872_s3 + $0x8] sm:$0xff] %vm218_vm0, %v13945_v0 }
  0x48 PF: > { %v11846_v1 = vld [vmem:[%s14073_s15 + $0x15e4] ss:$400 sps:$4 sm:$0xff]   ;;  %v11848_v2 = vld [vmem:[%s14073_s15 + $0x15ec] ss:$400 sps:$4 sm:$0xff]   ;;  %v11850_v3 = vld [vmem:[%s14073_s15 + $0x15e0] ss:$400 sps:$4 sm:$0xff]  }
  0x49   : > { %8222 = vmatprep.subr.bf16.mxu0 %v11846_v1  ;;  %v11851_v4 = vld [vmem:[%s14073_s15 + $0x15e8] ss:$400 sps:$4 sm:$0xff]   ;;  %8263 = vmatprep.subr.bf16.mxu1 %v11848_v2  ;;  %v11852_v5 = vld [vmem:[%s14073_s15 + $0x12c4] ss:$400 sps:$4 sm:$0xff]   ;;  %v11854_v6 = vld [vmem:[%s14073_s15 + $0x12cc] ss:$400 sps:$4 sm:$0xff]  }
  0x4a   : > { %8223 = vmatpush1.bf16.xpose.msra.mxu0 %v11850_v3  ;;  %8264 = vmatpush1.bf16.xpose.msra.mxu1 %v11851_v4  ;;  %v11856_v7 = vld [vmem:[%s14073_s15 + $0x12c0] ss:$400 sps:$4 sm:$0xff]   ;;  %v11857_v8 = vld [vmem:[%s14073_s15 + $0x12c8] ss:$400 sps:$4 sm:$0xff]   ;;  %v11858_v9 = vld [vmem:[%s14073_s15 + $0xfa4] ss:$400 sps:$4 sm:$0xff]  }
  0x4b   : > { %8224 = vmatprep.subr.bf16.mxu0 %v11852_v5  ;;  %8265 = vmatprep.subr.bf16.mxu1 %v11854_v6  ;;  %v11860_v10 = vld [vmem:[%s14073_s15 + $0xfac] ss:$400 sps:$4 sm:$0xff]   ;;  %v11862_v11 = vld [vmem:[%s14073_s15 + $0xfa0] ss:$400 sps:$4 sm:$0xff]   ;;  %v11863_v12 = vld [vmem:[%s14073_s15 + $0xfa8] ss:$400 sps:$4 sm:$0xff]  }
  0x4c   : > { %v11864_v13 = vld [vmem:[%s14073_s15 + $0xc84] ss:$400 sps:$4 sm:$0xff]   ;;  %v11866_v14 = vld [vmem:[%s14073_s15 + $0xc8c] ss:$400 sps:$4 sm:$0xff]   ;;  %v11868_v15 = vld [vmem:[%s14073_s15 + $0xc80] ss:$400 sps:$4 sm:$0xff]  }
  0x4d   : > { %v11869_v16 = vld [vmem:[%s14073_s15 + $0xc88] ss:$400 sps:$4 sm:$0xff]   ;;  %v11870_v17 = vld [vmem:[%s14073_s15 + $0x964] ss:$400 sps:$4 sm:$0xff]   ;;  %v11872_v18 = vld [vmem:[%s14073_s15 + $0x96c] ss:$400 sps:$4 sm:$0xff]  }
  0x4e   : > { %v11874_v19 = vld [vmem:[%s14073_s15 + $0x960] ss:$400 sps:$4 sm:$0xff]   ;;  %v11875_v20 = vld [vmem:[%s14073_s15 + $0x968] ss:$400 sps:$4 sm:$0xff]   ;;  %v11876_v21 = vld [vmem:[%s14073_s15 + $0x644] ss:$400 sps:$4 sm:$0xff]  }
  0x4f   : > { %v11878_v22 = vld [vmem:[%s14073_s15 + $0x64c] ss:$400 sps:$4 sm:$0xff]   ;;  %v14120_v23 = vld [vmem:[%s14087_s12] sm:$0xff]  ;;  %v11881_v28 = vld [vmem:[%s14073_s15 + $0x648] ss:$400 sps:$4 sm:$0xff]   ;;  %vm10275_vm1 = vcmask 588800  }
  0x50   : > { %v10387_v24 = vcombine.high %v14120_v23, %v14120_v23  ;;  %v14125_v25 = vld [vmem:[%s14087_s12 + $0x8] sm:$0xff]  ;;  %v11880_v27 = vld [vmem:[%s14073_s15 + $0x640] ss:$400 sps:$4 sm:$0xff]   ;;  %v11882_v29 = vld [vmem:[%s14073_s15 + $0x324] ss:$400 sps:$4 sm:$0xff]   ;;  %v10386_v1 = vcombine.low %v14120_v23, %v14120_v23  ;;  %p11786_p1 = scmp.ne.s32.totalorder %s13985_s16, 3 }
  0x51   : > { %v10389_v26 = vcombine.high %v14125_v25, %v14125_v25  ;;  %v11884_v30 = vld [vmem:[%s14073_s15 + $0x32c] ss:$400 sps:$4 sm:$0xff]   ;;  %v11886_v31 = vld [vmem:[%s14073_s15 + $0x320] ss:$400 sps:$4 sm:$0xff]   ;;  %v11887_v32 = vld [vmem:[%s14073_s15 + $0x328] ss:$400 sps:$4 sm:$0xff]   ;;  %v10388_v2 = vcombine.low %v14125_v25, %v14125_v25 }
  0x52   : > { %8225 = vmatpush1.bf16.xpose.msra.mxu0 %v11856_v7  ;;  %8266 = vmatpush1.bf16.xpose.msra.mxu1 %v11857_v8  ;;  %v11888_v33 = vld [vmem:[%s14073_s15 + $0x4] ss:$400 sps:$4 sm:$0xff]   ;;  %v11890_v34 = vld [vmem:[%s14073_s15 + $0xc] ss:$400 sps:$4 sm:$0xff]   ;;  %v11892_v37 = vld [vmem:[%s14073_s15] ss:$400 sps:$4 sm:$0xff]  }
  0x53   : > { %8226 = vmatprep.subr.bf16.mxu0 %v11858_v9  ;;  %8267 = vmatprep.subr.bf16.mxu1 %v11860_v10  ;;  %v1472_v35 = vld [vmem:[%s14073_s15 + $0x2580] sm:$0xff]  ;;  %v1473_v36 = vld [vmem:[%s14073_s15 + $0x2588] sm:$0xff] }
  0x54   : > { %8254 = vmatprep.mubr.bf16.mxu0 %v10387_v24  ;;  %8295 = vmatprep.mubr.bf16.mxu1 %v10389_v26  ;;  %v11893_v38 = vld [vmem:[%s14073_s15 + $0x8] ss:$400 sps:$4 sm:$0xff]   ;;  %v11687_v39 = vcombine.high %v1472_v35, %v1472_v35  ;;  %v11689_v40 = vcombine.high %v1473_v36, %v1473_v36  ;;  %v11898_v41 = vld [vmem:[%s14073_s15 + $0x2264] ss:$400 sps:$4 sm:$0xff]   ;;  %v11900_v42 = vld [vmem:[%s14073_s15 + $0x226c] ss:$400 sps:$4 sm:$0xff]   ;;  %v11686_v43 = vcombine.low %v1472_v35, %v1472_v35 }
  0x55   : > { %v11688_v44 = vcombine.low %v1473_v36, %v1473_v36  ;;  %v11902_v45 = vld [vmem:[%s14073_s15 + $0x2260] ss:$400 sps:$4 sm:$0xff]   ;;  %v11903_v46 = vld [vmem:[%s14073_s15 + $0x2268] ss:$400 sps:$4 sm:$0xff]   ;;  %v11904_v47 = vld [vmem:[%s14073_s15 + $0x1f44] ss:$400 sps:$4 sm:$0xff]  }
  0x56   : > { %v11906_v48 = vld [vmem:[%s14073_s15 + $0x1f4c] ss:$400 sps:$4 sm:$0xff]   ;;  %v11908_v49 = vld [vmem:[%s14073_s15 + $0x1f40] ss:$400 sps:$4 sm:$0xff]   ;;  %v11909_v50 = vld [vmem:[%s14073_s15 + $0x1f48] ss:$400 sps:$4 sm:$0xff]  }
  0x57   : > { %v11910_v51 = vld [vmem:[%s14073_s15 + $0x1c24] ss:$400 sps:$4 sm:$0xff]   ;;  %v11912_v52 = vld [vmem:[%s14073_s15 + $0x1c2c] ss:$400 sps:$4 sm:$0xff]   ;;  %v11914_v53 = vld [vmem:[%s14073_s15 + $0x1c20] ss:$400 sps:$4 sm:$0xff]  }
  0x58   : > { %v11915_v54 = vld [vmem:[%s14073_s15 + $0x1c28] ss:$400 sps:$4 sm:$0xff]   ;;  %v11916_v55 = vld [vmem:[%s14073_s15 + $0x1904] ss:$400 sps:$4 sm:$0xff]   ;;  %v11918_v56 = vld [vmem:[%s14073_s15 + $0x190c] ss:$400 sps:$4 sm:$0xff]  }
  0x59   : > { %v11920_v57 = vld [vmem:[%s14073_s15 + $0x1900] ss:$400 sps:$4 sm:$0xff]   ;;  %v11921_v58 = vld [vmem:[%s14073_s15 + $0x1908] ss:$400 sps:$4 sm:$0xff]   ;;  %v11928_v59 = vld [vmem:[%s14073_s15 + $0x15f4] ss:$400 sps:$4 sm:$0xff]  }
  0x5a   : > { %8227 = vmatpush1.bf16.xpose.msra.mxu0 %v11862_v11  ;;  %8268 = vmatpush1.bf16.xpose.msra.mxu1 %v11863_v12  ;;  %v11931_v60 = vld [vmem:[%s14073_s15 + $0x15fc] ss:$400 sps:$4 sm:$0xff]   ;;  %v14160_v61 = vld [vmem:[%s14087_s12 + $0x10] sm:$0xff]  ;;  %v11929_v0 = vld [vmem:[%s14073_s15 + $0x15f8] ss:$400 sps:$4 sm:$0xff]  }
  0x5b   : > { %8228 = vmatprep.subr.bf16.mxu0 %v11864_v13  ;;  %8269 = vmatprep.subr.bf16.mxu1 %v11866_v14  ;;  %v14163_v62 = vld [vmem:[%s14087_s12 + $0x18] sm:$0xff]  ;;  %v11926_v63 = vld [vmem:[%s14073_s15 + $0x15f0] ss:$400 sps:$4 sm:$0xff]   ;;  %v11934_v3 = vld [vmem:[%s14073_s15 + $0x12d4] ss:$400 sps:$4 sm:$0xff]   ;;  %v10391_v5 = vcombine.high %v14160_v61, %v14160_v61 }
  0x5c   : > { %v11937_v4 = vld [vmem:[%s14073_s15 + $0x12dc] ss:$400 sps:$4 sm:$0xff]   ;;  %v10393_v6 = vcombine.high %v14163_v62, %v14163_v62  ;;  %v11932_v7 = vld [vmem:[%s14073_s15 + $0x12d0] ss:$400 sps:$4 sm:$0xff]   ;;  %v11935_v8 = vld [vmem:[%s14073_s15 + $0x12d8] ss:$400 sps:$4 sm:$0xff]  }
  0x5d   : > { %v11940_v9 = vld [vmem:[%s14073_s15 + $0xfb4] ss:$400 sps:$4 sm:$0xff]   ;;  %v11943_v10 = vld [vmem:[%s14073_s15 + $0xfbc] ss:$400 sps:$4 sm:$0xff]   ;;  %v11938_v11 = vld [vmem:[%s14073_s15 + $0xfb0] ss:$400 sps:$4 sm:$0xff]  }
  0x5e   : > { %v11941_v12 = vld [vmem:[%s14073_s15 + $0xfb8] ss:$400 sps:$4 sm:$0xff]   ;;  %v11946_v13 = vld [vmem:[%s14073_s15 + $0xc94] ss:$400 sps:$4 sm:$0xff]   ;;  %v11949_v14 = vld [vmem:[%s14073_s15 + $0xc9c] ss:$400 sps:$4 sm:$0xff]  }
  0x5f   : > { %v11956_v23 = vld [vmem:[%s14073_s15 + $0x650] ss:$400 sps:$4 sm:$0xff]   ;;  %v11959_v24 = vld [vmem:[%s14073_s15 + $0x658] ss:$400 sps:$4 sm:$0xff]   ;;  %v11964_v25 = vld [vmem:[%s14073_s15 + $0x334] ss:$400 sps:$4 sm:$0xff]  }
  0x60   : > { %v11967_v26 = vld [vmem:[%s14073_s15 + $0x33c] ss:$400 sps:$4 sm:$0xff]  }
  0x62   : > { %8229 = vmatpush1.bf16.xpose.msra.mxu0 %v11868_v15  ;;  %8270 = vmatpush1.bf16.xpose.msra.mxu1 %v11869_v16  ;;  %v11944_v15 = vld [vmem:[%s14073_s15 + $0xc90] ss:$400 sps:$4 sm:$0xff]   ;;  %v11947_v16 = vld [vmem:[%s14073_s15 + $0xc98] ss:$400 sps:$4 sm:$0xff]  }
  0x63   : > { %8230 = vmatprep.subr.bf16.mxu0 %v11870_v17  ;;  %8271 = vmatprep.subr.bf16.mxu1 %v11872_v18  ;;  %v11952_v17 = vld [vmem:[%s14073_s15 + $0x974] ss:$400 sps:$4 sm:$0xff]   ;;  %v11955_v18 = vld [vmem:[%s14073_s15 + $0x97c] ss:$400 sps:$4 sm:$0xff]  }
  0x6a   : > { %8231 = vmatpush1.bf16.xpose.msra.mxu0 %v11874_v19  ;;  %8272 = vmatpush1.bf16.xpose.msra.mxu1 %v11875_v20  ;;  %v11950_v19 = vld [vmem:[%s14073_s15 + $0x970] ss:$400 sps:$4 sm:$0xff]   ;;  %v11953_v20 = vld [vmem:[%s14073_s15 + $0x978] ss:$400 sps:$4 sm:$0xff]  }
  0x6b   : > { %8232 = vmatprep.subr.bf16.mxu0 %v11876_v21  ;;  %8273 = vmatprep.subr.bf16.mxu1 %v11878_v22  ;;  %v11958_v21 = vld [vmem:[%s14073_s15 + $0x654] ss:$400 sps:$4 sm:$0xff]   ;;  %v11961_v22 = vld [vmem:[%s14073_s15 + $0x65c] ss:$400 sps:$4 sm:$0xff]  }
  0x72   : > { %8233 = vmatpush1.bf16.xpose.msra.mxu0 %v11880_v27  ;;  %8274 = vmatpush1.bf16.xpose.msra.mxu1 %v11881_v28  ;;  %v11962_v27 = vld [vmem:[%s14073_s15 + $0x330] ss:$400 sps:$4 sm:$0xff]   ;;  %v11965_v28 = vld [vmem:[%s14073_s15 + $0x338] ss:$400 sps:$4 sm:$0xff]  }
  0x73   : > { %8234 = vmatprep.subr.bf16.mxu0 %v11882_v29  ;;  %8275 = vmatprep.subr.bf16.mxu1 %v11884_v30  ;;  %v11970_v29 = vld [vmem:[%s14073_s15 + $0x14] ss:$400 sps:$4 sm:$0xff]   ;;  %v11973_v30 = vld [vmem:[%s14073_s15 + $0x1c] ss:$400 sps:$4 sm:$0xff]  }
  0x7a   : > { %8235 = vmatpush1.bf16.xpose.msra.mxu0 %v11886_v31  ;;  %8276 = vmatpush1.bf16.xpose.msra.mxu1 %v11887_v32  ;;  %v1474_v31 = vld [vmem:[%s14073_s15 + $0x2590] sm:$0xff]  ;;  %v1475_v32 = vld [vmem:[%s14073_s15 + $0x2598] sm:$0xff] }
  0x7b   : > { %8236 = vmatprep.subr.bf16.mxu0 %v11888_v33  ;;  %8277 = vmatprep.subr.bf16.mxu1 %v11890_v34  ;;  %v11968_v33 = vld [vmem:[%s14073_s15 + $0x10] ss:$400 sps:$4 sm:$0xff]   ;;  %v11971_v34 = vld [vmem:[%s14073_s15 + $0x18] ss:$400 sps:$4 sm:$0xff]   ;;  %v11691_v35 = vcombine.high %v1474_v31, %v1474_v31  ;;  %v11693_v36 = vcombine.high %v1475_v32, %v1475_v32 }
  0x82   : > { %8237 = vmatpush1.bf16.xpose.msra.mxu0 %v11892_v37  ;;  %8278 = vmatpush1.bf16.xpose.msra.mxu1 %v11893_v38  ;;  %v11690_v37 = vcombine.low %v1474_v31, %v1474_v31  ;;  %v11692_v38 = vcombine.low %v1475_v32, %v1475_v32 }
  0x83   : > { %8244 = vmatprep.subr.bf16.mxu0 %v11687_v39  ;;  %8285 = vmatprep.subr.bf16.mxu1 %v11689_v40  ;;  %v11980_v39 = vld [vmem:[%s14073_s15 + $0x2274] ss:$400 sps:$4 sm:$0xff]   ;;  %v11983_v40 = vld [vmem:[%s14073_s15 + $0x227c] ss:$400 sps:$4 sm:$0xff]  }
  0x8a   : > { %8245 = vmatpush2.bf16.xpose.msra.mxu0 %v11686_v43  ;;  %8286 = vmatpush2.bf16.xpose.msra.mxu1 %v11688_v44  ;;  %v11986_v43 = vld [vmem:[%s14073_s15 + $0x1f54] ss:$400 sps:$4 sm:$0xff]   ;;  %v11989_v44 = vld [vmem:[%s14073_s15 + $0x1f5c] ss:$400 sps:$4 sm:$0xff]  }
  0x8b   : > { %8246 = vmatprep.subr.bf16.mxu0 %v11898_v41  ;;  %8287 = vmatprep.subr.bf16.mxu1 %v11900_v42  ;;  %v11978_v41 = vld [vmem:[%s14073_s15 + $0x2270] ss:$400 sps:$4 sm:$0xff]   ;;  %v11981_v42 = vld [vmem:[%s14073_s15 + $0x2278] ss:$400 sps:$4 sm:$0xff]  }
  0x92   : > { %8247 = vmatpush2.bf16.xpose.msra.mxu0 %v11902_v45  ;;  %8288 = vmatpush2.bf16.xpose.msra.mxu1 %v11903_v46  ;;  %v11984_v45 = vld [vmem:[%s14073_s15 + $0x1f50] ss:$400 sps:$4 sm:$0xff]   ;;  %v11987_v46 = vld [vmem:[%s14073_s15 + $0x1f58] ss:$400 sps:$4 sm:$0xff]  }
  0x93   : > { %8248 = vmatprep.subr.bf16.mxu0 %v11904_v47  ;;  %8289 = vmatprep.subr.bf16.mxu1 %v11906_v48  ;;  %v11992_v47 = vld [vmem:[%s14073_s15 + $0x1c34] ss:$400 sps:$4 sm:$0xff]   ;;  %v11995_v48 = vld [vmem:[%s14073_s15 + $0x1c3c] ss:$400 sps:$4 sm:$0xff]  }
  0x9a   : > { %8249 = vmatpush2.bf16.xpose.msra.mxu0 %v11908_v49  ;;  %8290 = vmatpush2.bf16.xpose.msra.mxu1 %v11909_v50  ;;  %v11990_v49 = vld [vmem:[%s14073_s15 + $0x1c30] ss:$400 sps:$4 sm:$0xff]   ;;  %v11993_v50 = vld [vmem:[%s14073_s15 + $0x1c38] ss:$400 sps:$4 sm:$0xff]  }
  0x9b   : > { %8250 = vmatprep.subr.bf16.mxu0 %v11910_v51  ;;  %8291 = vmatprep.subr.bf16.mxu1 %v11912_v52  ;;  %v11998_v51 = vld [vmem:[%s14073_s15 + $0x1914] ss:$400 sps:$4 sm:$0xff]   ;;  %v12001_v52 = vld [vmem:[%s14073_s15 + $0x191c] ss:$400 sps:$4 sm:$0xff]  }
  0xa2   : > { %8251 = vmatpush2.bf16.xpose.msra.mxu0 %v11914_v53  ;;  %8292 = vmatpush2.bf16.xpose.msra.mxu1 %v11915_v54  ;;  %v11996_v53 = vld [vmem:[%s14073_s15 + $0x1910] ss:$400 sps:$4 sm:$0xff]   ;;  %v11999_v54 = vld [vmem:[%s14073_s15 + $0x1918] ss:$400 sps:$4 sm:$0xff]  }
  0xa3   : > { %8252 = vmatprep.subr.bf16.mxu0 %v11916_v55  ;;  %8293 = vmatprep.subr.bf16.mxu1 %v11918_v56  ;;  %v12008_v55 = vld [vmem:[%s14073_s15 + $0x1604] ss:$400 sps:$4 sm:$0xff]   ;;  %v12011_v56 = vld [vmem:[%s14073_s15 + $0x160c] ss:$400 sps:$4 sm:$0xff]  }
  0xaa   : > { %8253 = vmatpush2.bf16.xpose.msra.mxu0 %v11920_v57  ;;  %8294 = vmatpush2.bf16.xpose.msra.mxu1 %v11921_v58  ;;  %v14224_v57 = vld [vmem:[%s14087_s12 + $0x20] sm:$0xff]  ;;  %v14227_v58 = vld [vmem:[%s14087_s12 + $0x28] sm:$0xff] }
  0xab   : > { %8304 = vmatprep.subr.bf16.mxu0 %v11928_v59  ;;  %8345 = vmatprep.subr.bf16.mxu1 %v11931_v60  ;;  %v12006_v59 = vld [vmem:[%s14073_s15 + $0x1600] ss:$400 sps:$4 sm:$0xff]   ;;  %v12009_v60 = vld [vmem:[%s14073_s15 + $0x1608] ss:$400 sps:$4 sm:$0xff]  }
  0xb1   : > { %8255 = vmatmul.mubr.bf16.vlgmr.msra.gmra.mxu0 %v10386_v1  ;;  %8296 = vmatmul.mubr.bf16.vlgmr.msra.gmra.mxu1 %v10388_v2  ;;  %v12014_v1 = vld [vmem:[%s14073_s15 + $0x12e4] ss:$400 sps:$4 sm:$0xff]   ;;  %v12017_v2 = vld [vmem:[%s14073_s15 + $0x12ec] ss:$400 sps:$4 sm:$0xff]  }
  0xb2   : > { %8305 = vmatpush1.bf16.xpose.msra.mxu0 %v11926_v63  ;;  %8346 = vmatpush1.bf16.xpose.msra.mxu1 %v11929_v0  ;;  %v10390_v63 = vcombine.low %v14160_v61, %v14160_v61  ;;  %v10392_v0 = vcombine.low %v14163_v62, %v14163_v62  ;;  %v12012_v61 = vld [vmem:[%s14073_s15 + $0x12e0] ss:$400 sps:$4 sm:$0xff]   ;;  %v12015_v62 = vld [vmem:[%s14073_s15 + $0x12e8] ss:$400 sps:$4 sm:$0xff]  }
  0xb3   : > { %8306 = vmatprep.subr.bf16.mxu0 %v11934_v3  ;;  %8347 = vmatprep.subr.bf16.mxu1 %v11937_v4  ;;  %v10395_v3 = vcombine.high %v14224_v57, %v14224_v57  ;;  %v10397_v4 = vcombine.high %v14227_v58, %v14227_v58 }
  0xb4   : > { %8336 = vmatprep.mubr.bf16.mxu0 %v10391_v5  ;;  %8377 = vmatprep.mubr.bf16.mxu1 %v10393_v6  ;;  %v12020_v5 = vld [vmem:[%s14073_s15 + $0xfc4] ss:$400 sps:$4 sm:$0xff]   ;;  %v12023_v6 = vld [vmem:[%s14073_s15 + $0xfcc] ss:$400 sps:$4 sm:$0xff]  }
  0xba   : > { %8307 = vmatpush1.bf16.xpose.msra.mxu0 %v11932_v7  ;;  %8348 = vmatpush1.bf16.xpose.msra.mxu1 %v11935_v8  ;;  %v12018_v7 = vld [vmem:[%s14073_s15 + $0xfc0] ss:$400 sps:$4 sm:$0xff]   ;;  %v12021_v8 = vld [vmem:[%s14073_s15 + $0xfc8] ss:$400 sps:$4 sm:$0xff]  }
  0xbb   : > { %8308 = vmatprep.subr.bf16.mxu0 %v11940_v9  ;;  %8349 = vmatprep.subr.bf16.mxu1 %v11943_v10  ;;  %v12026_v9 = vld [vmem:[%s14073_s15 + $0xca4] ss:$400 sps:$4 sm:$0xff]   ;;  %v12029_v10 = vld [vmem:[%s14073_s15 + $0xcac] ss:$400 sps:$4 sm:$0xff]  }
  0xc2   : > { %8309 = vmatpush1.bf16.xpose.msra.mxu0 %v11938_v11  ;;  %8350 = vmatpush1.bf16.xpose.msra.mxu1 %v11941_v12  ;;  %v12024_v11 = vld [vmem:[%s14073_s15 + $0xca0] ss:$400 sps:$4 sm:$0xff]   ;;  %v12027_v12 = vld [vmem:[%s14073_s15 + $0xca8] ss:$400 sps:$4 sm:$0xff]  }
  0xc3   : > { %8310 = vmatprep.subr.bf16.mxu0 %v11946_v13  ;;  %8351 = vmatprep.subr.bf16.mxu1 %v11949_v14  ;;  %v12032_v13 = vld [vmem:[%s14073_s15 + $0x984] ss:$400 sps:$4 sm:$0xff]   ;;  %v12035_v14 = vld [vmem:[%s14073_s15 + $0x98c] ss:$400 sps:$4 sm:$0xff]  }
  0xca   : > { %8311 = vmatpush1.bf16.xpose.msra.mxu0 %v11944_v15  ;;  %8352 = vmatpush1.bf16.xpose.msra.mxu1 %v11947_v16  ;;  %v12030_v15 = vld [vmem:[%s14073_s15 + $0x980] ss:$400 sps:$4 sm:$0xff]   ;;  %v12033_v16 = vld [vmem:[%s14073_s15 + $0x988] ss:$400 sps:$4 sm:$0xff]  }
  0xcb   : > { %8312 = vmatprep.subr.bf16.mxu0 %v11952_v17  ;;  %8353 = vmatprep.subr.bf16.mxu1 %v11955_v18  ;;  %v12038_v17 = vld [vmem:[%s14073_s15 + $0x664] ss:$400 sps:$4 sm:$0xff]   ;;  %v12041_v18 = vld [vmem:[%s14073_s15 + $0x66c] ss:$400 sps:$4 sm:$0xff]  }
  0xd2   : > { %8313 = vmatpush1.bf16.xpose.msra.mxu0 %v11950_v19  ;;  %8354 = vmatpush1.bf16.xpose.msra.mxu1 %v11953_v20  ;;  %v12036_v19 = vld [vmem:[%s14073_s15 + $0x660] ss:$400 sps:$4 sm:$0xff]   ;;  %v12039_v20 = vld [vmem:[%s14073_s15 + $0x668] ss:$400 sps:$4 sm:$0xff]  }
  0xd3   : > { %8314 = vmatprep.subr.bf16.mxu0 %v11958_v21  ;;  %8355 = vmatprep.subr.bf16.mxu1 %v11961_v22  ;;  %v12044_v21 = vld [vmem:[%s14073_s15 + $0x344] ss:$400 sps:$4 sm:$0xff]   ;;  %v12047_v22 = vld [vmem:[%s14073_s15 + $0x34c] ss:$400 sps:$4 sm:$0xff]  }
  0xda   : > { %8315 = vmatpush1.bf16.xpose.msra.mxu0 %v11956_v23  ;;  %8356 = vmatpush1.bf16.xpose.msra.mxu1 %v11959_v24  ;;  %v12042_v23 = vld [vmem:[%s14073_s15 + $0x340] ss:$400 sps:$4 sm:$0xff]   ;;  %v12045_v24 = vld [vmem:[%s14073_s15 + $0x348] ss:$400 sps:$4 sm:$0xff]  }
  0xdb   : > { %8316 = vmatprep.subr.bf16.mxu0 %v11964_v25  ;;  %8357 = vmatprep.subr.bf16.mxu1 %v11967_v26  ;;  %v12050_v25 = vld [vmem:[%s14073_s15 + $0x24] ss:$400 sps:$4 sm:$0xff]   ;;  %v12053_v26 = vld [vmem:[%s14073_s15 + $0x2c] ss:$400 sps:$4 sm:$0xff]  }
  0xe2   : > { %8317 = vmatpush1.bf16.xpose.msra.mxu0 %v11962_v27  ;;  %8358 = vmatpush1.bf16.xpose.msra.mxu1 %v11965_v28  ;;  %v1476_v27 = vld [vmem:[%s14073_s15 + $0x25a0] sm:$0xff]  ;;  %v1477_v28 = vld [vmem:[%s14073_s15 + $0x25a8] sm:$0xff] }
  0xe3   : > { %8318 = vmatprep.subr.bf16.mxu0 %v11970_v29  ;;  %8359 = vmatprep.subr.bf16.mxu1 %v11973_v30  ;;  %v12048_v29 = vld [vmem:[%s14073_s15 + $0x20] ss:$400 sps:$4 sm:$0xff]   ;;  %v12051_v30 = vld [vmem:[%s14073_s15 + $0x28] ss:$400 sps:$4 sm:$0xff]   ;;  %v11695_v31 = vcombine.high %v1476_v27, %v1476_v27  ;;  %v11697_v32 = vcombine.high %v1477_v28, %v1477_v28 }
  0xea   : > { %8319 = vmatpush1.bf16.xpose.msra.mxu0 %v11968_v33  ;;  %8360 = vmatpush1.bf16.xpose.msra.mxu1 %v11971_v34  ;;  %v11694_v33 = vcombine.low %v1476_v27, %v1476_v27  ;;  %v11696_v34 = vcombine.low %v1477_v28, %v1477_v28  ;;  %v12124_v27 = vld [vmem:[%s14073_s15 + $0x354] ss:$400 sps:$4 sm:$0xff]   ;;  %v12127_v28 = vld [vmem:[%s14073_s15 + $0x35c] ss:$400 sps:$4 sm:$0xff]  }
  0xeb   : > { %8326 = vmatprep.subr.bf16.mxu0 %v11691_v35  ;;  %8367 = vmatprep.subr.bf16.mxu1 %v11693_v36  ;;  %v12060_v35 = vld [vmem:[%s14073_s15 + $0x2284] ss:$400 sps:$4 sm:$0xff]   ;;  %v12063_v36 = vld [vmem:[%s14073_s15 + $0x228c] ss:$400 sps:$4 sm:$0xff]  }
  0xf2   : > { %8327 = vmatpush2.bf16.xpose.msra.mxu0 %v11690_v37  ;;  %8368 = vmatpush2.bf16.xpose.msra.mxu1 %v11692_v38  ;;  %v12058_v37 = vld [vmem:[%s14073_s15 + $0x2280] ss:$400 sps:$4 sm:$0xff]   ;;  %v12061_v38 = vld [vmem:[%s14073_s15 + $0x2288] ss:$400 sps:$4 sm:$0xff]  }
  0xf3   : > { %8328 = vmatprep.subr.bf16.mxu0 %v11980_v39  ;;  %8369 = vmatprep.subr.bf16.mxu1 %v11983_v40  ;;  %v12066_v39 = vld [vmem:[%s14073_s15 + $0x1f64] ss:$400 sps:$4 sm:$0xff]   ;;  %v12069_v40 = vld [vmem:[%s14073_s15 + $0x1f6c] ss:$400 sps:$4 sm:$0xff]  }
  0xfa   : > { %8329 = vmatpush2.bf16.xpose.msra.mxu0 %v11978_v41  ;;  %8370 = vmatpush2.bf16.xpose.msra.mxu1 %v11981_v42  ;;  %v12064_v41 = vld [vmem:[%s14073_s15 + $0x1f60] ss:$400 sps:$4 sm:$0xff]   ;;  %v12067_v42 = vld [vmem:[%s14073_s15 + $0x1f68] ss:$400 sps:$4 sm:$0xff]  }
  0xfb   : > { %8330 = vmatprep.subr.bf16.mxu0 %v11986_v43  ;;  %8371 = vmatprep.subr.bf16.mxu1 %v11989_v44  ;;  %v12072_v43 = vld [vmem:[%s14073_s15 + $0x1c44] ss:$400 sps:$4 sm:$0xff]   ;;  %v12075_v44 = vld [vmem:[%s14073_s15 + $0x1c4c] ss:$400 sps:$4 sm:$0xff]  }
 0x102   : > { %8331 = vmatpush2.bf16.xpose.msra.mxu0 %v11984_v45  ;;  %8372 = vmatpush2.bf16.xpose.msra.mxu1 %v11987_v46  ;;  %v12070_v45 = vld [vmem:[%s14073_s15 + $0x1c40] ss:$400 sps:$4 sm:$0xff]   ;;  %v12073_v46 = vld [vmem:[%s14073_s15 + $0x1c48] ss:$400 sps:$4 sm:$0xff]  }
 0x103   : > { %8332 = vmatprep.subr.bf16.mxu0 %v11992_v47  ;;  %8373 = vmatprep.subr.bf16.mxu1 %v11995_v48  ;;  %v12078_v47 = vld [vmem:[%s14073_s15 + $0x1924] ss:$400 sps:$4 sm:$0xff]   ;;  %v12081_v48 = vld [vmem:[%s14073_s15 + $0x192c] ss:$400 sps:$4 sm:$0xff]  }
 0x10a   : > { %8333 = vmatpush2.bf16.xpose.msra.mxu0 %v11990_v49  ;;  %8374 = vmatpush2.bf16.xpose.msra.mxu1 %v11993_v50 }
 0x10b   : > { %8334 = vmatprep.subr.bf16.mxu0 %v11998_v51  ;;  %8375 = vmatprep.subr.bf16.mxu1 %v12001_v52 }
 0x112   : > { %8335 = vmatpush2.bf16.xpose.msra.mxu0 %v11996_v53  ;;  %8376 = vmatpush2.bf16.xpose.msra.mxu1 %v11999_v54 }
 0x113   : > { %8386 = vmatprep.subr.bf16.mxu0 %v12008_v55  ;;  %8427 = vmatprep.subr.bf16.mxu1 %v12011_v56  ;;  %v12076_v55 = vld [vmem:[%s14073_s15 + $0x1920] ss:$400 sps:$4 sm:$0xff]   ;;  %v12079_v56 = vld [vmem:[%s14073_s15 + $0x1928] ss:$400 sps:$4 sm:$0xff]  }
 0x119   : > { %8337 = vmatmul.mubr.bf16.vlgmr.msra.gmra.mxu0 %v10390_v63  ;;  %8378 = vmatmul.mubr.bf16.vlgmr.msra.gmra.mxu1 %v10392_v0  ;;  %v12088_v63 = vld [vmem:[%s14073_s15 + $0x1614] ss:$400 sps:$4 sm:$0xff]   ;;  %v12091_v0 = vld [vmem:[%s14073_s15 + $0x161c] ss:$400 sps:$4 sm:$0xff]  }
 0x11a   : > { %8387 = vmatpush1.bf16.xpose.msra.mxu0 %v12006_v59  ;;  %8428 = vmatpush1.bf16.xpose.msra.mxu1 %v12009_v60 }
 0x11b   : > { %8388 = vmatprep.subr.bf16.mxu0 %v12014_v1  ;;  %8429 = vmatprep.subr.bf16.mxu1 %v12017_v2 }
 0x11c   : > { %8418 = vmatprep.mubr.bf16.mxu0 %v10395_v3  ;;  %8459 = vmatprep.mubr.bf16.mxu1 %v10397_v4  ;;  %v14292_v3 = vld [vmem:[%s14087_s12 + $0x30] sm:$0xff]  ;;  %v14295_v4 = vld [vmem:[%s14087_s12 + $0x38] sm:$0xff] }
 0x122   : > { %8389 = vmatpush1.bf16.xpose.msra.mxu0 %v12012_v61  ;;  %8430 = vmatpush1.bf16.xpose.msra.mxu1 %v12015_v62  ;;  %v12086_v61 = vld [vmem:[%s14073_s15 + $0x1610] ss:$400 sps:$4 sm:$0xff]   ;;  %v12089_v62 = vld [vmem:[%s14073_s15 + $0x1618] ss:$400 sps:$4 sm:$0xff]  }
 0x123   : > { %8390 = vmatprep.subr.bf16.mxu0 %v12020_v5  ;;  %8431 = vmatprep.subr.bf16.mxu1 %v12023_v6  ;;  %v10394_v5 = vcombine.low %v14224_v57, %v14224_v57  ;;  %v10396_v6 = vcombine.low %v14227_v58, %v14227_v58  ;;  %v12092_v57 = vld [vmem:[%s14073_s15 + $0x12f0] ss:$400 sps:$4 sm:$0xff]   ;;  %v12095_v58 = vld [vmem:[%s14073_s15 + $0x12f8] ss:$400 sps:$4 sm:$0xff]  }
 0x12a   : > { %8391 = vmatpush1.bf16.xpose.msra.mxu0 %v12018_v7  ;;  %8432 = vmatpush1.bf16.xpose.msra.mxu1 %v12021_v8  ;;  %v12094_v7 = vld [vmem:[%s14073_s15 + $0x12f4] ss:$400 sps:$4 sm:$0xff]   ;;  %v12097_v8 = vld [vmem:[%s14073_s15 + $0x12fc] ss:$400 sps:$4 sm:$0xff]  }
 0x12b   : > { %8392 = vmatprep.subr.bf16.mxu0 %v12026_v9  ;;  %8433 = vmatprep.subr.bf16.mxu1 %v12029_v10  ;;  %v10399_v9 = vcombine.high %v14292_v3, %v14292_v3  ;;  %v10401_v10 = vcombine.high %v14295_v4, %v14295_v4 }
 0x132   : > { %8393 = vmatpush1.bf16.xpose.msra.mxu0 %v12024_v11  ;;  %8434 = vmatpush1.bf16.xpose.msra.mxu1 %v12027_v12  ;;  %v12100_v11 = vld [vmem:[%s14073_s15 + $0xfd4] ss:$400 sps:$4 sm:$0xff]   ;;  %v12103_v12 = vld [vmem:[%s14073_s15 + $0xfdc] ss:$400 sps:$4 sm:$0xff]  }
 0x133   : > { %8394 = vmatprep.subr.bf16.mxu0 %v12032_v13  ;;  %8435 = vmatprep.subr.bf16.mxu1 %v12035_v14  ;;  %v12098_v13 = vld [vmem:[%s14073_s15 + $0xfd0] ss:$400 sps:$4 sm:$0xff]   ;;  %v12101_v14 = vld [vmem:[%s14073_s15 + $0xfd8] ss:$400 sps:$4 sm:$0xff]  }
 0x13a   : > { %8395 = vmatpush1.bf16.xpose.msra.mxu0 %v12030_v15  ;;  %8436 = vmatpush1.bf16.xpose.msra.mxu1 %v12033_v16  ;;  %v12106_v15 = vld [vmem:[%s14073_s15 + $0xcb4] ss:$400 sps:$4 sm:$0xff]   ;;  %v12109_v16 = vld [vmem:[%s14073_s15 + $0xcbc] ss:$400 sps:$4 sm:$0xff]  }
 0x13b   : > { %8396 = vmatprep.subr.bf16.mxu0 %v12038_v17  ;;  %8437 = vmatprep.subr.bf16.mxu1 %v12041_v18  ;;  %v12104_v17 = vld [vmem:[%s14073_s15 + $0xcb0] ss:$400 sps:$4 sm:$0xff]   ;;  %v12107_v18 = vld [vmem:[%s14073_s15 + $0xcb8] ss:$400 sps:$4 sm:$0xff]  }
 0x142   : > { %8397 = vmatpush1.bf16.xpose.msra.mxu0 %v12036_v19  ;;  %8438 = vmatpush1.bf16.xpose.msra.mxu1 %v12039_v20  ;;  %v12112_v19 = vld [vmem:[%s14073_s15 + $0x994] ss:$400 sps:$4 sm:$0xff]   ;;  %v12115_v20 = vld [vmem:[%s14073_s15 + $0x99c] ss:$400 sps:$4 sm:$0xff]  }
 0x143   : > { %8398 = vmatprep.subr.bf16.mxu0 %v12044_v21  ;;  %8439 = vmatprep.subr.bf16.mxu1 %v12047_v22  ;;  %v12110_v21 = vld [vmem:[%s14073_s15 + $0x990] ss:$400 sps:$4 sm:$0xff]   ;;  %v12113_v22 = vld [vmem:[%s14073_s15 + $0x998] ss:$400 sps:$4 sm:$0xff]  }
 0x14a   : > { %8399 = vmatpush1.bf16.xpose.msra.mxu0 %v12042_v23  ;;  %8440 = vmatpush1.bf16.xpose.msra.mxu1 %v12045_v24  ;;  %v12118_v23 = vld [vmem:[%s14073_s15 + $0x674] ss:$400 sps:$4 sm:$0xff]   ;;  %v12121_v24 = vld [vmem:[%s14073_s15 + $0x67c] ss:$400 sps:$4 sm:$0xff]  }
 0x14b   : > { %8400 = vmatprep.subr.bf16.mxu0 %v12050_v25  ;;  %8441 = vmatprep.subr.bf16.mxu1 %v12053_v26  ;;  %v12116_v25 = vld [vmem:[%s14073_s15 + $0x670] ss:$400 sps:$4 sm:$0xff]   ;;  %v12119_v26 = vld [vmem:[%s14073_s15 + $0x678] ss:$400 sps:$4 sm:$0xff]  }
 0x152   : > { %8401 = vmatpush1.bf16.xpose.msra.mxu0 %v12048_v29  ;;  %8442 = vmatpush1.bf16.xpose.msra.mxu1 %v12051_v30  ;;  %v12122_v29 = vld [vmem:[%s14073_s15 + $0x350] ss:$400 sps:$4 sm:$0xff]   ;;  %v12125_v30 = vld [vmem:[%s14073_s15 + $0x358] ss:$400 sps:$4 sm:$0xff]  }
 0x153   : > { %8408 = vmatprep.subr.bf16.mxu0 %v11695_v31  ;;  %8449 = vmatprep.subr.bf16.mxu1 %v11697_v32  ;;  %v12130_v31 = vld [vmem:[%s14073_s15 + $0x34] ss:$400 sps:$4 sm:$0xff]   ;;  %v12133_v32 = vld [vmem:[%s14073_s15 + $0x3c] ss:$400 sps:$4 sm:$0xff]  }
 0x15a   : > { %8409 = vmatpush2.bf16.xpose.msra.mxu0 %v11694_v33  ;;  %8450 = vmatpush2.bf16.xpose.msra.mxu1 %v11696_v34  ;;  %v1478_v33 = vld [vmem:[%s14073_s15 + $0x25b0] sm:$0xff]  ;;  %v1479_v34 = vld [vmem:[%s14073_s15 + $0x25b8] sm:$0xff] }
 0x15b   : > { %8410 = vmatprep.subr.bf16.mxu0 %v12060_v35  ;;  %8451 = vmatprep.subr.bf16.mxu1 %v12063_v36  ;;  %v12128_v35 = vld [vmem:[%s14073_s15 + $0x30] ss:$400 sps:$4 sm:$0xff]   ;;  %v12131_v36 = vld [vmem:[%s14073_s15 + $0x38] ss:$400 sps:$4 sm:$0xff]  }
 0x162   : > { %8411 = vmatpush2.bf16.xpose.msra.mxu0 %v12058_v37  ;;  %8452 = vmatpush2.bf16.xpose.msra.mxu1 %v12061_v38  ;;  %v11699_v37 = vcombine.high %v1478_v33, %v1478_v33  ;;  %v11701_v38 = vcombine.high %v1479_v34, %v1479_v34 }
 0x163   : > { %8412 = vmatprep.subr.bf16.mxu0 %v12066_v39  ;;  %8453 = vmatprep.subr.bf16.mxu1 %v12069_v40  ;;  %v11698_v39 = vcombine.low %v1478_v33, %v1478_v33  ;;  %v11700_v40 = vcombine.low %v1479_v34, %v1479_v34  ;;  %v12196_v33 = vld [vmem:[%s14073_s15 + $0x680] ss:$400 sps:$4 sm:$0xff]   ;;  %v12199_v34 = vld [vmem:[%s14073_s15 + $0x688] ss:$400 sps:$4 sm:$0xff]  }
 0x16a   : > { %8413 = vmatpush2.bf16.xpose.msra.mxu0 %v12064_v41  ;;  %8454 = vmatpush2.bf16.xpose.msra.mxu1 %v12067_v42  ;;  %v12140_v41 = vld [vmem:[%s14073_s15 + $0x2294] ss:$400 sps:$4 sm:$0xff]   ;;  %v12143_v42 = vld [vmem:[%s14073_s15 + $0x229c] ss:$400 sps:$4 sm:$0xff]  }
 0x16b   : > { %8414 = vmatprep.subr.bf16.mxu0 %v12072_v43  ;;  %8455 = vmatprep.subr.bf16.mxu1 %v12075_v44  ;;  %v12138_v43 = vld [vmem:[%s14073_s15 + $0x2290] ss:$400 sps:$4 sm:$0xff]   ;;  %v12141_v44 = vld [vmem:[%s14073_s15 + $0x2298] ss:$400 sps:$4 sm:$0xff]  }
 0x171   : > { %v8256_v49 = vpop.f32.mrf.mxu0  ;;  %v8297_v50 = vpop.f32.mrf.mxu1 }
 0x172   : > { %v14283_v51 = vadd.f32 %v8297_v50, %v8256_v49  ;;  %8415 = vmatpush2.bf16.xpose.msra.mxu0 %v12070_v45  ;;  %8456 = vmatpush2.bf16.xpose.msra.mxu1 %v12073_v46  ;;  %v12146_v45 = vld [vmem:[%s14073_s15 + $0x1f74] ss:$400 sps:$4 sm:$0xff]   ;;  %v12149_v46 = vld [vmem:[%s14073_s15 + $0x1f7c] ss:$400 sps:$4 sm:$0xff]  }
 0x173   : > { %v8258_v52 = vpop.f32.mrf.mxu0  ;;  %v8299_v53 = vpop.f32.mrf.mxu1  ;;  %8416 = vmatprep.subr.bf16.mxu0 %v12078_v47  ;;  %8457 = vmatprep.subr.bf16.mxu1 %v12081_v48  ;;  %v12144_v47 = vld [vmem:[%s14073_s15 + $0x1f70] ss:$400 sps:$4 sm:$0xff]   ;;  %v12147_v48 = vld [vmem:[%s14073_s15 + $0x1f78] ss:$400 sps:$4 sm:$0xff]   ;;  %v12152_v49 = vld [vmem:[%s14073_s15 + $0x1c54] ss:$400 sps:$4 sm:$0xff]  }
 0x174   : > { %v14285_v54 = vadd.f32 %v8299_v53, %v8258_v52  ;;  %v12155_v50 = vld [vmem:[%s14073_s15 + $0x1c5c] ss:$400 sps:$4 sm:$0xff]   ;;  %v12150_v52 = vld [vmem:[%s14073_s15 + $0x1c50] ss:$400 sps:$4 sm:$0xff]   ;;  %v12153_v53 = vld [vmem:[%s14073_s15 + $0x1c58] ss:$400 sps:$4 sm:$0xff]  }
 0x175   : > { %v8260_v59 = vpop.f32.mrf.mxu0  ;;  %v8301_v60 = vpop.f32.mrf.mxu1 }
 0x177   : > { %v8261_v1 = vpop.f32.mrf.mxu0  ;;  %v8302_v2 = vpop.f32.mrf.mxu1 }
 0x17a   : > { %8417 = vmatpush2.bf16.xpose.msra.mxu0 %v12076_v55  ;;  %8458 = vmatpush2.bf16.xpose.msra.mxu1 %v12079_v56  ;;  %v12158_v55 = vld [vmem:[%s14073_s15 + $0x1934] ss:$400 sps:$4 sm:$0xff]   ;;  %v12161_v56 = vld [vmem:[%s14073_s15 + $0x193c] ss:$400 sps:$4 sm:$0xff]  }
 0x17b   : > { %8468 = vmatprep.subr.bf16.mxu0 %v12088_v63  ;;  %8509 = vmatprep.subr.bf16.mxu1 %v12091_v0 }
 0x181   : > { %8419 = vmatmul.mubr.bf16.vlgmr.msra.gmra.mxu0 %v10394_v5  ;;  %8460 = vmatmul.mubr.bf16.vlgmr.msra.gmra.mxu1 %v10396_v6  ;;  %v12159_v5 = vld [vmem:[%s14073_s15 + $0x1938] ss:$400 sps:$4 sm:$0xff]  }
 0x182   : > { %8469 = vmatpush1.bf16.xpose.msra.mxu0 %v12086_v61  ;;  %8510 = vmatpush1.bf16.xpose.msra.mxu1 %v12089_v62  ;;  %v12156_v62 = vld [vmem:[%s14073_s15 + $0x1930] ss:$400 sps:$4 sm:$0xff]  }
 0x183   : > { %8470 = vmatprep.subr.bf16.mxu0 %v12094_v7  ;;  %8511 = vmatprep.subr.bf16.mxu1 %v12097_v8  ;;  %v12171_v8 = vld [vmem:[%s14073_s15 + $0x162c] ss:$400 sps:$4 sm:$0xff]  }
 0x184   : > { %8500 = vmatprep.mubr.bf16.mxu0 %v10399_v9  ;;  %8541 = vmatprep.mubr.bf16.mxu1 %v10401_v10 }
 0x18a   : > { %8471 = vmatpush1.bf16.xpose.msra.mxu0 %v12092_v57  ;;  %8512 = vmatpush1.bf16.xpose.msra.mxu1 %v12095_v58  ;;  %v14362_v58 = vld [vmem:[%s14087_s12 + $0x40] sm:$0xff] }
 0x18b   : > { %8472 = vmatprep.subr.bf16.mxu0 %v12100_v11  ;;  %8513 = vmatprep.subr.bf16.mxu1 %v12103_v12  ;;  %v12166_v11 = vld [vmem:[%s14073_s15 + $0x1620] ss:$400 sps:$4 sm:$0xff]   ;;  %v12169_v12 = vld [vmem:[%s14073_s15 + $0x1628] ss:$400 sps:$4 sm:$0xff]  }
 0x192   : > { %8473 = vmatpush1.bf16.xpose.msra.mxu0 %v12098_v13  ;;  %8514 = vmatpush1.bf16.xpose.msra.mxu1 %v12101_v14  ;;  %v10398_v13 = vcombine.low %v14292_v3, %v14292_v3  ;;  %v10400_v14 = vcombine.low %v14295_v4, %v14295_v4  ;;  %v12172_v3 = vld [vmem:[%s14073_s15 + $0x1300] ss:$400 sps:$4 sm:$0xff]   ;;  %v12175_v4 = vld [vmem:[%s14073_s15 + $0x1308] ss:$400 sps:$4 sm:$0xff]  }
 0x193   : > { %8474 = vmatprep.subr.bf16.mxu0 %v12106_v15  ;;  %8515 = vmatprep.subr.bf16.mxu1 %v12109_v16  ;;  %v12174_v15 = vld [vmem:[%s14073_s15 + $0x1304] ss:$400 sps:$4 sm:$0xff]   ;;  %v12177_v16 = vld [vmem:[%s14073_s15 + $0x130c] ss:$400 sps:$4 sm:$0xff]  }
 0x19a   : > { %8475 = vmatpush1.bf16.xpose.msra.mxu0 %v12104_v17  ;;  %8516 = vmatpush1.bf16.xpose.msra.mxu1 %v12107_v18  ;;  %v10403_v17 = vcombine.high %v14362_v58, %v14362_v58 }
 0x19b   : > { %8476 = vmatprep.subr.bf16.mxu0 %v12112_v19  ;;  %8517 = vmatprep.subr.bf16.mxu1 %v12115_v20  ;;  %v12180_v19 = vld [vmem:[%s14073_s15 + $0xfe4] ss:$400 sps:$4 sm:$0xff]   ;;  %v12183_v20 = vld [vmem:[%s14073_s15 + $0xfec] ss:$400 sps:$4 sm:$0xff]  }
 0x1a2   : > { %8477 = vmatpush1.bf16.xpose.msra.mxu0 %v12110_v21  ;;  %8518 = vmatpush1.bf16.xpose.msra.mxu1 %v12113_v22  ;;  %v12178_v21 = vld [vmem:[%s14073_s15 + $0xfe0] ss:$400 sps:$4 sm:$0xff]   ;;  %v12181_v22 = vld [vmem:[%s14073_s15 + $0xfe8] ss:$400 sps:$4 sm:$0xff]  }
 0x1a3   : > { %8478 = vmatprep.subr.bf16.mxu0 %v12118_v23  ;;  %8519 = vmatprep.subr.bf16.mxu1 %v12121_v24  ;;  %v12186_v23 = vld [vmem:[%s14073_s15 + $0xcc4] ss:$400 sps:$4 sm:$0xff]   ;;  %v12189_v24 = vld [vmem:[%s14073_s15 + $0xccc] ss:$400 sps:$4 sm:$0xff]  }
 0x1aa   : > { %8479 = vmatpush1.bf16.xpose.msra.mxu0 %v12116_v25  ;;  %8520 = vmatpush1.bf16.xpose.msra.mxu1 %v12119_v26  ;;  %v12184_v25 = vld [vmem:[%s14073_s15 + $0xcc0] ss:$400 sps:$4 sm:$0xff]   ;;  %v12187_v26 = vld [vmem:[%s14073_s15 + $0xcc8] ss:$400 sps:$4 sm:$0xff]  }
 0x1ab   : > { %8480 = vmatprep.subr.bf16.mxu0 %v12124_v27  ;;  %8521 = vmatprep.subr.bf16.mxu1 %v12127_v28  ;;  %v12192_v27 = vld [vmem:[%s14073_s15 + $0x9a4] ss:$400 sps:$4 sm:$0xff]   ;;  %v12195_v28 = vld [vmem:[%s14073_s15 + $0x9ac] ss:$400 sps:$4 sm:$0xff]  }
 0x1b2   : > { %8481 = vmatpush1.bf16.xpose.msra.mxu0 %v12122_v29  ;;  %8522 = vmatpush1.bf16.xpose.msra.mxu1 %v12125_v30  ;;  %v12190_v29 = vld [vmem:[%s14073_s15 + $0x9a0] ss:$400 sps:$4 sm:$0xff]   ;;  %v12193_v30 = vld [vmem:[%s14073_s15 + $0x9a8] ss:$400 sps:$4 sm:$0xff]  }
 0x1b3   : > { %8482 = vmatprep.subr.bf16.mxu0 %v12130_v31  ;;  %8523 = vmatprep.subr.bf16.mxu1 %v12133_v32  ;;  %v12198_v31 = vld [vmem:[%s14073_s15 + $0x684] ss:$400 sps:$4 sm:$0xff]   ;;  %v12201_v32 = vld [vmem:[%s14073_s15 + $0x68c] ss:$400 sps:$4 sm:$0xff]  }
 0x1ba   : > { %8483 = vmatpush1.bf16.xpose.msra.mxu0 %v12128_v35  ;;  %8524 = vmatpush1.bf16.xpose.msra.mxu1 %v12131_v36  ;;  %v12204_v35 = vld [vmem:[%s14073_s15 + $0x364] ss:$400 sps:$4 sm:$0xff]   ;;  %v12207_v36 = vld [vmem:[%s14073_s15 + $0x36c] ss:$400 sps:$4 sm:$0xff]  }
 0x1bb   : > { %8490 = vmatprep.subr.bf16.mxu0 %v11699_v37  ;;  %8531 = vmatprep.subr.bf16.mxu1 %v11701_v38  ;;  %v12202_v37 = vld [vmem:[%s14073_s15 + $0x360] ss:$400 sps:$4 sm:$0xff]   ;;  %v12205_v38 = vld [vmem:[%s14073_s15 + $0x368] ss:$400 sps:$4 sm:$0xff]  }
 0x1c2   : > { %8491 = vmatpush2.bf16.xpose.msra.mxu0 %v11698_v39  ;;  %8532 = vmatpush2.bf16.xpose.msra.mxu1 %v11700_v40  ;;  %v12210_v39 = vld [vmem:[%s14073_s15 + $0x44] ss:$400 sps:$4 sm:$0xff]   ;;  %v12213_v40 = vld [vmem:[%s14073_s15 + $0x4c] ss:$400 sps:$4 sm:$0xff]  }
 0x1c3   : > { %8492 = vmatprep.subr.bf16.mxu0 %v12140_v41  ;;  %8533 = vmatprep.subr.bf16.mxu1 %v12143_v42  ;;  %v1480_v41 = vld [vmem:[%s14073_s15 + $0x25c0] sm:$0xff]  ;;  %v1481_v42 = vld [vmem:[%s14073_s15 + $0x25c8] sm:$0xff] }
 0x1ca   : > { %8493 = vmatpush2.bf16.xpose.msra.mxu0 %v12138_v43  ;;  %8534 = vmatpush2.bf16.xpose.msra.mxu1 %v12141_v44  ;;  %v12208_v43 = vld [vmem:[%s14073_s15 + $0x40] ss:$400 sps:$4 sm:$0xff]   ;;  %v12211_v44 = vld [vmem:[%s14073_s15 + $0x48] ss:$400 sps:$4 sm:$0xff]  }
 0x1cb   : > { %8494 = vmatprep.subr.bf16.mxu0 %v12146_v45  ;;  %8535 = vmatprep.subr.bf16.mxu1 %v12149_v46  ;;  %v11703_v45 = vcombine.high %v1480_v41, %v1480_v41  ;;  %v11705_v46 = vcombine.high %v1481_v42, %v1481_v42 }
 0x1d2   : > { %8495 = vmatpush2.bf16.xpose.msra.mxu0 %v12144_v47  ;;  %8536 = vmatpush2.bf16.xpose.msra.mxu1 %v12147_v48  ;;  %v11702_v47 = vcombine.low %v1480_v41, %v1480_v41  ;;  %v11704_v48 = vcombine.low %v1481_v42, %v1481_v42  ;;  %v12276_v41 = vld [vmem:[%s14073_s15 + $0x690] ss:$400 sps:$4 sm:$0xff]   ;;  %v12279_v42 = vld [vmem:[%s14073_s15 + $0x698] ss:$400 sps:$4 sm:$0xff]  }
 0x1d3   : > { %8496 = vmatprep.subr.bf16.mxu0 %v12152_v49  ;;  %8537 = vmatprep.subr.bf16.mxu1 %v12155_v50  ;;  %v12220_v49 = vld [vmem:[%s14073_s15 + $0x22a4] ss:$400 sps:$4 sm:$0xff]   ;;  %v12223_v50 = vld [vmem:[%s14073_s15 + $0x22ac] ss:$400 sps:$4 sm:$0xff]  }
 0x1d9   : > { %v8338_v59 = vpop.f32.mrf.mxu0  ;;  %v8379_v60 = vpop.f32.mrf.mxu1 }
 0x1da   : > { %v8339_v63 = vadd.f32 %v8338_v59, %v14283_v51  ;;  %8497 = vmatpush2.bf16.xpose.msra.mxu0 %v12150_v52  ;;  %8538 = vmatpush2.bf16.xpose.msra.mxu1 %v12153_v53  ;;  %v12168_v51 = vld [vmem:[%s14073_s15 + $0x1624] ss:$400 sps:$4 sm:$0xff]   ;;  %v12218_v52 = vld [vmem:[%s14073_s15 + $0x22a0] ss:$400 sps:$4 sm:$0xff]   ;;  %v12221_v53 = vld [vmem:[%s14073_s15 + $0x22a8] ss:$400 sps:$4 sm:$0xff]  }
 0x1db   : > { %v8340_v0 = vpop.f32.mrf.mxu0  ;;  %v8381_v1 = vpop.f32.mrf.mxu1  ;;  %8498 = vmatprep.subr.bf16.mxu0 %v12158_v55  ;;  %8539 = vmatprep.subr.bf16.mxu1 %v12161_v56  ;;  %v12226_v55 = vld [vmem:[%s14073_s15 + $0x1f84] ss:$400 sps:$4 sm:$0xff]   ;;  %v12229_v56 = vld [vmem:[%s14073_s15 + $0x1f8c] ss:$400 sps:$4 sm:$0xff]   ;;  %v12224_v59 = vld [vmem:[%s14073_s15 + $0x1f80] ss:$400 sps:$4 sm:$0xff]  }
 0x1dc   : > { %v14352_v2 = vadd.f32 %v8379_v60, %v8339_v63  ;;  %v8341_v61 = vadd.f32 %v8340_v0, %v14285_v54  ;;  %v14365_v54 = vld [vmem:[%s14087_s12 + $0x48] sm:$0xff]  ;;  %v12232_v63 = vld [vmem:[%s14073_s15 + $0x1c64] ss:$400 sps:$4 sm:$0xff]  }
 0x1dd   : > { %v8342_v6 = vpop.f32.mrf.mxu0  ;;  %v8383_v7 = vpop.f32.mrf.mxu1  ;;  %v10405_v18 = vcombine.high %v14365_v54, %v14365_v54  ;;  %v12227_v60 = vld [vmem:[%s14073_s15 + $0x1f88] ss:$400 sps:$4 sm:$0xff]   ;;  %v12235_v0 = vld [vmem:[%s14073_s15 + $0x1c6c] ss:$400 sps:$4 sm:$0xff]  }
 0x1de   : > { %v14359_v9 = vadd.f32 %v8381_v1, %v8341_v61  ;;  %v12230_v1 = vld [vmem:[%s14073_s15 + $0x1c60] ss:$400 sps:$4 sm:$0xff]   ;;  %v12233_v61 = vld [vmem:[%s14073_s15 + $0x1c68] ss:$400 sps:$4 sm:$0xff]  }
 0x1df   : > { %v8343_v10 = vpop.f32.mrf.mxu0  ;;  %v8384_v57 = vpop.f32.mrf.mxu1 }
 0x1e2   : > { %8499 = vmatpush2.bf16.xpose.msra.mxu0 %v12156_v62  ;;  %8540 = vmatpush2.bf16.xpose.msra.mxu1 %v12159_v5  ;;  %v12238_v62 = vld [vmem:[%s14073_s15 + $0x1944] ss:$400 sps:$4 sm:$0xff]   ;;  %v12241_v5 = vld [vmem:[%s14073_s15 + $0x194c] ss:$400 sps:$4 sm:$0xff]  }
 0x1e3   : > { %8550 = vmatprep.subr.bf16.mxu0 %v12168_v51  ;;  %8591 = vmatprep.subr.bf16.mxu1 %v12171_v8 }
 0x1e9   : > { %8501 = vmatmul.mubr.bf16.vlgmr.msra.gmra.mxu0 %v10398_v13  ;;  %8542 = vmatmul.mubr.bf16.vlgmr.msra.gmra.mxu1 %v10400_v14 }
 0x1ea   : > { %8551 = vmatpush1.bf16.xpose.msra.mxu0 %v12166_v11  ;;  %8592 = vmatpush1.bf16.xpose.msra.mxu1 %v12169_v12 }
 0x1eb   : > { %8552 = vmatprep.subr.bf16.mxu0 %v12174_v15  ;;  %8593 = vmatprep.subr.bf16.mxu1 %v12177_v16  ;;  %v12239_v15 = vld [vmem:[%s14073_s15 + $0x1948] ss:$400 sps:$4 sm:$0xff]  }
 0x1ec   : > { %8582 = vmatprep.mubr.bf16.mxu0 %v10403_v17  ;;  %8623 = vmatprep.mubr.bf16.mxu1 %v10405_v18  ;;  %v12248_v18 = vld [vmem:[%s14073_s15 + $0x1634] ss:$400 sps:$4 sm:$0xff]  }
 0x1f2   : > { %8553 = vmatpush1.bf16.xpose.msra.mxu0 %v12172_v3  ;;  %8594 = vmatpush1.bf16.xpose.msra.mxu1 %v12175_v4  ;;  %v12251_v3 = vld [vmem:[%s14073_s15 + $0x163c] ss:$400 sps:$4 sm:$0xff]   ;;  %v10404_v4 = vcombine.low %v14365_v54, %v14365_v54  ;;  %v12252_v54 = vld [vmem:[%s14073_s15 + $0x1310] ss:$400 sps:$4 sm:$0xff]  }
 0x1f3   : > { %8554 = vmatprep.subr.bf16.mxu0 %v12180_v19  ;;  %8595 = vmatprep.subr.bf16.mxu1 %v12183_v20  ;;  %v14436_v19 = vld [vmem:[%s14087_s12 + $0x50] sm:$0xff]  ;;  %v14439_v20 = vld [vmem:[%s14087_s12 + $0x58] sm:$0xff] }
 0x1fa   : > { %8555 = vmatpush1.bf16.xpose.msra.mxu0 %v12178_v21  ;;  %8596 = vmatpush1.bf16.xpose.msra.mxu1 %v12181_v22  ;;  %v12246_v21 = vld [vmem:[%s14073_s15 + $0x1630] ss:$400 sps:$4 sm:$0xff]   ;;  %v12249_v22 = vld [vmem:[%s14073_s15 + $0x1638] ss:$400 sps:$4 sm:$0xff]  }
 0x1fb   : > { %8556 = vmatprep.subr.bf16.mxu0 %v12186_v23  ;;  %8597 = vmatprep.subr.bf16.mxu1 %v12189_v24  ;;  %v12254_v23 = vld [vmem:[%s14073_s15 + $0x1314] ss:$400 sps:$4 sm:$0xff]   ;;  %v12257_v24 = vld [vmem:[%s14073_s15 + $0x131c] ss:$400 sps:$4 sm:$0xff]  }
 0x202   : > { %8557 = vmatpush1.bf16.xpose.msra.mxu0 %v12184_v25  ;;  %8598 = vmatpush1.bf16.xpose.msra.mxu1 %v12187_v26  ;;  %v10407_v25 = vcombine.high %v14436_v19, %v14436_v19  ;;  %v12255_v26 = vld [vmem:[%s14073_s15 + $0x1318] ss:$400 sps:$4 sm:$0xff]  }
 0x203   : > { %8558 = vmatprep.subr.bf16.mxu0 %v12192_v27  ;;  %8599 = vmatprep.subr.bf16.mxu1 %v12195_v28  ;;  %v12260_v27 = vld [vmem:[%s14073_s15 + $0xff4] ss:$400 sps:$4 sm:$0xff]   ;;  %v12263_v28 = vld [vmem:[%s14073_s15 + $0xffc] ss:$400 sps:$4 sm:$0xff]  }
 0x20a   : > { %8559 = vmatpush1.bf16.xpose.msra.mxu0 %v12190_v29  ;;  %8600 = vmatpush1.bf16.xpose.msra.mxu1 %v12193_v30  ;;  %v12258_v29 = vld [vmem:[%s14073_s15 + $0xff0] ss:$400 sps:$4 sm:$0xff]   ;;  %v12261_v30 = vld [vmem:[%s14073_s15 + $0xff8] ss:$400 sps:$4 sm:$0xff]  }
 0x20b   : > { %8560 = vmatprep.subr.bf16.mxu0 %v12198_v31  ;;  %8601 = vmatprep.subr.bf16.mxu1 %v12201_v32  ;;  %v12266_v31 = vld [vmem:[%s14073_s15 + $0xcd4] ss:$400 sps:$4 sm:$0xff]   ;;  %v12269_v32 = vld [vmem:[%s14073_s15 + $0xcdc] ss:$400 sps:$4 sm:$0xff]  }
 0x212   : > { %8561 = vmatpush1.bf16.xpose.msra.mxu0 %v12196_v33  ;;  %8602 = vmatpush1.bf16.xpose.msra.mxu1 %v12199_v34  ;;  %v12264_v33 = vld [vmem:[%s14073_s15 + $0xcd0] ss:$400 sps:$4 sm:$0xff]   ;;  %v12267_v34 = vld [vmem:[%s14073_s15 + $0xcd8] ss:$400 sps:$4 sm:$0xff]  }
 0x213   : > { %8562 = vmatprep.subr.bf16.mxu0 %v12204_v35  ;;  %8603 = vmatprep.subr.bf16.mxu1 %v12207_v36  ;;  %v12272_v35 = vld [vmem:[%s14073_s15 + $0x9b4] ss:$400 sps:$4 sm:$0xff]   ;;  %v12275_v36 = vld [vmem:[%s14073_s15 + $0x9bc] ss:$400 sps:$4 sm:$0xff]  }
 0x21a   : > { %8563 = vmatpush1.bf16.xpose.msra.mxu0 %v12202_v37  ;;  %8604 = vmatpush1.bf16.xpose.msra.mxu1 %v12205_v38  ;;  %v12270_v37 = vld [vmem:[%s14073_s15 + $0x9b0] ss:$400 sps:$4 sm:$0xff]   ;;  %v12273_v38 = vld [vmem:[%s14073_s15 + $0x9b8] ss:$400 sps:$4 sm:$0xff]  }
 0x21b   : > { %8564 = vmatprep.subr.bf16.mxu0 %v12210_v39  ;;  %8605 = vmatprep.subr.bf16.mxu1 %v12213_v40  ;;  %v12278_v39 = vld [vmem:[%s14073_s15 + $0x694] ss:$400 sps:$4 sm:$0xff]   ;;  %v12281_v40 = vld [vmem:[%s14073_s15 + $0x69c] ss:$400 sps:$4 sm:$0xff]  }
 0x222   : > { %8565 = vmatpush1.bf16.xpose.msra.mxu0 %v12208_v43  ;;  %8606 = vmatpush1.bf16.xpose.msra.mxu1 %v12211_v44  ;;  %v12284_v43 = vld [vmem:[%s14073_s15 + $0x374] ss:$400 sps:$4 sm:$0xff]   ;;  %v12287_v44 = vld [vmem:[%s14073_s15 + $0x37c] ss:$400 sps:$4 sm:$0xff]  }
 0x223   : > { %8572 = vmatprep.subr.bf16.mxu0 %v11703_v45  ;;  %8613 = vmatprep.subr.bf16.mxu1 %v11705_v46  ;;  %v12282_v45 = vld [vmem:[%s14073_s15 + $0x370] ss:$400 sps:$4 sm:$0xff]   ;;  %v12285_v46 = vld [vmem:[%s14073_s15 + $0x378] ss:$400 sps:$4 sm:$0xff]  }
 0x22a   : > { %8573 = vmatpush2.bf16.xpose.msra.mxu0 %v11702_v47  ;;  %8614 = vmatpush2.bf16.xpose.msra.mxu1 %v11704_v48  ;;  %v12290_v47 = vld [vmem:[%s14073_s15 + $0x54] ss:$400 sps:$4 sm:$0xff]   ;;  %v12293_v48 = vld [vmem:[%s14073_s15 + $0x5c] ss:$400 sps:$4 sm:$0xff]  }
 0x22b   : > { %8574 = vmatprep.subr.bf16.mxu0 %v12220_v49  ;;  %8615 = vmatprep.subr.bf16.mxu1 %v12223_v50  ;;  %v1482_v49 = vld [vmem:[%s14073_s15 + $0x25d0] sm:$0xff]  ;;  %v1483_v50 = vld [vmem:[%s14073_s15 + $0x25d8] sm:$0xff] }
 0x232   : > { %8575 = vmatpush2.bf16.xpose.msra.mxu0 %v12218_v52  ;;  %8616 = vmatpush2.bf16.xpose.msra.mxu1 %v12221_v53  ;;  %v12288_v52 = vld [vmem:[%s14073_s15 + $0x50] ss:$400 sps:$4 sm:$0xff]   ;;  %v12291_v53 = vld [vmem:[%s14073_s15 + $0x58] ss:$400 sps:$4 sm:$0xff]  }
 0x233   : > { %8576 = vmatprep.subr.bf16.mxu0 %v12226_v55  ;;  %8617 = vmatprep.subr.bf16.mxu1 %v12229_v56  ;;  %v11707_v55 = vcombine.high %v1482_v49, %v1482_v49  ;;  %v11709_v56 = vcombine.high %v1483_v50, %v1483_v50 }
 0x23a   : > { %8577 = vmatpush2.bf16.xpose.msra.mxu0 %v12224_v59  ;;  %8618 = vmatpush2.bf16.xpose.msra.mxu1 %v12227_v60  ;;  %v11706_v59 = vcombine.low %v1482_v49, %v1482_v49  ;;  %v11708_v60 = vcombine.low %v1483_v50, %v1483_v50  ;;  %v12356_v49 = vld [vmem:[%s14073_s15 + $0x6a0] ss:$400 sps:$4 sm:$0xff]   ;;  %v12359_v50 = vld [vmem:[%s14073_s15 + $0x6a8] ss:$400 sps:$4 sm:$0xff]  }
 0x23b   : > { %8578 = vmatprep.subr.bf16.mxu0 %v12232_v63  ;;  %8619 = vmatprep.subr.bf16.mxu1 %v12235_v0  ;;  %v12300_v63 = vld [vmem:[%s14073_s15 + $0x22b4] ss:$400 sps:$4 sm:$0xff]   ;;  %v12303_v0 = vld [vmem:[%s14073_s15 + $0x22bc] ss:$400 sps:$4 sm:$0xff]  }
 0x241   : > { %v8420_v6 = vpop.f32.mrf.mxu0  ;;  %v8461_v7 = vpop.f32.mrf.mxu1 }
 0x242   : > { %v8421_v51 = vadd.f32 %v8420_v6, %v14352_v2  ;;  %8579 = vmatpush2.bf16.xpose.msra.mxu0 %v12230_v1  ;;  %8620 = vmatpush2.bf16.xpose.msra.mxu1 %v12233_v61  ;;  %v12236_v2 = vld [vmem:[%s14073_s15 + $0x1940] ss:$400 sps:$4 sm:$0xff]   ;;  %v12301_v61 = vld [vmem:[%s14073_s15 + $0x22b8] ss:$400 sps:$4 sm:$0xff]  }
 0x243   : > { %v8422_v8 = vpop.f32.mrf.mxu0  ;;  %v8463_v10 = vpop.f32.mrf.mxu1  ;;  %8580 = vmatprep.subr.bf16.mxu0 %v12238_v62  ;;  %8621 = vmatprep.subr.bf16.mxu1 %v12241_v5  ;;  %v12298_v1 = vld [vmem:[%s14073_s15 + $0x22b0] ss:$400 sps:$4 sm:$0xff]   ;;  %v12306_v62 = vld [vmem:[%s14073_s15 + $0x1f94] ss:$400 sps:$4 sm:$0xff]   ;;  %v12309_v5 = vld [vmem:[%s14073_s15 + $0x1f9c] ss:$400 sps:$4 sm:$0xff]  }
 0x244   : > { %v14422_v57 = vadd.f32 %v8461_v7, %v8421_v51  ;;  %v8423_v11 = vadd.f32 %v8422_v8, %v14359_v9  ;;  %v10402_v9 = vcombine.low %v14362_v58, %v14362_v58  ;;  %v10409_v58 = vcombine.high %v14439_v20, %v14439_v20  ;;  %v12304_v6 = vld [vmem:[%s14073_s15 + $0x1f90] ss:$400 sps:$4 sm:$0xff]   ;;  %v12307_v7 = vld [vmem:[%s14073_s15 + $0x1f98] ss:$400 sps:$4 sm:$0xff]   ;;  %v12312_v51 = vld [vmem:[%s14073_s15 + $0x1c74] ss:$400 sps:$4 sm:$0xff]  }
 0x245   : > { %v8424_v12 = vpop.f32.mrf.mxu0  ;;  %v8465_v13 = vpop.f32.mrf.mxu1  ;;  %v12315_v8 = vld [vmem:[%s14073_s15 + $0x1c7c] ss:$400 sps:$4 sm:$0xff]  }
 0x246   : > { %v14425_v14 = vadd.f32 %v8463_v10, %v8423_v11  ;;  %v12310_v10 = vld [vmem:[%s14073_s15 + $0x1c70] ss:$400 sps:$4 sm:$0xff]   ;;  %v12313_v11 = vld [vmem:[%s14073_s15 + $0x1c78] ss:$400 sps:$4 sm:$0xff]   ;;  %v12318_v12 = vld [vmem:[%s14073_s15 + $0x1954] ss:$400 sps:$4 sm:$0xff]  }
 0x247   : > { %v8425_v16 = vpop.f32.mrf.mxu0  ;;  %v8466_v17 = vpop.f32.mrf.mxu1  ;;  %v12321_v13 = vld [vmem:[%s14073_s15 + $0x195c] ss:$400 sps:$4 sm:$0xff]  }
 0x24a   : > { %8581 = vmatpush2.bf16.xpose.msra.mxu0 %v12236_v2  ;;  %8622 = vmatpush2.bf16.xpose.msra.mxu1 %v12239_v15 }
 0x24b   : > { %8632 = vmatprep.subr.bf16.mxu0 %v12248_v18  ;;  %8673 = vmatprep.subr.bf16.mxu1 %v12251_v3 }
 0x251   : > { %8583 = vmatmul.mubr.bf16.vlgmr.msra.gmra.mxu0 %v10402_v9  ;;  %8624 = vmatmul.mubr.bf16.vlgmr.msra.gmra.mxu1 %v10404_v4 }
 0x252   : > { %8633 = vmatpush1.bf16.xpose.msra.mxu0 %v12246_v21  ;;  %8674 = vmatpush1.bf16.xpose.msra.mxu1 %v12249_v22 }
 0x253   : > { %8634 = vmatprep.subr.bf16.mxu0 %v12254_v23  ;;  %8675 = vmatprep.subr.bf16.mxu1 %v12257_v24  ;;  %v12319_v23 = vld [vmem:[%s14073_s15 + $0x1958] ss:$400 sps:$4 sm:$0xff]  }
 0x254   : > { %8664 = vmatprep.mubr.bf16.mxu0 %v10407_v25  ;;  %8705 = vmatprep.mubr.bf16.mxu1 %v10409_v58  ;;  %v12328_v58 = vld [vmem:[%s14073_s15 + $0x1644] ss:$400 sps:$4 sm:$0xff]  }
 0x25a   : > { %8635 = vmatpush1.bf16.xpose.msra.mxu0 %v12252_v54  ;;  %8676 = vmatpush1.bf16.xpose.msra.mxu1 %v12255_v26  ;;  %v12331_v54 = vld [vmem:[%s14073_s15 + $0x164c] ss:$400 sps:$4 sm:$0xff]   ;;  %v10408_v26 = vcombine.low %v14439_v20, %v14439_v20  ;;  %v12332_v20 = vld [vmem:[%s14073_s15 + $0x1320] ss:$400 sps:$4 sm:$0xff]  }
 0x25b   : > { %8636 = vmatprep.subr.bf16.mxu0 %v12260_v27  ;;  %8677 = vmatprep.subr.bf16.mxu1 %v12263_v28  ;;  %v14506_v27 = vld [vmem:[%s14087_s12 + $0x60] sm:$0xff]  ;;  %v14509_v28 = vld [vmem:[%s14087_s12 + $0x68] sm:$0xff] }
 0x262   : > { %8637 = vmatpush1.bf16.xpose.msra.mxu0 %v12258_v29  ;;  %8678 = vmatpush1.bf16.xpose.msra.mxu1 %v12261_v30  ;;  %v12326_v29 = vld [vmem:[%s14073_s15 + $0x1640] ss:$400 sps:$4 sm:$0xff]   ;;  %v12329_v30 = vld [vmem:[%s14073_s15 + $0x1648] ss:$400 sps:$4 sm:$0xff]  }
 0x263   : > { %8638 = vmatprep.subr.bf16.mxu0 %v12266_v31  ;;  %8679 = vmatprep.subr.bf16.mxu1 %v12269_v32  ;;  %v12334_v31 = vld [vmem:[%s14073_s15 + $0x1324] ss:$400 sps:$4 sm:$0xff]   ;;  %v12337_v32 = vld [vmem:[%s14073_s15 + $0x132c] ss:$400 sps:$4 sm:$0xff]  }
 0x26a   : > { %8639 = vmatpush1.bf16.xpose.msra.mxu0 %v12264_v33  ;;  %8680 = vmatpush1.bf16.xpose.msra.mxu1 %v12267_v34  ;;  %v10411_v33 = vcombine.high %v14506_v27, %v14506_v27  ;;  %v12335_v34 = vld [vmem:[%s14073_s15 + $0x1328] ss:$400 sps:$4 sm:$0xff]  }
 0x26b   : > { %8640 = vmatprep.subr.bf16.mxu0 %v12272_v35  ;;  %8681 = vmatprep.subr.bf16.mxu1 %v12275_v36  ;;  %v12340_v35 = vld [vmem:[%s14073_s15 + $0x1004] ss:$400 sps:$4 sm:$0xff]   ;;  %v12343_v36 = vld [vmem:[%s14073_s15 + $0x100c] ss:$400 sps:$4 sm:$0xff]  }
 0x272   : > { %8641 = vmatpush1.bf16.xpose.msra.mxu0 %v12270_v37  ;;  %8682 = vmatpush1.bf16.xpose.msra.mxu1 %v12273_v38  ;;  %v12338_v37 = vld [vmem:[%s14073_s15 + $0x1000] ss:$400 sps:$4 sm:$0xff]   ;;  %v12341_v38 = vld [vmem:[%s14073_s15 + $0x1008] ss:$400 sps:$4 sm:$0xff]  }
 0x273   : > { %8642 = vmatprep.subr.bf16.mxu0 %v12278_v39  ;;  %8683 = vmatprep.subr.bf16.mxu1 %v12281_v40  ;;  %v12346_v39 = vld [vmem:[%s14073_s15 + $0xce4] ss:$400 sps:$4 sm:$0xff]   ;;  %v12349_v40 = vld [vmem:[%s14073_s15 + $0xcec] ss:$400 sps:$4 sm:$0xff]  }
 0x27a   : > { %8643 = vmatpush1.bf16.xpose.msra.mxu0 %v12276_v41  ;;  %8684 = vmatpush1.bf16.xpose.msra.mxu1 %v12279_v42  ;;  %v12344_v41 = vld [vmem:[%s14073_s15 + $0xce0] ss:$400 sps:$4 sm:$0xff]   ;;  %v12347_v42 = vld [vmem:[%s14073_s15 + $0xce8] ss:$400 sps:$4 sm:$0xff]  }
 0x27b   : > { %8644 = vmatprep.subr.bf16.mxu0 %v12284_v43  ;;  %8685 = vmatprep.subr.bf16.mxu1 %v12287_v44  ;;  %v12352_v43 = vld [vmem:[%s14073_s15 + $0x9c4] ss:$400 sps:$4 sm:$0xff]   ;;  %v12355_v44 = vld [vmem:[%s14073_s15 + $0x9cc] ss:$400 sps:$4 sm:$0xff]  }
 0x282   : > { %8645 = vmatpush1.bf16.xpose.msra.mxu0 %v12282_v45  ;;  %8686 = vmatpush1.bf16.xpose.msra.mxu1 %v12285_v46  ;;  %v12350_v45 = vld [vmem:[%s14073_s15 + $0x9c0] ss:$400 sps:$4 sm:$0xff]   ;;  %v12353_v46 = vld [vmem:[%s14073_s15 + $0x9c8] ss:$400 sps:$4 sm:$0xff]  }
 0x283   : > { %8646 = vmatprep.subr.bf16.mxu0 %v12290_v47  ;;  %8687 = vmatprep.subr.bf16.mxu1 %v12293_v48  ;;  %v12358_v47 = vld [vmem:[%s14073_s15 + $0x6a4] ss:$400 sps:$4 sm:$0xff]   ;;  %v12361_v48 = vld [vmem:[%s14073_s15 + $0x6ac] ss:$400 sps:$4 sm:$0xff]  }
 0x28a   : > { %8647 = vmatpush1.bf16.xpose.msra.mxu0 %v12288_v52  ;;  %8688 = vmatpush1.bf16.xpose.msra.mxu1 %v12291_v53  ;;  %v12364_v52 = vld [vmem:[%s14073_s15 + $0x384] ss:$400 sps:$4 sm:$0xff]   ;;  %v12367_v53 = vld [vmem:[%s14073_s15 + $0x38c] ss:$400 sps:$4 sm:$0xff]  }
 0x28b   : > { %8654 = vmatprep.subr.bf16.mxu0 %v11707_v55  ;;  %8695 = vmatprep.subr.bf16.mxu1 %v11709_v56  ;;  %v12362_v55 = vld [vmem:[%s14073_s15 + $0x380] ss:$400 sps:$4 sm:$0xff]   ;;  %v12365_v56 = vld [vmem:[%s14073_s15 + $0x388] ss:$400 sps:$4 sm:$0xff]  }
 0x292   : > { %8655 = vmatpush2.bf16.xpose.msra.mxu0 %v11706_v59  ;;  %8696 = vmatpush2.bf16.xpose.msra.mxu1 %v11708_v60  ;;  %v12370_v59 = vld [vmem:[%s14073_s15 + $0x64] ss:$400 sps:$4 sm:$0xff]   ;;  %v12373_v60 = vld [vmem:[%s14073_s15 + $0x6c] ss:$400 sps:$4 sm:$0xff]  }
 0x293   : > { %8656 = vmatprep.subr.bf16.mxu0 %v12300_v63  ;;  %8697 = vmatprep.subr.bf16.mxu1 %v12303_v0  ;;  %v1484_v63 = vld [vmem:[%s14073_s15 + $0x25e0] sm:$0xff]  ;;  %v1485_v0 = vld [vmem:[%s14073_s15 + $0x25e8] sm:$0xff] }
 0x29a   : > { %8657 = vmatpush2.bf16.xpose.msra.mxu0 %v12298_v1  ;;  %8698 = vmatpush2.bf16.xpose.msra.mxu1 %v12301_v61  ;;  %v12368_v1 = vld [vmem:[%s14073_s15 + $0x60] ss:$400 sps:$4 sm:$0xff]   ;;  %v12371_v61 = vld [vmem:[%s14073_s15 + $0x68] ss:$400 sps:$4 sm:$0xff]  }
 0x29b   : > { %8658 = vmatprep.subr.bf16.mxu0 %v12306_v62  ;;  %8699 = vmatprep.subr.bf16.mxu1 %v12309_v5  ;;  %v11711_v62 = vcombine.high %v1484_v63, %v1484_v63  ;;  %v11713_v5 = vcombine.high %v1485_v0, %v1485_v0 }
 0x2a2   : > { %8659 = vmatpush2.bf16.xpose.msra.mxu0 %v12304_v6  ;;  %8700 = vmatpush2.bf16.xpose.msra.mxu1 %v12307_v7  ;;  %v11710_v6 = vcombine.low %v1484_v63, %v1484_v63  ;;  %v11712_v7 = vcombine.low %v1485_v0, %v1485_v0  ;;  %v12436_v63 = vld [vmem:[%s14073_s15 + $0x6b0] ss:$400 sps:$4 sm:$0xff]   ;;  %v12439_v0 = vld [vmem:[%s14073_s15 + $0x6b8] ss:$400 sps:$4 sm:$0xff]  }
 0x2a3   : > { %8660 = vmatprep.subr.bf16.mxu0 %v12312_v51  ;;  %8701 = vmatprep.subr.bf16.mxu1 %v12315_v8  ;;  %v12380_v51 = vld [vmem:[%s14073_s15 + $0x22c4] ss:$400 sps:$4 sm:$0xff]   ;;  %v12383_v8 = vld [vmem:[%s14073_s15 + $0x22cc] ss:$400 sps:$4 sm:$0xff]  }
 0x2a9   : > { %v8502_v2 = vpop.f32.mrf.mxu0  ;;  %v8543_v15 = vpop.f32.mrf.mxu1 }
 0x2aa   : > { %v8503_v16 = vadd.f32 %v8502_v2, %v14422_v57  ;;  %8661 = vmatpush2.bf16.xpose.msra.mxu0 %v12310_v10  ;;  %8702 = vmatpush2.bf16.xpose.msra.mxu1 %v12313_v11  ;;  %v12316_v57 = vld [vmem:[%s14073_s15 + $0x1950] ss:$400 sps:$4 sm:$0xff]   ;;  %v12381_v11 = vld [vmem:[%s14073_s15 + $0x22c8] ss:$400 sps:$4 sm:$0xff]  }
 0x2ab   : > { %v8504_v17 = vpop.f32.mrf.mxu0  ;;  %v8545_v18 = vpop.f32.mrf.mxu1  ;;  %8662 = vmatprep.subr.bf16.mxu0 %v12318_v12  ;;  %8703 = vmatprep.subr.bf16.mxu1 %v12321_v13  ;;  %v12378_v10 = vld [vmem:[%s14073_s15 + $0x22c0] ss:$400 sps:$4 sm:$0xff]   ;;  %v12386_v12 = vld [vmem:[%s14073_s15 + $0x1fa4] ss:$400 sps:$4 sm:$0xff]   ;;  %v12389_v13 = vld [vmem:[%s14073_s15 + $0x1fac] ss:$400 sps:$4 sm:$0xff]  }
 0x2ac   : > { %v14492_v3 = vadd.f32 %v8543_v15, %v8503_v16  ;;  %v8505_v9 = vadd.f32 %v8504_v17, %v14425_v14  ;;  %v10406_v14 = vcombine.low %v14436_v19, %v14436_v19  ;;  %v10413_v19 = vcombine.high %v14509_v28, %v14509_v28  ;;  %v12384_v2 = vld [vmem:[%s14073_s15 + $0x1fa0] ss:$400 sps:$4 sm:$0xff]   ;;  %v12387_v15 = vld [vmem:[%s14073_s15 + $0x1fa8] ss:$400 sps:$4 sm:$0xff]   ;;  %v12392_v16 = vld [vmem:[%s14073_s15 + $0x1c84] ss:$400 sps:$4 sm:$0xff]  }
 0x2ad   : > { %v8506_v4 = vpop.f32.mrf.mxu0  ;;  %v8547_v21 = vpop.f32.mrf.mxu1  ;;  %v12395_v17 = vld [vmem:[%s14073_s15 + $0x1c8c] ss:$400 sps:$4 sm:$0xff]  }
 0x2ae   : > { %v14495_v22 = vadd.f32 %v8545_v18, %v8505_v9  ;;  %v12390_v18 = vld [vmem:[%s14073_s15 + $0x1c80] ss:$400 sps:$4 sm:$0xff]   ;;  %v12393_v9 = vld [vmem:[%s14073_s15 + $0x1c88] ss:$400 sps:$4 sm:$0xff]   ;;  %v12398_v4 = vld [vmem:[%s14073_s15 + $0x1964] ss:$400 sps:$4 sm:$0xff]  }
 0x2af   : > { %v8507_v24 = vpop.f32.mrf.mxu0  ;;  %v8548_v25 = vpop.f32.mrf.mxu1  ;;  %v12401_v21 = vld [vmem:[%s14073_s15 + $0x196c] ss:$400 sps:$4 sm:$0xff]  }
 0x2b2   : > { %8663 = vmatpush2.bf16.xpose.msra.mxu0 %v12316_v57  ;;  %8704 = vmatpush2.bf16.xpose.msra.mxu1 %v12319_v23 }
 0x2b3   : > { %8714 = vmatprep.subr.bf16.mxu0 %v12328_v58  ;;  %8755 = vmatprep.subr.bf16.mxu1 %v12331_v54 }
 0x2b9   : > { %8665 = vmatmul.mubr.bf16.vlgmr.msra.gmra.mxu0 %v10406_v14  ;;  %8706 = vmatmul.mubr.bf16.vlgmr.msra.gmra.mxu1 %v10408_v26 }
 0x2ba   : > { %8715 = vmatpush1.bf16.xpose.msra.mxu0 %v12326_v29  ;;  %8756 = vmatpush1.bf16.xpose.msra.mxu1 %v12329_v30 }
 0x2bb   : > { %8716 = vmatprep.subr.bf16.mxu0 %v12334_v31  ;;  %8757 = vmatprep.subr.bf16.mxu1 %v12337_v32  ;;  %v12399_v31 = vld [vmem:[%s14073_s15 + $0x1968] ss:$400 sps:$4 sm:$0xff]  }
 0x2bc   : > { %8746 = vmatprep.mubr.bf16.mxu0 %v10411_v33  ;;  %8787 = vmatprep.mubr.bf16.mxu1 %v10413_v19  ;;  %v12408_v19 = vld [vmem:[%s14073_s15 + $0x1654] ss:$400 sps:$4 sm:$0xff]  }
 0x2c2   : > { %8717 = vmatpush1.bf16.xpose.msra.mxu0 %v12332_v20  ;;  %8758 = vmatpush1.bf16.xpose.msra.mxu1 %v12335_v34  ;;  %v12411_v20 = vld [vmem:[%s14073_s15 + $0x165c] ss:$400 sps:$4 sm:$0xff]   ;;  %v10412_v34 = vcombine.low %v14509_v28, %v14509_v28  ;;  %v12412_v28 = vld [vmem:[%s14073_s15 + $0x1330] ss:$400 sps:$4 sm:$0xff]  }
 0x2c3   : > { %8718 = vmatprep.subr.bf16.mxu0 %v12340_v35  ;;  %8759 = vmatprep.subr.bf16.mxu1 %v12343_v36  ;;  %v14576_v35 = vld [vmem:[%s14087_s12 + $0x70] sm:$0xff]  ;;  %v14579_v36 = vld [vmem:[%s14087_s12 + $0x78] sm:$0xff] }
 0x2ca   : > { %8719 = vmatpush1.bf16.xpose.msra.mxu0 %v12338_v37  ;;  %8760 = vmatpush1.bf16.xpose.msra.mxu1 %v12341_v38  ;;  %v12406_v37 = vld [vmem:[%s14073_s15 + $0x1650] ss:$400 sps:$4 sm:$0xff]   ;;  %v12409_v38 = vld [vmem:[%s14073_s15 + $0x1658] ss:$400 sps:$4 sm:$0xff]  }
 0x2cb   : > { %8720 = vmatprep.subr.bf16.mxu0 %v12346_v39  ;;  %8761 = vmatprep.subr.bf16.mxu1 %v12349_v40  ;;  %v12414_v39 = vld [vmem:[%s14073_s15 + $0x1334] ss:$400 sps:$4 sm:$0xff]   ;;  %v12417_v40 = vld [vmem:[%s14073_s15 + $0x133c] ss:$400 sps:$4 sm:$0xff]  }
 0x2d2   : > { %8721 = vmatpush1.bf16.xpose.msra.mxu0 %v12344_v41  ;;  %8762 = vmatpush1.bf16.xpose.msra.mxu1 %v12347_v42  ;;  %v10415_v41 = vcombine.high %v14576_v35, %v14576_v35  ;;  %v12415_v42 = vld [vmem:[%s14073_s15 + $0x1338] ss:$400 sps:$4 sm:$0xff]  }
 0x2d3   : > { %8722 = vmatprep.subr.bf16.mxu0 %v12352_v43  ;;  %8763 = vmatprep.subr.bf16.mxu1 %v12355_v44  ;;  %v12420_v43 = vld [vmem:[%s14073_s15 + $0x1014] ss:$400 sps:$4 sm:$0xff]   ;;  %v12423_v44 = vld [vmem:[%s14073_s15 + $0x101c] ss:$400 sps:$4 sm:$0xff]  }
 0x2da   : > { %8723 = vmatpush1.bf16.xpose.msra.mxu0 %v12350_v45  ;;  %8764 = vmatpush1.bf16.xpose.msra.mxu1 %v12353_v46  ;;  %v12418_v45 = vld [vmem:[%s14073_s15 + $0x1010] ss:$400 sps:$4 sm:$0xff]   ;;  %v12421_v46 = vld [vmem:[%s14073_s15 + $0x1018] ss:$400 sps:$4 sm:$0xff]  }
 0x2db   : > { %8724 = vmatprep.subr.bf16.mxu0 %v12358_v47  ;;  %8765 = vmatprep.subr.bf16.mxu1 %v12361_v48  ;;  %v12426_v47 = vld [vmem:[%s14073_s15 + $0xcf4] ss:$400 sps:$4 sm:$0xff]   ;;  %v12429_v48 = vld [vmem:[%s14073_s15 + $0xcfc] ss:$400 sps:$4 sm:$0xff]  }
 0x2e2   : > { %8725 = vmatpush1.bf16.xpose.msra.mxu0 %v12356_v49  ;;  %8766 = vmatpush1.bf16.xpose.msra.mxu1 %v12359_v50  ;;  %v12424_v49 = vld [vmem:[%s14073_s15 + $0xcf0] ss:$400 sps:$4 sm:$0xff]   ;;  %v12427_v50 = vld [vmem:[%s14073_s15 + $0xcf8] ss:$400 sps:$4 sm:$0xff]  }
 0x2e3   : > { %8726 = vmatprep.subr.bf16.mxu0 %v12364_v52  ;;  %8767 = vmatprep.subr.bf16.mxu1 %v12367_v53  ;;  %v12432_v52 = vld [vmem:[%s14073_s15 + $0x9d4] ss:$400 sps:$4 sm:$0xff]   ;;  %v12435_v53 = vld [vmem:[%s14073_s15 + $0x9dc] ss:$400 sps:$4 sm:$0xff]  }
 0x2ea   : > { %8727 = vmatpush1.bf16.xpose.msra.mxu0 %v12362_v55  ;;  %8768 = vmatpush1.bf16.xpose.msra.mxu1 %v12365_v56  ;;  %v12430_v55 = vld [vmem:[%s14073_s15 + $0x9d0] ss:$400 sps:$4 sm:$0xff]   ;;  %v12433_v56 = vld [vmem:[%s14073_s15 + $0x9d8] ss:$400 sps:$4 sm:$0xff]  }
 0x2eb   : > { %8728 = vmatprep.subr.bf16.mxu0 %v12370_v59  ;;  %8769 = vmatprep.subr.bf16.mxu1 %v12373_v60  ;;  %v12438_v59 = vld [vmem:[%s14073_s15 + $0x6b4] ss:$400 sps:$4 sm:$0xff]   ;;  %v12441_v60 = vld [vmem:[%s14073_s15 + $0x6bc] ss:$400 sps:$4 sm:$0xff]  }
 0x2f2   : > { %8729 = vmatpush1.bf16.xpose.msra.mxu0 %v12368_v1  ;;  %8770 = vmatpush1.bf16.xpose.msra.mxu1 %v12371_v61  ;;  %v12444_v1 = vld [vmem:[%s14073_s15 + $0x394] ss:$400 sps:$4 sm:$0xff]   ;;  %v12447_v61 = vld [vmem:[%s14073_s15 + $0x39c] ss:$400 sps:$4 sm:$0xff]  }
 0x2f3   : > { %8736 = vmatprep.subr.bf16.mxu0 %v11711_v62  ;;  %8777 = vmatprep.subr.bf16.mxu1 %v11713_v5  ;;  %v12442_v62 = vld [vmem:[%s14073_s15 + $0x390] ss:$400 sps:$4 sm:$0xff]   ;;  %v12445_v5 = vld [vmem:[%s14073_s15 + $0x398] ss:$400 sps:$4 sm:$0xff]  }
 0x2fa   : > { %8737 = vmatpush2.bf16.xpose.msra.mxu0 %v11710_v6  ;;  %8778 = vmatpush2.bf16.xpose.msra.mxu1 %v11712_v7  ;;  %v12450_v6 = vld [vmem:[%s14073_s15 + $0x74] ss:$400 sps:$4 sm:$0xff]   ;;  %v12453_v7 = vld [vmem:[%s14073_s15 + $0x7c] ss:$400 sps:$4 sm:$0xff]  }
 0x2fb   : > { %8738 = vmatprep.subr.bf16.mxu0 %v12380_v51  ;;  %8779 = vmatprep.subr.bf16.mxu1 %v12383_v8  ;;  %v1486_v51 = vld [vmem:[%s14073_s15 + $0x25f0] sm:$0xff]  ;;  %v1487_v8 = vld [vmem:[%s14073_s15 + $0x25f8] sm:$0xff] }
 0x302   : > { %8739 = vmatpush2.bf16.xpose.msra.mxu0 %v12378_v10  ;;  %8780 = vmatpush2.bf16.xpose.msra.mxu1 %v12381_v11  ;;  %v12448_v10 = vld [vmem:[%s14073_s15 + $0x70] ss:$400 sps:$4 sm:$0xff]   ;;  %v12451_v11 = vld [vmem:[%s14073_s15 + $0x78] ss:$400 sps:$4 sm:$0xff]  }
 0x303   : > { %8740 = vmatprep.subr.bf16.mxu0 %v12386_v12  ;;  %8781 = vmatprep.subr.bf16.mxu1 %v12389_v13  ;;  %v11715_v12 = vcombine.high %v1486_v51, %v1486_v51  ;;  %v11717_v13 = vcombine.high %v1487_v8, %v1487_v8 }
 0x30a   : > { %8741 = vmatpush2.bf16.xpose.msra.mxu0 %v12384_v2  ;;  %8782 = vmatpush2.bf16.xpose.msra.mxu1 %v12387_v15  ;;  %v11714_v2 = vcombine.low %v1486_v51, %v1486_v51  ;;  %v11716_v15 = vcombine.low %v1487_v8, %v1487_v8  ;;  %v12516_v51 = vld [vmem:[%s14073_s15 + $0x6c0] ss:$400 sps:$4 sm:$0xff]   ;;  %v12519_v8 = vld [vmem:[%s14073_s15 + $0x6c8] ss:$400 sps:$4 sm:$0xff]  }
 0x30b   : > { %8742 = vmatprep.subr.bf16.mxu0 %v12392_v16  ;;  %8783 = vmatprep.subr.bf16.mxu1 %v12395_v17  ;;  %v12460_v16 = vld [vmem:[%s14073_s15 + $0x22d4] ss:$400 sps:$4 sm:$0xff]   ;;  %v12463_v17 = vld [vmem:[%s14073_s15 + $0x22dc] ss:$400 sps:$4 sm:$0xff]  }
 0x311   : > { %v8584_v57 = vpop.f32.mrf.mxu0  ;;  %v8625_v23 = vpop.f32.mrf.mxu1 }
 0x312   : > { %v8585_v24 = vadd.f32 %v8584_v57, %v14492_v3  ;;  %8743 = vmatpush2.bf16.xpose.msra.mxu0 %v12390_v18  ;;  %8784 = vmatpush2.bf16.xpose.msra.mxu1 %v12393_v9  ;;  %v12396_v3 = vld [vmem:[%s14073_s15 + $0x1960] ss:$400 sps:$4 sm:$0xff]   ;;  %v12461_v9 = vld [vmem:[%s14073_s15 + $0x22d8] ss:$400 sps:$4 sm:$0xff]  }
 0x313   : > { %v8586_v25 = vpop.f32.mrf.mxu0  ;;  %v8627_v58 = vpop.f32.mrf.mxu1  ;;  %8744 = vmatprep.subr.bf16.mxu0 %v12398_v4  ;;  %8785 = vmatprep.subr.bf16.mxu1 %v12401_v21  ;;  %v12458_v18 = vld [vmem:[%s14073_s15 + $0x22d0] ss:$400 sps:$4 sm:$0xff]   ;;  %v12466_v4 = vld [vmem:[%s14073_s15 + $0x1fb4] ss:$400 sps:$4 sm:$0xff]   ;;  %v12469_v21 = vld [vmem:[%s14073_s15 + $0x1fbc] ss:$400 sps:$4 sm:$0xff]  }
 0x314   : > { %v14562_v54 = vadd.f32 %v8625_v23, %v8585_v24  ;;  %v8587_v14 = vadd.f32 %v8586_v25, %v14495_v22  ;;  %v10410_v22 = vcombine.low %v14506_v27, %v14506_v27  ;;  %v10417_v27 = vcombine.high %v14579_v36, %v14579_v36  ;;  %v12464_v57 = vld [vmem:[%s14073_s15 + $0x1fb0] ss:$400 sps:$4 sm:$0xff]   ;;  %v12467_v23 = vld [vmem:[%s14073_s15 + $0x1fb8] ss:$400 sps:$4 sm:$0xff]   ;;  %v12472_v24 = vld [vmem:[%s14073_s15 + $0x1c94] ss:$400 sps:$4 sm:$0xff]  }
 0x315   : > { %v8588_v26 = vpop.f32.mrf.mxu0  ;;  %v8629_v29 = vpop.f32.mrf.mxu1  ;;  %v12475_v25 = vld [vmem:[%s14073_s15 + $0x1c9c] ss:$400 sps:$4 sm:$0xff]  }
 0x316   : > { %v14565_v30 = vadd.f32 %v8627_v58, %v8587_v14  ;;  %v12470_v58 = vld [vmem:[%s14073_s15 + $0x1c90] ss:$400 sps:$4 sm:$0xff]   ;;  %v12473_v14 = vld [vmem:[%s14073_s15 + $0x1c98] ss:$400 sps:$4 sm:$0xff]   ;;  %v12478_v26 = vld [vmem:[%s14073_s15 + $0x1974] ss:$400 sps:$4 sm:$0xff]  }
 0x317   : > { %v8589_v32 = vpop.f32.mrf.mxu0  ;;  %v8630_v33 = vpop.f32.mrf.mxu1  ;;  %v12481_v29 = vld [vmem:[%s14073_s15 + $0x197c] ss:$400 sps:$4 sm:$0xff]  }
 0x31a   : > { %8745 = vmatpush2.bf16.xpose.msra.mxu0 %v12396_v3  ;;  %8786 = vmatpush2.bf16.xpose.msra.mxu1 %v12399_v31 }
 0x31b   : > { %8796 = vmatprep.subr.bf16.mxu0 %v12408_v19  ;;  %8837 = vmatprep.subr.bf16.mxu1 %v12411_v20 }
 0x321   : > { %8747 = vmatmul.mubr.bf16.vlgmr.msra.gmra.mxu0 %v10410_v22  ;;  %8788 = vmatmul.mubr.bf16.vlgmr.msra.gmra.mxu1 %v10412_v34 }
 0x322   : > { %8797 = vmatpush1.bf16.xpose.msra.mxu0 %v12406_v37  ;;  %8838 = vmatpush1.bf16.xpose.msra.mxu1 %v12409_v38 }
 0x323   : > { %8798 = vmatprep.subr.bf16.mxu0 %v12414_v39  ;;  %8839 = vmatprep.subr.bf16.mxu1 %v12417_v40  ;;  %v12479_v39 = vld [vmem:[%s14073_s15 + $0x1978] ss:$400 sps:$4 sm:$0xff]  }
 0x324   : > { %8828 = vmatprep.mubr.bf16.mxu0 %v10415_v41  ;;  %8869 = vmatprep.mubr.bf16.mxu1 %v10417_v27  ;;  %v12488_v27 = vld [vmem:[%s14073_s15 + $0x1664] ss:$400 sps:$4 sm:$0xff]  }
 0x32a   : > { %8799 = vmatpush1.bf16.xpose.msra.mxu0 %v12412_v28  ;;  %8840 = vmatpush1.bf16.xpose.msra.mxu1 %v12415_v42  ;;  %v12491_v28 = vld [vmem:[%s14073_s15 + $0x166c] ss:$400 sps:$4 sm:$0xff]   ;;  %v10416_v42 = vcombine.low %v14579_v36, %v14579_v36  ;;  %v12492_v36 = vld [vmem:[%s14073_s15 + $0x1340] ss:$400 sps:$4 sm:$0xff]  }
 0x32b   : > { %8800 = vmatprep.subr.bf16.mxu0 %v12420_v43  ;;  %8841 = vmatprep.subr.bf16.mxu1 %v12423_v44  ;;  %v14646_v43 = vld [vmem:[%s14087_s12 + $0x80] sm:$0xff]  ;;  %v14649_v44 = vld [vmem:[%s14087_s12 + $0x88] sm:$0xff] }
 0x332   : > { %8801 = vmatpush1.bf16.xpose.msra.mxu0 %v12418_v45  ;;  %8842 = vmatpush1.bf16.xpose.msra.mxu1 %v12421_v46  ;;  %v12486_v45 = vld [vmem:[%s14073_s15 + $0x1660] ss:$400 sps:$4 sm:$0xff]   ;;  %v12489_v46 = vld [vmem:[%s14073_s15 + $0x1668] ss:$400 sps:$4 sm:$0xff]  }
 0x333   : > { %8802 = vmatprep.subr.bf16.mxu0 %v12426_v47  ;;  %8843 = vmatprep.subr.bf16.mxu1 %v12429_v48  ;;  %v12494_v47 = vld [vmem:[%s14073_s15 + $0x1344] ss:$400 sps:$4 sm:$0xff]   ;;  %v12497_v48 = vld [vmem:[%s14073_s15 + $0x134c] ss:$400 sps:$4 sm:$0xff]  }
 0x33a   : > { %8803 = vmatpush1.bf16.xpose.msra.mxu0 %v12424_v49  ;;  %8844 = vmatpush1.bf16.xpose.msra.mxu1 %v12427_v50  ;;  %v10419_v49 = vcombine.high %v14646_v43, %v14646_v43  ;;  %v12495_v50 = vld [vmem:[%s14073_s15 + $0x1348] ss:$400 sps:$4 sm:$0xff]  }
 0x33b   : > { %8804 = vmatprep.subr.bf16.mxu0 %v12432_v52  ;;  %8845 = vmatprep.subr.bf16.mxu1 %v12435_v53  ;;  %v12500_v52 = vld [vmem:[%s14073_s15 + $0x1024] ss:$400 sps:$4 sm:$0xff]   ;;  %v12503_v53 = vld [vmem:[%s14073_s15 + $0x102c] ss:$400 sps:$4 sm:$0xff]  }
 0x342   : > { %8805 = vmatpush1.bf16.xpose.msra.mxu0 %v12430_v55  ;;  %8846 = vmatpush1.bf16.xpose.msra.mxu1 %v12433_v56  ;;  %v12498_v55 = vld [vmem:[%s14073_s15 + $0x1020] ss:$400 sps:$4 sm:$0xff]   ;;  %v12501_v56 = vld [vmem:[%s14073_s15 + $0x1028] ss:$400 sps:$4 sm:$0xff]  }
 0x343   : > { %8806 = vmatprep.subr.bf16.mxu0 %v12438_v59  ;;  %8847 = vmatprep.subr.bf16.mxu1 %v12441_v60  ;;  %v12506_v59 = vld [vmem:[%s14073_s15 + $0xd04] ss:$400 sps:$4 sm:$0xff]   ;;  %v12509_v60 = vld [vmem:[%s14073_s15 + $0xd0c] ss:$400 sps:$4 sm:$0xff]  }
 0x34a   : > { %8807 = vmatpush1.bf16.xpose.msra.mxu0 %v12436_v63  ;;  %8848 = vmatpush1.bf16.xpose.msra.mxu1 %v12439_v0  ;;  %v12504_v63 = vld [vmem:[%s14073_s15 + $0xd00] ss:$400 sps:$4 sm:$0xff]   ;;  %v12507_v0 = vld [vmem:[%s14073_s15 + $0xd08] ss:$400 sps:$4 sm:$0xff]  }
 0x34b   : > { %8808 = vmatprep.subr.bf16.mxu0 %v12444_v1  ;;  %8849 = vmatprep.subr.bf16.mxu1 %v12447_v61  ;;  %v12512_v1 = vld [vmem:[%s14073_s15 + $0x9e4] ss:$400 sps:$4 sm:$0xff]   ;;  %v12515_v61 = vld [vmem:[%s14073_s15 + $0x9ec] ss:$400 sps:$4 sm:$0xff]  }
 0x352   : > { %8809 = vmatpush1.bf16.xpose.msra.mxu0 %v12442_v62  ;;  %8850 = vmatpush1.bf16.xpose.msra.mxu1 %v12445_v5  ;;  %v12510_v62 = vld [vmem:[%s14073_s15 + $0x9e0] ss:$400 sps:$4 sm:$0xff]   ;;  %v12513_v5 = vld [vmem:[%s14073_s15 + $0x9e8] ss:$400 sps:$4 sm:$0xff]  }
 0x353   : > { %8810 = vmatprep.subr.bf16.mxu0 %v12450_v6  ;;  %8851 = vmatprep.subr.bf16.mxu1 %v12453_v7  ;;  %v12518_v6 = vld [vmem:[%s14073_s15 + $0x6c4] ss:$400 sps:$4 sm:$0xff]   ;;  %v12521_v7 = vld [vmem:[%s14073_s15 + $0x6cc] ss:$400 sps:$4 sm:$0xff]  }
 0x35a   : > { %8811 = vmatpush1.bf16.xpose.msra.mxu0 %v12448_v10  ;;  %8852 = vmatpush1.bf16.xpose.msra.mxu1 %v12451_v11  ;;  %v12524_v10 = vld [vmem:[%s14073_s15 + $0x3a4] ss:$400 sps:$4 sm:$0xff]   ;;  %v12527_v11 = vld [vmem:[%s14073_s15 + $0x3ac] ss:$400 sps:$4 sm:$0xff]  }
 0x35b   : > { %8818 = vmatprep.subr.bf16.mxu0 %v11715_v12  ;;  %8859 = vmatprep.subr.bf16.mxu1 %v11717_v13  ;;  %v12522_v12 = vld [vmem:[%s14073_s15 + $0x3a0] ss:$400 sps:$4 sm:$0xff]   ;;  %v12525_v13 = vld [vmem:[%s14073_s15 + $0x3a8] ss:$400 sps:$4 sm:$0xff]  }
 0x362   : > { %8819 = vmatpush2.bf16.xpose.msra.mxu0 %v11714_v2  ;;  %8860 = vmatpush2.bf16.xpose.msra.mxu1 %v11716_v15  ;;  %v12530_v2 = vld [vmem:[%s14073_s15 + $0x84] ss:$400 sps:$4 sm:$0xff]   ;;  %v12533_v15 = vld [vmem:[%s14073_s15 + $0x8c] ss:$400 sps:$4 sm:$0xff]  }
 0x363   : > { %8820 = vmatprep.subr.bf16.mxu0 %v12460_v16  ;;  %8861 = vmatprep.subr.bf16.mxu1 %v12463_v17  ;;  %v1488_v16 = vld [vmem:[%s14073_s15 + $0x2600] sm:$0xff]  ;;  %v1489_v17 = vld [vmem:[%s14073_s15 + $0x2608] sm:$0xff] }
 0x36a   : > { %8821 = vmatpush2.bf16.xpose.msra.mxu0 %v12458_v18  ;;  %8862 = vmatpush2.bf16.xpose.msra.mxu1 %v12461_v9  ;;  %v12528_v18 = vld [vmem:[%s14073_s15 + $0x80] ss:$400 sps:$4 sm:$0xff]   ;;  %v12531_v9 = vld [vmem:[%s14073_s15 + $0x88] ss:$400 sps:$4 sm:$0xff]  }
 0x36b   : > { %8822 = vmatprep.subr.bf16.mxu0 %v12466_v4  ;;  %8863 = vmatprep.subr.bf16.mxu1 %v12469_v21  ;;  %v11719_v4 = vcombine.high %v1488_v16, %v1488_v16  ;;  %v11721_v21 = vcombine.high %v1489_v17, %v1489_v17 }
 0x372   : > { %8823 = vmatpush2.bf16.xpose.msra.mxu0 %v12464_v57  ;;  %8864 = vmatpush2.bf16.xpose.msra.mxu1 %v12467_v23  ;;  %v11718_v57 = vcombine.low %v1488_v16, %v1488_v16  ;;  %v11720_v23 = vcombine.low %v1489_v17, %v1489_v17  ;;  %v12596_v16 = vld [vmem:[%s14073_s15 + $0x6d0] ss:$400 sps:$4 sm:$0xff]   ;;  %v12599_v17 = vld [vmem:[%s14073_s15 + $0x6d8] ss:$400 sps:$4 sm:$0xff]  }
 0x373   : > { %8824 = vmatprep.subr.bf16.mxu0 %v12472_v24  ;;  %8865 = vmatprep.subr.bf16.mxu1 %v12475_v25  ;;  %v12540_v24 = vld [vmem:[%s14073_s15 + $0x22e4] ss:$400 sps:$4 sm:$0xff]   ;;  %v12543_v25 = vld [vmem:[%s14073_s15 + $0x22ec] ss:$400 sps:$4 sm:$0xff]  }
 0x379   : > { %v8666_v3 = vpop.f32.mrf.mxu0  ;;  %v8707_v31 = vpop.f32.mrf.mxu1 }
 0x37a   : > { %v8667_v32 = vadd.f32 %v8666_v3, %v14562_v54  ;;  %8825 = vmatpush2.bf16.xpose.msra.mxu0 %v12470_v58  ;;  %8866 = vmatpush2.bf16.xpose.msra.mxu1 %v12473_v14  ;;  %v12476_v54 = vld [vmem:[%s14073_s15 + $0x1970] ss:$400 sps:$4 sm:$0xff]   ;;  %v12541_v14 = vld [vmem:[%s14073_s15 + $0x22e8] ss:$400 sps:$4 sm:$0xff]  }
 0x37b   : > { %v8668_v33 = vpop.f32.mrf.mxu0  ;;  %v8709_v19 = vpop.f32.mrf.mxu1  ;;  %8826 = vmatprep.subr.bf16.mxu0 %v12478_v26  ;;  %8867 = vmatprep.subr.bf16.mxu1 %v12481_v29  ;;  %v12538_v58 = vld [vmem:[%s14073_s15 + $0x22e0] ss:$400 sps:$4 sm:$0xff]   ;;  %v12546_v26 = vld [vmem:[%s14073_s15 + $0x1fc4] ss:$400 sps:$4 sm:$0xff]   ;;  %v12549_v29 = vld [vmem:[%s14073_s15 + $0x1fcc] ss:$400 sps:$4 sm:$0xff]  }
 0x37c   : > { %v14632_v20 = vadd.f32 %v8707_v31, %v8667_v32  ;;  %v8669_v22 = vadd.f32 %v8668_v33, %v14565_v30  ;;  %v10414_v30 = vcombine.low %v14576_v35, %v14576_v35  ;;  %v10421_v35 = vcombine.high %v14649_v44, %v14649_v44  ;;  %v12544_v3 = vld [vmem:[%s14073_s15 + $0x1fc0] ss:$400 sps:$4 sm:$0xff]   ;;  %v12547_v31 = vld [vmem:[%s14073_s15 + $0x1fc8] ss:$400 sps:$4 sm:$0xff]   ;;  %v12552_v32 = vld [vmem:[%s14073_s15 + $0x1ca4] ss:$400 sps:$4 sm:$0xff]  }
 0x37d   : > { %v8670_v34 = vpop.f32.mrf.mxu0  ;;  %v8711_v37 = vpop.f32.mrf.mxu1  ;;  %v12555_v33 = vld [vmem:[%s14073_s15 + $0x1cac] ss:$400 sps:$4 sm:$0xff]  }
 0x37e   : > { %v14635_v38 = vadd.f32 %v8709_v19, %v8669_v22  ;;  %v12550_v19 = vld [vmem:[%s14073_s15 + $0x1ca0] ss:$400 sps:$4 sm:$0xff]   ;;  %v12553_v22 = vld [vmem:[%s14073_s15 + $0x1ca8] ss:$400 sps:$4 sm:$0xff]   ;;  %v12558_v34 = vld [vmem:[%s14073_s15 + $0x1984] ss:$400 sps:$4 sm:$0xff]  }
 0x37f   : > { %v8671_v40 = vpop.f32.mrf.mxu0  ;;  %v8712_v41 = vpop.f32.mrf.mxu1  ;;  %v12561_v37 = vld [vmem:[%s14073_s15 + $0x198c] ss:$400 sps:$4 sm:$0xff]  }
 0x382   : > { %8827 = vmatpush2.bf16.xpose.msra.mxu0 %v12476_v54  ;;  %8868 = vmatpush2.bf16.xpose.msra.mxu1 %v12479_v39 }
 0x383   : > { %8878 = vmatprep.subr.bf16.mxu0 %v12488_v27  ;;  %8919 = vmatprep.subr.bf16.mxu1 %v12491_v28 }
 0x389   : > { %8829 = vmatmul.mubr.bf16.vlgmr.msra.gmra.mxu0 %v10414_v30  ;;  %8870 = vmatmul.mubr.bf16.vlgmr.msra.gmra.mxu1 %v10416_v42 }
 0x38a   : > { %8879 = vmatpush1.bf16.xpose.msra.mxu0 %v12486_v45  ;;  %8920 = vmatpush1.bf16.xpose.msra.mxu1 %v12489_v46 }
 0x38b   : > { %8880 = vmatprep.subr.bf16.mxu0 %v12494_v47  ;;  %8921 = vmatprep.subr.bf16.mxu1 %v12497_v48  ;;  %v12559_v47 = vld [vmem:[%s14073_s15 + $0x1988] ss:$400 sps:$4 sm:$0xff]  }
 0x38c   : > { %8910 = vmatprep.mubr.bf16.mxu0 %v10419_v49  ;;  %8951 = vmatprep.mubr.bf16.mxu1 %v10421_v35  ;;  %v12568_v35 = vld [vmem:[%s14073_s15 + $0x1674] ss:$400 sps:$4 sm:$0xff]  }
 0x392   : > { %8881 = vmatpush1.bf16.xpose.msra.mxu0 %v12492_v36  ;;  %8922 = vmatpush1.bf16.xpose.msra.mxu1 %v12495_v50  ;;  %v12571_v36 = vld [vmem:[%s14073_s15 + $0x167c] ss:$400 sps:$4 sm:$0xff]   ;;  %v10420_v50 = vcombine.low %v14649_v44, %v14649_v44  ;;  %v12572_v44 = vld [vmem:[%s14073_s15 + $0x1350] ss:$400 sps:$4 sm:$0xff]  }
 0x393   : > { %8882 = vmatprep.subr.bf16.mxu0 %v12500_v52  ;;  %8923 = vmatprep.subr.bf16.mxu1 %v12503_v53  ;;  %v14716_v52 = vld [vmem:[%s14087_s12 + $0x90] sm:$0xff]  ;;  %v14719_v53 = vld [vmem:[%s14087_s12 + $0x98] sm:$0xff] }
 0x39a   : > { %8883 = vmatpush1.bf16.xpose.msra.mxu0 %v12498_v55  ;;  %8924 = vmatpush1.bf16.xpose.msra.mxu1 %v12501_v56  ;;  %v12566_v55 = vld [vmem:[%s14073_s15 + $0x1670] ss:$400 sps:$4 sm:$0xff]   ;;  %v12569_v56 = vld [vmem:[%s14073_s15 + $0x1678] ss:$400 sps:$4 sm:$0xff]  }
 0x39b   : > { %8884 = vmatprep.subr.bf16.mxu0 %v12506_v59  ;;  %8925 = vmatprep.subr.bf16.mxu1 %v12509_v60  ;;  %v12574_v59 = vld [vmem:[%s14073_s15 + $0x1354] ss:$400 sps:$4 sm:$0xff]   ;;  %v12577_v60 = vld [vmem:[%s14073_s15 + $0x135c] ss:$400 sps:$4 sm:$0xff]  }
 0x3a2   : > { %8885 = vmatpush1.bf16.xpose.msra.mxu0 %v12504_v63  ;;  %8926 = vmatpush1.bf16.xpose.msra.mxu1 %v12507_v0  ;;  %v10423_v63 = vcombine.high %v14716_v52, %v14716_v52  ;;  %v12575_v0 = vld [vmem:[%s14073_s15 + $0x1358] ss:$400 sps:$4 sm:$0xff]  }
 0x3a3   : > { %8886 = vmatprep.subr.bf16.mxu0 %v12512_v1  ;;  %8927 = vmatprep.subr.bf16.mxu1 %v12515_v61  ;;  %v12580_v1 = vld [vmem:[%s14073_s15 + $0x1034] ss:$400 sps:$4 sm:$0xff]   ;;  %v12583_v61 = vld [vmem:[%s14073_s15 + $0x103c] ss:$400 sps:$4 sm:$0xff]  }
 0x3aa   : > { %8887 = vmatpush1.bf16.xpose.msra.mxu0 %v12510_v62  ;;  %8928 = vmatpush1.bf16.xpose.msra.mxu1 %v12513_v5  ;;  %v12578_v62 = vld [vmem:[%s14073_s15 + $0x1030] ss:$400 sps:$4 sm:$0xff]   ;;  %v12581_v5 = vld [vmem:[%s14073_s15 + $0x1038] ss:$400 sps:$4 sm:$0xff]  }
 0x3ab   : > { %8888 = vmatprep.subr.bf16.mxu0 %v12518_v6  ;;  %8929 = vmatprep.subr.bf16.mxu1 %v12521_v7  ;;  %v12586_v6 = vld [vmem:[%s14073_s15 + $0xd14] ss:$400 sps:$4 sm:$0xff]   ;;  %v12589_v7 = vld [vmem:[%s14073_s15 + $0xd1c] ss:$400 sps:$4 sm:$0xff]  }
 0x3b2   : > { %8889 = vmatpush1.bf16.xpose.msra.mxu0 %v12516_v51  ;;  %8930 = vmatpush1.bf16.xpose.msra.mxu1 %v12519_v8  ;;  %v12584_v51 = vld [vmem:[%s14073_s15 + $0xd10] ss:$400 sps:$4 sm:$0xff]   ;;  %v12587_v8 = vld [vmem:[%s14073_s15 + $0xd18] ss:$400 sps:$4 sm:$0xff]  }
 0x3b3   : > { %8890 = vmatprep.subr.bf16.mxu0 %v12524_v10  ;;  %8931 = vmatprep.subr.bf16.mxu1 %v12527_v11  ;;  %v12592_v10 = vld [vmem:[%s14073_s15 + $0x9f4] ss:$400 sps:$4 sm:$0xff]   ;;  %v12595_v11 = vld [vmem:[%s14073_s15 + $0x9fc] ss:$400 sps:$4 sm:$0xff]  }
 0x3ba   : > { %8891 = vmatpush1.bf16.xpose.msra.mxu0 %v12522_v12  ;;  %8932 = vmatpush1.bf16.xpose.msra.mxu1 %v12525_v13  ;;  %v12590_v12 = vld [vmem:[%s14073_s15 + $0x9f0] ss:$400 sps:$4 sm:$0xff]   ;;  %v12593_v13 = vld [vmem:[%s14073_s15 + $0x9f8] ss:$400 sps:$4 sm:$0xff]  }
 0x3bb   : > { %8892 = vmatprep.subr.bf16.mxu0 %v12530_v2  ;;  %8933 = vmatprep.subr.bf16.mxu1 %v12533_v15  ;;  %v12598_v2 = vld [vmem:[%s14073_s15 + $0x6d4] ss:$400 sps:$4 sm:$0xff]   ;;  %v12601_v15 = vld [vmem:[%s14073_s15 + $0x6dc] ss:$400 sps:$4 sm:$0xff]  }
 0x3c2   : > { %8893 = vmatpush1.bf16.xpose.msra.mxu0 %v12528_v18  ;;  %8934 = vmatpush1.bf16.xpose.msra.mxu1 %v12531_v9  ;;  %v12604_v18 = vld [vmem:[%s14073_s15 + $0x3b4] ss:$400 sps:$4 sm:$0xff]   ;;  %v12607_v9 = vld [vmem:[%s14073_s15 + $0x3bc] ss:$400 sps:$4 sm:$0xff]  }
 0x3c3   : > { %8900 = vmatprep.subr.bf16.mxu0 %v11719_v4  ;;  %8941 = vmatprep.subr.bf16.mxu1 %v11721_v21  ;;  %v12602_v4 = vld [vmem:[%s14073_s15 + $0x3b0] ss:$400 sps:$4 sm:$0xff]   ;;  %v12605_v21 = vld [vmem:[%s14073_s15 + $0x3b8] ss:$400 sps:$4 sm:$0xff]  }
 0x3ca   : > { %8901 = vmatpush2.bf16.xpose.msra.mxu0 %v11718_v57  ;;  %8942 = vmatpush2.bf16.xpose.msra.mxu1 %v11720_v23  ;;  %v12610_v57 = vld [vmem:[%s14073_s15 + $0x94] ss:$400 sps:$4 sm:$0xff]   ;;  %v12613_v23 = vld [vmem:[%s14073_s15 + $0x9c] ss:$400 sps:$4 sm:$0xff]  }
 0x3cb   : > { %8902 = vmatprep.subr.bf16.mxu0 %v12540_v24  ;;  %8943 = vmatprep.subr.bf16.mxu1 %v12543_v25  ;;  %v1490_v24 = vld [vmem:[%s14073_s15 + $0x2610] sm:$0xff]  ;;  %v1491_v25 = vld [vmem:[%s14073_s15 + $0x2618] sm:$0xff] }
 0x3d2   : > { %8903 = vmatpush2.bf16.xpose.msra.mxu0 %v12538_v58  ;;  %8944 = vmatpush2.bf16.xpose.msra.mxu1 %v12541_v14  ;;  %v12608_v58 = vld [vmem:[%s14073_s15 + $0x90] ss:$400 sps:$4 sm:$0xff]   ;;  %v12611_v14 = vld [vmem:[%s14073_s15 + $0x98] ss:$400 sps:$4 sm:$0xff]  }
 0x3d3   : > { %8904 = vmatprep.subr.bf16.mxu0 %v12546_v26  ;;  %8945 = vmatprep.subr.bf16.mxu1 %v12549_v29  ;;  %v11723_v26 = vcombine.high %v1490_v24, %v1490_v24  ;;  %v11725_v29 = vcombine.high %v1491_v25, %v1491_v25 }
 0x3da   : > { %8905 = vmatpush2.bf16.xpose.msra.mxu0 %v12544_v3  ;;  %8946 = vmatpush2.bf16.xpose.msra.mxu1 %v12547_v31  ;;  %v11722_v3 = vcombine.low %v1490_v24, %v1490_v24  ;;  %v11724_v31 = vcombine.low %v1491_v25, %v1491_v25  ;;  %v12676_v24 = vld [vmem:[%s14073_s15 + $0x6e0] ss:$400 sps:$4 sm:$0xff]   ;;  %v12679_v25 = vld [vmem:[%s14073_s15 + $0x6e8] ss:$400 sps:$4 sm:$0xff]  }
 0x3db   : > { %8906 = vmatprep.subr.bf16.mxu0 %v12552_v32  ;;  %8947 = vmatprep.subr.bf16.mxu1 %v12555_v33  ;;  %v12620_v32 = vld [vmem:[%s14073_s15 + $0x22f4] ss:$400 sps:$4 sm:$0xff]   ;;  %v12623_v33 = vld [vmem:[%s14073_s15 + $0x22fc] ss:$400 sps:$4 sm:$0xff]  }
 0x3e1   : > { %v8748_v54 = vpop.f32.mrf.mxu0  ;;  %v8789_v39 = vpop.f32.mrf.mxu1 }
 0x3e2   : > { %v8749_v40 = vadd.f32 %v8748_v54, %v14632_v20  ;;  %8907 = vmatpush2.bf16.xpose.msra.mxu0 %v12550_v19  ;;  %8948 = vmatpush2.bf16.xpose.msra.mxu1 %v12553_v22  ;;  %v12556_v20 = vld [vmem:[%s14073_s15 + $0x1980] ss:$400 sps:$4 sm:$0xff]   ;;  %v12621_v22 = vld [vmem:[%s14073_s15 + $0x22f8] ss:$400 sps:$4 sm:$0xff]  }
 0x3e3   : > { %v8750_v41 = vpop.f32.mrf.mxu0  ;;  %v8791_v27 = vpop.f32.mrf.mxu1  ;;  %8908 = vmatprep.subr.bf16.mxu0 %v12558_v34  ;;  %8949 = vmatprep.subr.bf16.mxu1 %v12561_v37  ;;  %v12618_v19 = vld [vmem:[%s14073_s15 + $0x22f0] ss:$400 sps:$4 sm:$0xff]   ;;  %v12626_v34 = vld [vmem:[%s14073_s15 + $0x1fd4] ss:$400 sps:$4 sm:$0xff]   ;;  %v12629_v37 = vld [vmem:[%s14073_s15 + $0x1fdc] ss:$400 sps:$4 sm:$0xff]  }
 0x3e4   : > { %v14702_v28 = vadd.f32 %v8789_v39, %v8749_v40  ;;  %v8751_v30 = vadd.f32 %v8750_v41, %v14635_v38  ;;  %v10418_v38 = vcombine.low %v14646_v43, %v14646_v43  ;;  %v10425_v43 = vcombine.high %v14719_v53, %v14719_v53  ;;  %v12624_v54 = vld [vmem:[%s14073_s15 + $0x1fd0] ss:$400 sps:$4 sm:$0xff]   ;;  %v12627_v39 = vld [vmem:[%s14073_s15 + $0x1fd8] ss:$400 sps:$4 sm:$0xff]   ;;  %v12632_v40 = vld [vmem:[%s14073_s15 + $0x1cb4] ss:$400 sps:$4 sm:$0xff]  }
 0x3e5   : > { %v8752_v42 = vpop.f32.mrf.mxu0  ;;  %v8793_v45 = vpop.f32.mrf.mxu1  ;;  %v12635_v41 = vld [vmem:[%s14073_s15 + $0x1cbc] ss:$400 sps:$4 sm:$0xff]  }
 0x3e6   : > { %v14705_v46 = vadd.f32 %v8791_v27, %v8751_v30  ;;  %v12630_v27 = vld [vmem:[%s14073_s15 + $0x1cb0] ss:$400 sps:$4 sm:$0xff]   ;;  %v12633_v30 = vld [vmem:[%s14073_s15 + $0x1cb8] ss:$400 sps:$4 sm:$0xff]   ;;  %v12638_v42 = vld [vmem:[%s14073_s15 + $0x1994] ss:$400 sps:$4 sm:$0xff]  }
 0x3e7   : > { %v8753_v48 = vpop.f32.mrf.mxu0  ;;  %v8794_v49 = vpop.f32.mrf.mxu1  ;;  %v12641_v45 = vld [vmem:[%s14073_s15 + $0x199c] ss:$400 sps:$4 sm:$0xff]  }
 0x3ea   : > { %8909 = vmatpush2.bf16.xpose.msra.mxu0 %v12556_v20  ;;  %8950 = vmatpush2.bf16.xpose.msra.mxu1 %v12559_v47 }
 0x3eb   : > { %8960 = vmatprep.subr.bf16.mxu0 %v12568_v35  ;;  %9001 = vmatprep.subr.bf16.mxu1 %v12571_v36 }
 0x3f1   : > { %8911 = vmatmul.mubr.bf16.vlgmr.msra.gmra.mxu0 %v10418_v38  ;;  %8952 = vmatmul.mubr.bf16.vlgmr.msra.gmra.mxu1 %v10420_v50 }
 0x3f2   : > { %8961 = vmatpush1.bf16.xpose.msra.mxu0 %v12566_v55  ;;  %9002 = vmatpush1.bf16.xpose.msra.mxu1 %v12569_v56 }
 0x3f3   : > { %8962 = vmatprep.subr.bf16.mxu0 %v12574_v59  ;;  %9003 = vmatprep.subr.bf16.mxu1 %v12577_v60  ;;  %v12639_v59 = vld [vmem:[%s14073_s15 + $0x1998] ss:$400 sps:$4 sm:$0xff]  }
 0x3f4   : > { %8992 = vmatprep.mubr.bf16.mxu0 %v10423_v63  ;;  %9033 = vmatprep.mubr.bf16.mxu1 %v10425_v43  ;;  %v12648_v43 = vld [vmem:[%s14073_s15 + $0x1684] ss:$400 sps:$4 sm:$0xff]  }
 0x3fa   : > { %8963 = vmatpush1.bf16.xpose.msra.mxu0 %v12572_v44  ;;  %9004 = vmatpush1.bf16.xpose.msra.mxu1 %v12575_v0  ;;  %v12651_v44 = vld [vmem:[%s14073_s15 + $0x168c] ss:$400 sps:$4 sm:$0xff]   ;;  %v10424_v0 = vcombine.low %v14719_v53, %v14719_v53  ;;  %v12652_v53 = vld [vmem:[%s14073_s15 + $0x1360] ss:$400 sps:$4 sm:$0xff]  }
 0x3fb   : > { %8964 = vmatprep.subr.bf16.mxu0 %v12580_v1  ;;  %9005 = vmatprep.subr.bf16.mxu1 %v12583_v61  ;;  %v14786_v1 = vld [vmem:[%s14087_s12 + $0xa0] sm:$0xff]  ;;  %v14789_v61 = vld [vmem:[%s14087_s12 + $0xa8] sm:$0xff] }
 0x402   : > { %8965 = vmatpush1.bf16.xpose.msra.mxu0 %v12578_v62  ;;  %9006 = vmatpush1.bf16.xpose.msra.mxu1 %v12581_v5  ;;  %v12646_v62 = vld [vmem:[%s14073_s15 + $0x1680] ss:$400 sps:$4 sm:$0xff]   ;;  %v12649_v5 = vld [vmem:[%s14073_s15 + $0x1688] ss:$400 sps:$4 sm:$0xff]  }
 0x403   : > { %8966 = vmatprep.subr.bf16.mxu0 %v12586_v6  ;;  %9007 = vmatprep.subr.bf16.mxu1 %v12589_v7  ;;  %v12654_v6 = vld [vmem:[%s14073_s15 + $0x1364] ss:$400 sps:$4 sm:$0xff]   ;;  %v12657_v7 = vld [vmem:[%s14073_s15 + $0x136c] ss:$400 sps:$4 sm:$0xff]  }
 0x40a   : > { %8967 = vmatpush1.bf16.xpose.msra.mxu0 %v12584_v51  ;;  %9008 = vmatpush1.bf16.xpose.msra.mxu1 %v12587_v8  ;;  %v10427_v51 = vcombine.high %v14786_v1, %v14786_v1  ;;  %v12655_v8 = vld [vmem:[%s14073_s15 + $0x1368] ss:$400 sps:$4 sm:$0xff]  }
 0x40b   : > { %8968 = vmatprep.subr.bf16.mxu0 %v12592_v10  ;;  %9009 = vmatprep.subr.bf16.mxu1 %v12595_v11  ;;  %v12660_v10 = vld [vmem:[%s14073_s15 + $0x1044] ss:$400 sps:$4 sm:$0xff]   ;;  %v12663_v11 = vld [vmem:[%s14073_s15 + $0x104c] ss:$400 sps:$4 sm:$0xff]  }
 0x412   : > { %8969 = vmatpush1.bf16.xpose.msra.mxu0 %v12590_v12  ;;  %9010 = vmatpush1.bf16.xpose.msra.mxu1 %v12593_v13  ;;  %v12658_v12 = vld [vmem:[%s14073_s15 + $0x1040] ss:$400 sps:$4 sm:$0xff]   ;;  %v12661_v13 = vld [vmem:[%s14073_s15 + $0x1048] ss:$400 sps:$4 sm:$0xff]  }
 0x413   : > { %8970 = vmatprep.subr.bf16.mxu0 %v12598_v2  ;;  %9011 = vmatprep.subr.bf16.mxu1 %v12601_v15  ;;  %v12666_v2 = vld [vmem:[%s14073_s15 + $0xd24] ss:$400 sps:$4 sm:$0xff]   ;;  %v12669_v15 = vld [vmem:[%s14073_s15 + $0xd2c] ss:$400 sps:$4 sm:$0xff]  }
 0x41a   : > { %8971 = vmatpush1.bf16.xpose.msra.mxu0 %v12596_v16  ;;  %9012 = vmatpush1.bf16.xpose.msra.mxu1 %v12599_v17  ;;  %v12664_v16 = vld [vmem:[%s14073_s15 + $0xd20] ss:$400 sps:$4 sm:$0xff]   ;;  %v12667_v17 = vld [vmem:[%s14073_s15 + $0xd28] ss:$400 sps:$4 sm:$0xff]  }
 0x41b   : > { %8972 = vmatprep.subr.bf16.mxu0 %v12604_v18  ;;  %9013 = vmatprep.subr.bf16.mxu1 %v12607_v9  ;;  %v12672_v18 = vld [vmem:[%s14073_s15 + $0xa04] ss:$400 sps:$4 sm:$0xff]   ;;  %v12675_v9 = vld [vmem:[%s14073_s15 + $0xa0c] ss:$400 sps:$4 sm:$0xff]  }
 0x422   : > { %8973 = vmatpush1.bf16.xpose.msra.mxu0 %v12602_v4  ;;  %9014 = vmatpush1.bf16.xpose.msra.mxu1 %v12605_v21  ;;  %v12670_v4 = vld [vmem:[%s14073_s15 + $0xa00] ss:$400 sps:$4 sm:$0xff]   ;;  %v12673_v21 = vld [vmem:[%s14073_s15 + $0xa08] ss:$400 sps:$4 sm:$0xff]  }
 0x423   : > { %8974 = vmatprep.subr.bf16.mxu0 %v12610_v57  ;;  %9015 = vmatprep.subr.bf16.mxu1 %v12613_v23  ;;  %v12678_v57 = vld [vmem:[%s14073_s15 + $0x6e4] ss:$400 sps:$4 sm:$0xff]   ;;  %v12681_v23 = vld [vmem:[%s14073_s15 + $0x6ec] ss:$400 sps:$4 sm:$0xff]  }
 0x42a   : > { %8975 = vmatpush1.bf16.xpose.msra.mxu0 %v12608_v58  ;;  %9016 = vmatpush1.bf16.xpose.msra.mxu1 %v12611_v14  ;;  %v12684_v58 = vld [vmem:[%s14073_s15 + $0x3c4] ss:$400 sps:$4 sm:$0xff]   ;;  %v12687_v14 = vld [vmem:[%s14073_s15 + $0x3cc] ss:$400 sps:$4 sm:$0xff]  }
 0x42b   : > { %8982 = vmatprep.subr.bf16.mxu0 %v11723_v26  ;;  %9023 = vmatprep.subr.bf16.mxu1 %v11725_v29  ;;  %v12682_v26 = vld [vmem:[%s14073_s15 + $0x3c0] ss:$400 sps:$4 sm:$0xff]   ;;  %v12685_v29 = vld [vmem:[%s14073_s15 + $0x3c8] ss:$400 sps:$4 sm:$0xff]  }
 0x432   : > { %8983 = vmatpush2.bf16.xpose.msra.mxu0 %v11722_v3  ;;  %9024 = vmatpush2.bf16.xpose.msra.mxu1 %v11724_v31  ;;  %v12690_v3 = vld [vmem:[%s14073_s15 + $0xa4] ss:$400 sps:$4 sm:$0xff]   ;;  %v12693_v31 = vld [vmem:[%s14073_s15 + $0xac] ss:$400 sps:$4 sm:$0xff]  }
 0x433   : > { %8984 = vmatprep.subr.bf16.mxu0 %v12620_v32  ;;  %9025 = vmatprep.subr.bf16.mxu1 %v12623_v33  ;;  %v1492_v32 = vld [vmem:[%s14073_s15 + $0x2620] sm:$0xff]  ;;  %v1493_v33 = vld [vmem:[%s14073_s15 + $0x2628] sm:$0xff] }
 0x43a   : > { %8985 = vmatpush2.bf16.xpose.msra.mxu0 %v12618_v19  ;;  %9026 = vmatpush2.bf16.xpose.msra.mxu1 %v12621_v22  ;;  %v12688_v19 = vld [vmem:[%s14073_s15 + $0xa0] ss:$400 sps:$4 sm:$0xff]   ;;  %v12691_v22 = vld [vmem:[%s14073_s15 + $0xa8] ss:$400 sps:$4 sm:$0xff]  }
 0x43b   : > { %8986 = vmatprep.subr.bf16.mxu0 %v12626_v34  ;;  %9027 = vmatprep.subr.bf16.mxu1 %v12629_v37  ;;  %v11727_v34 = vcombine.high %v1492_v32, %v1492_v32  ;;  %v11729_v37 = vcombine.high %v1493_v33, %v1493_v33 }
 0x442   : > { %8987 = vmatpush2.bf16.xpose.msra.mxu0 %v12624_v54  ;;  %9028 = vmatpush2.bf16.xpose.msra.mxu1 %v12627_v39  ;;  %v11726_v54 = vcombine.low %v1492_v32, %v1492_v32  ;;  %v11728_v39 = vcombine.low %v1493_v33, %v1493_v33  ;;  %v12756_v32 = vld [vmem:[%s14073_s15 + $0x6f0] ss:$400 sps:$4 sm:$0xff]   ;;  %v12759_v33 = vld [vmem:[%s14073_s15 + $0x6f8] ss:$400 sps:$4 sm:$0xff]  }
 0x443   : > { %8988 = vmatprep.subr.bf16.mxu0 %v12632_v40  ;;  %9029 = vmatprep.subr.bf16.mxu1 %v12635_v41  ;;  %v12700_v40 = vld [vmem:[%s14073_s15 + $0x2304] ss:$400 sps:$4 sm:$0xff]   ;;  %v12703_v41 = vld [vmem:[%s14073_s15 + $0x230c] ss:$400 sps:$4 sm:$0xff]  }
 0x449   : > { %v8830_v20 = vpop.f32.mrf.mxu0  ;;  %v8871_v47 = vpop.f32.mrf.mxu1 }
 0x44a   : > { %v8831_v48 = vadd.f32 %v8830_v20, %v14702_v28  ;;  %8989 = vmatpush2.bf16.xpose.msra.mxu0 %v12630_v27  ;;  %9030 = vmatpush2.bf16.xpose.msra.mxu1 %v12633_v30  ;;  %v12636_v28 = vld [vmem:[%s14073_s15 + $0x1990] ss:$400 sps:$4 sm:$0xff]   ;;  %v12701_v30 = vld [vmem:[%s14073_s15 + $0x2308] ss:$400 sps:$4 sm:$0xff]  }
 0x44b   : > { %v8832_v49 = vpop.f32.mrf.mxu0  ;;  %v8873_v35 = vpop.f32.mrf.mxu1  ;;  %8990 = vmatprep.subr.bf16.mxu0 %v12638_v42  ;;  %9031 = vmatprep.subr.bf16.mxu1 %v12641_v45  ;;  %v12698_v27 = vld [vmem:[%s14073_s15 + $0x2300] ss:$400 sps:$4 sm:$0xff]   ;;  %v12706_v42 = vld [vmem:[%s14073_s15 + $0x1fe4] ss:$400 sps:$4 sm:$0xff]   ;;  %v12709_v45 = vld [vmem:[%s14073_s15 + $0x1fec] ss:$400 sps:$4 sm:$0xff]  }
 0x44c   : > { %v14772_v36 = vadd.f32 %v8871_v47, %v8831_v48  ;;  %v8833_v38 = vadd.f32 %v8832_v49, %v14705_v46  ;;  %v10422_v46 = vcombine.low %v14716_v52, %v14716_v52  ;;  %v10429_v52 = vcombine.high %v14789_v61, %v14789_v61  ;;  %v12704_v20 = vld [vmem:[%s14073_s15 + $0x1fe0] ss:$400 sps:$4 sm:$0xff]   ;;  %v12707_v47 = vld [vmem:[%s14073_s15 + $0x1fe8] ss:$400 sps:$4 sm:$0xff]   ;;  %v12712_v48 = vld [vmem:[%s14073_s15 + $0x1cc4] ss:$400 sps:$4 sm:$0xff]  }
 0x44d   : > { %v8834_v50 = vpop.f32.mrf.mxu0  ;;  %v8875_v55 = vpop.f32.mrf.mxu1  ;;  %v12715_v49 = vld [vmem:[%s14073_s15 + $0x1ccc] ss:$400 sps:$4 sm:$0xff]  }
 0x44e   : > { %v14775_v56 = vadd.f32 %v8873_v35, %v8833_v38  ;;  %v12710_v35 = vld [vmem:[%s14073_s15 + $0x1cc0] ss:$400 sps:$4 sm:$0xff]   ;;  %v12713_v38 = vld [vmem:[%s14073_s15 + $0x1cc8] ss:$400 sps:$4 sm:$0xff]   ;;  %v12718_v50 = vld [vmem:[%s14073_s15 + $0x19a4] ss:$400 sps:$4 sm:$0xff]  }
 0x44f   : > { %v8835_v60 = vpop.f32.mrf.mxu0  ;;  %v8876_v63 = vpop.f32.mrf.mxu1  ;;  %v12721_v55 = vld [vmem:[%s14073_s15 + $0x19ac] ss:$400 sps:$4 sm:$0xff]  }
 0x452   : > { %8991 = vmatpush2.bf16.xpose.msra.mxu0 %v12636_v28  ;;  %9032 = vmatpush2.bf16.xpose.msra.mxu1 %v12639_v59 }
 0x453   : > { %9042 = vmatprep.subr.bf16.mxu0 %v12648_v43  ;;  %9083 = vmatprep.subr.bf16.mxu1 %v12651_v44 }
 0x459   : > { %8993 = vmatmul.mubr.bf16.vlgmr.msra.gmra.mxu0 %v10422_v46  ;;  %9034 = vmatmul.mubr.bf16.vlgmr.msra.gmra.mxu1 %v10424_v0 }
 0x45a   : > { %9043 = vmatpush1.bf16.xpose.msra.mxu0 %v12646_v62  ;;  %9084 = vmatpush1.bf16.xpose.msra.mxu1 %v12649_v5 }
 0x45b   : > { %9044 = vmatprep.subr.bf16.mxu0 %v12654_v6  ;;  %9085 = vmatprep.subr.bf16.mxu1 %v12657_v7  ;;  %v12719_v6 = vld [vmem:[%s14073_s15 + $0x19a8] ss:$400 sps:$4 sm:$0xff]  }
 0x45c   : > { %9074 = vmatprep.mubr.bf16.mxu0 %v10427_v51  ;;  %9115 = vmatprep.mubr.bf16.mxu1 %v10429_v52  ;;  %v12728_v52 = vld [vmem:[%s14073_s15 + $0x1694] ss:$400 sps:$4 sm:$0xff]  }
 0x462   : > { %9045 = vmatpush1.bf16.xpose.msra.mxu0 %v12652_v53  ;;  %9086 = vmatpush1.bf16.xpose.msra.mxu1 %v12655_v8  ;;  %v12731_v53 = vld [vmem:[%s14073_s15 + $0x169c] ss:$400 sps:$4 sm:$0xff]   ;;  %v10428_v8 = vcombine.low %v14789_v61, %v14789_v61  ;;  %v12732_v61 = vld [vmem:[%s14073_s15 + $0x1370] ss:$400 sps:$4 sm:$0xff]  }
 0x463   : > { %9046 = vmatprep.subr.bf16.mxu0 %v12660_v10  ;;  %9087 = vmatprep.subr.bf16.mxu1 %v12663_v11  ;;  %v14856_v10 = vld [vmem:[%s14087_s12 + $0xb0] sm:$0xff]  ;;  %v14859_v11 = vld [vmem:[%s14087_s12 + $0xb8] sm:$0xff] }
 0x46a   : > { %9047 = vmatpush1.bf16.xpose.msra.mxu0 %v12658_v12  ;;  %9088 = vmatpush1.bf16.xpose.msra.mxu1 %v12661_v13  ;;  %v12726_v12 = vld [vmem:[%s14073_s15 + $0x1690] ss:$400 sps:$4 sm:$0xff]   ;;  %v12729_v13 = vld [vmem:[%s14073_s15 + $0x1698] ss:$400 sps:$4 sm:$0xff]  }
 0x46b   : > { %9048 = vmatprep.subr.bf16.mxu0 %v12666_v2  ;;  %9089 = vmatprep.subr.bf16.mxu1 %v12669_v15  ;;  %v12734_v2 = vld [vmem:[%s14073_s15 + $0x1374] ss:$400 sps:$4 sm:$0xff]   ;;  %v12737_v15 = vld [vmem:[%s14073_s15 + $0x137c] ss:$400 sps:$4 sm:$0xff]  }
 0x472   : > { %9049 = vmatpush1.bf16.xpose.msra.mxu0 %v12664_v16  ;;  %9090 = vmatpush1.bf16.xpose.msra.mxu1 %v12667_v17  ;;  %v10431_v16 = vcombine.high %v14856_v10, %v14856_v10  ;;  %v12735_v17 = vld [vmem:[%s14073_s15 + $0x1378] ss:$400 sps:$4 sm:$0xff]  }
 0x473   : > { %9050 = vmatprep.subr.bf16.mxu0 %v12672_v18  ;;  %9091 = vmatprep.subr.bf16.mxu1 %v12675_v9  ;;  %v12740_v18 = vld [vmem:[%s14073_s15 + $0x1054] ss:$400 sps:$4 sm:$0xff]   ;;  %v12743_v9 = vld [vmem:[%s14073_s15 + $0x105c] ss:$400 sps:$4 sm:$0xff]  }
 0x47a   : > { %9051 = vmatpush1.bf16.xpose.msra.mxu0 %v12670_v4  ;;  %9092 = vmatpush1.bf16.xpose.msra.mxu1 %v12673_v21  ;;  %v12738_v4 = vld [vmem:[%s14073_s15 + $0x1050] ss:$400 sps:$4 sm:$0xff]   ;;  %v12741_v21 = vld [vmem:[%s14073_s15 + $0x1058] ss:$400 sps:$4 sm:$0xff]  }
 0x47b   : > { %9052 = vmatprep.subr.bf16.mxu0 %v12678_v57  ;;  %9093 = vmatprep.subr.bf16.mxu1 %v12681_v23  ;;  %v12746_v57 = vld [vmem:[%s14073_s15 + $0xd34] ss:$400 sps:$4 sm:$0xff]   ;;  %v12749_v23 = vld [vmem:[%s14073_s15 + $0xd3c] ss:$400 sps:$4 sm:$0xff]  }
 0x482   : > { %9053 = vmatpush1.bf16.xpose.msra.mxu0 %v12676_v24  ;;  %9094 = vmatpush1.bf16.xpose.msra.mxu1 %v12679_v25  ;;  %v12744_v24 = vld [vmem:[%s14073_s15 + $0xd30] ss:$400 sps:$4 sm:$0xff]   ;;  %v12747_v25 = vld [vmem:[%s14073_s15 + $0xd38] ss:$400 sps:$4 sm:$0xff]  }
 0x483   : > { %9054 = vmatprep.subr.bf16.mxu0 %v12684_v58  ;;  %9095 = vmatprep.subr.bf16.mxu1 %v12687_v14  ;;  %v12752_v58 = vld [vmem:[%s14073_s15 + $0xa14] ss:$400 sps:$4 sm:$0xff]   ;;  %v12755_v14 = vld [vmem:[%s14073_s15 + $0xa1c] ss:$400 sps:$4 sm:$0xff]  }
 0x48a   : > { %9055 = vmatpush1.bf16.xpose.msra.mxu0 %v12682_v26  ;;  %9096 = vmatpush1.bf16.xpose.msra.mxu1 %v12685_v29  ;;  %v12750_v26 = vld [vmem:[%s14073_s15 + $0xa10] ss:$400 sps:$4 sm:$0xff]   ;;  %v12753_v29 = vld [vmem:[%s14073_s15 + $0xa18] ss:$400 sps:$4 sm:$0xff]  }
 0x48b   : > { %9056 = vmatprep.subr.bf16.mxu0 %v12690_v3  ;;  %9097 = vmatprep.subr.bf16.mxu1 %v12693_v31  ;;  %v12758_v3 = vld [vmem:[%s14073_s15 + $0x6f4] ss:$400 sps:$4 sm:$0xff]   ;;  %v12761_v31 = vld [vmem:[%s14073_s15 + $0x6fc] ss:$400 sps:$4 sm:$0xff]  }
 0x492   : > { %9057 = vmatpush1.bf16.xpose.msra.mxu0 %v12688_v19  ;;  %9098 = vmatpush1.bf16.xpose.msra.mxu1 %v12691_v22  ;;  %v12764_v19 = vld [vmem:[%s14073_s15 + $0x3d4] ss:$400 sps:$4 sm:$0xff]   ;;  %v12767_v22 = vld [vmem:[%s14073_s15 + $0x3dc] ss:$400 sps:$4 sm:$0xff]  }
 0x493   : > { %9064 = vmatprep.subr.bf16.mxu0 %v11727_v34  ;;  %9105 = vmatprep.subr.bf16.mxu1 %v11729_v37  ;;  %v12762_v34 = vld [vmem:[%s14073_s15 + $0x3d0] ss:$400 sps:$4 sm:$0xff]   ;;  %v12765_v37 = vld [vmem:[%s14073_s15 + $0x3d8] ss:$400 sps:$4 sm:$0xff]  }
 0x49a   : > { %9065 = vmatpush2.bf16.xpose.msra.mxu0 %v11726_v54  ;;  %9106 = vmatpush2.bf16.xpose.msra.mxu1 %v11728_v39  ;;  %v12770_v54 = vld [vmem:[%s14073_s15 + $0xb4] ss:$400 sps:$4 sm:$0xff]   ;;  %v12773_v39 = vld [vmem:[%s14073_s15 + $0xbc] ss:$400 sps:$4 sm:$0xff]  }
 0x49b   : > { %9066 = vmatprep.subr.bf16.mxu0 %v12700_v40  ;;  %9107 = vmatprep.subr.bf16.mxu1 %v12703_v41  ;;  %v1494_v40 = vld [vmem:[%s14073_s15 + $0x2630] sm:$0xff]  ;;  %v1495_v41 = vld [vmem:[%s14073_s15 + $0x2638] sm:$0xff] }
 0x4a2   : > { %9067 = vmatpush2.bf16.xpose.msra.mxu0 %v12698_v27  ;;  %9108 = vmatpush2.bf16.xpose.msra.mxu1 %v12701_v30  ;;  %v12768_v27 = vld [vmem:[%s14073_s15 + $0xb0] ss:$400 sps:$4 sm:$0xff]   ;;  %v12771_v30 = vld [vmem:[%s14073_s15 + $0xb8] ss:$400 sps:$4 sm:$0xff]  }
 0x4a3   : > { %9068 = vmatprep.subr.bf16.mxu0 %v12706_v42  ;;  %9109 = vmatprep.subr.bf16.mxu1 %v12709_v45  ;;  %v11731_v42 = vcombine.high %v1494_v40, %v1494_v40  ;;  %v11733_v45 = vcombine.high %v1495_v41, %v1495_v41 }
 0x4aa   : > { %9069 = vmatpush2.bf16.xpose.msra.mxu0 %v12704_v20  ;;  %9110 = vmatpush2.bf16.xpose.msra.mxu1 %v12707_v47  ;;  %v11730_v20 = vcombine.low %v1494_v40, %v1494_v40  ;;  %v11732_v47 = vcombine.low %v1495_v41, %v1495_v41  ;;  %v12836_v40 = vld [vmem:[%s14073_s15 + $0x700] ss:$400 sps:$4 sm:$0xff]   ;;  %v12839_v41 = vld [vmem:[%s14073_s15 + $0x708] ss:$400 sps:$4 sm:$0xff]  }
 0x4ab   : > { %9070 = vmatprep.subr.bf16.mxu0 %v12712_v48  ;;  %9111 = vmatprep.subr.bf16.mxu1 %v12715_v49  ;;  %v12780_v48 = vld [vmem:[%s14073_s15 + $0x2314] ss:$400 sps:$4 sm:$0xff]   ;;  %v12783_v49 = vld [vmem:[%s14073_s15 + $0x231c] ss:$400 sps:$4 sm:$0xff]  }
 0x4b1   : > { %v8912_v28 = vpop.f32.mrf.mxu0  ;;  %v8953_v59 = vpop.f32.mrf.mxu1 }
 0x4b2   : > { %v8913_v60 = vadd.f32 %v8912_v28, %v14772_v36  ;;  %9071 = vmatpush2.bf16.xpose.msra.mxu0 %v12710_v35  ;;  %9112 = vmatpush2.bf16.xpose.msra.mxu1 %v12713_v38  ;;  %v12716_v36 = vld [vmem:[%s14073_s15 + $0x19a0] ss:$400 sps:$4 sm:$0xff]   ;;  %v12781_v38 = vld [vmem:[%s14073_s15 + $0x2318] ss:$400 sps:$4 sm:$0xff]  }
 0x4b3   : > { %v8914_v63 = vpop.f32.mrf.mxu0  ;;  %v8955_v43 = vpop.f32.mrf.mxu1  ;;  %9072 = vmatprep.subr.bf16.mxu0 %v12718_v50  ;;  %9113 = vmatprep.subr.bf16.mxu1 %v12721_v55  ;;  %v12778_v35 = vld [vmem:[%s14073_s15 + $0x2310] ss:$400 sps:$4 sm:$0xff]   ;;  %v12786_v50 = vld [vmem:[%s14073_s15 + $0x1ff4] ss:$400 sps:$4 sm:$0xff]   ;;  %v12789_v55 = vld [vmem:[%s14073_s15 + $0x1ffc] ss:$400 sps:$4 sm:$0xff]  }
 0x4b4   : > { %v14842_v44 = vadd.f32 %v8953_v59, %v8913_v60  ;;  %v8915_v46 = vadd.f32 %v8914_v63, %v14775_v56  ;;  %v10426_v56 = vcombine.low %v14786_v1, %v14786_v1  ;;  %v10433_v1 = vcombine.high %v14859_v11, %v14859_v11  ;;  %v12784_v28 = vld [vmem:[%s14073_s15 + $0x1ff0] ss:$400 sps:$4 sm:$0xff]   ;;  %v12787_v59 = vld [vmem:[%s14073_s15 + $0x1ff8] ss:$400 sps:$4 sm:$0xff]   ;;  %v12792_v60 = vld [vmem:[%s14073_s15 + $0x1cd4] ss:$400 sps:$4 sm:$0xff]  }
 0x4b5   : > { %v8916_v0 = vpop.f32.mrf.mxu0  ;;  %v8957_v62 = vpop.f32.mrf.mxu1  ;;  %v12795_v63 = vld [vmem:[%s14073_s15 + $0x1cdc] ss:$400 sps:$4 sm:$0xff]  }
 0x4b6   : > { %v14845_v5 = vadd.f32 %v8955_v43, %v8915_v46  ;;  %v12790_v43 = vld [vmem:[%s14073_s15 + $0x1cd0] ss:$400 sps:$4 sm:$0xff]   ;;  %v12793_v46 = vld [vmem:[%s14073_s15 + $0x1cd8] ss:$400 sps:$4 sm:$0xff]   ;;  %v12798_v0 = vld [vmem:[%s14073_s15 + $0x19b4] ss:$400 sps:$4 sm:$0xff]  }
 0x4b7   : > { %v8917_v7 = vpop.f32.mrf.mxu0  ;;  %v8958_v51 = vpop.f32.mrf.mxu1  ;;  %v12801_v62 = vld [vmem:[%s14073_s15 + $0x19bc] ss:$400 sps:$4 sm:$0xff]  }
 0x4ba   : > { %9073 = vmatpush2.bf16.xpose.msra.mxu0 %v12716_v36  ;;  %9114 = vmatpush2.bf16.xpose.msra.mxu1 %v12719_v6 }
 0x4bb   : > { %9124 = vmatprep.subr.bf16.mxu0 %v12728_v52  ;;  %9165 = vmatprep.subr.bf16.mxu1 %v12731_v53 }
 0x4c1   : > { %9075 = vmatmul.mubr.bf16.vlgmr.msra.gmra.mxu0 %v10426_v56  ;;  %9116 = vmatmul.mubr.bf16.vlgmr.msra.gmra.mxu1 %v10428_v8 }
 0x4c2   : > { %9125 = vmatpush1.bf16.xpose.msra.mxu0 %v12726_v12  ;;  %9166 = vmatpush1.bf16.xpose.msra.mxu1 %v12729_v13 }
 0x4c3   : > { %9126 = vmatprep.subr.bf16.mxu0 %v12734_v2  ;;  %9167 = vmatprep.subr.bf16.mxu1 %v12737_v15  ;;  %v12799_v2 = vld [vmem:[%s14073_s15 + $0x19b8] ss:$400 sps:$4 sm:$0xff]  }
 0x4c4   : > { %9156 = vmatprep.mubr.bf16.mxu0 %v10431_v16  ;;  %9197 = vmatprep.mubr.bf16.mxu1 %v10433_v1  ;;  %v12808_v1 = vld [vmem:[%s14073_s15 + $0x16a4] ss:$400 sps:$4 sm:$0xff]  }
 0x4ca   : > { %9127 = vmatpush1.bf16.xpose.msra.mxu0 %v12732_v61  ;;  %9168 = vmatpush1.bf16.xpose.msra.mxu1 %v12735_v17  ;;  %v12811_v61 = vld [vmem:[%s14073_s15 + $0x16ac] ss:$400 sps:$4 sm:$0xff]   ;;  %v10432_v17 = vcombine.low %v14859_v11, %v14859_v11  ;;  %v12812_v11 = vld [vmem:[%s14073_s15 + $0x1380] ss:$400 sps:$4 sm:$0xff]  }
 0x4cb   : > { %9128 = vmatprep.subr.bf16.mxu0 %v12740_v18  ;;  %9169 = vmatprep.subr.bf16.mxu1 %v12743_v9  ;;  %v14926_v18 = vld [vmem:[%s14087_s12 + $0xc0] sm:$0xff]  ;;  %v14929_v9 = vld [vmem:[%s14087_s12 + $0xc8] sm:$0xff] }
 0x4d2   : > { %9129 = vmatpush1.bf16.xpose.msra.mxu0 %v12738_v4  ;;  %9170 = vmatpush1.bf16.xpose.msra.mxu1 %v12741_v21  ;;  %v12806_v4 = vld [vmem:[%s14073_s15 + $0x16a0] ss:$400 sps:$4 sm:$0xff]   ;;  %v12809_v21 = vld [vmem:[%s14073_s15 + $0x16a8] ss:$400 sps:$4 sm:$0xff]  }
 0x4d3   : > { %9130 = vmatprep.subr.bf16.mxu0 %v12746_v57  ;;  %9171 = vmatprep.subr.bf16.mxu1 %v12749_v23  ;;  %v12814_v57 = vld [vmem:[%s14073_s15 + $0x1384] ss:$400 sps:$4 sm:$0xff]   ;;  %v12817_v23 = vld [vmem:[%s14073_s15 + $0x138c] ss:$400 sps:$4 sm:$0xff]  }
 0x4da   : > { %9131 = vmatpush1.bf16.xpose.msra.mxu0 %v12744_v24  ;;  %9172 = vmatpush1.bf16.xpose.msra.mxu1 %v12747_v25  ;;  %v10435_v24 = vcombine.high %v14926_v18, %v14926_v18  ;;  %v12815_v25 = vld [vmem:[%s14073_s15 + $0x1388] ss:$400 sps:$4 sm:$0xff]  }
 0x4db   : > { %9132 = vmatprep.subr.bf16.mxu0 %v12752_v58  ;;  %9173 = vmatprep.subr.bf16.mxu1 %v12755_v14  ;;  %v12820_v58 = vld [vmem:[%s14073_s15 + $0x1064] ss:$400 sps:$4 sm:$0xff]   ;;  %v12823_v14 = vld [vmem:[%s14073_s15 + $0x106c] ss:$400 sps:$4 sm:$0xff]  }
 0x4e2   : > { %9133 = vmatpush1.bf16.xpose.msra.mxu0 %v12750_v26  ;;  %9174 = vmatpush1.bf16.xpose.msra.mxu1 %v12753_v29  ;;  %v12818_v26 = vld [vmem:[%s14073_s15 + $0x1060] ss:$400 sps:$4 sm:$0xff]   ;;  %v12821_v29 = vld [vmem:[%s14073_s15 + $0x1068] ss:$400 sps:$4 sm:$0xff]  }
 0x4e3   : > { %9134 = vmatprep.subr.bf16.mxu0 %v12758_v3  ;;  %9175 = vmatprep.subr.bf16.mxu1 %v12761_v31  ;;  %v12826_v3 = vld [vmem:[%s14073_s15 + $0xd44] ss:$400 sps:$4 sm:$0xff]   ;;  %v12829_v31 = vld [vmem:[%s14073_s15 + $0xd4c] ss:$400 sps:$4 sm:$0xff]  }
 0x4ea   : > { %9135 = vmatpush1.bf16.xpose.msra.mxu0 %v12756_v32  ;;  %9176 = vmatpush1.bf16.xpose.msra.mxu1 %v12759_v33  ;;  %v12824_v32 = vld [vmem:[%s14073_s15 + $0xd40] ss:$400 sps:$4 sm:$0xff]   ;;  %v12827_v33 = vld [vmem:[%s14073_s15 + $0xd48] ss:$400 sps:$4 sm:$0xff]  }
 0x4eb   : > { %9136 = vmatprep.subr.bf16.mxu0 %v12764_v19  ;;  %9177 = vmatprep.subr.bf16.mxu1 %v12767_v22  ;;  %v12832_v19 = vld [vmem:[%s14073_s15 + $0xa24] ss:$400 sps:$4 sm:$0xff]   ;;  %v12835_v22 = vld [vmem:[%s14073_s15 + $0xa2c] ss:$400 sps:$4 sm:$0xff]  }
 0x4f2   : > { %9137 = vmatpush1.bf16.xpose.msra.mxu0 %v12762_v34  ;;  %9178 = vmatpush1.bf16.xpose.msra.mxu1 %v12765_v37  ;;  %v12830_v34 = vld [vmem:[%s14073_s15 + $0xa20] ss:$400 sps:$4 sm:$0xff]   ;;  %v12833_v37 = vld [vmem:[%s14073_s15 + $0xa28] ss:$400 sps:$4 sm:$0xff]  }
 0x4f3   : > { %9138 = vmatprep.subr.bf16.mxu0 %v12770_v54  ;;  %9179 = vmatprep.subr.bf16.mxu1 %v12773_v39  ;;  %v12838_v54 = vld [vmem:[%s14073_s15 + $0x704] ss:$400 sps:$4 sm:$0xff]   ;;  %v12841_v39 = vld [vmem:[%s14073_s15 + $0x70c] ss:$400 sps:$4 sm:$0xff]  }
 0x4fa   : > { %9139 = vmatpush1.bf16.xpose.msra.mxu0 %v12768_v27  ;;  %9180 = vmatpush1.bf16.xpose.msra.mxu1 %v12771_v30  ;;  %v12844_v27 = vld [vmem:[%s14073_s15 + $0x3e4] ss:$400 sps:$4 sm:$0xff]   ;;  %v12847_v30 = vld [vmem:[%s14073_s15 + $0x3ec] ss:$400 sps:$4 sm:$0xff]  }
 0x4fb   : > { %9146 = vmatprep.subr.bf16.mxu0 %v11731_v42  ;;  %9187 = vmatprep.subr.bf16.mxu1 %v11733_v45  ;;  %v12842_v42 = vld [vmem:[%s14073_s15 + $0x3e0] ss:$400 sps:$4 sm:$0xff]   ;;  %v12845_v45 = vld [vmem:[%s14073_s15 + $0x3e8] ss:$400 sps:$4 sm:$0xff]  }
 0x502   : > { %9147 = vmatpush2.bf16.xpose.msra.mxu0 %v11730_v20  ;;  %9188 = vmatpush2.bf16.xpose.msra.mxu1 %v11732_v47  ;;  %v12850_v20 = vld [vmem:[%s14073_s15 + $0xc4] ss:$400 sps:$4 sm:$0xff]   ;;  %v12853_v47 = vld [vmem:[%s14073_s15 + $0xcc] ss:$400 sps:$4 sm:$0xff]  }
 0x503   : > { %9148 = vmatprep.subr.bf16.mxu0 %v12780_v48  ;;  %9189 = vmatprep.subr.bf16.mxu1 %v12783_v49  ;;  %v1496_v48 = vld [vmem:[%s14073_s15 + $0x2640] sm:$0xff]  ;;  %v1497_v49 = vld [vmem:[%s14073_s15 + $0x2648] sm:$0xff] }
 0x50a   : > { %9149 = vmatpush2.bf16.xpose.msra.mxu0 %v12778_v35  ;;  %9190 = vmatpush2.bf16.xpose.msra.mxu1 %v12781_v38  ;;  %v12848_v35 = vld [vmem:[%s14073_s15 + $0xc0] ss:$400 sps:$4 sm:$0xff]   ;;  %v12851_v38 = vld [vmem:[%s14073_s15 + $0xc8] ss:$400 sps:$4 sm:$0xff]  }
 0x50b   : > { %9150 = vmatprep.subr.bf16.mxu0 %v12786_v50  ;;  %9191 = vmatprep.subr.bf16.mxu1 %v12789_v55  ;;  %v11735_v50 = vcombine.high %v1496_v48, %v1496_v48  ;;  %v11737_v55 = vcombine.high %v1497_v49, %v1497_v49 }
 0x512   : > { %9151 = vmatpush2.bf16.xpose.msra.mxu0 %v12784_v28  ;;  %9192 = vmatpush2.bf16.xpose.msra.mxu1 %v12787_v59  ;;  %v11734_v28 = vcombine.low %v1496_v48, %v1496_v48  ;;  %v11736_v59 = vcombine.low %v1497_v49, %v1497_v49  ;;  %v12916_v48 = vld [vmem:[%s14073_s15 + $0x710] ss:$400 sps:$4 sm:$0xff]   ;;  %v12919_v49 = vld [vmem:[%s14073_s15 + $0x718] ss:$400 sps:$4 sm:$0xff]  }
 0x513   : > { %9152 = vmatprep.subr.bf16.mxu0 %v12792_v60  ;;  %9193 = vmatprep.subr.bf16.mxu1 %v12795_v63  ;;  %v12860_v60 = vld [vmem:[%s14073_s15 + $0x2324] ss:$400 sps:$4 sm:$0xff]   ;;  %v12863_v63 = vld [vmem:[%s14073_s15 + $0x232c] ss:$400 sps:$4 sm:$0xff]  }
 0x519   : > { %v8994_v36 = vpop.f32.mrf.mxu0  ;;  %v9035_v6 = vpop.f32.mrf.mxu1 }
 0x51a   : > { %v8995_v7 = vadd.f32 %v8994_v36, %v14842_v44  ;;  %9153 = vmatpush2.bf16.xpose.msra.mxu0 %v12790_v43  ;;  %9194 = vmatpush2.bf16.xpose.msra.mxu1 %v12793_v46  ;;  %v12796_v44 = vld [vmem:[%s14073_s15 + $0x19b0] ss:$400 sps:$4 sm:$0xff]   ;;  %v12861_v46 = vld [vmem:[%s14073_s15 + $0x2328] ss:$400 sps:$4 sm:$0xff]  }
 0x51b   : > { %v8996_v51 = vpop.f32.mrf.mxu0  ;;  %v9037_v52 = vpop.f32.mrf.mxu1  ;;  %9154 = vmatprep.subr.bf16.mxu0 %v12798_v0  ;;  %9195 = vmatprep.subr.bf16.mxu1 %v12801_v62  ;;  %v12858_v43 = vld [vmem:[%s14073_s15 + $0x2320] ss:$400 sps:$4 sm:$0xff]   ;;  %v12866_v0 = vld [vmem:[%s14073_s15 + $0x2004] ss:$400 sps:$4 sm:$0xff]   ;;  %v12869_v62 = vld [vmem:[%s14073_s15 + $0x200c] ss:$400 sps:$4 sm:$0xff]  }
 0x51c   : > { %v14912_v53 = vadd.f32 %v9035_v6, %v8995_v7  ;;  %v8997_v56 = vadd.f32 %v8996_v51, %v14845_v5  ;;  %v10430_v5 = vcombine.low %v14856_v10, %v14856_v10  ;;  %v10437_v10 = vcombine.high %v14929_v9, %v14929_v9  ;;  %v12864_v36 = vld [vmem:[%s14073_s15 + $0x2000] ss:$400 sps:$4 sm:$0xff]   ;;  %v12867_v6 = vld [vmem:[%s14073_s15 + $0x2008] ss:$400 sps:$4 sm:$0xff]   ;;  %v12872_v7 = vld [vmem:[%s14073_s15 + $0x1ce4] ss:$400 sps:$4 sm:$0xff]  }
 0x51d   : > { %v8998_v8 = vpop.f32.mrf.mxu0  ;;  %v9039_v12 = vpop.f32.mrf.mxu1  ;;  %v12875_v51 = vld [vmem:[%s14073_s15 + $0x1cec] ss:$400 sps:$4 sm:$0xff]  }
 0x51e   : > { %v14915_v13 = vadd.f32 %v9037_v52, %v8997_v56  ;;  %v12870_v52 = vld [vmem:[%s14073_s15 + $0x1ce0] ss:$400 sps:$4 sm:$0xff]   ;;  %v12873_v56 = vld [vmem:[%s14073_s15 + $0x1ce8] ss:$400 sps:$4 sm:$0xff]   ;;  %v12878_v8 = vld [vmem:[%s14073_s15 + $0x19c4] ss:$400 sps:$4 sm:$0xff]  }
 0x51f   : > { %v8999_v15 = vpop.f32.mrf.mxu0  ;;  %v9040_v16 = vpop.f32.mrf.mxu1  ;;  %v12881_v12 = vld [vmem:[%s14073_s15 + $0x19cc] ss:$400 sps:$4 sm:$0xff]  }
 0x522   : > { %9155 = vmatpush2.bf16.xpose.msra.mxu0 %v12796_v44  ;;  %9196 = vmatpush2.bf16.xpose.msra.mxu1 %v12799_v2 }
 0x523   : > { %9206 = vmatprep.subr.bf16.mxu0 %v12808_v1  ;;  %9247 = vmatprep.subr.bf16.mxu1 %v12811_v61 }
 0x529   : > { %9157 = vmatmul.mubr.bf16.vlgmr.msra.gmra.mxu0 %v10430_v5  ;;  %9198 = vmatmul.mubr.bf16.vlgmr.msra.gmra.mxu1 %v10432_v17 }
 0x52a   : > { %9207 = vmatpush1.bf16.xpose.msra.mxu0 %v12806_v4  ;;  %9248 = vmatpush1.bf16.xpose.msra.mxu1 %v12809_v21 }
 0x52b   : > { %9208 = vmatprep.subr.bf16.mxu0 %v12814_v57  ;;  %9249 = vmatprep.subr.bf16.mxu1 %v12817_v23  ;;  %v12879_v57 = vld [vmem:[%s14073_s15 + $0x19c8] ss:$400 sps:$4 sm:$0xff]  }
 0x52c   : > { %9238 = vmatprep.mubr.bf16.mxu0 %v10435_v24  ;;  %9279 = vmatprep.mubr.bf16.mxu1 %v10437_v10  ;;  %v12888_v10 = vld [vmem:[%s14073_s15 + $0x16b4] ss:$400 sps:$4 sm:$0xff]  }
 0x532   : > { %9209 = vmatpush1.bf16.xpose.msra.mxu0 %v12812_v11  ;;  %9250 = vmatpush1.bf16.xpose.msra.mxu1 %v12815_v25  ;;  %v12891_v11 = vld [vmem:[%s14073_s15 + $0x16bc] ss:$400 sps:$4 sm:$0xff]   ;;  %v10436_v25 = vcombine.low %v14929_v9, %v14929_v9  ;;  %v12892_v9 = vld [vmem:[%s14073_s15 + $0x1390] ss:$400 sps:$4 sm:$0xff]  }
 0x533   : > { %9210 = vmatprep.subr.bf16.mxu0 %v12820_v58  ;;  %9251 = vmatprep.subr.bf16.mxu1 %v12823_v14  ;;  %v14996_v58 = vld [vmem:[%s14087_s12 + $0xd0] sm:$0xff]  ;;  %v14999_v14 = vld [vmem:[%s14087_s12 + $0xd8] sm:$0xff] }
 0x53a   : > { %9211 = vmatpush1.bf16.xpose.msra.mxu0 %v12818_v26  ;;  %9252 = vmatpush1.bf16.xpose.msra.mxu1 %v12821_v29  ;;  %v12886_v26 = vld [vmem:[%s14073_s15 + $0x16b0] ss:$400 sps:$4 sm:$0xff]   ;;  %v12889_v29 = vld [vmem:[%s14073_s15 + $0x16b8] ss:$400 sps:$4 sm:$0xff]  }
 0x53b   : > { %9212 = vmatprep.subr.bf16.mxu0 %v12826_v3  ;;  %9253 = vmatprep.subr.bf16.mxu1 %v12829_v31  ;;  %v12894_v3 = vld [vmem:[%s14073_s15 + $0x1394] ss:$400 sps:$4 sm:$0xff]   ;;  %v12897_v31 = vld [vmem:[%s14073_s15 + $0x139c] ss:$400 sps:$4 sm:$0xff]  }
 0x542   : > { %9213 = vmatpush1.bf16.xpose.msra.mxu0 %v12824_v32  ;;  %9254 = vmatpush1.bf16.xpose.msra.mxu1 %v12827_v33  ;;  %v10439_v32 = vcombine.high %v14996_v58, %v14996_v58  ;;  %v12895_v33 = vld [vmem:[%s14073_s15 + $0x1398] ss:$400 sps:$4 sm:$0xff]  }
 0x543   : > { %9214 = vmatprep.subr.bf16.mxu0 %v12832_v19  ;;  %9255 = vmatprep.subr.bf16.mxu1 %v12835_v22  ;;  %v12900_v19 = vld [vmem:[%s14073_s15 + $0x1074] ss:$400 sps:$4 sm:$0xff]   ;;  %v12903_v22 = vld [vmem:[%s14073_s15 + $0x107c] ss:$400 sps:$4 sm:$0xff]  }
 0x54a   : > { %9215 = vmatpush1.bf16.xpose.msra.mxu0 %v12830_v34  ;;  %9256 = vmatpush1.bf16.xpose.msra.mxu1 %v12833_v37  ;;  %v12898_v34 = vld [vmem:[%s14073_s15 + $0x1070] ss:$400 sps:$4 sm:$0xff]   ;;  %v12901_v37 = vld [vmem:[%s14073_s15 + $0x1078] ss:$400 sps:$4 sm:$0xff]  }
 0x54b   : > { %9216 = vmatprep.subr.bf16.mxu0 %v12838_v54  ;;  %9257 = vmatprep.subr.bf16.mxu1 %v12841_v39  ;;  %v12906_v54 = vld [vmem:[%s14073_s15 + $0xd54] ss:$400 sps:$4 sm:$0xff]   ;;  %v12909_v39 = vld [vmem:[%s14073_s15 + $0xd5c] ss:$400 sps:$4 sm:$0xff]  }
 0x552   : > { %9217 = vmatpush1.bf16.xpose.msra.mxu0 %v12836_v40  ;;  %9258 = vmatpush1.bf16.xpose.msra.mxu1 %v12839_v41  ;;  %v12904_v40 = vld [vmem:[%s14073_s15 + $0xd50] ss:$400 sps:$4 sm:$0xff]   ;;  %v12907_v41 = vld [vmem:[%s14073_s15 + $0xd58] ss:$400 sps:$4 sm:$0xff]  }
 0x553   : > { %9218 = vmatprep.subr.bf16.mxu0 %v12844_v27  ;;  %9259 = vmatprep.subr.bf16.mxu1 %v12847_v30  ;;  %v12912_v27 = vld [vmem:[%s14073_s15 + $0xa34] ss:$400 sps:$4 sm:$0xff]   ;;  %v12915_v30 = vld [vmem:[%s14073_s15 + $0xa3c] ss:$400 sps:$4 sm:$0xff]  }
 0x55a   : > { %9219 = vmatpush1.bf16.xpose.msra.mxu0 %v12842_v42  ;;  %9260 = vmatpush1.bf16.xpose.msra.mxu1 %v12845_v45  ;;  %v12910_v42 = vld [vmem:[%s14073_s15 + $0xa30] ss:$400 sps:$4 sm:$0xff]   ;;  %v12913_v45 = vld [vmem:[%s14073_s15 + $0xa38] ss:$400 sps:$4 sm:$0xff]  }
 0x55b   : > { %9220 = vmatprep.subr.bf16.mxu0 %v12850_v20  ;;  %9261 = vmatprep.subr.bf16.mxu1 %v12853_v47  ;;  %v12918_v20 = vld [vmem:[%s14073_s15 + $0x714] ss:$400 sps:$4 sm:$0xff]   ;;  %v12921_v47 = vld [vmem:[%s14073_s15 + $0x71c] ss:$400 sps:$4 sm:$0xff]  }
 0x562   : > { %9221 = vmatpush1.bf16.xpose.msra.mxu0 %v12848_v35  ;;  %9262 = vmatpush1.bf16.xpose.msra.mxu1 %v12851_v38  ;;  %v12924_v35 = vld [vmem:[%s14073_s15 + $0x3f4] ss:$400 sps:$4 sm:$0xff]   ;;  %v12927_v38 = vld [vmem:[%s14073_s15 + $0x3fc] ss:$400 sps:$4 sm:$0xff]  }
 0x563   : > { %9228 = vmatprep.subr.bf16.mxu0 %v11735_v50  ;;  %9269 = vmatprep.subr.bf16.mxu1 %v11737_v55  ;;  %v12922_v50 = vld [vmem:[%s14073_s15 + $0x3f0] ss:$400 sps:$4 sm:$0xff]   ;;  %v12925_v55 = vld [vmem:[%s14073_s15 + $0x3f8] ss:$400 sps:$4 sm:$0xff]  }
 0x56a   : > { %9229 = vmatpush2.bf16.xpose.msra.mxu0 %v11734_v28  ;;  %9270 = vmatpush2.bf16.xpose.msra.mxu1 %v11736_v59  ;;  %v12930_v28 = vld [vmem:[%s14073_s15 + $0xd4] ss:$400 sps:$4 sm:$0xff]   ;;  %v12933_v59 = vld [vmem:[%s14073_s15 + $0xdc] ss:$400 sps:$4 sm:$0xff]  }
 0x56b   : > { %9230 = vmatprep.subr.bf16.mxu0 %v12860_v60  ;;  %9271 = vmatprep.subr.bf16.mxu1 %v12863_v63  ;;  %v1498_v60 = vld [vmem:[%s14073_s15 + $0x2650] sm:$0xff]  ;;  %v1499_v63 = vld [vmem:[%s14073_s15 + $0x2658] sm:$0xff] }
 0x572   : > { %9231 = vmatpush2.bf16.xpose.msra.mxu0 %v12858_v43  ;;  %9272 = vmatpush2.bf16.xpose.msra.mxu1 %v12861_v46  ;;  %v12928_v43 = vld [vmem:[%s14073_s15 + $0xd0] ss:$400 sps:$4 sm:$0xff]   ;;  %v12931_v46 = vld [vmem:[%s14073_s15 + $0xd8] ss:$400 sps:$4 sm:$0xff]  }
 0x573   : > { %9232 = vmatprep.subr.bf16.mxu0 %v12866_v0  ;;  %9273 = vmatprep.subr.bf16.mxu1 %v12869_v62  ;;  %v11739_v0 = vcombine.high %v1498_v60, %v1498_v60  ;;  %v11741_v62 = vcombine.high %v1499_v63, %v1499_v63 }
 0x57a   : > { %9233 = vmatpush2.bf16.xpose.msra.mxu0 %v12864_v36  ;;  %9274 = vmatpush2.bf16.xpose.msra.mxu1 %v12867_v6  ;;  %v11738_v36 = vcombine.low %v1498_v60, %v1498_v60  ;;  %v11740_v6 = vcombine.low %v1499_v63, %v1499_v63  ;;  %v12996_v60 = vld [vmem:[%s14073_s15 + $0x720] ss:$400 sps:$4 sm:$0xff]   ;;  %v12999_v63 = vld [vmem:[%s14073_s15 + $0x728] ss:$400 sps:$4 sm:$0xff]  }
 0x57b   : > { %9234 = vmatprep.subr.bf16.mxu0 %v12872_v7  ;;  %9275 = vmatprep.subr.bf16.mxu1 %v12875_v51  ;;  %v12940_v7 = vld [vmem:[%s14073_s15 + $0x2334] ss:$400 sps:$4 sm:$0xff]   ;;  %v12943_v51 = vld [vmem:[%s14073_s15 + $0x233c] ss:$400 sps:$4 sm:$0xff]  }
 0x581   : > { %v9076_v44 = vpop.f32.mrf.mxu0  ;;  %v9117_v2 = vpop.f32.mrf.mxu1 }
 0x582   : > { %v9077_v15 = vadd.f32 %v9076_v44, %v14912_v53  ;;  %9235 = vmatpush2.bf16.xpose.msra.mxu0 %v12870_v52  ;;  %9276 = vmatpush2.bf16.xpose.msra.mxu1 %v12873_v56  ;;  %v12876_v53 = vld [vmem:[%s14073_s15 + $0x19c0] ss:$400 sps:$4 sm:$0xff]   ;;  %v12941_v56 = vld [vmem:[%s14073_s15 + $0x2338] ss:$400 sps:$4 sm:$0xff]  }
 0x583   : > { %v9078_v16 = vpop.f32.mrf.mxu0  ;;  %v9119_v1 = vpop.f32.mrf.mxu1  ;;  %9236 = vmatprep.subr.bf16.mxu0 %v12878_v8  ;;  %9277 = vmatprep.subr.bf16.mxu1 %v12881_v12  ;;  %v12938_v52 = vld [vmem:[%s14073_s15 + $0x2330] ss:$400 sps:$4 sm:$0xff]   ;;  %v12946_v8 = vld [vmem:[%s14073_s15 + $0x2014] ss:$400 sps:$4 sm:$0xff]   ;;  %v12949_v12 = vld [vmem:[%s14073_s15 + $0x201c] ss:$400 sps:$4 sm:$0xff]  }
 0x584   : > { %v14982_v61 = vadd.f32 %v9117_v2, %v9077_v15  ;;  %v9079_v5 = vadd.f32 %v9078_v16, %v14915_v13  ;;  %v10434_v13 = vcombine.low %v14926_v18, %v14926_v18  ;;  %v10441_v18 = vcombine.high %v14999_v14, %v14999_v14  ;;  %v12944_v44 = vld [vmem:[%s14073_s15 + $0x2010] ss:$400 sps:$4 sm:$0xff]   ;;  %v12947_v2 = vld [vmem:[%s14073_s15 + $0x2018] ss:$400 sps:$4 sm:$0xff]   ;;  %v12952_v15 = vld [vmem:[%s14073_s15 + $0x1cf4] ss:$400 sps:$4 sm:$0xff]  }
 0x585   : > { %v9080_v17 = vpop.f32.mrf.mxu0  ;;  %v9121_v4 = vpop.f32.mrf.mxu1  ;;  %v12955_v16 = vld [vmem:[%s14073_s15 + $0x1cfc] ss:$400 sps:$4 sm:$0xff]  }
 0x586   : > { %v14985_v21 = vadd.f32 %v9119_v1, %v9079_v5  ;;  %v12950_v1 = vld [vmem:[%s14073_s15 + $0x1cf0] ss:$400 sps:$4 sm:$0xff]   ;;  %v12953_v5 = vld [vmem:[%s14073_s15 + $0x1cf8] ss:$400 sps:$4 sm:$0xff]   ;;  %v12958_v17 = vld [vmem:[%s14073_s15 + $0x19d4] ss:$400 sps:$4 sm:$0xff]  }
 0x587   : > { %v9081_v23 = vpop.f32.mrf.mxu0  ;;  %v9122_v24 = vpop.f32.mrf.mxu1  ;;  %v12961_v4 = vld [vmem:[%s14073_s15 + $0x19dc] ss:$400 sps:$4 sm:$0xff]  }
 0x58a   : > { %9237 = vmatpush2.bf16.xpose.msra.mxu0 %v12876_v53  ;;  %9278 = vmatpush2.bf16.xpose.msra.mxu1 %v12879_v57 }
 0x58b   : > { %9288 = vmatprep.subr.bf16.mxu0 %v12888_v10  ;;  %9329 = vmatprep.subr.bf16.mxu1 %v12891_v11 }
 0x591   : > { %9239 = vmatmul.mubr.bf16.vlgmr.msra.gmra.mxu0 %v10434_v13  ;;  %9280 = vmatmul.mubr.bf16.vlgmr.msra.gmra.mxu1 %v10436_v25 }
 0x592   : > { %9289 = vmatpush1.bf16.xpose.msra.mxu0 %v12886_v26  ;;  %9330 = vmatpush1.bf16.xpose.msra.mxu1 %v12889_v29 }
 0x593   : > { %9290 = vmatprep.subr.bf16.mxu0 %v12894_v3  ;;  %9331 = vmatprep.subr.bf16.mxu1 %v12897_v31  ;;  %v12959_v3 = vld [vmem:[%s14073_s15 + $0x19d8] ss:$400 sps:$4 sm:$0xff]  }
 0x594   : > { %9320 = vmatprep.mubr.bf16.mxu0 %v10439_v32  ;;  %9361 = vmatprep.mubr.bf16.mxu1 %v10441_v18  ;;  %v12968_v18 = vld [vmem:[%s14073_s15 + $0x16c4] ss:$400 sps:$4 sm:$0xff]  }
 0x59a   : > { %9291 = vmatpush1.bf16.xpose.msra.mxu0 %v12892_v9  ;;  %9332 = vmatpush1.bf16.xpose.msra.mxu1 %v12895_v33  ;;  %v12971_v9 = vld [vmem:[%s14073_s15 + $0x16cc] ss:$400 sps:$4 sm:$0xff]   ;;  %v10440_v33 = vcombine.low %v14999_v14, %v14999_v14  ;;  %v12972_v14 = vld [vmem:[%s14073_s15 + $0x13a0] ss:$400 sps:$4 sm:$0xff]  }
 0x59b   : > { %9292 = vmatprep.subr.bf16.mxu0 %v12900_v19  ;;  %9333 = vmatprep.subr.bf16.mxu1 %v12903_v22  ;;  %v15066_v19 = vld [vmem:[%s14087_s12 + $0xe0] sm:$0xff]  ;;  %v15069_v22 = vld [vmem:[%s14087_s12 + $0xe8] sm:$0xff] }
 0x5a2   : > { %9293 = vmatpush1.bf16.xpose.msra.mxu0 %v12898_v34  ;;  %9334 = vmatpush1.bf16.xpose.msra.mxu1 %v12901_v37  ;;  %v12966_v34 = vld [vmem:[%s14073_s15 + $0x16c0] ss:$400 sps:$4 sm:$0xff]   ;;  %v12969_v37 = vld [vmem:[%s14073_s15 + $0x16c8] ss:$400 sps:$4 sm:$0xff]  }
 0x5a3   : > { %9294 = vmatprep.subr.bf16.mxu0 %v12906_v54  ;;  %9335 = vmatprep.subr.bf16.mxu1 %v12909_v39  ;;  %v12974_v54 = vld [vmem:[%s14073_s15 + $0x13a4] ss:$400 sps:$4 sm:$0xff]   ;;  %v12977_v39 = vld [vmem:[%s14073_s15 + $0x13ac] ss:$400 sps:$4 sm:$0xff]  }
 0x5aa   : > { %9295 = vmatpush1.bf16.xpose.msra.mxu0 %v12904_v40  ;;  %9336 = vmatpush1.bf16.xpose.msra.mxu1 %v12907_v41  ;;  %v10443_v40 = vcombine.high %v15066_v19, %v15066_v19  ;;  %v12975_v41 = vld [vmem:[%s14073_s15 + $0x13a8] ss:$400 sps:$4 sm:$0xff]  }
 0x5ab   : > { %9296 = vmatprep.subr.bf16.mxu0 %v12912_v27  ;;  %9337 = vmatprep.subr.bf16.mxu1 %v12915_v30  ;;  %v12980_v27 = vld [vmem:[%s14073_s15 + $0x1084] ss:$400 sps:$4 sm:$0xff]   ;;  %v12983_v30 = vld [vmem:[%s14073_s15 + $0x108c] ss:$400 sps:$4 sm:$0xff]  }
 0x5b2   : > { %9297 = vmatpush1.bf16.xpose.msra.mxu0 %v12910_v42  ;;  %9338 = vmatpush1.bf16.xpose.msra.mxu1 %v12913_v45  ;;  %v12978_v42 = vld [vmem:[%s14073_s15 + $0x1080] ss:$400 sps:$4 sm:$0xff]   ;;  %v12981_v45 = vld [vmem:[%s14073_s15 + $0x1088] ss:$400 sps:$4 sm:$0xff]  }
 0x5b3   : > { %9298 = vmatprep.subr.bf16.mxu0 %v12918_v20  ;;  %9339 = vmatprep.subr.bf16.mxu1 %v12921_v47  ;;  %v12986_v20 = vld [vmem:[%s14073_s15 + $0xd64] ss:$400 sps:$4 sm:$0xff]   ;;  %v12989_v47 = vld [vmem:[%s14073_s15 + $0xd6c] ss:$400 sps:$4 sm:$0xff]  }
 0x5ba   : > { %9299 = vmatpush1.bf16.xpose.msra.mxu0 %v12916_v48  ;;  %9340 = vmatpush1.bf16.xpose.msra.mxu1 %v12919_v49  ;;  %v12984_v48 = vld [vmem:[%s14073_s15 + $0xd60] ss:$400 sps:$4 sm:$0xff]   ;;  %v12987_v49 = vld [vmem:[%s14073_s15 + $0xd68] ss:$400 sps:$4 sm:$0xff]  }
 0x5bb   : > { %9300 = vmatprep.subr.bf16.mxu0 %v12924_v35  ;;  %9341 = vmatprep.subr.bf16.mxu1 %v12927_v38  ;;  %v12992_v35 = vld [vmem:[%s14073_s15 + $0xa44] ss:$400 sps:$4 sm:$0xff]   ;;  %v12995_v38 = vld [vmem:[%s14073_s15 + $0xa4c] ss:$400 sps:$4 sm:$0xff]  }
 0x5c2   : > { %9301 = vmatpush1.bf16.xpose.msra.mxu0 %v12922_v50  ;;  %9342 = vmatpush1.bf16.xpose.msra.mxu1 %v12925_v55  ;;  %v12990_v50 = vld [vmem:[%s14073_s15 + $0xa40] ss:$400 sps:$4 sm:$0xff]   ;;  %v12993_v55 = vld [vmem:[%s14073_s15 + $0xa48] ss:$400 sps:$4 sm:$0xff]  }
 0x5c3   : > { %9302 = vmatprep.subr.bf16.mxu0 %v12930_v28  ;;  %9343 = vmatprep.subr.bf16.mxu1 %v12933_v59  ;;  %v12998_v28 = vld [vmem:[%s14073_s15 + $0x724] ss:$400 sps:$4 sm:$0xff]   ;;  %v13001_v59 = vld [vmem:[%s14073_s15 + $0x72c] ss:$400 sps:$4 sm:$0xff]  }
 0x5ca   : > { %9303 = vmatpush1.bf16.xpose.msra.mxu0 %v12928_v43  ;;  %9344 = vmatpush1.bf16.xpose.msra.mxu1 %v12931_v46  ;;  %v13004_v43 = vld [vmem:[%s14073_s15 + $0x404] ss:$400 sps:$4 sm:$0xff]   ;;  %v13007_v46 = vld [vmem:[%s14073_s15 + $0x40c] ss:$400 sps:$4 sm:$0xff]  }
 0x5cb   : > { %9310 = vmatprep.subr.bf16.mxu0 %v11739_v0  ;;  %9351 = vmatprep.subr.bf16.mxu1 %v11741_v62  ;;  %v13002_v0 = vld [vmem:[%s14073_s15 + $0x400] ss:$400 sps:$4 sm:$0xff]   ;;  %v13005_v62 = vld [vmem:[%s14073_s15 + $0x408] ss:$400 sps:$4 sm:$0xff]  }
 0x5d2   : > { %9311 = vmatpush2.bf16.xpose.msra.mxu0 %v11738_v36  ;;  %9352 = vmatpush2.bf16.xpose.msra.mxu1 %v11740_v6  ;;  %v13010_v36 = vld [vmem:[%s14073_s15 + $0xe4] ss:$400 sps:$4 sm:$0xff]   ;;  %v13013_v6 = vld [vmem:[%s14073_s15 + $0xec] ss:$400 sps:$4 sm:$0xff]  }
 0x5d3   : > { %9312 = vmatprep.subr.bf16.mxu0 %v12940_v7  ;;  %9353 = vmatprep.subr.bf16.mxu1 %v12943_v51  ;;  %v1500_v7 = vld [vmem:[%s14073_s15 + $0x2660] sm:$0xff]  ;;  %v1501_v51 = vld [vmem:[%s14073_s15 + $0x2668] sm:$0xff] }
 0x5da   : > { %9313 = vmatpush2.bf16.xpose.msra.mxu0 %v12938_v52  ;;  %9354 = vmatpush2.bf16.xpose.msra.mxu1 %v12941_v56  ;;  %v13008_v52 = vld [vmem:[%s14073_s15 + $0xe0] ss:$400 sps:$4 sm:$0xff]   ;;  %v13011_v56 = vld [vmem:[%s14073_s15 + $0xe8] ss:$400 sps:$4 sm:$0xff]  }
 0x5db   : > { %9314 = vmatprep.subr.bf16.mxu0 %v12946_v8  ;;  %9355 = vmatprep.subr.bf16.mxu1 %v12949_v12  ;;  %v11743_v8 = vcombine.high %v1500_v7, %v1500_v7  ;;  %v11745_v12 = vcombine.high %v1501_v51, %v1501_v51 }
 0x5e2   : > { %9315 = vmatpush2.bf16.xpose.msra.mxu0 %v12944_v44  ;;  %9356 = vmatpush2.bf16.xpose.msra.mxu1 %v12947_v2  ;;  %v11742_v44 = vcombine.low %v1500_v7, %v1500_v7  ;;  %v11744_v2 = vcombine.low %v1501_v51, %v1501_v51  ;;  %v13076_v7 = vld [vmem:[%s14073_s15 + $0x730] ss:$400 sps:$4 sm:$0xff]   ;;  %v13079_v51 = vld [vmem:[%s14073_s15 + $0x738] ss:$400 sps:$4 sm:$0xff]  }
 0x5e3   : > { %9316 = vmatprep.subr.bf16.mxu0 %v12952_v15  ;;  %9357 = vmatprep.subr.bf16.mxu1 %v12955_v16  ;;  %v13020_v15 = vld [vmem:[%s14073_s15 + $0x2344] ss:$400 sps:$4 sm:$0xff]   ;;  %v13023_v16 = vld [vmem:[%s14073_s15 + $0x234c] ss:$400 sps:$4 sm:$0xff]  }
 0x5e9   : > { %v9158_v53 = vpop.f32.mrf.mxu0  ;;  %v9199_v57 = vpop.f32.mrf.mxu1 }
 0x5ea   : > { %v9159_v23 = vadd.f32 %v9158_v53, %v14982_v61  ;;  %9317 = vmatpush2.bf16.xpose.msra.mxu0 %v12950_v1  ;;  %9358 = vmatpush2.bf16.xpose.msra.mxu1 %v12953_v5  ;;  %v12956_v61 = vld [vmem:[%s14073_s15 + $0x19d0] ss:$400 sps:$4 sm:$0xff]   ;;  %v13021_v5 = vld [vmem:[%s14073_s15 + $0x2348] ss:$400 sps:$4 sm:$0xff]  }
 0x5eb   : > { %v9160_v24 = vpop.f32.mrf.mxu0  ;;  %v9201_v10 = vpop.f32.mrf.mxu1  ;;  %9318 = vmatprep.subr.bf16.mxu0 %v12958_v17  ;;  %9359 = vmatprep.subr.bf16.mxu1 %v12961_v4  ;;  %v13018_v1 = vld [vmem:[%s14073_s15 + $0x2340] ss:$400 sps:$4 sm:$0xff]   ;;  %v13026_v17 = vld [vmem:[%s14073_s15 + $0x2024] ss:$400 sps:$4 sm:$0xff]   ;;  %v13029_v4 = vld [vmem:[%s14073_s15 + $0x202c] ss:$400 sps:$4 sm:$0xff]  }
 0x5ec   : > { %v15052_v11 = vadd.f32 %v9199_v57, %v9159_v23  ;;  %v9161_v13 = vadd.f32 %v9160_v24, %v14985_v21  ;;  %v10438_v21 = vcombine.low %v14996_v58, %v14996_v58  ;;  %v10445_v58 = vcombine.high %v15069_v22, %v15069_v22  ;;  %v13024_v53 = vld [vmem:[%s14073_s15 + $0x2020] ss:$400 sps:$4 sm:$0xff]   ;;  %v13027_v57 = vld [vmem:[%s14073_s15 + $0x2028] ss:$400 sps:$4 sm:$0xff]   ;;  %v13032_v23 = vld [vmem:[%s14073_s15 + $0x1d04] ss:$400 sps:$4 sm:$0xff]  }
 0x5ed   : > { %v9162_v25 = vpop.f32.mrf.mxu0  ;;  %v9203_v26 = vpop.f32.mrf.mxu1  ;;  %v13035_v24 = vld [vmem:[%s14073_s15 + $0x1d0c] ss:$400 sps:$4 sm:$0xff]  }
 0x5ee   : > { %v15055_v29 = vadd.f32 %v9201_v10, %v9161_v13  ;;  %v13030_v10 = vld [vmem:[%s14073_s15 + $0x1d00] ss:$400 sps:$4 sm:$0xff]   ;;  %v13033_v13 = vld [vmem:[%s14073_s15 + $0x1d08] ss:$400 sps:$4 sm:$0xff]   ;;  %v13038_v25 = vld [vmem:[%s14073_s15 + $0x19e4] ss:$400 sps:$4 sm:$0xff]  }
 0x5ef   : > { %v9163_v31 = vpop.f32.mrf.mxu0  ;;  %v9204_v32 = vpop.f32.mrf.mxu1  ;;  %v13041_v26 = vld [vmem:[%s14073_s15 + $0x19ec] ss:$400 sps:$4 sm:$0xff]  }
 0x5f2   : > { %9319 = vmatpush2.bf16.xpose.msra.mxu0 %v12956_v61  ;;  %9360 = vmatpush2.bf16.xpose.msra.mxu1 %v12959_v3 }
 0x5f3   : > { %9370 = vmatprep.subr.bf16.mxu0 %v12968_v18  ;;  %9411 = vmatprep.subr.bf16.mxu1 %v12971_v9 }
 0x5f9   : > { %9321 = vmatmul.mubr.bf16.vlgmr.msra.gmra.mxu0 %v10438_v21  ;;  %9362 = vmatmul.mubr.bf16.vlgmr.msra.gmra.mxu1 %v10440_v33 }
 0x5fa   : > { %9371 = vmatpush1.bf16.xpose.msra.mxu0 %v12966_v34  ;;  %9412 = vmatpush1.bf16.xpose.msra.mxu1 %v12969_v37 }
 0x5fb   : > { %9372 = vmatprep.subr.bf16.mxu0 %v12974_v54  ;;  %9413 = vmatprep.subr.bf16.mxu1 %v12977_v39  ;;  %v13039_v54 = vld [vmem:[%s14073_s15 + $0x19e8] ss:$400 sps:$4 sm:$0xff]  }
 0x5fc   : > { %9402 = vmatprep.mubr.bf16.mxu0 %v10443_v40  ;;  %9443 = vmatprep.mubr.bf16.mxu1 %v10445_v58  ;;  %v13048_v58 = vld [vmem:[%s14073_s15 + $0x16d4] ss:$400 sps:$4 sm:$0xff]  }
 0x602   : > { %9373 = vmatpush1.bf16.xpose.msra.mxu0 %v12972_v14  ;;  %9414 = vmatpush1.bf16.xpose.msra.mxu1 %v12975_v41  ;;  %v13051_v14 = vld [vmem:[%s14073_s15 + $0x16dc] ss:$400 sps:$4 sm:$0xff]   ;;  %v10444_v41 = vcombine.low %v15069_v22, %v15069_v22  ;;  %v13052_v22 = vld [vmem:[%s14073_s15 + $0x13b0] ss:$400 sps:$4 sm:$0xff]  }
 0x603   : > { %9374 = vmatprep.subr.bf16.mxu0 %v12980_v27  ;;  %9415 = vmatprep.subr.bf16.mxu1 %v12983_v30  ;;  %v15136_v27 = vld [vmem:[%s14087_s12 + $0xf0] sm:$0xff]  ;;  %v15139_v30 = vld [vmem:[%s14087_s12 + $0xf8] sm:$0xff] }
 0x60a   : > { %9375 = vmatpush1.bf16.xpose.msra.mxu0 %v12978_v42  ;;  %9416 = vmatpush1.bf16.xpose.msra.mxu1 %v12981_v45  ;;  %v13046_v42 = vld [vmem:[%s14073_s15 + $0x16d0] ss:$400 sps:$4 sm:$0xff]   ;;  %v13049_v45 = vld [vmem:[%s14073_s15 + $0x16d8] ss:$400 sps:$4 sm:$0xff]  }
 0x60b   : > { %9376 = vmatprep.subr.bf16.mxu0 %v12986_v20  ;;  %9417 = vmatprep.subr.bf16.mxu1 %v12989_v47  ;;  %v13054_v20 = vld [vmem:[%s14073_s15 + $0x13b4] ss:$400 sps:$4 sm:$0xff]   ;;  %v13057_v47 = vld [vmem:[%s14073_s15 + $0x13bc] ss:$400 sps:$4 sm:$0xff]  }
 0x612   : > { %9377 = vmatpush1.bf16.xpose.msra.mxu0 %v12984_v48  ;;  %9418 = vmatpush1.bf16.xpose.msra.mxu1 %v12987_v49  ;;  %v10447_v48 = vcombine.high %v15136_v27, %v15136_v27  ;;  %v13055_v49 = vld [vmem:[%s14073_s15 + $0x13b8] ss:$400 sps:$4 sm:$0xff]  }
 0x613   : > { %9378 = vmatprep.subr.bf16.mxu0 %v12992_v35  ;;  %9419 = vmatprep.subr.bf16.mxu1 %v12995_v38  ;;  %v13060_v35 = vld [vmem:[%s14073_s15 + $0x1094] ss:$400 sps:$4 sm:$0xff]   ;;  %v13063_v38 = vld [vmem:[%s14073_s15 + $0x109c] ss:$400 sps:$4 sm:$0xff]  }
 0x61a   : > { %9379 = vmatpush1.bf16.xpose.msra.mxu0 %v12990_v50  ;;  %9420 = vmatpush1.bf16.xpose.msra.mxu1 %v12993_v55  ;;  %v13058_v50 = vld [vmem:[%s14073_s15 + $0x1090] ss:$400 sps:$4 sm:$0xff]   ;;  %v13061_v55 = vld [vmem:[%s14073_s15 + $0x1098] ss:$400 sps:$4 sm:$0xff]  }
 0x61b   : > { %9380 = vmatprep.subr.bf16.mxu0 %v12998_v28  ;;  %9421 = vmatprep.subr.bf16.mxu1 %v13001_v59  ;;  %v13066_v28 = vld [vmem:[%s14073_s15 + $0xd74] ss:$400 sps:$4 sm:$0xff]   ;;  %v13069_v59 = vld [vmem:[%s14073_s15 + $0xd7c] ss:$400 sps:$4 sm:$0xff]  }
 0x622   : > { %9381 = vmatpush1.bf16.xpose.msra.mxu0 %v12996_v60  ;;  %9422 = vmatpush1.bf16.xpose.msra.mxu1 %v12999_v63  ;;  %v13064_v60 = vld [vmem:[%s14073_s15 + $0xd70] ss:$400 sps:$4 sm:$0xff]   ;;  %v13067_v63 = vld [vmem:[%s14073_s15 + $0xd78] ss:$400 sps:$4 sm:$0xff]  }
 0x623   : > { %9382 = vmatprep.subr.bf16.mxu0 %v13004_v43  ;;  %9423 = vmatprep.subr.bf16.mxu1 %v13007_v46  ;;  %v13072_v43 = vld [vmem:[%s14073_s15 + $0xa54] ss:$400 sps:$4 sm:$0xff]   ;;  %v13075_v46 = vld [vmem:[%s14073_s15 + $0xa5c] ss:$400 sps:$4 sm:$0xff]  }
 0x62a   : > { %9383 = vmatpush1.bf16.xpose.msra.mxu0 %v13002_v0  ;;  %9424 = vmatpush1.bf16.xpose.msra.mxu1 %v13005_v62  ;;  %v13070_v0 = vld [vmem:[%s14073_s15 + $0xa50] ss:$400 sps:$4 sm:$0xff]   ;;  %v13073_v62 = vld [vmem:[%s14073_s15 + $0xa58] ss:$400 sps:$4 sm:$0xff]  }
 0x62b   : > { %9384 = vmatprep.subr.bf16.mxu0 %v13010_v36  ;;  %9425 = vmatprep.subr.bf16.mxu1 %v13013_v6  ;;  %v13078_v36 = vld [vmem:[%s14073_s15 + $0x734] ss:$400 sps:$4 sm:$0xff]   ;;  %v13081_v6 = vld [vmem:[%s14073_s15 + $0x73c] ss:$400 sps:$4 sm:$0xff]  }
 0x632   : > { %9385 = vmatpush1.bf16.xpose.msra.mxu0 %v13008_v52  ;;  %9426 = vmatpush1.bf16.xpose.msra.mxu1 %v13011_v56  ;;  %v13084_v52 = vld [vmem:[%s14073_s15 + $0x414] ss:$400 sps:$4 sm:$0xff]   ;;  %v13087_v56 = vld [vmem:[%s14073_s15 + $0x41c] ss:$400 sps:$4 sm:$0xff]  }
 0x633   : > { %9392 = vmatprep.subr.bf16.mxu0 %v11743_v8  ;;  %9433 = vmatprep.subr.bf16.mxu1 %v11745_v12  ;;  %v13082_v8 = vld [vmem:[%s14073_s15 + $0x410] ss:$400 sps:$4 sm:$0xff]   ;;  %v13085_v12 = vld [vmem:[%s14073_s15 + $0x418] ss:$400 sps:$4 sm:$0xff]  }
 0x63a   : > { %9393 = vmatpush2.bf16.xpose.msra.mxu0 %v11742_v44  ;;  %9434 = vmatpush2.bf16.xpose.msra.mxu1 %v11744_v2  ;;  %v13090_v44 = vld [vmem:[%s14073_s15 + $0xf4] ss:$400 sps:$4 sm:$0xff]   ;;  %v13093_v2 = vld [vmem:[%s14073_s15 + $0xfc] ss:$400 sps:$4 sm:$0xff]  }
 0x63b   : > { %9394 = vmatprep.subr.bf16.mxu0 %v13020_v15  ;;  %9435 = vmatprep.subr.bf16.mxu1 %v13023_v16  ;;  %v1502_v15 = vld [vmem:[%s14073_s15 + $0x2670] sm:$0xff]  ;;  %v1503_v16 = vld [vmem:[%s14073_s15 + $0x2678] sm:$0xff] }
 0x642   : > { %9395 = vmatpush2.bf16.xpose.msra.mxu0 %v13018_v1  ;;  %9436 = vmatpush2.bf16.xpose.msra.mxu1 %v13021_v5  ;;  %v13088_v1 = vld [vmem:[%s14073_s15 + $0xf0] ss:$400 sps:$4 sm:$0xff]   ;;  %v13091_v5 = vld [vmem:[%s14073_s15 + $0xf8] ss:$400 sps:$4 sm:$0xff]  }
 0x643   : > { %9396 = vmatprep.subr.bf16.mxu0 %v13026_v17  ;;  %9437 = vmatprep.subr.bf16.mxu1 %v13029_v4  ;;  %v11747_v17 = vcombine.high %v1502_v15, %v1502_v15  ;;  %v11749_v4 = vcombine.high %v1503_v16, %v1503_v16 }
 0x64a   : > { %9397 = vmatpush2.bf16.xpose.msra.mxu0 %v13024_v53  ;;  %9438 = vmatpush2.bf16.xpose.msra.mxu1 %v13027_v57  ;;  %v11746_v53 = vcombine.low %v1502_v15, %v1502_v15  ;;  %v11748_v57 = vcombine.low %v1503_v16, %v1503_v16  ;;  %v13156_v15 = vld [vmem:[%s14073_s15 + $0x740] ss:$400 sps:$4 sm:$0xff]   ;;  %v13159_v16 = vld [vmem:[%s14073_s15 + $0x748] ss:$400 sps:$4 sm:$0xff]  }
 0x64b   : > { %9398 = vmatprep.subr.bf16.mxu0 %v13032_v23  ;;  %9439 = vmatprep.subr.bf16.mxu1 %v13035_v24  ;;  %v13100_v23 = vld [vmem:[%s14073_s15 + $0x2354] ss:$400 sps:$4 sm:$0xff]   ;;  %v13103_v24 = vld [vmem:[%s14073_s15 + $0x235c] ss:$400 sps:$4 sm:$0xff]  }
 0x651   : > { %v9240_v61 = vpop.f32.mrf.mxu0  ;;  %v9281_v3 = vpop.f32.mrf.mxu1 }
 0x652   : > { %v9241_v31 = vadd.f32 %v9240_v61, %v15052_v11  ;;  %9399 = vmatpush2.bf16.xpose.msra.mxu0 %v13030_v10  ;;  %9440 = vmatpush2.bf16.xpose.msra.mxu1 %v13033_v13  ;;  %v13036_v11 = vld [vmem:[%s14073_s15 + $0x19e0] ss:$400 sps:$4 sm:$0xff]   ;;  %v13101_v13 = vld [vmem:[%s14073_s15 + $0x2358] ss:$400 sps:$4 sm:$0xff]  }
 0x653   : > { %v9242_v32 = vpop.f32.mrf.mxu0  ;;  %v9283_v18 = vpop.f32.mrf.mxu1  ;;  %9400 = vmatprep.subr.bf16.mxu0 %v13038_v25  ;;  %9441 = vmatprep.subr.bf16.mxu1 %v13041_v26  ;;  %v13098_v10 = vld [vmem:[%s14073_s15 + $0x2350] ss:$400 sps:$4 sm:$0xff]   ;;  %v13106_v25 = vld [vmem:[%s14073_s15 + $0x2034] ss:$400 sps:$4 sm:$0xff]   ;;  %v13109_v26 = vld [vmem:[%s14073_s15 + $0x203c] ss:$400 sps:$4 sm:$0xff]  }
 0x654   : > { %v15122_v9 = vadd.f32 %v9281_v3, %v9241_v31  ;;  %v9243_v21 = vadd.f32 %v9242_v32, %v15055_v29  ;;  %v10442_v29 = vcombine.low %v15066_v19, %v15066_v19  ;;  %v10449_v19 = vcombine.high %v15139_v30, %v15139_v30  ;;  %v13104_v61 = vld [vmem:[%s14073_s15 + $0x2030] ss:$400 sps:$4 sm:$0xff]   ;;  %v13107_v3 = vld [vmem:[%s14073_s15 + $0x2038] ss:$400 sps:$4 sm:$0xff]   ;;  %v13112_v31 = vld [vmem:[%s14073_s15 + $0x1d14] ss:$400 sps:$4 sm:$0xff]  }
 0x655   : > { %v9244_v33 = vpop.f32.mrf.mxu0  ;;  %v9285_v34 = vpop.f32.mrf.mxu1  ;;  %v13115_v32 = vld [vmem:[%s14073_s15 + $0x1d1c] ss:$400 sps:$4 sm:$0xff]  }
 0x656   : > { %v15125_v37 = vadd.f32 %v9283_v18, %v9243_v21  ;;  %v13110_v18 = vld [vmem:[%s14073_s15 + $0x1d10] ss:$400 sps:$4 sm:$0xff]   ;;  %v13113_v21 = vld [vmem:[%s14073_s15 + $0x1d18] ss:$400 sps:$4 sm:$0xff]   ;;  %v13118_v33 = vld [vmem:[%s14073_s15 + $0x19f4] ss:$400 sps:$4 sm:$0xff]  }
 0x657   : > { %v9245_v39 = vpop.f32.mrf.mxu0  ;;  %v9286_v40 = vpop.f32.mrf.mxu1  ;;  %v13121_v34 = vld [vmem:[%s14073_s15 + $0x19fc] ss:$400 sps:$4 sm:$0xff]  }
 0x65a   : > { %9401 = vmatpush2.bf16.xpose.msra.mxu0 %v13036_v11  ;;  %9442 = vmatpush2.bf16.xpose.msra.mxu1 %v13039_v54 }
 0x65b   : > { %9452 = vmatprep.subr.bf16.mxu0 %v13048_v58  ;;  %9493 = vmatprep.subr.bf16.mxu1 %v13051_v14 }
 0x661   : > { %9403 = vmatmul.mubr.bf16.vlgmr.msra.gmra.mxu0 %v10442_v29  ;;  %9444 = vmatmul.mubr.bf16.vlgmr.msra.gmra.mxu1 %v10444_v41 }
 0x662   : > { %9453 = vmatpush1.bf16.xpose.msra.mxu0 %v13046_v42  ;;  %9494 = vmatpush1.bf16.xpose.msra.mxu1 %v13049_v45 }
 0x663   : > { %9454 = vmatprep.subr.bf16.mxu0 %v13054_v20  ;;  %9495 = vmatprep.subr.bf16.mxu1 %v13057_v47  ;;  %v13119_v20 = vld [vmem:[%s14073_s15 + $0x19f8] ss:$400 sps:$4 sm:$0xff]  }
 0x664   : > { %9484 = vmatprep.mubr.bf16.mxu0 %v10447_v48  ;;  %9525 = vmatprep.mubr.bf16.mxu1 %v10449_v19  ;;  %v13128_v19 = vld [vmem:[%s14073_s15 + $0x16e4] ss:$400 sps:$4 sm:$0xff]  }
 0x66a   : > { %9455 = vmatpush1.bf16.xpose.msra.mxu0 %v13052_v22  ;;  %9496 = vmatpush1.bf16.xpose.msra.mxu1 %v13055_v49  ;;  %v13131_v22 = vld [vmem:[%s14073_s15 + $0x16ec] ss:$400 sps:$4 sm:$0xff]   ;;  %v10448_v49 = vcombine.low %v15139_v30, %v15139_v30  ;;  %v13132_v30 = vld [vmem:[%s14073_s15 + $0x13c0] ss:$400 sps:$4 sm:$0xff]  }
 0x66b   : > { %9456 = vmatprep.subr.bf16.mxu0 %v13060_v35  ;;  %9497 = vmatprep.subr.bf16.mxu1 %v13063_v38  ;;  %v15206_v35 = vld [vmem:[%s14087_s12 + $0x100] sm:$0xff]  ;;  %v15209_v38 = vld [vmem:[%s14087_s12 + $0x108] sm:$0xff] }
 0x672   : > { %9457 = vmatpush1.bf16.xpose.msra.mxu0 %v13058_v50  ;;  %9498 = vmatpush1.bf16.xpose.msra.mxu1 %v13061_v55  ;;  %v13126_v50 = vld [vmem:[%s14073_s15 + $0x16e0] ss:$400 sps:$4 sm:$0xff]   ;;  %v13129_v55 = vld [vmem:[%s14073_s15 + $0x16e8] ss:$400 sps:$4 sm:$0xff]  }
 0x673   : > { %9458 = vmatprep.subr.bf16.mxu0 %v13066_v28  ;;  %9499 = vmatprep.subr.bf16.mxu1 %v13069_v59  ;;  %v13134_v28 = vld [vmem:[%s14073_s15 + $0x13c4] ss:$400 sps:$4 sm:$0xff]   ;;  %v13137_v59 = vld [vmem:[%s14073_s15 + $0x13cc] ss:$400 sps:$4 sm:$0xff]  }
 0x67a   : > { %9459 = vmatpush1.bf16.xpose.msra.mxu0 %v13064_v60  ;;  %9500 = vmatpush1.bf16.xpose.msra.mxu1 %v13067_v63  ;;  %v10451_v60 = vcombine.high %v15206_v35, %v15206_v35  ;;  %v13135_v63 = vld [vmem:[%s14073_s15 + $0x13c8] ss:$400 sps:$4 sm:$0xff]  }
 0x67b   : > { %9460 = vmatprep.subr.bf16.mxu0 %v13072_v43  ;;  %9501 = vmatprep.subr.bf16.mxu1 %v13075_v46  ;;  %v13140_v43 = vld [vmem:[%s14073_s15 + $0x10a4] ss:$400 sps:$4 sm:$0xff]   ;;  %v13143_v46 = vld [vmem:[%s14073_s15 + $0x10ac] ss:$400 sps:$4 sm:$0xff]  }
 0x682   : > { %9461 = vmatpush1.bf16.xpose.msra.mxu0 %v13070_v0  ;;  %9502 = vmatpush1.bf16.xpose.msra.mxu1 %v13073_v62  ;;  %v13138_v0 = vld [vmem:[%s14073_s15 + $0x10a0] ss:$400 sps:$4 sm:$0xff]   ;;  %v13141_v62 = vld [vmem:[%s14073_s15 + $0x10a8] ss:$400 sps:$4 sm:$0xff]  }
 0x683   : > { %9462 = vmatprep.subr.bf16.mxu0 %v13078_v36  ;;  %9503 = vmatprep.subr.bf16.mxu1 %v13081_v6  ;;  %v13146_v36 = vld [vmem:[%s14073_s15 + $0xd84] ss:$400 sps:$4 sm:$0xff]   ;;  %v13149_v6 = vld [vmem:[%s14073_s15 + $0xd8c] ss:$400 sps:$4 sm:$0xff]  }
 0x68a   : > { %9463 = vmatpush1.bf16.xpose.msra.mxu0 %v13076_v7  ;;  %9504 = vmatpush1.bf16.xpose.msra.mxu1 %v13079_v51  ;;  %v13144_v7 = vld [vmem:[%s14073_s15 + $0xd80] ss:$400 sps:$4 sm:$0xff]   ;;  %v13147_v51 = vld [vmem:[%s14073_s15 + $0xd88] ss:$400 sps:$4 sm:$0xff]  }
 0x68b   : > { %9464 = vmatprep.subr.bf16.mxu0 %v13084_v52  ;;  %9505 = vmatprep.subr.bf16.mxu1 %v13087_v56  ;;  %v13152_v52 = vld [vmem:[%s14073_s15 + $0xa64] ss:$400 sps:$4 sm:$0xff]   ;;  %v13155_v56 = vld [vmem:[%s14073_s15 + $0xa6c] ss:$400 sps:$4 sm:$0xff]  }
 0x692   : > { %9465 = vmatpush1.bf16.xpose.msra.mxu0 %v13082_v8  ;;  %9506 = vmatpush1.bf16.xpose.msra.mxu1 %v13085_v12  ;;  %v13150_v8 = vld [vmem:[%s14073_s15 + $0xa60] ss:$400 sps:$4 sm:$0xff]   ;;  %v13153_v12 = vld [vmem:[%s14073_s15 + $0xa68] ss:$400 sps:$4 sm:$0xff]  }
 0x693   : > { %9466 = vmatprep.subr.bf16.mxu0 %v13090_v44  ;;  %9507 = vmatprep.subr.bf16.mxu1 %v13093_v2  ;;  %v13158_v44 = vld [vmem:[%s14073_s15 + $0x744] ss:$400 sps:$4 sm:$0xff]   ;;  %v13161_v2 = vld [vmem:[%s14073_s15 + $0x74c] ss:$400 sps:$4 sm:$0xff]  }
 0x69a   : > { %9467 = vmatpush1.bf16.xpose.msra.mxu0 %v13088_v1  ;;  %9508 = vmatpush1.bf16.xpose.msra.mxu1 %v13091_v5  ;;  %v13164_v1 = vld [vmem:[%s14073_s15 + $0x424] ss:$400 sps:$4 sm:$0xff]   ;;  %v13167_v5 = vld [vmem:[%s14073_s15 + $0x42c] ss:$400 sps:$4 sm:$0xff]  }
 0x69b   : > { %9474 = vmatprep.subr.bf16.mxu0 %v11747_v17  ;;  %9515 = vmatprep.subr.bf16.mxu1 %v11749_v4  ;;  %v13162_v17 = vld [vmem:[%s14073_s15 + $0x420] ss:$400 sps:$4 sm:$0xff]   ;;  %v13165_v4 = vld [vmem:[%s14073_s15 + $0x428] ss:$400 sps:$4 sm:$0xff]  }
 0x6a2   : > { %9475 = vmatpush2.bf16.xpose.msra.mxu0 %v11746_v53  ;;  %9516 = vmatpush2.bf16.xpose.msra.mxu1 %v11748_v57  ;;  %v13170_v53 = vld [vmem:[%s14073_s15 + $0x104] ss:$400 sps:$4 sm:$0xff]   ;;  %v13173_v57 = vld [vmem:[%s14073_s15 + $0x10c] ss:$400 sps:$4 sm:$0xff]  }
 0x6a3   : > { %9476 = vmatprep.subr.bf16.mxu0 %v13100_v23  ;;  %9517 = vmatprep.subr.bf16.mxu1 %v13103_v24  ;;  %v1504_v23 = vld [vmem:[%s14073_s15 + $0x2680] sm:$0xff]  ;;  %v1505_v24 = vld [vmem:[%s14073_s15 + $0x2688] sm:$0xff] }
 0x6aa   : > { %9477 = vmatpush2.bf16.xpose.msra.mxu0 %v13098_v10  ;;  %9518 = vmatpush2.bf16.xpose.msra.mxu1 %v13101_v13  ;;  %v13168_v10 = vld [vmem:[%s14073_s15 + $0x100] ss:$400 sps:$4 sm:$0xff]   ;;  %v13171_v13 = vld [vmem:[%s14073_s15 + $0x108] ss:$400 sps:$4 sm:$0xff]  }
 0x6ab   : > { %9478 = vmatprep.subr.bf16.mxu0 %v13106_v25  ;;  %9519 = vmatprep.subr.bf16.mxu1 %v13109_v26  ;;  %v11751_v25 = vcombine.high %v1504_v23, %v1504_v23  ;;  %v11753_v26 = vcombine.high %v1505_v24, %v1505_v24 }
 0x6b2   : > { %9479 = vmatpush2.bf16.xpose.msra.mxu0 %v13104_v61  ;;  %9520 = vmatpush2.bf16.xpose.msra.mxu1 %v13107_v3  ;;  %v11750_v61 = vcombine.low %v1504_v23, %v1504_v23  ;;  %v11752_v3 = vcombine.low %v1505_v24, %v1505_v24  ;;  %v13236_v23 = vld [vmem:[%s14073_s15 + $0x750] ss:$400 sps:$4 sm:$0xff]   ;;  %v13239_v24 = vld [vmem:[%s14073_s15 + $0x758] ss:$400 sps:$4 sm:$0xff]  }
 0x6b3   : > { %9480 = vmatprep.subr.bf16.mxu0 %v13112_v31  ;;  %9521 = vmatprep.subr.bf16.mxu1 %v13115_v32  ;;  %v13180_v31 = vld [vmem:[%s14073_s15 + $0x2364] ss:$400 sps:$4 sm:$0xff]   ;;  %v13183_v32 = vld [vmem:[%s14073_s15 + $0x236c] ss:$400 sps:$4 sm:$0xff]  }
 0x6b9   : > { %v9322_v11 = vpop.f32.mrf.mxu0  ;;  %v9363_v54 = vpop.f32.mrf.mxu1 }
 0x6ba   : > { %v9323_v39 = vadd.f32 %v9322_v11, %v15122_v9  ;;  %9481 = vmatpush2.bf16.xpose.msra.mxu0 %v13110_v18  ;;  %9522 = vmatpush2.bf16.xpose.msra.mxu1 %v13113_v21  ;;  %v13116_v9 = vld [vmem:[%s14073_s15 + $0x19f0] ss:$400 sps:$4 sm:$0xff]   ;;  %v13181_v21 = vld [vmem:[%s14073_s15 + $0x2368] ss:$400 sps:$4 sm:$0xff]  }
 0x6bb   : > { %v9324_v40 = vpop.f32.mrf.mxu0  ;;  %v9365_v58 = vpop.f32.mrf.mxu1  ;;  %9482 = vmatprep.subr.bf16.mxu0 %v13118_v33  ;;  %9523 = vmatprep.subr.bf16.mxu1 %v13121_v34  ;;  %v13178_v18 = vld [vmem:[%s14073_s15 + $0x2360] ss:$400 sps:$4 sm:$0xff]   ;;  %v13186_v33 = vld [vmem:[%s14073_s15 + $0x2044] ss:$400 sps:$4 sm:$0xff]   ;;  %v13189_v34 = vld [vmem:[%s14073_s15 + $0x204c] ss:$400 sps:$4 sm:$0xff]  }
 0x6bc   : > { %v15192_v14 = vadd.f32 %v9363_v54, %v9323_v39  ;;  %v9325_v29 = vadd.f32 %v9324_v40, %v15125_v37  ;;  %v10446_v37 = vcombine.low %v15136_v27, %v15136_v27  ;;  %v10453_v27 = vcombine.high %v15209_v38, %v15209_v38  ;;  %v13184_v11 = vld [vmem:[%s14073_s15 + $0x2040] ss:$400 sps:$4 sm:$0xff]   ;;  %v13187_v54 = vld [vmem:[%s14073_s15 + $0x2048] ss:$400 sps:$4 sm:$0xff]   ;;  %v13192_v39 = vld [vmem:[%s14073_s15 + $0x1d24] ss:$400 sps:$4 sm:$0xff]  }
 0x6bd   : > { %v9326_v41 = vpop.f32.mrf.mxu0  ;;  %v9367_v42 = vpop.f32.mrf.mxu1  ;;  %v13195_v40 = vld [vmem:[%s14073_s15 + $0x1d2c] ss:$400 sps:$4 sm:$0xff]  }
 0x6be   : > { %v15195_v45 = vadd.f32 %v9365_v58, %v9325_v29  ;;  %v13190_v58 = vld [vmem:[%s14073_s15 + $0x1d20] ss:$400 sps:$4 sm:$0xff]   ;;  %v13193_v29 = vld [vmem:[%s14073_s15 + $0x1d28] ss:$400 sps:$4 sm:$0xff]   ;;  %v13198_v41 = vld [vmem:[%s14073_s15 + $0x1a04] ss:$400 sps:$4 sm:$0xff]  }
 0x6bf   : > { %v9327_v47 = vpop.f32.mrf.mxu0  ;;  %v9368_v48 = vpop.f32.mrf.mxu1  ;;  %v13201_v42 = vld [vmem:[%s14073_s15 + $0x1a0c] ss:$400 sps:$4 sm:$0xff]  }
 0x6c2   : > { %9483 = vmatpush2.bf16.xpose.msra.mxu0 %v13116_v9  ;;  %9524 = vmatpush2.bf16.xpose.msra.mxu1 %v13119_v20 }
 0x6c3   : > { %9534 = vmatprep.subr.bf16.mxu0 %v13128_v19  ;;  %9575 = vmatprep.subr.bf16.mxu1 %v13131_v22 }
 0x6c9   : > { %9485 = vmatmul.mubr.bf16.vlgmr.msra.gmra.mxu0 %v10446_v37  ;;  %9526 = vmatmul.mubr.bf16.vlgmr.msra.gmra.mxu1 %v10448_v49 }
 0x6ca   : > { %9535 = vmatpush1.bf16.xpose.msra.mxu0 %v13126_v50  ;;  %9576 = vmatpush1.bf16.xpose.msra.mxu1 %v13129_v55 }
 0x6cb   : > { %9536 = vmatprep.subr.bf16.mxu0 %v13134_v28  ;;  %9577 = vmatprep.subr.bf16.mxu1 %v13137_v59  ;;  %v13199_v28 = vld [vmem:[%s14073_s15 + $0x1a08] ss:$400 sps:$4 sm:$0xff]  }
 0x6cc   : > { %9566 = vmatprep.mubr.bf16.mxu0 %v10451_v60  ;;  %9607 = vmatprep.mubr.bf16.mxu1 %v10453_v27  ;;  %v13208_v27 = vld [vmem:[%s14073_s15 + $0x16f4] ss:$400 sps:$4 sm:$0xff]  }
 0x6d2   : > { %9537 = vmatpush1.bf16.xpose.msra.mxu0 %v13132_v30  ;;  %9578 = vmatpush1.bf16.xpose.msra.mxu1 %v13135_v63  ;;  %v13211_v30 = vld [vmem:[%s14073_s15 + $0x16fc] ss:$400 sps:$4 sm:$0xff]   ;;  %v10452_v63 = vcombine.low %v15209_v38, %v15209_v38  ;;  %v13212_v38 = vld [vmem:[%s14073_s15 + $0x13d0] ss:$400 sps:$4 sm:$0xff]  }
 0x6d3   : > { %9538 = vmatprep.subr.bf16.mxu0 %v13140_v43  ;;  %9579 = vmatprep.subr.bf16.mxu1 %v13143_v46  ;;  %v15276_v43 = vld [vmem:[%s14087_s12 + $0x110] sm:$0xff]  ;;  %v15279_v46 = vld [vmem:[%s14087_s12 + $0x118] sm:$0xff] }
 0x6da   : > { %9539 = vmatpush1.bf16.xpose.msra.mxu0 %v13138_v0  ;;  %9580 = vmatpush1.bf16.xpose.msra.mxu1 %v13141_v62  ;;  %v13206_v0 = vld [vmem:[%s14073_s15 + $0x16f0] ss:$400 sps:$4 sm:$0xff]   ;;  %v13209_v62 = vld [vmem:[%s14073_s15 + $0x16f8] ss:$400 sps:$4 sm:$0xff]  }
 0x6db   : > { %9540 = vmatprep.subr.bf16.mxu0 %v13146_v36  ;;  %9581 = vmatprep.subr.bf16.mxu1 %v13149_v6  ;;  %v13214_v36 = vld [vmem:[%s14073_s15 + $0x13d4] ss:$400 sps:$4 sm:$0xff]   ;;  %v13217_v6 = vld [vmem:[%s14073_s15 + $0x13dc] ss:$400 sps:$4 sm:$0xff]  }
 0x6e2   : > { %9541 = vmatpush1.bf16.xpose.msra.mxu0 %v13144_v7  ;;  %9582 = vmatpush1.bf16.xpose.msra.mxu1 %v13147_v51  ;;  %v10455_v7 = vcombine.high %v15276_v43, %v15276_v43  ;;  %v13215_v51 = vld [vmem:[%s14073_s15 + $0x13d8] ss:$400 sps:$4 sm:$0xff]  }
 0x6e3   : > { %9542 = vmatprep.subr.bf16.mxu0 %v13152_v52  ;;  %9583 = vmatprep.subr.bf16.mxu1 %v13155_v56  ;;  %v13220_v52 = vld [vmem:[%s14073_s15 + $0x10b4] ss:$400 sps:$4 sm:$0xff]   ;;  %v13223_v56 = vld [vmem:[%s14073_s15 + $0x10bc] ss:$400 sps:$4 sm:$0xff]  }
 0x6ea   : > { %9543 = vmatpush1.bf16.xpose.msra.mxu0 %v13150_v8  ;;  %9584 = vmatpush1.bf16.xpose.msra.mxu1 %v13153_v12  ;;  %v13218_v8 = vld [vmem:[%s14073_s15 + $0x10b0] ss:$400 sps:$4 sm:$0xff]   ;;  %v13221_v12 = vld [vmem:[%s14073_s15 + $0x10b8] ss:$400 sps:$4 sm:$0xff]  }
 0x6eb   : > { %9544 = vmatprep.subr.bf16.mxu0 %v13158_v44  ;;  %9585 = vmatprep.subr.bf16.mxu1 %v13161_v2  ;;  %v13226_v44 = vld [vmem:[%s14073_s15 + $0xd94] ss:$400 sps:$4 sm:$0xff]   ;;  %v13229_v2 = vld [vmem:[%s14073_s15 + $0xd9c] ss:$400 sps:$4 sm:$0xff]  }
 0x6f2   : > { %9545 = vmatpush1.bf16.xpose.msra.mxu0 %v13156_v15  ;;  %9586 = vmatpush1.bf16.xpose.msra.mxu1 %v13159_v16  ;;  %v13224_v15 = vld [vmem:[%s14073_s15 + $0xd90] ss:$400 sps:$4 sm:$0xff]   ;;  %v13227_v16 = vld [vmem:[%s14073_s15 + $0xd98] ss:$400 sps:$4 sm:$0xff]  }
 0x6f3   : > { %9546 = vmatprep.subr.bf16.mxu0 %v13164_v1  ;;  %9587 = vmatprep.subr.bf16.mxu1 %v13167_v5  ;;  %v13232_v1 = vld [vmem:[%s14073_s15 + $0xa74] ss:$400 sps:$4 sm:$0xff]   ;;  %v13235_v5 = vld [vmem:[%s14073_s15 + $0xa7c] ss:$400 sps:$4 sm:$0xff]  }
 0x6fa   : > { %9547 = vmatpush1.bf16.xpose.msra.mxu0 %v13162_v17  ;;  %9588 = vmatpush1.bf16.xpose.msra.mxu1 %v13165_v4  ;;  %v13230_v17 = vld [vmem:[%s14073_s15 + $0xa70] ss:$400 sps:$4 sm:$0xff]   ;;  %v13233_v4 = vld [vmem:[%s14073_s15 + $0xa78] ss:$400 sps:$4 sm:$0xff]  }
 0x6fb   : > { %9548 = vmatprep.subr.bf16.mxu0 %v13170_v53  ;;  %9589 = vmatprep.subr.bf16.mxu1 %v13173_v57  ;;  %v13238_v53 = vld [vmem:[%s14073_s15 + $0x754] ss:$400 sps:$4 sm:$0xff]   ;;  %v13241_v57 = vld [vmem:[%s14073_s15 + $0x75c] ss:$400 sps:$4 sm:$0xff]  }
 0x702   : > { %9549 = vmatpush1.bf16.xpose.msra.mxu0 %v13168_v10  ;;  %9590 = vmatpush1.bf16.xpose.msra.mxu1 %v13171_v13  ;;  %v13244_v10 = vld [vmem:[%s14073_s15 + $0x434] ss:$400 sps:$4 sm:$0xff]   ;;  %v13247_v13 = vld [vmem:[%s14073_s15 + $0x43c] ss:$400 sps:$4 sm:$0xff]  }
 0x703   : > { %9556 = vmatprep.subr.bf16.mxu0 %v11751_v25  ;;  %9597 = vmatprep.subr.bf16.mxu1 %v11753_v26  ;;  %v13242_v25 = vld [vmem:[%s14073_s15 + $0x430] ss:$400 sps:$4 sm:$0xff]   ;;  %v13245_v26 = vld [vmem:[%s14073_s15 + $0x438] ss:$400 sps:$4 sm:$0xff]  }
 0x70a   : > { %9557 = vmatpush2.bf16.xpose.msra.mxu0 %v11750_v61  ;;  %9598 = vmatpush2.bf16.xpose.msra.mxu1 %v11752_v3  ;;  %v13250_v61 = vld [vmem:[%s14073_s15 + $0x114] ss:$400 sps:$4 sm:$0xff]   ;;  %v13253_v3 = vld [vmem:[%s14073_s15 + $0x11c] ss:$400 sps:$4 sm:$0xff]  }
 0x70b   : > { %9558 = vmatprep.subr.bf16.mxu0 %v13180_v31  ;;  %9599 = vmatprep.subr.bf16.mxu1 %v13183_v32  ;;  %v1506_v31 = vld [vmem:[%s14073_s15 + $0x2690] sm:$0xff]  ;;  %v1507_v32 = vld [vmem:[%s14073_s15 + $0x2698] sm:$0xff] }
 0x712   : > { %9559 = vmatpush2.bf16.xpose.msra.mxu0 %v13178_v18  ;;  %9600 = vmatpush2.bf16.xpose.msra.mxu1 %v13181_v21  ;;  %v13248_v18 = vld [vmem:[%s14073_s15 + $0x110] ss:$400 sps:$4 sm:$0xff]   ;;  %v13251_v21 = vld [vmem:[%s14073_s15 + $0x118] ss:$400 sps:$4 sm:$0xff]  }
 0x713   : > { %9560 = vmatprep.subr.bf16.mxu0 %v13186_v33  ;;  %9601 = vmatprep.subr.bf16.mxu1 %v13189_v34  ;;  %v11755_v33 = vcombine.high %v1506_v31, %v1506_v31  ;;  %v11757_v34 = vcombine.high %v1507_v32, %v1507_v32 }
 0x71a   : > { %9561 = vmatpush2.bf16.xpose.msra.mxu0 %v13184_v11  ;;  %9602 = vmatpush2.bf16.xpose.msra.mxu1 %v13187_v54  ;;  %v11754_v11 = vcombine.low %v1506_v31, %v1506_v31  ;;  %v11756_v54 = vcombine.low %v1507_v32, %v1507_v32  ;;  %v13316_v31 = vld [vmem:[%s14073_s15 + $0x760] ss:$400 sps:$4 sm:$0xff]   ;;  %v13319_v32 = vld [vmem:[%s14073_s15 + $0x768] ss:$400 sps:$4 sm:$0xff]  }
 0x71b   : > { %9562 = vmatprep.subr.bf16.mxu0 %v13192_v39  ;;  %9603 = vmatprep.subr.bf16.mxu1 %v13195_v40  ;;  %v13260_v39 = vld [vmem:[%s14073_s15 + $0x2374] ss:$400 sps:$4 sm:$0xff]   ;;  %v13263_v40 = vld [vmem:[%s14073_s15 + $0x237c] ss:$400 sps:$4 sm:$0xff]  }
 0x721   : > { %v9404_v9 = vpop.f32.mrf.mxu0  ;;  %v9445_v20 = vpop.f32.mrf.mxu1 }
 0x722   : > { %v9405_v47 = vadd.f32 %v9404_v9, %v15192_v14  ;;  %9563 = vmatpush2.bf16.xpose.msra.mxu0 %v13190_v58  ;;  %9604 = vmatpush2.bf16.xpose.msra.mxu1 %v13193_v29  ;;  %v13196_v14 = vld [vmem:[%s14073_s15 + $0x1a00] ss:$400 sps:$4 sm:$0xff]   ;;  %v13261_v29 = vld [vmem:[%s14073_s15 + $0x2378] ss:$400 sps:$4 sm:$0xff]  }
 0x723   : > { %v9406_v48 = vpop.f32.mrf.mxu0  ;;  %v9447_v19 = vpop.f32.mrf.mxu1  ;;  %9564 = vmatprep.subr.bf16.mxu0 %v13198_v41  ;;  %9605 = vmatprep.subr.bf16.mxu1 %v13201_v42  ;;  %v13258_v58 = vld [vmem:[%s14073_s15 + $0x2370] ss:$400 sps:$4 sm:$0xff]   ;;  %v13266_v41 = vld [vmem:[%s14073_s15 + $0x2054] ss:$400 sps:$4 sm:$0xff]   ;;  %v13269_v42 = vld [vmem:[%s14073_s15 + $0x205c] ss:$400 sps:$4 sm:$0xff]  }
 0x724   : > { %v15262_v22 = vadd.f32 %v9445_v20, %v9405_v47  ;;  %v9407_v37 = vadd.f32 %v9406_v48, %v15195_v45  ;;  %v10450_v45 = vcombine.low %v15206_v35, %v15206_v35  ;;  %v10457_v35 = vcombine.high %v15279_v46, %v15279_v46  ;;  %v13264_v9 = vld [vmem:[%s14073_s15 + $0x2050] ss:$400 sps:$4 sm:$0xff]   ;;  %v13267_v20 = vld [vmem:[%s14073_s15 + $0x2058] ss:$400 sps:$4 sm:$0xff]   ;;  %v13272_v47 = vld [vmem:[%s14073_s15 + $0x1d34] ss:$400 sps:$4 sm:$0xff]  }
 0x725   : > { %v9408_v49 = vpop.f32.mrf.mxu0  ;;  %v9449_v50 = vpop.f32.mrf.mxu1  ;;  %v13275_v48 = vld [vmem:[%s14073_s15 + $0x1d3c] ss:$400 sps:$4 sm:$0xff]  }
 0x726   : > { %v15265_v55 = vadd.f32 %v9447_v19, %v9407_v37  ;;  %v13270_v19 = vld [vmem:[%s14073_s15 + $0x1d30] ss:$400 sps:$4 sm:$0xff]   ;;  %v13273_v37 = vld [vmem:[%s14073_s15 + $0x1d38] ss:$400 sps:$4 sm:$0xff]   ;;  %v13278_v49 = vld [vmem:[%s14073_s15 + $0x1a14] ss:$400 sps:$4 sm:$0xff]  }
 0x727   : > { %v9409_v59 = vpop.f32.mrf.mxu0  ;;  %v9450_v60 = vpop.f32.mrf.mxu1  ;;  %v13281_v50 = vld [vmem:[%s14073_s15 + $0x1a1c] ss:$400 sps:$4 sm:$0xff]  }
 0x72a   : > { %9565 = vmatpush2.bf16.xpose.msra.mxu0 %v13196_v14  ;;  %9606 = vmatpush2.bf16.xpose.msra.mxu1 %v13199_v28 }
 0x72b   : > { %9616 = vmatprep.subr.bf16.mxu0 %v13208_v27  ;;  %9657 = vmatprep.subr.bf16.mxu1 %v13211_v30 }
 0x731   : > { %9567 = vmatmul.mubr.bf16.vlgmr.msra.gmra.mxu0 %v10450_v45  ;;  %9608 = vmatmul.mubr.bf16.vlgmr.msra.gmra.mxu1 %v10452_v63 }
 0x732   : > { %9617 = vmatpush1.bf16.xpose.msra.mxu0 %v13206_v0  ;;  %9658 = vmatpush1.bf16.xpose.msra.mxu1 %v13209_v62 }
 0x733   : > { %9618 = vmatprep.subr.bf16.mxu0 %v13214_v36  ;;  %9659 = vmatprep.subr.bf16.mxu1 %v13217_v6  ;;  %v13279_v36 = vld [vmem:[%s14073_s15 + $0x1a18] ss:$400 sps:$4 sm:$0xff]  }
 0x734   : > { %9648 = vmatprep.mubr.bf16.mxu0 %v10455_v7  ;;  %9689 = vmatprep.mubr.bf16.mxu1 %v10457_v35  ;;  %v13288_v35 = vld [vmem:[%s14073_s15 + $0x1704] ss:$400 sps:$4 sm:$0xff]  }
 0x73a   : > { %9619 = vmatpush1.bf16.xpose.msra.mxu0 %v13212_v38  ;;  %9660 = vmatpush1.bf16.xpose.msra.mxu1 %v13215_v51  ;;  %v13291_v38 = vld [vmem:[%s14073_s15 + $0x170c] ss:$400 sps:$4 sm:$0xff]   ;;  %v10456_v51 = vcombine.low %v15279_v46, %v15279_v46  ;;  %v13292_v46 = vld [vmem:[%s14073_s15 + $0x13e0] ss:$400 sps:$4 sm:$0xff]  }
 0x73b   : > { %9620 = vmatprep.subr.bf16.mxu0 %v13220_v52  ;;  %9661 = vmatprep.subr.bf16.mxu1 %v13223_v56  ;;  %v15346_v52 = vld [vmem:[%s14087_s12 + $0x120] sm:$0xff]  ;;  %v15349_v56 = vld [vmem:[%s14087_s12 + $0x128] sm:$0xff] }
 0x742   : > { %9621 = vmatpush1.bf16.xpose.msra.mxu0 %v13218_v8  ;;  %9662 = vmatpush1.bf16.xpose.msra.mxu1 %v13221_v12  ;;  %v13286_v8 = vld [vmem:[%s14073_s15 + $0x1700] ss:$400 sps:$4 sm:$0xff]   ;;  %v13289_v12 = vld [vmem:[%s14073_s15 + $0x1708] ss:$400 sps:$4 sm:$0xff]  }
 0x743   : > { %9622 = vmatprep.subr.bf16.mxu0 %v13226_v44  ;;  %9663 = vmatprep.subr.bf16.mxu1 %v13229_v2  ;;  %v13294_v44 = vld [vmem:[%s14073_s15 + $0x13e4] ss:$400 sps:$4 sm:$0xff]   ;;  %v13297_v2 = vld [vmem:[%s14073_s15 + $0x13ec] ss:$400 sps:$4 sm:$0xff]  }
 0x74a   : > { %9623 = vmatpush1.bf16.xpose.msra.mxu0 %v13224_v15  ;;  %9664 = vmatpush1.bf16.xpose.msra.mxu1 %v13227_v16  ;;  %v10459_v15 = vcombine.high %v15346_v52, %v15346_v52  ;;  %v13295_v16 = vld [vmem:[%s14073_s15 + $0x13e8] ss:$400 sps:$4 sm:$0xff]  }
 0x74b   : > { %9624 = vmatprep.subr.bf16.mxu0 %v13232_v1  ;;  %9665 = vmatprep.subr.bf16.mxu1 %v13235_v5  ;;  %v13300_v1 = vld [vmem:[%s14073_s15 + $0x10c4] ss:$400 sps:$4 sm:$0xff]   ;;  %v13303_v5 = vld [vmem:[%s14073_s15 + $0x10cc] ss:$400 sps:$4 sm:$0xff]  }
 0x752   : > { %9625 = vmatpush1.bf16.xpose.msra.mxu0 %v13230_v17  ;;  %9666 = vmatpush1.bf16.xpose.msra.mxu1 %v13233_v4  ;;  %v13298_v17 = vld [vmem:[%s14073_s15 + $0x10c0] ss:$400 sps:$4 sm:$0xff]   ;;  %v13301_v4 = vld [vmem:[%s14073_s15 + $0x10c8] ss:$400 sps:$4 sm:$0xff]  }
 0x753   : > { %9626 = vmatprep.subr.bf16.mxu0 %v13238_v53  ;;  %9667 = vmatprep.subr.bf16.mxu1 %v13241_v57  ;;  %v13306_v53 = vld [vmem:[%s14073_s15 + $0xda4] ss:$400 sps:$4 sm:$0xff]   ;;  %v13309_v57 = vld [vmem:[%s14073_s15 + $0xdac] ss:$400 sps:$4 sm:$0xff]  }
 0x75a   : > { %9627 = vmatpush1.bf16.xpose.msra.mxu0 %v13236_v23  ;;  %9668 = vmatpush1.bf16.xpose.msra.mxu1 %v13239_v24  ;;  %v13304_v23 = vld [vmem:[%s14073_s15 + $0xda0] ss:$400 sps:$4 sm:$0xff]   ;;  %v13307_v24 = vld [vmem:[%s14073_s15 + $0xda8] ss:$400 sps:$4 sm:$0xff]  }
 0x75b   : > { %9628 = vmatprep.subr.bf16.mxu0 %v13244_v10  ;;  %9669 = vmatprep.subr.bf16.mxu1 %v13247_v13  ;;  %v13312_v10 = vld [vmem:[%s14073_s15 + $0xa84] ss:$400 sps:$4 sm:$0xff]   ;;  %v13315_v13 = vld [vmem:[%s14073_s15 + $0xa8c] ss:$400 sps:$4 sm:$0xff]  }
 0x762   : > { %9629 = vmatpush1.bf16.xpose.msra.mxu0 %v13242_v25  ;;  %9670 = vmatpush1.bf16.xpose.msra.mxu1 %v13245_v26  ;;  %v13310_v25 = vld [vmem:[%s14073_s15 + $0xa80] ss:$400 sps:$4 sm:$0xff]   ;;  %v13313_v26 = vld [vmem:[%s14073_s15 + $0xa88] ss:$400 sps:$4 sm:$0xff]  }
 0x763   : > { %9630 = vmatprep.subr.bf16.mxu0 %v13250_v61  ;;  %9671 = vmatprep.subr.bf16.mxu1 %v13253_v3  ;;  %v13318_v61 = vld [vmem:[%s14073_s15 + $0x764] ss:$400 sps:$4 sm:$0xff]   ;;  %v13321_v3 = vld [vmem:[%s14073_s15 + $0x76c] ss:$400 sps:$4 sm:$0xff]  }
 0x76a   : > { %9631 = vmatpush1.bf16.xpose.msra.mxu0 %v13248_v18  ;;  %9672 = vmatpush1.bf16.xpose.msra.mxu1 %v13251_v21  ;;  %v13324_v18 = vld [vmem:[%s14073_s15 + $0x444] ss:$400 sps:$4 sm:$0xff]   ;;  %v13327_v21 = vld [vmem:[%s14073_s15 + $0x44c] ss:$400 sps:$4 sm:$0xff]  }
 0x76b   : > { %9638 = vmatprep.subr.bf16.mxu0 %v11755_v33  ;;  %9679 = vmatprep.subr.bf16.mxu1 %v11757_v34  ;;  %v13322_v33 = vld [vmem:[%s14073_s15 + $0x440] ss:$400 sps:$4 sm:$0xff]   ;;  %v13325_v34 = vld [vmem:[%s14073_s15 + $0x448] ss:$400 sps:$4 sm:$0xff]  }
 0x772   : > { %9639 = vmatpush2.bf16.xpose.msra.mxu0 %v11754_v11  ;;  %9680 = vmatpush2.bf16.xpose.msra.mxu1 %v11756_v54  ;;  %v13330_v11 = vld [vmem:[%s14073_s15 + $0x124] ss:$400 sps:$4 sm:$0xff]   ;;  %v13333_v54 = vld [vmem:[%s14073_s15 + $0x12c] ss:$400 sps:$4 sm:$0xff]  }
 0x773   : > { %9640 = vmatprep.subr.bf16.mxu0 %v13260_v39  ;;  %9681 = vmatprep.subr.bf16.mxu1 %v13263_v40  ;;  %v1508_v39 = vld [vmem:[%s14073_s15 + $0x26a0] sm:$0xff]  ;;  %v1509_v40 = vld [vmem:[%s14073_s15 + $0x26a8] sm:$0xff] }
 0x77a   : > { %9641 = vmatpush2.bf16.xpose.msra.mxu0 %v13258_v58  ;;  %9682 = vmatpush2.bf16.xpose.msra.mxu1 %v13261_v29  ;;  %v13328_v58 = vld [vmem:[%s14073_s15 + $0x120] ss:$400 sps:$4 sm:$0xff]   ;;  %v13331_v29 = vld [vmem:[%s14073_s15 + $0x128] ss:$400 sps:$4 sm:$0xff]  }
 0x77b   : > { %9642 = vmatprep.subr.bf16.mxu0 %v13266_v41  ;;  %9683 = vmatprep.subr.bf16.mxu1 %v13269_v42  ;;  %v11759_v41 = vcombine.high %v1508_v39, %v1508_v39  ;;  %v11761_v42 = vcombine.high %v1509_v40, %v1509_v40 }
 0x782   : > { %9643 = vmatpush2.bf16.xpose.msra.mxu0 %v13264_v9  ;;  %9684 = vmatpush2.bf16.xpose.msra.mxu1 %v13267_v20  ;;  %v11758_v9 = vcombine.low %v1508_v39, %v1508_v39  ;;  %v11760_v20 = vcombine.low %v1509_v40, %v1509_v40  ;;  %v13396_v39 = vld [vmem:[%s14073_s15 + $0x770] ss:$400 sps:$4 sm:$0xff]   ;;  %v13399_v40 = vld [vmem:[%s14073_s15 + $0x778] ss:$400 sps:$4 sm:$0xff]  }
 0x783   : > { %9644 = vmatprep.subr.bf16.mxu0 %v13272_v47  ;;  %9685 = vmatprep.subr.bf16.mxu1 %v13275_v48  ;;  %v13340_v47 = vld [vmem:[%s14073_s15 + $0x2384] ss:$400 sps:$4 sm:$0xff]   ;;  %v13343_v48 = vld [vmem:[%s14073_s15 + $0x238c] ss:$400 sps:$4 sm:$0xff]  }
 0x789   : > { %v9486_v14 = vpop.f32.mrf.mxu0  ;;  %v9527_v28 = vpop.f32.mrf.mxu1 }
 0x78a   : > { %v9487_v59 = vadd.f32 %v9486_v14, %v15262_v22  ;;  %9645 = vmatpush2.bf16.xpose.msra.mxu0 %v13270_v19  ;;  %9686 = vmatpush2.bf16.xpose.msra.mxu1 %v13273_v37  ;;  %v13276_v22 = vld [vmem:[%s14073_s15 + $0x1a10] ss:$400 sps:$4 sm:$0xff]   ;;  %v13341_v37 = vld [vmem:[%s14073_s15 + $0x2388] ss:$400 sps:$4 sm:$0xff]  }
 0x78b   : > { %v9488_v60 = vpop.f32.mrf.mxu0  ;;  %v9529_v27 = vpop.f32.mrf.mxu1  ;;  %9646 = vmatprep.subr.bf16.mxu0 %v13278_v49  ;;  %9687 = vmatprep.subr.bf16.mxu1 %v13281_v50  ;;  %v13338_v19 = vld [vmem:[%s14073_s15 + $0x2380] ss:$400 sps:$4 sm:$0xff]   ;;  %v13346_v49 = vld [vmem:[%s14073_s15 + $0x2064] ss:$400 sps:$4 sm:$0xff]   ;;  %v13349_v50 = vld [vmem:[%s14073_s15 + $0x206c] ss:$400 sps:$4 sm:$0xff]  }
 0x78c   : > { %v15332_v30 = vadd.f32 %v9527_v28, %v9487_v59  ;;  %v9489_v45 = vadd.f32 %v9488_v60, %v15265_v55  ;;  %v10454_v55 = vcombine.low %v15276_v43, %v15276_v43  ;;  %v10461_v43 = vcombine.high %v15349_v56, %v15349_v56  ;;  %v13344_v14 = vld [vmem:[%s14073_s15 + $0x2060] ss:$400 sps:$4 sm:$0xff]   ;;  %v13347_v28 = vld [vmem:[%s14073_s15 + $0x2068] ss:$400 sps:$4 sm:$0xff]   ;;  %v13352_v59 = vld [vmem:[%s14073_s15 + $0x1d44] ss:$400 sps:$4 sm:$0xff]  }
 0x78d   : > { %v9490_v63 = vpop.f32.mrf.mxu0  ;;  %v9531_v0 = vpop.f32.mrf.mxu1  ;;  %v13355_v60 = vld [vmem:[%s14073_s15 + $0x1d4c] ss:$400 sps:$4 sm:$0xff]  }
 0x78e   : > { %v15335_v62 = vadd.f32 %v9529_v27, %v9489_v45  ;;  %v13350_v27 = vld [vmem:[%s14073_s15 + $0x1d40] ss:$400 sps:$4 sm:$0xff]   ;;  %v13353_v45 = vld [vmem:[%s14073_s15 + $0x1d48] ss:$400 sps:$4 sm:$0xff]   ;;  %v13358_v63 = vld [vmem:[%s14073_s15 + $0x1a24] ss:$400 sps:$4 sm:$0xff]  }
 0x78f   : > { %v9491_v6 = vpop.f32.mrf.mxu0  ;;  %v9532_v7 = vpop.f32.mrf.mxu1  ;;  %v13361_v0 = vld [vmem:[%s14073_s15 + $0x1a2c] ss:$400 sps:$4 sm:$0xff]  }
 0x792   : > { %9647 = vmatpush2.bf16.xpose.msra.mxu0 %v13276_v22  ;;  %9688 = vmatpush2.bf16.xpose.msra.mxu1 %v13279_v36 }
 0x793   : > { %9698 = vmatprep.subr.bf16.mxu0 %v13288_v35  ;;  %9739 = vmatprep.subr.bf16.mxu1 %v13291_v38 }
 0x799   : > { %9649 = vmatmul.mubr.bf16.vlgmr.msra.gmra.mxu0 %v10454_v55  ;;  %9690 = vmatmul.mubr.bf16.vlgmr.msra.gmra.mxu1 %v10456_v51 }
 0x79a   : > { %9699 = vmatpush1.bf16.xpose.msra.mxu0 %v13286_v8  ;;  %9740 = vmatpush1.bf16.xpose.msra.mxu1 %v13289_v12 }
 0x79b   : > { %9700 = vmatprep.subr.bf16.mxu0 %v13294_v44  ;;  %9741 = vmatprep.subr.bf16.mxu1 %v13297_v2  ;;  %v13359_v44 = vld [vmem:[%s14073_s15 + $0x1a28] ss:$400 sps:$4 sm:$0xff]  }
 0x79c   : > { %9730 = vmatprep.mubr.bf16.mxu0 %v10459_v15  ;;  %9771 = vmatprep.mubr.bf16.mxu1 %v10461_v43  ;;  %v13368_v43 = vld [vmem:[%s14073_s15 + $0x1714] ss:$400 sps:$4 sm:$0xff]  }
 0x7a2   : > { %9701 = vmatpush1.bf16.xpose.msra.mxu0 %v13292_v46  ;;  %9742 = vmatpush1.bf16.xpose.msra.mxu1 %v13295_v16  ;;  %v13371_v46 = vld [vmem:[%s14073_s15 + $0x171c] ss:$400 sps:$4 sm:$0xff]   ;;  %v10460_v16 = vcombine.low %v15349_v56, %v15349_v56  ;;  %v13372_v56 = vld [vmem:[%s14073_s15 + $0x13f0] ss:$400 sps:$4 sm:$0xff]  }
 0x7a3   : > { %9702 = vmatprep.subr.bf16.mxu0 %v13300_v1  ;;  %9743 = vmatprep.subr.bf16.mxu1 %v13303_v5  ;;  %v15416_v1 = vld [vmem:[%s14087_s12 + $0x130] sm:$0xff]  ;;  %v15419_v5 = vld [vmem:[%s14087_s12 + $0x138] sm:$0xff] }
 0x7aa   : > { %9703 = vmatpush1.bf16.xpose.msra.mxu0 %v13298_v17  ;;  %9744 = vmatpush1.bf16.xpose.msra.mxu1 %v13301_v4  ;;  %v13366_v17 = vld [vmem:[%s14073_s15 + $0x1710] ss:$400 sps:$4 sm:$0xff]   ;;  %v13369_v4 = vld [vmem:[%s14073_s15 + $0x1718] ss:$400 sps:$4 sm:$0xff]  }
 0x7ab   : > { %9704 = vmatprep.subr.bf16.mxu0 %v13306_v53  ;;  %9745 = vmatprep.subr.bf16.mxu1 %v13309_v57  ;;  %v13374_v53 = vld [vmem:[%s14073_s15 + $0x13f4] ss:$400 sps:$4 sm:$0xff]   ;;  %v13377_v57 = vld [vmem:[%s14073_s15 + $0x13fc] ss:$400 sps:$4 sm:$0xff]  }
 0x7b2   : > { %9705 = vmatpush1.bf16.xpose.msra.mxu0 %v13304_v23  ;;  %9746 = vmatpush1.bf16.xpose.msra.mxu1 %v13307_v24  ;;  %v10463_v23 = vcombine.high %v15416_v1, %v15416_v1  ;;  %v13375_v24 = vld [vmem:[%s14073_s15 + $0x13f8] ss:$400 sps:$4 sm:$0xff]  }
 0x7b3   : > { %9706 = vmatprep.subr.bf16.mxu0 %v13312_v10  ;;  %9747 = vmatprep.subr.bf16.mxu1 %v13315_v13  ;;  %v13380_v10 = vld [vmem:[%s14073_s15 + $0x10d4] ss:$400 sps:$4 sm:$0xff]   ;;  %v13383_v13 = vld [vmem:[%s14073_s15 + $0x10dc] ss:$400 sps:$4 sm:$0xff]  }
 0x7ba   : > { %9707 = vmatpush1.bf16.xpose.msra.mxu0 %v13310_v25  ;;  %9748 = vmatpush1.bf16.xpose.msra.mxu1 %v13313_v26  ;;  %v13378_v25 = vld [vmem:[%s14073_s15 + $0x10d0] ss:$400 sps:$4 sm:$0xff]   ;;  %v13381_v26 = vld [vmem:[%s14073_s15 + $0x10d8] ss:$400 sps:$4 sm:$0xff]  }
 0x7bb   : > { %9708 = vmatprep.subr.bf16.mxu0 %v13318_v61  ;;  %9749 = vmatprep.subr.bf16.mxu1 %v13321_v3  ;;  %v13386_v61 = vld [vmem:[%s14073_s15 + $0xdb4] ss:$400 sps:$4 sm:$0xff]   ;;  %v13389_v3 = vld [vmem:[%s14073_s15 + $0xdbc] ss:$400 sps:$4 sm:$0xff]  }
 0x7c2   : > { %9709 = vmatpush1.bf16.xpose.msra.mxu0 %v13316_v31  ;;  %9750 = vmatpush1.bf16.xpose.msra.mxu1 %v13319_v32  ;;  %v13384_v31 = vld [vmem:[%s14073_s15 + $0xdb0] ss:$400 sps:$4 sm:$0xff]   ;;  %v13387_v32 = vld [vmem:[%s14073_s15 + $0xdb8] ss:$400 sps:$4 sm:$0xff]  }
 0x7c3   : > { %9710 = vmatprep.subr.bf16.mxu0 %v13324_v18  ;;  %9751 = vmatprep.subr.bf16.mxu1 %v13327_v21  ;;  %v13392_v18 = vld [vmem:[%s14073_s15 + $0xa94] ss:$400 sps:$4 sm:$0xff]   ;;  %v13395_v21 = vld [vmem:[%s14073_s15 + $0xa9c] ss:$400 sps:$4 sm:$0xff]  }
 0x7ca   : > { %9711 = vmatpush1.bf16.xpose.msra.mxu0 %v13322_v33  ;;  %9752 = vmatpush1.bf16.xpose.msra.mxu1 %v13325_v34  ;;  %v13390_v33 = vld [vmem:[%s14073_s15 + $0xa90] ss:$400 sps:$4 sm:$0xff]   ;;  %v13393_v34 = vld [vmem:[%s14073_s15 + $0xa98] ss:$400 sps:$4 sm:$0xff]  }
 0x7cb   : > { %9712 = vmatprep.subr.bf16.mxu0 %v13330_v11  ;;  %9753 = vmatprep.subr.bf16.mxu1 %v13333_v54  ;;  %v13398_v11 = vld [vmem:[%s14073_s15 + $0x774] ss:$400 sps:$4 sm:$0xff]   ;;  %v13401_v54 = vld [vmem:[%s14073_s15 + $0x77c] ss:$400 sps:$4 sm:$0xff]  }
 0x7d2   : > { %9713 = vmatpush1.bf16.xpose.msra.mxu0 %v13328_v58  ;;  %9754 = vmatpush1.bf16.xpose.msra.mxu1 %v13331_v29  ;;  %v13404_v58 = vld [vmem:[%s14073_s15 + $0x454] ss:$400 sps:$4 sm:$0xff]   ;;  %v13407_v29 = vld [vmem:[%s14073_s15 + $0x45c] ss:$400 sps:$4 sm:$0xff]  }
 0x7d3   : > { %9720 = vmatprep.subr.bf16.mxu0 %v11759_v41  ;;  %9761 = vmatprep.subr.bf16.mxu1 %v11761_v42  ;;  %v13402_v41 = vld [vmem:[%s14073_s15 + $0x450] ss:$400 sps:$4 sm:$0xff]   ;;  %v13405_v42 = vld [vmem:[%s14073_s15 + $0x458] ss:$400 sps:$4 sm:$0xff]  }
 0x7da   : > { %9721 = vmatpush2.bf16.xpose.msra.mxu0 %v11758_v9  ;;  %9762 = vmatpush2.bf16.xpose.msra.mxu1 %v11760_v20  ;;  %v13410_v9 = vld [vmem:[%s14073_s15 + $0x134] ss:$400 sps:$4 sm:$0xff]   ;;  %v13413_v20 = vld [vmem:[%s14073_s15 + $0x13c] ss:$400 sps:$4 sm:$0xff]  }
 0x7db   : > { %9722 = vmatprep.subr.bf16.mxu0 %v13340_v47  ;;  %9763 = vmatprep.subr.bf16.mxu1 %v13343_v48  ;;  %v1510_v47 = vld [vmem:[%s14073_s15 + $0x26b0] sm:$0xff]  ;;  %v1511_v48 = vld [vmem:[%s14073_s15 + $0x26b8] sm:$0xff] }
 0x7e2   : > { %9723 = vmatpush2.bf16.xpose.msra.mxu0 %v13338_v19  ;;  %9764 = vmatpush2.bf16.xpose.msra.mxu1 %v13341_v37  ;;  %v13408_v19 = vld [vmem:[%s14073_s15 + $0x130] ss:$400 sps:$4 sm:$0xff]   ;;  %v13411_v37 = vld [vmem:[%s14073_s15 + $0x138] ss:$400 sps:$4 sm:$0xff]  }
 0x7e3   : > { %9724 = vmatprep.subr.bf16.mxu0 %v13346_v49  ;;  %9765 = vmatprep.subr.bf16.mxu1 %v13349_v50  ;;  %v11763_v49 = vcombine.high %v1510_v47, %v1510_v47  ;;  %v11765_v50 = vcombine.high %v1511_v48, %v1511_v48 }
 0x7ea   : > { %9725 = vmatpush2.bf16.xpose.msra.mxu0 %v13344_v14  ;;  %9766 = vmatpush2.bf16.xpose.msra.mxu1 %v13347_v28  ;;  %v11762_v14 = vcombine.low %v1510_v47, %v1510_v47  ;;  %v11764_v28 = vcombine.low %v1511_v48, %v1511_v48  ;;  %v13476_v47 = vld [vmem:[%s14073_s15 + $0x780] ss:$400 sps:$4 sm:$0xff]   ;;  %v13479_v48 = vld [vmem:[%s14073_s15 + $0x788] ss:$400 sps:$4 sm:$0xff]  }
 0x7eb   : > { %9726 = vmatprep.subr.bf16.mxu0 %v13352_v59  ;;  %9767 = vmatprep.subr.bf16.mxu1 %v13355_v60  ;;  %v13420_v59 = vld [vmem:[%s14073_s15 + $0x2394] ss:$400 sps:$4 sm:$0xff]   ;;  %v13423_v60 = vld [vmem:[%s14073_s15 + $0x239c] ss:$400 sps:$4 sm:$0xff]  }
 0x7f1   : > { %v9568_v22 = vpop.f32.mrf.mxu0  ;;  %v9609_v36 = vpop.f32.mrf.mxu1 }
 0x7f2   : > { %v9569_v6 = vadd.f32 %v9568_v22, %v15332_v30  ;;  %9727 = vmatpush2.bf16.xpose.msra.mxu0 %v13350_v27  ;;  %9768 = vmatpush2.bf16.xpose.msra.mxu1 %v13353_v45  ;;  %v13356_v30 = vld [vmem:[%s14073_s15 + $0x1a20] ss:$400 sps:$4 sm:$0xff]   ;;  %v13421_v45 = vld [vmem:[%s14073_s15 + $0x2398] ss:$400 sps:$4 sm:$0xff]  }
 0x7f3   : > { %v9570_v7 = vpop.f32.mrf.mxu0  ;;  %v9611_v35 = vpop.f32.mrf.mxu1  ;;  %9728 = vmatprep.subr.bf16.mxu0 %v13358_v63  ;;  %9769 = vmatprep.subr.bf16.mxu1 %v13361_v0  ;;  %v13418_v27 = vld [vmem:[%s14073_s15 + $0x2390] ss:$400 sps:$4 sm:$0xff]   ;;  %v13426_v63 = vld [vmem:[%s14073_s15 + $0x2074] ss:$400 sps:$4 sm:$0xff]   ;;  %v13429_v0 = vld [vmem:[%s14073_s15 + $0x207c] ss:$400 sps:$4 sm:$0xff]  }
 0x7f4   : > { %v15402_v38 = vadd.f32 %v9609_v36, %v9569_v6  ;;  %v9571_v55 = vadd.f32 %v9570_v7, %v15335_v62  ;;  %v10458_v62 = vcombine.low %v15346_v52, %v15346_v52  ;;  %v10465_v52 = vcombine.high %v15419_v5, %v15419_v5  ;;  %v13424_v22 = vld [vmem:[%s14073_s15 + $0x2070] ss:$400 sps:$4 sm:$0xff]   ;;  %v13427_v36 = vld [vmem:[%s14073_s15 + $0x2078] ss:$400 sps:$4 sm:$0xff]   ;;  %v13432_v6 = vld [vmem:[%s14073_s15 + $0x1d54] ss:$400 sps:$4 sm:$0xff]  }
 0x7f5   : > { %v9572_v51 = vpop.f32.mrf.mxu0  ;;  %v9613_v8 = vpop.f32.mrf.mxu1  ;;  %v13435_v7 = vld [vmem:[%s14073_s15 + $0x1d5c] ss:$400 sps:$4 sm:$0xff]  }
 0x7f6   : > { %v15405_v12 = vadd.f32 %v9611_v35, %v9571_v55  ;;  %v13430_v35 = vld [vmem:[%s14073_s15 + $0x1d50] ss:$400 sps:$4 sm:$0xff]   ;;  %v13433_v55 = vld [vmem:[%s14073_s15 + $0x1d58] ss:$400 sps:$4 sm:$0xff]   ;;  %v13438_v51 = vld [vmem:[%s14073_s15 + $0x1a34] ss:$400 sps:$4 sm:$0xff]  }
 0x7f7   : > { %v9573_v2 = vpop.f32.mrf.mxu0  ;;  %v9614_v15 = vpop.f32.mrf.mxu1  ;;  %v13441_v8 = vld [vmem:[%s14073_s15 + $0x1a3c] ss:$400 sps:$4 sm:$0xff]  }
 0x7fa   : > { %9729 = vmatpush2.bf16.xpose.msra.mxu0 %v13356_v30  ;;  %9770 = vmatpush2.bf16.xpose.msra.mxu1 %v13359_v44 }
 0x7fb   : > { %9780 = vmatprep.subr.bf16.mxu0 %v13368_v43  ;;  %9821 = vmatprep.subr.bf16.mxu1 %v13371_v46 }
 0x801   : > { %9731 = vmatmul.mubr.bf16.vlgmr.msra.gmra.mxu0 %v10458_v62  ;;  %9772 = vmatmul.mubr.bf16.vlgmr.msra.gmra.mxu1 %v10460_v16 }
 0x802   : > { %9781 = vmatpush1.bf16.xpose.msra.mxu0 %v13366_v17  ;;  %9822 = vmatpush1.bf16.xpose.msra.mxu1 %v13369_v4 }
 0x803   : > { %9782 = vmatprep.subr.bf16.mxu0 %v13374_v53  ;;  %9823 = vmatprep.subr.bf16.mxu1 %v13377_v57  ;;  %v13439_v53 = vld [vmem:[%s14073_s15 + $0x1a38] ss:$400 sps:$4 sm:$0xff]  }
 0x804   : > { %9812 = vmatprep.mubr.bf16.mxu0 %v10463_v23  ;;  %9853 = vmatprep.mubr.bf16.mxu1 %v10465_v52  ;;  %v13448_v52 = vld [vmem:[%s14073_s15 + $0x1724] ss:$400 sps:$4 sm:$0xff]  }
 0x80a   : > { %9783 = vmatpush1.bf16.xpose.msra.mxu0 %v13372_v56  ;;  %9824 = vmatpush1.bf16.xpose.msra.mxu1 %v13375_v24  ;;  %v13451_v56 = vld [vmem:[%s14073_s15 + $0x172c] ss:$400 sps:$4 sm:$0xff]   ;;  %v10464_v24 = vcombine.low %v15419_v5, %v15419_v5  ;;  %v13452_v5 = vld [vmem:[%s14073_s15 + $0x1400] ss:$400 sps:$4 sm:$0xff]  }
 0x80b   : > { %9784 = vmatprep.subr.bf16.mxu0 %v13380_v10  ;;  %9825 = vmatprep.subr.bf16.mxu1 %v13383_v13  ;;  %v15486_v10 = vld [vmem:[%s14087_s12 + $0x140] sm:$0xff]  ;;  %v15489_v13 = vld [vmem:[%s14087_s12 + $0x148] sm:$0xff] }
 0x812   : > { %9785 = vmatpush1.bf16.xpose.msra.mxu0 %v13378_v25  ;;  %9826 = vmatpush1.bf16.xpose.msra.mxu1 %v13381_v26  ;;  %v13446_v25 = vld [vmem:[%s14073_s15 + $0x1720] ss:$400 sps:$4 sm:$0xff]   ;;  %v13449_v26 = vld [vmem:[%s14073_s15 + $0x1728] ss:$400 sps:$4 sm:$0xff]  }
 0x813   : > { %9786 = vmatprep.subr.bf16.mxu0 %v13386_v61  ;;  %9827 = vmatprep.subr.bf16.mxu1 %v13389_v3  ;;  %v13454_v61 = vld [vmem:[%s14073_s15 + $0x1404] ss:$400 sps:$4 sm:$0xff]   ;;  %v13457_v3 = vld [vmem:[%s14073_s15 + $0x140c] ss:$400 sps:$4 sm:$0xff]  }
 0x81a   : > { %9787 = vmatpush1.bf16.xpose.msra.mxu0 %v13384_v31  ;;  %9828 = vmatpush1.bf16.xpose.msra.mxu1 %v13387_v32  ;;  %v10467_v31 = vcombine.high %v15486_v10, %v15486_v10  ;;  %v13455_v32 = vld [vmem:[%s14073_s15 + $0x1408] ss:$400 sps:$4 sm:$0xff]  }
 0x81b   : > { %9788 = vmatprep.subr.bf16.mxu0 %v13392_v18  ;;  %9829 = vmatprep.subr.bf16.mxu1 %v13395_v21  ;;  %v13460_v18 = vld [vmem:[%s14073_s15 + $0x10e4] ss:$400 sps:$4 sm:$0xff]   ;;  %v13463_v21 = vld [vmem:[%s14073_s15 + $0x10ec] ss:$400 sps:$4 sm:$0xff]  }
 0x822   : > { %9789 = vmatpush1.bf16.xpose.msra.mxu0 %v13390_v33  ;;  %9830 = vmatpush1.bf16.xpose.msra.mxu1 %v13393_v34  ;;  %v13458_v33 = vld [vmem:[%s14073_s15 + $0x10e0] ss:$400 sps:$4 sm:$0xff]   ;;  %v13461_v34 = vld [vmem:[%s14073_s15 + $0x10e8] ss:$400 sps:$4 sm:$0xff]  }
 0x823   : > { %9790 = vmatprep.subr.bf16.mxu0 %v13398_v11  ;;  %9831 = vmatprep.subr.bf16.mxu1 %v13401_v54  ;;  %v13466_v11 = vld [vmem:[%s14073_s15 + $0xdc4] ss:$400 sps:$4 sm:$0xff]   ;;  %v13469_v54 = vld [vmem:[%s14073_s15 + $0xdcc] ss:$400 sps:$4 sm:$0xff]  }
 0x82a   : > { %9791 = vmatpush1.bf16.xpose.msra.mxu0 %v13396_v39  ;;  %9832 = vmatpush1.bf16.xpose.msra.mxu1 %v13399_v40  ;;  %v13464_v39 = vld [vmem:[%s14073_s15 + $0xdc0] ss:$400 sps:$4 sm:$0xff]   ;;  %v13467_v40 = vld [vmem:[%s14073_s15 + $0xdc8] ss:$400 sps:$4 sm:$0xff]  }
 0x82b   : > { %9792 = vmatprep.subr.bf16.mxu0 %v13404_v58  ;;  %9833 = vmatprep.subr.bf16.mxu1 %v13407_v29  ;;  %v13472_v58 = vld [vmem:[%s14073_s15 + $0xaa4] ss:$400 sps:$4 sm:$0xff]   ;;  %v13475_v29 = vld [vmem:[%s14073_s15 + $0xaac] ss:$400 sps:$4 sm:$0xff]  }
 0x832   : > { %9793 = vmatpush1.bf16.xpose.msra.mxu0 %v13402_v41  ;;  %9834 = vmatpush1.bf16.xpose.msra.mxu1 %v13405_v42  ;;  %v13470_v41 = vld [vmem:[%s14073_s15 + $0xaa0] ss:$400 sps:$4 sm:$0xff]   ;;  %v13473_v42 = vld [vmem:[%s14073_s15 + $0xaa8] ss:$400 sps:$4 sm:$0xff]  }
 0x833   : > { %9794 = vmatprep.subr.bf16.mxu0 %v13410_v9  ;;  %9835 = vmatprep.subr.bf16.mxu1 %v13413_v20  ;;  %v13478_v9 = vld [vmem:[%s14073_s15 + $0x784] ss:$400 sps:$4 sm:$0xff]   ;;  %v13481_v20 = vld [vmem:[%s14073_s15 + $0x78c] ss:$400 sps:$4 sm:$0xff]  }
 0x83a   : > { %9795 = vmatpush1.bf16.xpose.msra.mxu0 %v13408_v19  ;;  %9836 = vmatpush1.bf16.xpose.msra.mxu1 %v13411_v37  ;;  %v13484_v19 = vld [vmem:[%s14073_s15 + $0x464] ss:$400 sps:$4 sm:$0xff]   ;;  %v13487_v37 = vld [vmem:[%s14073_s15 + $0x46c] ss:$400 sps:$4 sm:$0xff]  }
 0x83b   : > { %9802 = vmatprep.subr.bf16.mxu0 %v11763_v49  ;;  %9843 = vmatprep.subr.bf16.mxu1 %v11765_v50  ;;  %v13482_v49 = vld [vmem:[%s14073_s15 + $0x460] ss:$400 sps:$4 sm:$0xff]   ;;  %v13485_v50 = vld [vmem:[%s14073_s15 + $0x468] ss:$400 sps:$4 sm:$0xff]  }
 0x842   : > { %9803 = vmatpush2.bf16.xpose.msra.mxu0 %v11762_v14  ;;  %9844 = vmatpush2.bf16.xpose.msra.mxu1 %v11764_v28  ;;  %v13490_v14 = vld [vmem:[%s14073_s15 + $0x144] ss:$400 sps:$4 sm:$0xff]   ;;  %v13493_v28 = vld [vmem:[%s14073_s15 + $0x14c] ss:$400 sps:$4 sm:$0xff]  }
 0x843   : > { %9804 = vmatprep.subr.bf16.mxu0 %v13420_v59  ;;  %9845 = vmatprep.subr.bf16.mxu1 %v13423_v60  ;;  %v1512_v59 = vld [vmem:[%s14073_s15 + $0x26c0] sm:$0xff]  ;;  %v1513_v60 = vld [vmem:[%s14073_s15 + $0x26c8] sm:$0xff] }
 0x84a   : > { %9805 = vmatpush2.bf16.xpose.msra.mxu0 %v13418_v27  ;;  %9846 = vmatpush2.bf16.xpose.msra.mxu1 %v13421_v45  ;;  %v13488_v27 = vld [vmem:[%s14073_s15 + $0x140] ss:$400 sps:$4 sm:$0xff]   ;;  %v13491_v45 = vld [vmem:[%s14073_s15 + $0x148] ss:$400 sps:$4 sm:$0xff]  }
 0x84b   : > { %9806 = vmatprep.subr.bf16.mxu0 %v13426_v63  ;;  %9847 = vmatprep.subr.bf16.mxu1 %v13429_v0  ;;  %v11767_v63 = vcombine.high %v1512_v59, %v1512_v59  ;;  %v11769_v0 = vcombine.high %v1513_v60, %v1513_v60 }
 0x852   : > { %9807 = vmatpush2.bf16.xpose.msra.mxu0 %v13424_v22  ;;  %9848 = vmatpush2.bf16.xpose.msra.mxu1 %v13427_v36  ;;  %v11766_v22 = vcombine.low %v1512_v59, %v1512_v59  ;;  %v11768_v36 = vcombine.low %v1513_v60, %v1513_v60  ;;  %v13556_v59 = vld [vmem:[%s14073_s15 + $0x790] ss:$400 sps:$4 sm:$0xff]   ;;  %v13559_v60 = vld [vmem:[%s14073_s15 + $0x798] ss:$400 sps:$4 sm:$0xff]  }
 0x853   : > { %9808 = vmatprep.subr.bf16.mxu0 %v13432_v6  ;;  %9849 = vmatprep.subr.bf16.mxu1 %v13435_v7  ;;  %v13500_v6 = vld [vmem:[%s14073_s15 + $0x23a4] ss:$400 sps:$4 sm:$0xff]   ;;  %v13503_v7 = vld [vmem:[%s14073_s15 + $0x23ac] ss:$400 sps:$4 sm:$0xff]  }
 0x859   : > { %v9650_v30 = vpop.f32.mrf.mxu0  ;;  %v9691_v44 = vpop.f32.mrf.mxu1 }
 0x85a   : > { %v9651_v2 = vadd.f32 %v9650_v30, %v15402_v38  ;;  %9809 = vmatpush2.bf16.xpose.msra.mxu0 %v13430_v35  ;;  %9850 = vmatpush2.bf16.xpose.msra.mxu1 %v13433_v55  ;;  %v13436_v38 = vld [vmem:[%s14073_s15 + $0x1a30] ss:$400 sps:$4 sm:$0xff]   ;;  %v13501_v55 = vld [vmem:[%s14073_s15 + $0x23a8] ss:$400 sps:$4 sm:$0xff]  }
 0x85b   : > { %v9652_v15 = vpop.f32.mrf.mxu0  ;;  %v9693_v43 = vpop.f32.mrf.mxu1  ;;  %9810 = vmatprep.subr.bf16.mxu0 %v13438_v51  ;;  %9851 = vmatprep.subr.bf16.mxu1 %v13441_v8  ;;  %v13498_v35 = vld [vmem:[%s14073_s15 + $0x23a0] ss:$400 sps:$4 sm:$0xff]   ;;  %v13506_v51 = vld [vmem:[%s14073_s15 + $0x2084] ss:$400 sps:$4 sm:$0xff]   ;;  %v13509_v8 = vld [vmem:[%s14073_s15 + $0x208c] ss:$400 sps:$4 sm:$0xff]  }
 0x85c   : > { %v15472_v46 = vadd.f32 %v9691_v44, %v9651_v2  ;;  %v9653_v62 = vadd.f32 %v9652_v15, %v15405_v12  ;;  %v10462_v12 = vcombine.low %v15416_v1, %v15416_v1  ;;  %v10469_v1 = vcombine.high %v15489_v13, %v15489_v13  ;;  %v13504_v30 = vld [vmem:[%s14073_s15 + $0x2080] ss:$400 sps:$4 sm:$0xff]   ;;  %v13507_v44 = vld [vmem:[%s14073_s15 + $0x2088] ss:$400 sps:$4 sm:$0xff]   ;;  %v13512_v2 = vld [vmem:[%s14073_s15 + $0x1d64] ss:$400 sps:$4 sm:$0xff]  }
 0x85d   : > { %v9654_v16 = vpop.f32.mrf.mxu0  ;;  %v9695_v17 = vpop.f32.mrf.mxu1  ;;  %v13515_v15 = vld [vmem:[%s14073_s15 + $0x1d6c] ss:$400 sps:$4 sm:$0xff]  }
 0x85e   : > { %v15475_v4 = vadd.f32 %v9693_v43, %v9653_v62  ;;  %v13510_v43 = vld [vmem:[%s14073_s15 + $0x1d60] ss:$400 sps:$4 sm:$0xff]   ;;  %v13513_v62 = vld [vmem:[%s14073_s15 + $0x1d68] ss:$400 sps:$4 sm:$0xff]   ;;  %v13518_v16 = vld [vmem:[%s14073_s15 + $0x1a44] ss:$400 sps:$4 sm:$0xff]  }
 0x85f   : > { %v9655_v57 = vpop.f32.mrf.mxu0  ;;  %v9696_v23 = vpop.f32.mrf.mxu1  ;;  %v13521_v17 = vld [vmem:[%s14073_s15 + $0x1a4c] ss:$400 sps:$4 sm:$0xff]  }
 0x862   : > { %9811 = vmatpush2.bf16.xpose.msra.mxu0 %v13436_v38  ;;  %9852 = vmatpush2.bf16.xpose.msra.mxu1 %v13439_v53 }
 0x863   : > { %9862 = vmatprep.subr.bf16.mxu0 %v13448_v52  ;;  %9903 = vmatprep.subr.bf16.mxu1 %v13451_v56 }
 0x869   : > { %9813 = vmatmul.mubr.bf16.vlgmr.msra.gmra.mxu0 %v10462_v12  ;;  %9854 = vmatmul.mubr.bf16.vlgmr.msra.gmra.mxu1 %v10464_v24 }
 0x86a   : > { %9863 = vmatpush1.bf16.xpose.msra.mxu0 %v13446_v25  ;;  %9904 = vmatpush1.bf16.xpose.msra.mxu1 %v13449_v26 }
 0x86b   : > { %9864 = vmatprep.subr.bf16.mxu0 %v13454_v61  ;;  %9905 = vmatprep.subr.bf16.mxu1 %v13457_v3  ;;  %v13519_v61 = vld [vmem:[%s14073_s15 + $0x1a48] ss:$400 sps:$4 sm:$0xff]  }
 0x86c   : > { %9894 = vmatprep.mubr.bf16.mxu0 %v10467_v31  ;;  %9935 = vmatprep.mubr.bf16.mxu1 %v10469_v1  ;;  %v13528_v1 = vld [vmem:[%s14073_s15 + $0x1734] ss:$400 sps:$4 sm:$0xff]  }
 0x872   : > { %9865 = vmatpush1.bf16.xpose.msra.mxu0 %v13452_v5  ;;  %9906 = vmatpush1.bf16.xpose.msra.mxu1 %v13455_v32  ;;  %v13531_v5 = vld [vmem:[%s14073_s15 + $0x173c] ss:$400 sps:$4 sm:$0xff]   ;;  %v10468_v32 = vcombine.low %v15489_v13, %v15489_v13  ;;  %v13532_v13 = vld [vmem:[%s14073_s15 + $0x1410] ss:$400 sps:$4 sm:$0xff]  }
 0x873   : > { %9866 = vmatprep.subr.bf16.mxu0 %v13460_v18  ;;  %9907 = vmatprep.subr.bf16.mxu1 %v13463_v21  ;;  %v15556_v18 = vld [vmem:[%s14087_s12 + $0x150] sm:$0xff]  ;;  %v15559_v21 = vld [vmem:[%s14087_s12 + $0x158] sm:$0xff] }
 0x87a   : > { %9867 = vmatpush1.bf16.xpose.msra.mxu0 %v13458_v33  ;;  %9908 = vmatpush1.bf16.xpose.msra.mxu1 %v13461_v34  ;;  %v13526_v33 = vld [vmem:[%s14073_s15 + $0x1730] ss:$400 sps:$4 sm:$0xff]   ;;  %v13529_v34 = vld [vmem:[%s14073_s15 + $0x1738] ss:$400 sps:$4 sm:$0xff]  }
 0x87b   : > { %9868 = vmatprep.subr.bf16.mxu0 %v13466_v11  ;;  %9909 = vmatprep.subr.bf16.mxu1 %v13469_v54  ;;  %v13534_v11 = vld [vmem:[%s14073_s15 + $0x1414] ss:$400 sps:$4 sm:$0xff]   ;;  %v13537_v54 = vld [vmem:[%s14073_s15 + $0x141c] ss:$400 sps:$4 sm:$0xff]  }
 0x882   : > { %9869 = vmatpush1.bf16.xpose.msra.mxu0 %v13464_v39  ;;  %9910 = vmatpush1.bf16.xpose.msra.mxu1 %v13467_v40  ;;  %v10471_v39 = vcombine.high %v15556_v18, %v15556_v18  ;;  %v13535_v40 = vld [vmem:[%s14073_s15 + $0x1418] ss:$400 sps:$4 sm:$0xff]  }
 0x883   : > { %9870 = vmatprep.subr.bf16.mxu0 %v13472_v58  ;;  %9911 = vmatprep.subr.bf16.mxu1 %v13475_v29  ;;  %v13540_v58 = vld [vmem:[%s14073_s15 + $0x10f4] ss:$400 sps:$4 sm:$0xff]   ;;  %v13543_v29 = vld [vmem:[%s14073_s15 + $0x10fc] ss:$400 sps:$4 sm:$0xff]  }
 0x88a   : > { %9871 = vmatpush1.bf16.xpose.msra.mxu0 %v13470_v41  ;;  %9912 = vmatpush1.bf16.xpose.msra.mxu1 %v13473_v42  ;;  %v13538_v41 = vld [vmem:[%s14073_s15 + $0x10f0] ss:$400 sps:$4 sm:$0xff]   ;;  %v13541_v42 = vld [vmem:[%s14073_s15 + $0x10f8] ss:$400 sps:$4 sm:$0xff]  }
 0x88b   : > { %9872 = vmatprep.subr.bf16.mxu0 %v13478_v9  ;;  %9913 = vmatprep.subr.bf16.mxu1 %v13481_v20  ;;  %v13546_v9 = vld [vmem:[%s14073_s15 + $0xdd4] ss:$400 sps:$4 sm:$0xff]   ;;  %v13549_v20 = vld [vmem:[%s14073_s15 + $0xddc] ss:$400 sps:$4 sm:$0xff]  }
 0x892   : > { %9873 = vmatpush1.bf16.xpose.msra.mxu0 %v13476_v47  ;;  %9914 = vmatpush1.bf16.xpose.msra.mxu1 %v13479_v48  ;;  %v13544_v47 = vld [vmem:[%s14073_s15 + $0xdd0] ss:$400 sps:$4 sm:$0xff]   ;;  %v13547_v48 = vld [vmem:[%s14073_s15 + $0xdd8] ss:$400 sps:$4 sm:$0xff]  }
 0x893   : > { %9874 = vmatprep.subr.bf16.mxu0 %v13484_v19  ;;  %9915 = vmatprep.subr.bf16.mxu1 %v13487_v37  ;;  %v13552_v19 = vld [vmem:[%s14073_s15 + $0xab4] ss:$400 sps:$4 sm:$0xff]   ;;  %v13555_v37 = vld [vmem:[%s14073_s15 + $0xabc] ss:$400 sps:$4 sm:$0xff]  }
 0x89a   : > { %9875 = vmatpush1.bf16.xpose.msra.mxu0 %v13482_v49  ;;  %9916 = vmatpush1.bf16.xpose.msra.mxu1 %v13485_v50  ;;  %v13550_v49 = vld [vmem:[%s14073_s15 + $0xab0] ss:$400 sps:$4 sm:$0xff]   ;;  %v13553_v50 = vld [vmem:[%s14073_s15 + $0xab8] ss:$400 sps:$4 sm:$0xff]  }
 0x89b   : > { %9876 = vmatprep.subr.bf16.mxu0 %v13490_v14  ;;  %9917 = vmatprep.subr.bf16.mxu1 %v13493_v28  ;;  %v13558_v14 = vld [vmem:[%s14073_s15 + $0x794] ss:$400 sps:$4 sm:$0xff]   ;;  %v13561_v28 = vld [vmem:[%s14073_s15 + $0x79c] ss:$400 sps:$4 sm:$0xff]  }
 0x8a2   : > { %9877 = vmatpush1.bf16.xpose.msra.mxu0 %v13488_v27  ;;  %9918 = vmatpush1.bf16.xpose.msra.mxu1 %v13491_v45  ;;  %v13564_v27 = vld [vmem:[%s14073_s15 + $0x474] ss:$400 sps:$4 sm:$0xff]   ;;  %v13567_v45 = vld [vmem:[%s14073_s15 + $0x47c] ss:$400 sps:$4 sm:$0xff]  }
 0x8a3   : > { %9884 = vmatprep.subr.bf16.mxu0 %v11767_v63  ;;  %9925 = vmatprep.subr.bf16.mxu1 %v11769_v0  ;;  %v13562_v63 = vld [vmem:[%s14073_s15 + $0x470] ss:$400 sps:$4 sm:$0xff]   ;;  %v13565_v0 = vld [vmem:[%s14073_s15 + $0x478] ss:$400 sps:$4 sm:$0xff]  }
 0x8aa   : > { %9885 = vmatpush2.bf16.xpose.msra.mxu0 %v11766_v22  ;;  %9926 = vmatpush2.bf16.xpose.msra.mxu1 %v11768_v36  ;;  %v13570_v22 = vld [vmem:[%s14073_s15 + $0x154] ss:$400 sps:$4 sm:$0xff]   ;;  %v13573_v36 = vld [vmem:[%s14073_s15 + $0x15c] ss:$400 sps:$4 sm:$0xff]  }
 0x8ab   : > { %9886 = vmatprep.subr.bf16.mxu0 %v13500_v6  ;;  %9927 = vmatprep.subr.bf16.mxu1 %v13503_v7  ;;  %v1514_v6 = vld [vmem:[%s14073_s15 + $0x26d0] sm:$0xff]  ;;  %v1515_v7 = vld [vmem:[%s14073_s15 + $0x26d8] sm:$0xff] }
 0x8b2   : > { %9887 = vmatpush2.bf16.xpose.msra.mxu0 %v13498_v35  ;;  %9928 = vmatpush2.bf16.xpose.msra.mxu1 %v13501_v55  ;;  %v13568_v35 = vld [vmem:[%s14073_s15 + $0x150] ss:$400 sps:$4 sm:$0xff]   ;;  %v13571_v55 = vld [vmem:[%s14073_s15 + $0x158] ss:$400 sps:$4 sm:$0xff]  }
 0x8b3   : > { %9888 = vmatprep.subr.bf16.mxu0 %v13506_v51  ;;  %9929 = vmatprep.subr.bf16.mxu1 %v13509_v8  ;;  %v11771_v51 = vcombine.high %v1514_v6, %v1514_v6  ;;  %v11773_v8 = vcombine.high %v1515_v7, %v1515_v7 }
 0x8ba   : > { %9889 = vmatpush2.bf16.xpose.msra.mxu0 %v13504_v30  ;;  %9930 = vmatpush2.bf16.xpose.msra.mxu1 %v13507_v44  ;;  %v11770_v30 = vcombine.low %v1514_v6, %v1514_v6  ;;  %v11772_v44 = vcombine.low %v1515_v7, %v1515_v7  ;;  %v13636_v6 = vld [vmem:[%s14073_s15 + $0x7a0] ss:$400 sps:$4 sm:$0xff]   ;;  %v13639_v7 = vld [vmem:[%s14073_s15 + $0x7a8] ss:$400 sps:$4 sm:$0xff]  }
 0x8bb   : > { %9890 = vmatprep.subr.bf16.mxu0 %v13512_v2  ;;  %9931 = vmatprep.subr.bf16.mxu1 %v13515_v15  ;;  %v13580_v2 = vld [vmem:[%s14073_s15 + $0x23b4] ss:$400 sps:$4 sm:$0xff]   ;;  %v13583_v15 = vld [vmem:[%s14073_s15 + $0x23bc] ss:$400 sps:$4 sm:$0xff]  }
 0x8c1   : > { %v9732_v38 = vpop.f32.mrf.mxu0  ;;  %v9773_v53 = vpop.f32.mrf.mxu1 }
 0x8c2   : > { %v9733_v57 = vadd.f32 %v9732_v38, %v15472_v46  ;;  %9891 = vmatpush2.bf16.xpose.msra.mxu0 %v13510_v43  ;;  %9932 = vmatpush2.bf16.xpose.msra.mxu1 %v13513_v62  ;;  %v13516_v46 = vld [vmem:[%s14073_s15 + $0x1a40] ss:$400 sps:$4 sm:$0xff]   ;;  %v13581_v62 = vld [vmem:[%s14073_s15 + $0x23b8] ss:$400 sps:$4 sm:$0xff]  }
 0x8c3   : > { %v9734_v23 = vpop.f32.mrf.mxu0  ;;  %v9775_v52 = vpop.f32.mrf.mxu1  ;;  %9892 = vmatprep.subr.bf16.mxu0 %v13518_v16  ;;  %9933 = vmatprep.subr.bf16.mxu1 %v13521_v17  ;;  %v13578_v43 = vld [vmem:[%s14073_s15 + $0x23b0] ss:$400 sps:$4 sm:$0xff]   ;;  %v13586_v16 = vld [vmem:[%s14073_s15 + $0x2094] ss:$400 sps:$4 sm:$0xff]   ;;  %v13589_v17 = vld [vmem:[%s14073_s15 + $0x209c] ss:$400 sps:$4 sm:$0xff]  }
 0x8c4   : > { %v15542_v56 = vadd.f32 %v9773_v53, %v9733_v57  ;;  %v9735_v12 = vadd.f32 %v9734_v23, %v15475_v4  ;;  %v10466_v4 = vcombine.low %v15486_v10, %v15486_v10  ;;  %v10473_v10 = vcombine.high %v15559_v21, %v15559_v21  ;;  %v13584_v38 = vld [vmem:[%s14073_s15 + $0x2090] ss:$400 sps:$4 sm:$0xff]   ;;  %v13587_v53 = vld [vmem:[%s14073_s15 + $0x2098] ss:$400 sps:$4 sm:$0xff]   ;;  %v13592_v57 = vld [vmem:[%s14073_s15 + $0x1d74] ss:$400 sps:$4 sm:$0xff]  }
 0x8c5   : > { %v9736_v24 = vpop.f32.mrf.mxu0  ;;  %v9777_v25 = vpop.f32.mrf.mxu1  ;;  %v13595_v23 = vld [vmem:[%s14073_s15 + $0x1d7c] ss:$400 sps:$4 sm:$0xff]  }
 0x8c6   : > { %v15545_v26 = vadd.f32 %v9775_v52, %v9735_v12  ;;  %v13590_v52 = vld [vmem:[%s14073_s15 + $0x1d70] ss:$400 sps:$4 sm:$0xff]   ;;  %v13593_v12 = vld [vmem:[%s14073_s15 + $0x1d78] ss:$400 sps:$4 sm:$0xff]   ;;  %v13598_v24 = vld [vmem:[%s14073_s15 + $0x1a54] ss:$400 sps:$4 sm:$0xff]  }
 0x8c7   : > { %v9737_v3 = vpop.f32.mrf.mxu0  ;;  %v9778_v31 = vpop.f32.mrf.mxu1  ;;  %v13601_v25 = vld [vmem:[%s14073_s15 + $0x1a5c] ss:$400 sps:$4 sm:$0xff]  }
 0x8ca   : > { %9893 = vmatpush2.bf16.xpose.msra.mxu0 %v13516_v46  ;;  %9934 = vmatpush2.bf16.xpose.msra.mxu1 %v13519_v61 }
 0x8cb   : > { %9944 = vmatprep.subr.bf16.mxu0 %v13528_v1  ;;  %9985 = vmatprep.subr.bf16.mxu1 %v13531_v5 }
 0x8d1   : > { %9895 = vmatmul.mubr.bf16.vlgmr.msra.gmra.mxu0 %v10466_v4  ;;  %9936 = vmatmul.mubr.bf16.vlgmr.msra.gmra.mxu1 %v10468_v32 }
 0x8d2   : > { %9945 = vmatpush1.bf16.xpose.msra.mxu0 %v13526_v33  ;;  %9986 = vmatpush1.bf16.xpose.msra.mxu1 %v13529_v34 }
 0x8d3   : > { %9946 = vmatprep.subr.bf16.mxu0 %v13534_v11  ;;  %9987 = vmatprep.subr.bf16.mxu1 %v13537_v54  ;;  %v13599_v11 = vld [vmem:[%s14073_s15 + $0x1a58] ss:$400 sps:$4 sm:$0xff]  }
 0x8d4   : > { %9976 = vmatprep.mubr.bf16.mxu0 %v10471_v39  ;;  %10017 = vmatprep.mubr.bf16.mxu1 %v10473_v10  ;;  %v13608_v10 = vld [vmem:[%s14073_s15 + $0x1744] ss:$400 sps:$4 sm:$0xff]  }
 0x8da   : > { %9947 = vmatpush1.bf16.xpose.msra.mxu0 %v13532_v13  ;;  %9988 = vmatpush1.bf16.xpose.msra.mxu1 %v13535_v40  ;;  %v13611_v13 = vld [vmem:[%s14073_s15 + $0x174c] ss:$400 sps:$4 sm:$0xff]   ;;  %v10472_v40 = vcombine.low %v15559_v21, %v15559_v21  ;;  %v13612_v21 = vld [vmem:[%s14073_s15 + $0x1420] ss:$400 sps:$4 sm:$0xff]  }
 0x8db   : > { %9948 = vmatprep.subr.bf16.mxu0 %v13540_v58  ;;  %9989 = vmatprep.subr.bf16.mxu1 %v13543_v29  ;;  %v15626_v58 = vld [vmem:[%s14087_s12 + $0x160] sm:$0xff]  ;;  %v15629_v29 = vld [vmem:[%s14087_s12 + $0x168] sm:$0xff] }
 0x8e2   : > { %9949 = vmatpush1.bf16.xpose.msra.mxu0 %v13538_v41  ;;  %9990 = vmatpush1.bf16.xpose.msra.mxu1 %v13541_v42  ;;  %v13606_v41 = vld [vmem:[%s14073_s15 + $0x1740] ss:$400 sps:$4 sm:$0xff]   ;;  %v13609_v42 = vld [vmem:[%s14073_s15 + $0x1748] ss:$400 sps:$4 sm:$0xff]  }
 0x8e3   : > { %9950 = vmatprep.subr.bf16.mxu0 %v13546_v9  ;;  %9991 = vmatprep.subr.bf16.mxu1 %v13549_v20  ;;  %v13614_v9 = vld [vmem:[%s14073_s15 + $0x1424] ss:$400 sps:$4 sm:$0xff]   ;;  %v13617_v20 = vld [vmem:[%s14073_s15 + $0x142c] ss:$400 sps:$4 sm:$0xff]  }
 0x8ea   : > { %9951 = vmatpush1.bf16.xpose.msra.mxu0 %v13544_v47  ;;  %9992 = vmatpush1.bf16.xpose.msra.mxu1 %v13547_v48  ;;  %v10475_v47 = vcombine.high %v15626_v58, %v15626_v58  ;;  %v13615_v48 = vld [vmem:[%s14073_s15 + $0x1428] ss:$400 sps:$4 sm:$0xff]  }
 0x8eb   : > { %9952 = vmatprep.subr.bf16.mxu0 %v13552_v19  ;;  %9993 = vmatprep.subr.bf16.mxu1 %v13555_v37  ;;  %v13620_v19 = vld [vmem:[%s14073_s15 + $0x1104] ss:$400 sps:$4 sm:$0xff]   ;;  %v13623_v37 = vld [vmem:[%s14073_s15 + $0x110c] ss:$400 sps:$4 sm:$0xff]  }
 0x8f2   : > { %9953 = vmatpush1.bf16.xpose.msra.mxu0 %v13550_v49  ;;  %9994 = vmatpush1.bf16.xpose.msra.mxu1 %v13553_v50  ;;  %v13618_v49 = vld [vmem:[%s14073_s15 + $0x1100] ss:$400 sps:$4 sm:$0xff]   ;;  %v13621_v50 = vld [vmem:[%s14073_s15 + $0x1108] ss:$400 sps:$4 sm:$0xff]  }
 0x8f3   : > { %9954 = vmatprep.subr.bf16.mxu0 %v13558_v14  ;;  %9995 = vmatprep.subr.bf16.mxu1 %v13561_v28  ;;  %v13626_v14 = vld [vmem:[%s14073_s15 + $0xde4] ss:$400 sps:$4 sm:$0xff]   ;;  %v13629_v28 = vld [vmem:[%s14073_s15 + $0xdec] ss:$400 sps:$4 sm:$0xff]  }
 0x8fa   : > { %9955 = vmatpush1.bf16.xpose.msra.mxu0 %v13556_v59  ;;  %9996 = vmatpush1.bf16.xpose.msra.mxu1 %v13559_v60  ;;  %v13624_v59 = vld [vmem:[%s14073_s15 + $0xde0] ss:$400 sps:$4 sm:$0xff]   ;;  %v13627_v60 = vld [vmem:[%s14073_s15 + $0xde8] ss:$400 sps:$4 sm:$0xff]  }
 0x8fb   : > { %9956 = vmatprep.subr.bf16.mxu0 %v13564_v27  ;;  %9997 = vmatprep.subr.bf16.mxu1 %v13567_v45  ;;  %v13632_v27 = vld [vmem:[%s14073_s15 + $0xac4] ss:$400 sps:$4 sm:$0xff]   ;;  %v13635_v45 = vld [vmem:[%s14073_s15 + $0xacc] ss:$400 sps:$4 sm:$0xff]  }
 0x902   : > { %9957 = vmatpush1.bf16.xpose.msra.mxu0 %v13562_v63  ;;  %9998 = vmatpush1.bf16.xpose.msra.mxu1 %v13565_v0  ;;  %v13630_v63 = vld [vmem:[%s14073_s15 + $0xac0] ss:$400 sps:$4 sm:$0xff]   ;;  %v13633_v0 = vld [vmem:[%s14073_s15 + $0xac8] ss:$400 sps:$4 sm:$0xff]  }
 0x903   : > { %9958 = vmatprep.subr.bf16.mxu0 %v13570_v22  ;;  %9999 = vmatprep.subr.bf16.mxu1 %v13573_v36  ;;  %v13638_v22 = vld [vmem:[%s14073_s15 + $0x7a4] ss:$400 sps:$4 sm:$0xff]   ;;  %v13641_v36 = vld [vmem:[%s14073_s15 + $0x7ac] ss:$400 sps:$4 sm:$0xff]  }
 0x90a   : > { %9959 = vmatpush1.bf16.xpose.msra.mxu0 %v13568_v35  ;;  %10000 = vmatpush1.bf16.xpose.msra.mxu1 %v13571_v55  ;;  %v13644_v35 = vld [vmem:[%s14073_s15 + $0x484] ss:$400 sps:$4 sm:$0xff]   ;;  %v13647_v55 = vld [vmem:[%s14073_s15 + $0x48c] ss:$400 sps:$4 sm:$0xff]  }
 0x90b   : > { %9966 = vmatprep.subr.bf16.mxu0 %v11771_v51  ;;  %10007 = vmatprep.subr.bf16.mxu1 %v11773_v8  ;;  %v13642_v51 = vld [vmem:[%s14073_s15 + $0x480] ss:$400 sps:$4 sm:$0xff]   ;;  %v13645_v8 = vld [vmem:[%s14073_s15 + $0x488] ss:$400 sps:$4 sm:$0xff]  }
 0x912   : > { %9967 = vmatpush2.bf16.xpose.msra.mxu0 %v11770_v30  ;;  %10008 = vmatpush2.bf16.xpose.msra.mxu1 %v11772_v44  ;;  %v13650_v30 = vld [vmem:[%s14073_s15 + $0x164] ss:$400 sps:$4 sm:$0xff]   ;;  %v13653_v44 = vld [vmem:[%s14073_s15 + $0x16c] ss:$400 sps:$4 sm:$0xff]  }
 0x913   : > { %9968 = vmatprep.subr.bf16.mxu0 %v13580_v2  ;;  %10009 = vmatprep.subr.bf16.mxu1 %v13583_v15  ;;  %v1516_v2 = vld [vmem:[%s14073_s15 + $0x26e0] sm:$0xff]  ;;  %v1517_v15 = vld [vmem:[%s14073_s15 + $0x26e8] sm:$0xff] }
 0x91a   : > { %9969 = vmatpush2.bf16.xpose.msra.mxu0 %v13578_v43  ;;  %10010 = vmatpush2.bf16.xpose.msra.mxu1 %v13581_v62  ;;  %v13648_v43 = vld [vmem:[%s14073_s15 + $0x160] ss:$400 sps:$4 sm:$0xff]   ;;  %v13651_v62 = vld [vmem:[%s14073_s15 + $0x168] ss:$400 sps:$4 sm:$0xff]  }
 0x91b   : > { %9970 = vmatprep.subr.bf16.mxu0 %v13586_v16  ;;  %10011 = vmatprep.subr.bf16.mxu1 %v13589_v17  ;;  %v11775_v16 = vcombine.high %v1516_v2, %v1516_v2  ;;  %v11777_v17 = vcombine.high %v1517_v15, %v1517_v15 }
 0x922   : > { %9971 = vmatpush2.bf16.xpose.msra.mxu0 %v13584_v38  ;;  %10012 = vmatpush2.bf16.xpose.msra.mxu1 %v13587_v53  ;;  %v11774_v38 = vcombine.low %v1516_v2, %v1516_v2  ;;  %v11776_v53 = vcombine.low %v1517_v15, %v1517_v15  ;;  %v13716_v2 = vld [vmem:[%s14073_s15 + $0x7b0] ss:$400 sps:$4 sm:$0xff]   ;;  %v13719_v15 = vld [vmem:[%s14073_s15 + $0x7b8] ss:$400 sps:$4 sm:$0xff]  }
 0x923   : > { %9972 = vmatprep.subr.bf16.mxu0 %v13592_v57  ;;  %10013 = vmatprep.subr.bf16.mxu1 %v13595_v23  ;;  %v13660_v57 = vld [vmem:[%s14073_s15 + $0x23c4] ss:$400 sps:$4 sm:$0xff]   ;;  %v13663_v23 = vld [vmem:[%s14073_s15 + $0x23cc] ss:$400 sps:$4 sm:$0xff]  }
 0x929   : > { %v9814_v46 = vpop.f32.mrf.mxu0  ;;  %v9855_v61 = vpop.f32.mrf.mxu1 }
 0x92a   : > { %v9815_v3 = vadd.f32 %v9814_v46, %v15542_v56  ;;  %9973 = vmatpush2.bf16.xpose.msra.mxu0 %v13590_v52  ;;  %10014 = vmatpush2.bf16.xpose.msra.mxu1 %v13593_v12  ;;  %v13596_v56 = vld [vmem:[%s14073_s15 + $0x1a50] ss:$400 sps:$4 sm:$0xff]   ;;  %v13661_v12 = vld [vmem:[%s14073_s15 + $0x23c8] ss:$400 sps:$4 sm:$0xff]  }
 0x92b   : > { %v9816_v31 = vpop.f32.mrf.mxu0  ;;  %v9857_v1 = vpop.f32.mrf.mxu1  ;;  %9974 = vmatprep.subr.bf16.mxu0 %v13598_v24  ;;  %10015 = vmatprep.subr.bf16.mxu1 %v13601_v25  ;;  %v13658_v52 = vld [vmem:[%s14073_s15 + $0x23c0] ss:$400 sps:$4 sm:$0xff]   ;;  %v13666_v24 = vld [vmem:[%s14073_s15 + $0x20a4] ss:$400 sps:$4 sm:$0xff]   ;;  %v13669_v25 = vld [vmem:[%s14073_s15 + $0x20ac] ss:$400 sps:$4 sm:$0xff]  }
 0x92c   : > { %v15612_v5 = vadd.f32 %v9855_v61, %v9815_v3  ;;  %v9817_v4 = vadd.f32 %v9816_v31, %v15545_v26  ;;  %v10470_v26 = vcombine.low %v15556_v18, %v15556_v18  ;;  %v10477_v18 = vcombine.high %v15629_v29, %v15629_v29  ;;  %v13664_v46 = vld [vmem:[%s14073_s15 + $0x20a0] ss:$400 sps:$4 sm:$0xff]   ;;  %v13667_v61 = vld [vmem:[%s14073_s15 + $0x20a8] ss:$400 sps:$4 sm:$0xff]   ;;  %v13672_v3 = vld [vmem:[%s14073_s15 + $0x1d84] ss:$400 sps:$4 sm:$0xff]  }
 0x92d   : > { %v9818_v32 = vpop.f32.mrf.mxu0  ;;  %v9859_v33 = vpop.f32.mrf.mxu1  ;;  %v13675_v31 = vld [vmem:[%s14073_s15 + $0x1d8c] ss:$400 sps:$4 sm:$0xff]  }
 0x92e   : > { %v15615_v34 = vadd.f32 %v9857_v1, %v9817_v4  ;;  %v13670_v1 = vld [vmem:[%s14073_s15 + $0x1d80] ss:$400 sps:$4 sm:$0xff]   ;;  %v13673_v4 = vld [vmem:[%s14073_s15 + $0x1d88] ss:$400 sps:$4 sm:$0xff]   ;;  %v13678_v32 = vld [vmem:[%s14073_s15 + $0x1a64] ss:$400 sps:$4 sm:$0xff]  }
 0x92f   : > { %v9819_v54 = vpop.f32.mrf.mxu0  ;;  %v9860_v39 = vpop.f32.mrf.mxu1  ;;  %v13681_v33 = vld [vmem:[%s14073_s15 + $0x1a6c] ss:$400 sps:$4 sm:$0xff]  }
 0x932   : > { %9975 = vmatpush2.bf16.xpose.msra.mxu0 %v13596_v56  ;;  %10016 = vmatpush2.bf16.xpose.msra.mxu1 %v13599_v11 }
 0x933   : > { %10026 = vmatprep.subr.bf16.mxu0 %v13608_v10  ;;  %10067 = vmatprep.subr.bf16.mxu1 %v13611_v13 }
 0x939   : > { %9977 = vmatmul.mubr.bf16.vlgmr.msra.gmra.mxu0 %v10470_v26  ;;  %10018 = vmatmul.mubr.bf16.vlgmr.msra.gmra.mxu1 %v10472_v40 }
 0x93a   : > { %10027 = vmatpush1.bf16.xpose.msra.mxu0 %v13606_v41  ;;  %10068 = vmatpush1.bf16.xpose.msra.mxu1 %v13609_v42 }
 0x93b   : > { %10028 = vmatprep.subr.bf16.mxu0 %v13614_v9  ;;  %10069 = vmatprep.subr.bf16.mxu1 %v13617_v20  ;;  %v13679_v9 = vld [vmem:[%s14073_s15 + $0x1a68] ss:$400 sps:$4 sm:$0xff]  }
 0x93c   : > { %10058 = vmatprep.mubr.bf16.mxu0 %v10475_v47  ;;  %10099 = vmatprep.mubr.bf16.mxu1 %v10477_v18  ;;  %v13688_v18 = vld [vmem:[%s14073_s15 + $0x1754] ss:$400 sps:$4 sm:$0xff]  }
 0x942   : > { %10029 = vmatpush1.bf16.xpose.msra.mxu0 %v13612_v21  ;;  %10070 = vmatpush1.bf16.xpose.msra.mxu1 %v13615_v48  ;;  %v13691_v21 = vld [vmem:[%s14073_s15 + $0x175c] ss:$400 sps:$4 sm:$0xff]   ;;  %v10476_v48 = vcombine.low %v15629_v29, %v15629_v29  ;;  %v13692_v29 = vld [vmem:[%s14073_s15 + $0x1430] ss:$400 sps:$4 sm:$0xff]  }
 0x943   : > { %10030 = vmatprep.subr.bf16.mxu0 %v13620_v19  ;;  %10071 = vmatprep.subr.bf16.mxu1 %v13623_v37  ;;  %v15696_v19 = vld [vmem:[%s14087_s12 + $0x170] sm:$0xff]  ;;  %v15699_v37 = vld [vmem:[%s14087_s12 + $0x178] sm:$0xff] }
 0x94a   : > { %10031 = vmatpush1.bf16.xpose.msra.mxu0 %v13618_v49  ;;  %10072 = vmatpush1.bf16.xpose.msra.mxu1 %v13621_v50  ;;  %v13686_v49 = vld [vmem:[%s14073_s15 + $0x1750] ss:$400 sps:$4 sm:$0xff]   ;;  %v13689_v50 = vld [vmem:[%s14073_s15 + $0x1758] ss:$400 sps:$4 sm:$0xff]  }
 0x94b   : > { %10032 = vmatprep.subr.bf16.mxu0 %v13626_v14  ;;  %10073 = vmatprep.subr.bf16.mxu1 %v13629_v28  ;;  %v13694_v14 = vld [vmem:[%s14073_s15 + $0x1434] ss:$400 sps:$4 sm:$0xff]   ;;  %v13697_v28 = vld [vmem:[%s14073_s15 + $0x143c] ss:$400 sps:$4 sm:$0xff]  }
 0x952   : > { %10033 = vmatpush1.bf16.xpose.msra.mxu0 %v13624_v59  ;;  %10074 = vmatpush1.bf16.xpose.msra.mxu1 %v13627_v60  ;;  %v10479_v59 = vcombine.high %v15696_v19, %v15696_v19  ;;  %v13695_v60 = vld [vmem:[%s14073_s15 + $0x1438] ss:$400 sps:$4 sm:$0xff]  }
 0x953   : > { %10034 = vmatprep.subr.bf16.mxu0 %v13632_v27  ;;  %10075 = vmatprep.subr.bf16.mxu1 %v13635_v45  ;;  %v13700_v27 = vld [vmem:[%s14073_s15 + $0x1114] ss:$400 sps:$4 sm:$0xff]   ;;  %v13703_v45 = vld [vmem:[%s14073_s15 + $0x111c] ss:$400 sps:$4 sm:$0xff]  }
 0x95a   : > { %10035 = vmatpush1.bf16.xpose.msra.mxu0 %v13630_v63  ;;  %10076 = vmatpush1.bf16.xpose.msra.mxu1 %v13633_v0  ;;  %v13698_v63 = vld [vmem:[%s14073_s15 + $0x1110] ss:$400 sps:$4 sm:$0xff]   ;;  %v13701_v0 = vld [vmem:[%s14073_s15 + $0x1118] ss:$400 sps:$4 sm:$0xff]  }
 0x95b   : > { %10036 = vmatprep.subr.bf16.mxu0 %v13638_v22  ;;  %10077 = vmatprep.subr.bf16.mxu1 %v13641_v36  ;;  %v13706_v22 = vld [vmem:[%s14073_s15 + $0xdf4] ss:$400 sps:$4 sm:$0xff]   ;;  %v13709_v36 = vld [vmem:[%s14073_s15 + $0xdfc] ss:$400 sps:$4 sm:$0xff]  }
 0x962   : > { %10037 = vmatpush1.bf16.xpose.msra.mxu0 %v13636_v6  ;;  %10078 = vmatpush1.bf16.xpose.msra.mxu1 %v13639_v7  ;;  %v13704_v6 = vld [vmem:[%s14073_s15 + $0xdf0] ss:$400 sps:$4 sm:$0xff]   ;;  %v13707_v7 = vld [vmem:[%s14073_s15 + $0xdf8] ss:$400 sps:$4 sm:$0xff]  }
 0x963   : > { %10038 = vmatprep.subr.bf16.mxu0 %v13644_v35  ;;  %10079 = vmatprep.subr.bf16.mxu1 %v13647_v55  ;;  %v13712_v35 = vld [vmem:[%s14073_s15 + $0xad4] ss:$400 sps:$4 sm:$0xff]   ;;  %v13715_v55 = vld [vmem:[%s14073_s15 + $0xadc] ss:$400 sps:$4 sm:$0xff]  }
 0x96a   : > { %10039 = vmatpush1.bf16.xpose.msra.mxu0 %v13642_v51  ;;  %10080 = vmatpush1.bf16.xpose.msra.mxu1 %v13645_v8  ;;  %v13710_v51 = vld [vmem:[%s14073_s15 + $0xad0] ss:$400 sps:$4 sm:$0xff]   ;;  %v13713_v8 = vld [vmem:[%s14073_s15 + $0xad8] ss:$400 sps:$4 sm:$0xff]  }
 0x96b   : > { %10040 = vmatprep.subr.bf16.mxu0 %v13650_v30  ;;  %10081 = vmatprep.subr.bf16.mxu1 %v13653_v44  ;;  %v13718_v30 = vld [vmem:[%s14073_s15 + $0x7b4] ss:$400 sps:$4 sm:$0xff]   ;;  %v13721_v44 = vld [vmem:[%s14073_s15 + $0x7bc] ss:$400 sps:$4 sm:$0xff]  }
 0x972   : > { %10041 = vmatpush1.bf16.xpose.msra.mxu0 %v13648_v43  ;;  %10082 = vmatpush1.bf16.xpose.msra.mxu1 %v13651_v62  ;;  %v13724_v43 = vld [vmem:[%s14073_s15 + $0x494] ss:$400 sps:$4 sm:$0xff]   ;;  %v13727_v62 = vld [vmem:[%s14073_s15 + $0x49c] ss:$400 sps:$4 sm:$0xff]  }
 0x973   : > { %10048 = vmatprep.subr.bf16.mxu0 %v11775_v16  ;;  %10089 = vmatprep.subr.bf16.mxu1 %v11777_v17  ;;  %v13722_v16 = vld [vmem:[%s14073_s15 + $0x490] ss:$400 sps:$4 sm:$0xff]   ;;  %v13725_v17 = vld [vmem:[%s14073_s15 + $0x498] ss:$400 sps:$4 sm:$0xff]  }
 0x97a   : > { %10049 = vmatpush2.bf16.xpose.msra.mxu0 %v11774_v38  ;;  %10090 = vmatpush2.bf16.xpose.msra.mxu1 %v11776_v53  ;;  %v13730_v38 = vld [vmem:[%s14073_s15 + $0x174] ss:$400 sps:$4 sm:$0xff]   ;;  %v13733_v53 = vld [vmem:[%s14073_s15 + $0x17c] ss:$400 sps:$4 sm:$0xff]  }
 0x97b   : > { %10050 = vmatprep.subr.bf16.mxu0 %v13660_v57  ;;  %10091 = vmatprep.subr.bf16.mxu1 %v13663_v23  ;;  %v1518_v57 = vld [vmem:[%s14073_s15 + $0x26f0] sm:$0xff]  ;;  %v1519_v23 = vld [vmem:[%s14073_s15 + $0x26f8] sm:$0xff] }
 0x982   : > { %10051 = vmatpush2.bf16.xpose.msra.mxu0 %v13658_v52  ;;  %10092 = vmatpush2.bf16.xpose.msra.mxu1 %v13661_v12  ;;  %v13728_v52 = vld [vmem:[%s14073_s15 + $0x170] ss:$400 sps:$4 sm:$0xff]   ;;  %v13731_v12 = vld [vmem:[%s14073_s15 + $0x178] ss:$400 sps:$4 sm:$0xff]  }
 0x983   : > { %10052 = vmatprep.subr.bf16.mxu0 %v13666_v24  ;;  %10093 = vmatprep.subr.bf16.mxu1 %v13669_v25  ;;  %v11779_v24 = vcombine.high %v1518_v57, %v1518_v57  ;;  %v11781_v25 = vcombine.high %v1519_v23, %v1519_v23 }
 0x98a   : > { %10053 = vmatpush2.bf16.xpose.msra.mxu0 %v13664_v46  ;;  %10094 = vmatpush2.bf16.xpose.msra.mxu1 %v13667_v61  ;;  %v11778_v46 = vcombine.low %v1518_v57, %v1518_v57  ;;  %v11780_v61 = vcombine.low %v1519_v23, %v1519_v23  ;;  %v13796_v57 = vld [vmem:[%s14073_s15 + $0x7c0] ss:$400 sps:$4 sm:$0xff]   ;;  %v13799_v23 = vld [vmem:[%s14073_s15 + $0x7c8] ss:$400 sps:$4 sm:$0xff]  }
 0x98b   : > { %10054 = vmatprep.subr.bf16.mxu0 %v13672_v3  ;;  %10095 = vmatprep.subr.bf16.mxu1 %v13675_v31  ;;  %v13740_v3 = vld [vmem:[%s14073_s15 + $0x23d4] ss:$400 sps:$4 sm:$0xff]   ;;  %v13743_v31 = vld [vmem:[%s14073_s15 + $0x23dc] ss:$400 sps:$4 sm:$0xff]  }
 0x991   : > { %v9896_v56 = vpop.f32.mrf.mxu0  ;;  %v9937_v11 = vpop.f32.mrf.mxu1 }
 0x992   : > { %v9897_v54 = vadd.f32 %v9896_v56, %v15612_v5  ;;  %10055 = vmatpush2.bf16.xpose.msra.mxu0 %v13670_v1  ;;  %10096 = vmatpush2.bf16.xpose.msra.mxu1 %v13673_v4  ;;  %v13676_v5 = vld [vmem:[%s14073_s15 + $0x1a60] ss:$400 sps:$4 sm:$0xff]   ;;  %v13741_v4 = vld [vmem:[%s14073_s15 + $0x23d8] ss:$400 sps:$4 sm:$0xff]  }
 0x993   : > { %v9898_v39 = vpop.f32.mrf.mxu0  ;;  %v9939_v10 = vpop.f32.mrf.mxu1  ;;  %10056 = vmatprep.subr.bf16.mxu0 %v13678_v32  ;;  %10097 = vmatprep.subr.bf16.mxu1 %v13681_v33  ;;  %v13738_v1 = vld [vmem:[%s14073_s15 + $0x23d0] ss:$400 sps:$4 sm:$0xff]   ;;  %v13746_v32 = vld [vmem:[%s14073_s15 + $0x20b4] ss:$400 sps:$4 sm:$0xff]   ;;  %v13749_v33 = vld [vmem:[%s14073_s15 + $0x20bc] ss:$400 sps:$4 sm:$0xff]  }
 0x994   : > { %v15682_v13 = vadd.f32 %v9937_v11, %v9897_v54  ;;  %v9899_v26 = vadd.f32 %v9898_v39, %v15615_v34  ;;  %v10474_v34 = vcombine.low %v15626_v58, %v15626_v58  ;;  %v10481_v58 = vcombine.high %v15699_v37, %v15699_v37  ;;  %v13744_v56 = vld [vmem:[%s14073_s15 + $0x20b0] ss:$400 sps:$4 sm:$0xff]   ;;  %v13747_v11 = vld [vmem:[%s14073_s15 + $0x20b8] ss:$400 sps:$4 sm:$0xff]   ;;  %v13752_v54 = vld [vmem:[%s14073_s15 + $0x1d94] ss:$400 sps:$4 sm:$0xff]  }
 0x995   : > { %v9900_v40 = vpop.f32.mrf.mxu0  ;;  %v9941_v41 = vpop.f32.mrf.mxu1  ;;  %v13755_v39 = vld [vmem:[%s14073_s15 + $0x1d9c] ss:$400 sps:$4 sm:$0xff]  }
 0x996   : > { %v15685_v42 = vadd.f32 %v9939_v10, %v9899_v26  ;;  %v13750_v10 = vld [vmem:[%s14073_s15 + $0x1d90] ss:$400 sps:$4 sm:$0xff]   ;;  %v13753_v26 = vld [vmem:[%s14073_s15 + $0x1d98] ss:$400 sps:$4 sm:$0xff]   ;;  %v13758_v40 = vld [vmem:[%s14073_s15 + $0x1a74] ss:$400 sps:$4 sm:$0xff]  }
 0x997   : > { %v9901_v20 = vpop.f32.mrf.mxu0  ;;  %v9942_v47 = vpop.f32.mrf.mxu1  ;;  %v13761_v41 = vld [vmem:[%s14073_s15 + $0x1a7c] ss:$400 sps:$4 sm:$0xff]  }
 0x99a   : > { %10057 = vmatpush2.bf16.xpose.msra.mxu0 %v13676_v5  ;;  %10098 = vmatpush2.bf16.xpose.msra.mxu1 %v13679_v9 }
 0x99b   : > { %10108 = vmatprep.subr.bf16.mxu0 %v13688_v18  ;;  %10149 = vmatprep.subr.bf16.mxu1 %v13691_v21 }
 0x9a1   : > { %10059 = vmatmul.mubr.bf16.vlgmr.msra.gmra.mxu0 %v10474_v34  ;;  %10100 = vmatmul.mubr.bf16.vlgmr.msra.gmra.mxu1 %v10476_v48 }
 0x9a2   : > { %10109 = vmatpush1.bf16.xpose.msra.mxu0 %v13686_v49  ;;  %10150 = vmatpush1.bf16.xpose.msra.mxu1 %v13689_v50 }
 0x9a3   : > { %10110 = vmatprep.subr.bf16.mxu0 %v13694_v14  ;;  %10151 = vmatprep.subr.bf16.mxu1 %v13697_v28  ;;  %v13759_v14 = vld [vmem:[%s14073_s15 + $0x1a78] ss:$400 sps:$4 sm:$0xff]  }
 0x9a4   : > { %10140 = vmatprep.mubr.bf16.mxu0 %v10479_v59  ;;  %10181 = vmatprep.mubr.bf16.mxu1 %v10481_v58  ;;  %v13768_v58 = vld [vmem:[%s14073_s15 + $0x1764] ss:$400 sps:$4 sm:$0xff]  }
 0x9aa   : > { %10111 = vmatpush1.bf16.xpose.msra.mxu0 %v13692_v29  ;;  %10152 = vmatpush1.bf16.xpose.msra.mxu1 %v13695_v60  ;;  %v13771_v29 = vld [vmem:[%s14073_s15 + $0x176c] ss:$400 sps:$4 sm:$0xff]   ;;  %v10480_v60 = vcombine.low %v15699_v37, %v15699_v37  ;;  %v13772_v37 = vld [vmem:[%s14073_s15 + $0x1440] ss:$400 sps:$4 sm:$0xff]  }
 0x9ab   : > { %10112 = vmatprep.subr.bf16.mxu0 %v13700_v27  ;;  %10153 = vmatprep.subr.bf16.mxu1 %v13703_v45  ;;  %v15766_v27 = vld [vmem:[%s14087_s12 + $0x180] sm:$0xff]  ;;  %v15769_v45 = vld [vmem:[%s14087_s12 + $0x188] sm:$0xff] }
 0x9b2   : > { %10113 = vmatpush1.bf16.xpose.msra.mxu0 %v13698_v63  ;;  %10154 = vmatpush1.bf16.xpose.msra.mxu1 %v13701_v0  ;;  %v13766_v63 = vld [vmem:[%s14073_s15 + $0x1760] ss:$400 sps:$4 sm:$0xff]   ;;  %v13769_v0 = vld [vmem:[%s14073_s15 + $0x1768] ss:$400 sps:$4 sm:$0xff]  }
 0x9b3   : > { %10114 = vmatprep.subr.bf16.mxu0 %v13706_v22  ;;  %10155 = vmatprep.subr.bf16.mxu1 %v13709_v36  ;;  %v13774_v22 = vld [vmem:[%s14073_s15 + $0x1444] ss:$400 sps:$4 sm:$0xff]   ;;  %v13777_v36 = vld [vmem:[%s14073_s15 + $0x144c] ss:$400 sps:$4 sm:$0xff]  }
 0x9ba   : > { %10115 = vmatpush1.bf16.xpose.msra.mxu0 %v13704_v6  ;;  %10156 = vmatpush1.bf16.xpose.msra.mxu1 %v13707_v7  ;;  %v10483_v6 = vcombine.high %v15766_v27, %v15766_v27  ;;  %v13775_v7 = vld [vmem:[%s14073_s15 + $0x1448] ss:$400 sps:$4 sm:$0xff]  }
 0x9bb   : > { %10116 = vmatprep.subr.bf16.mxu0 %v13712_v35  ;;  %10157 = vmatprep.subr.bf16.mxu1 %v13715_v55  ;;  %v13780_v35 = vld [vmem:[%s14073_s15 + $0x1124] ss:$400 sps:$4 sm:$0xff]   ;;  %v13783_v55 = vld [vmem:[%s14073_s15 + $0x112c] ss:$400 sps:$4 sm:$0xff]  }
 0x9c2   : > { %10117 = vmatpush1.bf16.xpose.msra.mxu0 %v13710_v51  ;;  %10158 = vmatpush1.bf16.xpose.msra.mxu1 %v13713_v8  ;;  %v13778_v51 = vld [vmem:[%s14073_s15 + $0x1120] ss:$400 sps:$4 sm:$0xff]   ;;  %v13781_v8 = vld [vmem:[%s14073_s15 + $0x1128] ss:$400 sps:$4 sm:$0xff]  }
 0x9c3   : > { %10118 = vmatprep.subr.bf16.mxu0 %v13718_v30  ;;  %10159 = vmatprep.subr.bf16.mxu1 %v13721_v44  ;;  %v13786_v30 = vld [vmem:[%s14073_s15 + $0xe04] ss:$400 sps:$4 sm:$0xff]   ;;  %v13789_v44 = vld [vmem:[%s14073_s15 + $0xe0c] ss:$400 sps:$4 sm:$0xff]  }
 0x9ca   : > { %10119 = vmatpush1.bf16.xpose.msra.mxu0 %v13716_v2  ;;  %10160 = vmatpush1.bf16.xpose.msra.mxu1 %v13719_v15  ;;  %v13784_v2 = vld [vmem:[%s14073_s15 + $0xe00] ss:$400 sps:$4 sm:$0xff]   ;;  %v13787_v15 = vld [vmem:[%s14073_s15 + $0xe08] ss:$400 sps:$4 sm:$0xff]  }
 0x9cb   : > { %10120 = vmatprep.subr.bf16.mxu0 %v13724_v43  ;;  %10161 = vmatprep.subr.bf16.mxu1 %v13727_v62  ;;  %v13792_v43 = vld [vmem:[%s14073_s15 + $0xae4] ss:$400 sps:$4 sm:$0xff]   ;;  %v13795_v62 = vld [vmem:[%s14073_s15 + $0xaec] ss:$400 sps:$4 sm:$0xff]  }
 0x9d2   : > { %10121 = vmatpush1.bf16.xpose.msra.mxu0 %v13722_v16  ;;  %10162 = vmatpush1.bf16.xpose.msra.mxu1 %v13725_v17  ;;  %v13790_v16 = vld [vmem:[%s14073_s15 + $0xae0] ss:$400 sps:$4 sm:$0xff]   ;;  %v13793_v17 = vld [vmem:[%s14073_s15 + $0xae8] ss:$400 sps:$4 sm:$0xff]  }
 0x9d3   : > { %10122 = vmatprep.subr.bf16.mxu0 %v13730_v38  ;;  %10163 = vmatprep.subr.bf16.mxu1 %v13733_v53  ;;  %v13798_v38 = vld [vmem:[%s14073_s15 + $0x7c4] ss:$400 sps:$4 sm:$0xff]   ;;  %v13801_v53 = vld [vmem:[%s14073_s15 + $0x7cc] ss:$400 sps:$4 sm:$0xff]  }
 0x9da   : > { %10123 = vmatpush1.bf16.xpose.msra.mxu0 %v13728_v52  ;;  %10164 = vmatpush1.bf16.xpose.msra.mxu1 %v13731_v12  ;;  %v13804_v52 = vld [vmem:[%s14073_s15 + $0x4a4] ss:$400 sps:$4 sm:$0xff]   ;;  %v13807_v12 = vld [vmem:[%s14073_s15 + $0x4ac] ss:$400 sps:$4 sm:$0xff]  }
 0x9db   : > { %10130 = vmatprep.subr.bf16.mxu0 %v11779_v24  ;;  %10171 = vmatprep.subr.bf16.mxu1 %v11781_v25  ;;  %v13802_v24 = vld [vmem:[%s14073_s15 + $0x4a0] ss:$400 sps:$4 sm:$0xff]   ;;  %v13805_v25 = vld [vmem:[%s14073_s15 + $0x4a8] ss:$400 sps:$4 sm:$0xff]  }
 0x9e2   : > { %10131 = vmatpush2.bf16.xpose.msra.mxu0 %v11778_v46  ;;  %10172 = vmatpush2.bf16.xpose.msra.mxu1 %v11780_v61  ;;  %v13810_v46 = vld [vmem:[%s14073_s15 + $0x184] ss:$400 sps:$4 sm:$0xff]   ;;  %v13813_v61 = vld [vmem:[%s14073_s15 + $0x18c] ss:$400 sps:$4 sm:$0xff]  }
 0x9e3   : > { %10132 = vmatprep.subr.bf16.mxu0 %v13740_v3  ;;  %10173 = vmatprep.subr.bf16.mxu1 %v13743_v31  ;;  %v1520_v3 = vld [vmem:[%s14073_s15 + $0x2700] sm:$0xff]  ;;  %v1521_v31 = vld [vmem:[%s14073_s15 + $0x2708] sm:$0xff] }
 0x9ea   : > { %10133 = vmatpush2.bf16.xpose.msra.mxu0 %v13738_v1  ;;  %10174 = vmatpush2.bf16.xpose.msra.mxu1 %v13741_v4  ;;  %v13808_v1 = vld [vmem:[%s14073_s15 + $0x180] ss:$400 sps:$4 sm:$0xff]   ;;  %v13811_v4 = vld [vmem:[%s14073_s15 + $0x188] ss:$400 sps:$4 sm:$0xff]  }
 0x9eb   : > { %10134 = vmatprep.subr.bf16.mxu0 %v13746_v32  ;;  %10175 = vmatprep.subr.bf16.mxu1 %v13749_v33  ;;  %v11783_v32 = vcombine.high %v1520_v3, %v1520_v3  ;;  %v11785_v33 = vcombine.high %v1521_v31, %v1521_v31 }
 0x9f2   : > { %10135 = vmatpush2.bf16.xpose.msra.mxu0 %v13744_v56  ;;  %10176 = vmatpush2.bf16.xpose.msra.mxu1 %v13747_v11  ;;  %v11782_v56 = vcombine.low %v1520_v3, %v1520_v3  ;;  %v11784_v11 = vcombine.low %v1521_v31, %v1521_v31 }
 0x9f3   : > { %10136 = vmatprep.subr.bf16.mxu0 %v13752_v54  ;;  %10177 = vmatprep.subr.bf16.mxu1 %v13755_v39  ;;  %v13820_v54 = vld [vmem:[%s14073_s15 + $0x23e4] ss:$400 sps:$4 sm:$0xff]   ;;  %v13823_v39 = vld [vmem:[%s14073_s15 + $0x23ec] ss:$400 sps:$4 sm:$0xff]  }
 0x9f9   : > { %v9978_v5 = vpop.f32.mrf.mxu0  ;;  %v10019_v9 = vpop.f32.mrf.mxu1 }
 0x9fa   : > { %v9979_v20 = vadd.f32 %v9978_v5, %v15682_v13  ;;  %10137 = vmatpush2.bf16.xpose.msra.mxu0 %v13750_v10  ;;  %10178 = vmatpush2.bf16.xpose.msra.mxu1 %v13753_v26  ;;  %v13756_v13 = vld [vmem:[%s14073_s15 + $0x1a70] ss:$400 sps:$4 sm:$0xff]   ;;  %v13821_v26 = vld [vmem:[%s14073_s15 + $0x23e8] ss:$400 sps:$4 sm:$0xff]  }
 0x9fb   : > { %v9980_v47 = vpop.f32.mrf.mxu0  ;;  %v10021_v18 = vpop.f32.mrf.mxu1  ;;  %10138 = vmatprep.subr.bf16.mxu0 %v13758_v40  ;;  %10179 = vmatprep.subr.bf16.mxu1 %v13761_v41  ;;  %v13818_v10 = vld [vmem:[%s14073_s15 + $0x23e0] ss:$400 sps:$4 sm:$0xff]   ;;  %v13826_v40 = vld [vmem:[%s14073_s15 + $0x20c4] ss:$400 sps:$4 sm:$0xff]   ;;  %v13829_v41 = vld [vmem:[%s14073_s15 + $0x20cc] ss:$400 sps:$4 sm:$0xff]  }
 0x9fc   : > { %v15752_v21 = vadd.f32 %v10019_v9, %v9979_v20  ;;  %v9981_v34 = vadd.f32 %v9980_v47, %v15685_v42  ;;  %v10478_v42 = vcombine.low %v15696_v19, %v15696_v19  ;;  %v10485_v19 = vcombine.high %v15769_v45, %v15769_v45  ;;  %v13824_v5 = vld [vmem:[%s14073_s15 + $0x20c0] ss:$400 sps:$4 sm:$0xff]   ;;  %v13827_v9 = vld [vmem:[%s14073_s15 + $0x20c8] ss:$400 sps:$4 sm:$0xff]   ;;  %v13832_v20 = vld [vmem:[%s14073_s15 + $0x1da4] ss:$400 sps:$4 sm:$0xff]  }
 0x9fd   : > { %v9982_v48 = vpop.f32.mrf.mxu0  ;;  %v10023_v49 = vpop.f32.mrf.mxu1  ;;  %v13835_v47 = vld [vmem:[%s14073_s15 + $0x1dac] ss:$400 sps:$4 sm:$0xff]  }
 0x9fe   : > { %v15755_v50 = vadd.f32 %v10021_v18, %v9981_v34  ;;  %v13830_v18 = vld [vmem:[%s14073_s15 + $0x1da0] ss:$400 sps:$4 sm:$0xff]   ;;  %v13833_v34 = vld [vmem:[%s14073_s15 + $0x1da8] ss:$400 sps:$4 sm:$0xff]   ;;  %v13838_v48 = vld [vmem:[%s14073_s15 + $0x1a84] ss:$400 sps:$4 sm:$0xff]  }
 0x9ff   : > { %v9983_v28 = vpop.f32.mrf.mxu0  ;;  %v10024_v59 = vpop.f32.mrf.mxu1  ;;  %v13841_v49 = vld [vmem:[%s14073_s15 + $0x1a8c] ss:$400 sps:$4 sm:$0xff]  }
 0xa02   : > { %10139 = vmatpush2.bf16.xpose.msra.mxu0 %v13756_v13  ;;  %10180 = vmatpush2.bf16.xpose.msra.mxu1 %v13759_v14 }
 0xa03   : > { %10190 = vmatprep.subr.bf16.mxu0 %v13768_v58  ;;  %10231 = vmatprep.subr.bf16.mxu1 %v13771_v29 }
 0xa09   : > { %10141 = vmatmul.mubr.bf16.vlgmr.msra.gmra.mxu0 %v10478_v42  ;;  %10182 = vmatmul.mubr.bf16.vlgmr.msra.gmra.mxu1 %v10480_v60 }
 0xa0a   : > { %10191 = vmatpush1.bf16.xpose.msra.mxu0 %v13766_v63  ;;  %10232 = vmatpush1.bf16.xpose.msra.mxu1 %v13769_v0 }
 0xa0b   : > { %10192 = vmatprep.subr.bf16.mxu0 %v13774_v22  ;;  %10233 = vmatprep.subr.bf16.mxu1 %v13777_v36  ;;  %v13836_v22 = vld [vmem:[%s14073_s15 + $0x1a80] ss:$400 sps:$4 sm:$0xff]   ;;  %v13839_v36 = vld [vmem:[%s14073_s15 + $0x1a88] ss:$400 sps:$4 sm:$0xff]  }
 0xa0c   : > { %10222 = vmatprep.mubr.bf16.mxu0 %v10483_v6  ;;  %10263 = vmatprep.mubr.bf16.mxu1 %v10485_v19 }
 0xa12   : > { %10193 = vmatpush1.bf16.xpose.msra.mxu0 %v13772_v37  ;;  %10234 = vmatpush1.bf16.xpose.msra.mxu1 %v13775_v7  ;;  %v10484_v37 = vcombine.low %v15769_v45, %v15769_v45  ;;  %v220_v45 = vld [vmem:[%s15872_s3] sm:$0xff] }
 0xa13   : > { %10194 = vmatprep.subr.bf16.mxu0 %v13780_v35  ;;  %10235 = vmatprep.subr.bf16.mxu1 %v13783_v55 }
 0xa1a   : > { %10195 = vmatpush1.bf16.xpose.msra.mxu0 %v13778_v51  ;;  %10236 = vmatpush1.bf16.xpose.msra.mxu1 %v13781_v8 }
 0xa1b   : > { %10196 = vmatprep.subr.bf16.mxu0 %v13786_v30  ;;  %10237 = vmatprep.subr.bf16.mxu1 %v13789_v44 }
 0xa22   : > { %10197 = vmatpush1.bf16.xpose.msra.mxu0 %v13784_v2  ;;  %10238 = vmatpush1.bf16.xpose.msra.mxu1 %v13787_v15 }
 0xa23   : > { %10198 = vmatprep.subr.bf16.mxu0 %v13792_v43  ;;  %10239 = vmatprep.subr.bf16.mxu1 %v13795_v62 }
 0xa2a   : > { %10199 = vmatpush1.bf16.xpose.msra.mxu0 %v13790_v16  ;;  %10240 = vmatpush1.bf16.xpose.msra.mxu1 %v13793_v17 }
 0xa2b   : > { %10200 = vmatprep.subr.bf16.mxu0 %v13798_v38  ;;  %10241 = vmatprep.subr.bf16.mxu1 %v13801_v53 }
 0xa32   : > { %10201 = vmatpush1.bf16.xpose.msra.mxu0 %v13796_v57  ;;  %10242 = vmatpush1.bf16.xpose.msra.mxu1 %v13799_v23 }
 0xa33   : > { %10202 = vmatprep.subr.bf16.mxu0 %v13804_v52  ;;  %10243 = vmatprep.subr.bf16.mxu1 %v13807_v12  ;;  %v221_v52 = vld [vmem:[%s15872_s3 + $0x8] sm:$0xff] }
 0xa3a   : > { %10203 = vmatpush1.bf16.xpose.msra.mxu0 %v13802_v24  ;;  %10244 = vmatpush1.bf16.xpose.msra.mxu1 %v13805_v25 }
 0xa3b   : > { %10204 = vmatprep.subr.bf16.mxu0 %v13810_v46  ;;  %10245 = vmatprep.subr.bf16.mxu1 %v13813_v61 }
 0xa42   : > { %10205 = vmatpush1.bf16.xpose.msra.mxu0 %v13808_v1  ;;  %10246 = vmatpush1.bf16.xpose.msra.mxu1 %v13811_v4 }
 0xa43   : > { %10212 = vmatprep.subr.bf16.mxu0 %v11783_v32  ;;  %10253 = vmatprep.subr.bf16.mxu1 %v11785_v33 }
 0xa4a   : > { %10213 = vmatpush2.bf16.xpose.msra.mxu0 %v11782_v56  ;;  %10254 = vmatpush2.bf16.xpose.msra.mxu1 %v11784_v11 }
 0xa4b   : > { %10214 = vmatprep.subr.bf16.mxu0 %v13820_v54  ;;  %10255 = vmatprep.subr.bf16.mxu1 %v13823_v39 }
 0xa52   : > { %10215 = vmatpush2.bf16.xpose.msra.mxu0 %v13818_v10  ;;  %10256 = vmatpush2.bf16.xpose.msra.mxu1 %v13821_v26 }
 0xa53   : > { %10216 = vmatprep.subr.bf16.mxu0 %v13826_v40  ;;  %10257 = vmatprep.subr.bf16.mxu1 %v13829_v41 }
 0xa5a   : > { %10217 = vmatpush2.bf16.xpose.msra.mxu0 %v13824_v5  ;;  %10258 = vmatpush2.bf16.xpose.msra.mxu1 %v13827_v9 }
 0xa5b   : > { %10218 = vmatprep.subr.bf16.mxu0 %v13832_v20  ;;  %10259 = vmatprep.subr.bf16.mxu1 %v13835_v47 }
 0xa61   : > { %v10060_v13 = vpop.f32.mrf.mxu0  ;;  %v10101_v14 = vpop.f32.mrf.mxu1 }
 0xa62   : > { %v10061_v28 = vadd.f32 %v10060_v13, %v15752_v21  ;;  %10219 = vmatpush2.bf16.xpose.msra.mxu0 %v13830_v18  ;;  %10260 = vmatpush2.bf16.xpose.msra.mxu1 %v13833_v34  ;;  %v10482_v21 = vcombine.low %v15766_v27, %v15766_v27 }
 0xa63   : > { %v10062_v59 = vpop.f32.mrf.mxu0  ;;  %v10103_v58 = vpop.f32.mrf.mxu1  ;;  %10220 = vmatprep.subr.bf16.mxu0 %v13838_v48  ;;  %10261 = vmatprep.subr.bf16.mxu1 %v13841_v49 }
 0xa64   : > { %v10102_v29 = vadd.f32 %v10101_v14, %v10061_v28  ;;  %v10063_v42 = vadd.f32 %v10062_v59, %v15755_v50 }
 0xa65   : > { %v10064_v60 = vpop.f32.mrf.mxu0  ;;  %v10105_v63 = vpop.f32.mrf.mxu1 }
 0xa66   : > { %v10104_v0 = vadd.f32 %v10103_v58, %v10063_v42 }
 0xa67   : > { %v10065_v6 = vpop.f32.mrf.mxu0  ;;  %v10106_v19 = vpop.f32.mrf.mxu1 }
 0xa6a   : > { %10221 = vmatpush2.bf16.xpose.msra.mxu0 %v13836_v22  ;;  %10262 = vmatpush2.bf16.xpose.msra.mxu1 %v13839_v36 }
 0xa71   : > { %10223 = vmatmul.mubr.bf16.vlgmr.msra.gmra.mxu0 %v10482_v21  ;;  %10264 = vmatmul.mubr.bf16.vlgmr.msra.gmra.mxu1 %v10484_v37 }
 0xac9   : > { %v10142_v7 = vpop.f32.mrf.mxu0  ;;  %v10183_v35 = vpop.f32.mrf.mxu1 }
 0xaca   : > { %v10143_v50 = vadd.f32 %v10142_v7, %v10102_v29 }
 0xacb   : > { %v10144_v55 = vpop.f32.mrf.mxu0  ;;  %v10185_v51 = vpop.f32.mrf.mxu1 }
 0xacc   : > { %v10184_v8 = vadd.f32 %v10183_v35, %v10143_v50  ;;  %v10145_v30 = vadd.f32 %v10144_v55, %v10104_v0 }
 0xacd   : > { %v10146_v44 = vpop.f32.mrf.mxu0  ;;  %v10187_v2 = vpop.f32.mrf.mxu1 }
 0xace   : > { %v10186_v15 = vadd.f32 %v10185_v51, %v10145_v30 }
 0xacf   : > { %v10147_v43 = vpop.f32.mrf.mxu0  ;;  %v10188_v62 = vpop.f32.mrf.mxu1 }
 0xb31   : > { %v10224_v16 = vpop.f32.mrf.mxu0  ;;  %v10265_v17 = vpop.f32.mrf.mxu1 }
 0xb32   : > { %v10225_v27 = vadd.f32 %v10224_v16, %v10184_v8 }
 0xb33   : > { %v10226_v38 = vpop.f32.mrf.mxu0  ;;  %v10267_v53 = vpop.f32.mrf.mxu1 }
 0xb34   : > { %v10266_v57 = vadd.f32 %v10265_v17, %v10225_v27  ;;  %v10227_v23 = vadd.f32 %v10226_v38, %v10186_v15 }
 0xb35   : > { %v10228_v12 = vpop.f32.mrf.mxu0  ;;  %v10269_v24 = vpop.f32.mrf.mxu1 }
 0xb36   : > { %v10272_v25 = vadd.f32 %v10266_v57, %v220_v45  ;;  %v10268_v46 = vadd.f32 %v10267_v53, %v10227_v23  ;;  %10280 = sbr.rel (%p11786_p1) target bundleno = 2890 (0xb4a), region = 48 }
 0xb37   : > { %v10229_v61 = vpop.f32.mrf.mxu0  ;;  %v10270_v3 = vpop.f32.mrf.mxu1 }
 0xb38   : > { %10274 = vst [vmem:[%s15872_s3] sm:$0xff] %v10272_v25  ;;  %v10273_v31 = vadd.f32 %v10268_v46, %v221_v52 }
 0xb3a   : > { %10276 = vst.msk [vmem:[%s15872_s3 + $0x8] sm:$0xff] %vm10275_vm1, %v10273_v31 }
 0xb3b   : > { %v10285_v1 = vlaneseq  ;;  %v10283_v32 = vld [vmem:[#allocation4] ss:$2 sm:$0x3]  ;;  %v10298_v33 = vld [vmem:[#allocation4 + $0x1] ss:$2 sm:$0x3] }
 0xb3d   : > { %v10286_v4 = vshrl.u32 %v10285_v1, 7 }
 0xb3f   : > { %v10287_v56 = vsub.s32 0, %v10286_v4  ;;  %v10291_v11 = vsub.s32 1, %v10286_v4  ;;  %v10281_v54 = vld [vmem:[%s15872_s3] sm:$0xff] }
 0xb41   : > { %v10282_v39 = vld [vmem:[%s15872_s3 + $0x8] sm:$0xff]  ;;  %v10288_v10 = vrot.slane %v10283_v32, %v10287_v56  ;;  %v10303_v26 = vrot.slane %v10298_v33, %v10287_v56  ;;  %v10292_v40 = vrot.slane %v10283_v32, %v10291_v11  ;;  %v10307_v41 = vrot.slane %v10298_v33, %v10291_v11 }
 0xb43   : > { %v10295_v5 = vmul.f32 %v10288_v10, %v10281_v54  ;;  %v10296_v9 = vmul.f32 %v10292_v40, %v10282_v39 }
 0xb45   : > { %v10310_v20 = vadd.f32 %v10303_v26, %v10295_v5  ;;  %v10311_v47 = vadd.f32 %v10307_v41, %v10296_v9 }
 0xb47   : > { %v10312_v18 = vmax.f32 %v10310_v20, 0.0  ;;  %v10313_v34 = vmax.f32 %v10311_v47, 0.0 }
 0xb49   : > { %10314 = vst [vmem:[%s15872_s3] sm:$0xff] %v10312_v18  ;;  %10315 = vst.msk [vmem:[%s15872_s3 + $0x8] sm:$0xff] %vm10275_vm1, %v10313_v34 }
 0xb4a PF: > { %p14_p2 = scmp.ge.s32.totalorder %s13988_s17, 6   ;;  %s15886_s12 = smov %s13930_s13 }
 0xb4b   : > { %s15887_s13 = smov %s13934_s14  ;;  %s15888_s14 = smov %s13998_s20 }
 0xb4c   : > { %s15889_s15 = smov %s13988_s17  ;;  %16 = sbr.rel (!%p14_p2) target bundleno = 4 (0x4), region = 84 }
 0xb51   :  { %10327 = vsyncpa [#allocation3], 1 }
 0xb52   :  { %10329 = vsyncpa [#allocation3 + $0x1], 1 }
 0xb53   :  { %10330 = vsyncpa [#allocation5], 1 }

</bundles_post_ra>
